<compile_context>
chip_gen: v6e
topology: v6e:2x2x1
jax: 0.10.0
libtpu: 0.0.40
codegen_flags: <defaults>
</compile_context>

<pallas_src>
import functools
import math

import jax
import jax.numpy as jnp
from jax import lax
from jax.experimental import pallas as pl
from jax.experimental.pallas import tpu as pltpu


# ------------------------- in-kernel helper functions -----------------------

def _ln(x, g, b, eps=1e-5):
    """LayerNorm over the last dim; x (M, E) f32, g/b broadcastable (1, E)."""
    mu = jnp.mean(x, axis=-1, keepdims=True)
    xc = x - mu
    var = jnp.mean(xc * xc, axis=-1, keepdims=True)
    return xc * lax.rsqrt(var + eps) * g + b


def _mha_heads(q, k, v, *, nhead, batch, scale):
    """Multi-head scaled-dot-product attention, all heads in one shot.

    q: (Mq, E), k/v: (Mk, E); rows are (seq, batch) with batch fastest
    (row % batch == batch index).  Cross-batch attention is masked out.
    """
    Mq, E = q.shape
    Mk = k.shape[0]
    hd = E // nhead
    qi = lax.broadcasted_iota(jnp.int32, (Mq, Mk), 0)
    ki = lax.broadcasted_iota(jnp.int32, (Mq, Mk), 1)
    same_batch = (qi % batch) == (ki % batch)
    neg = jnp.float32(-1e30)
    outs = []
    for h in range(nhead):
        qh = q[:, h * hd:(h + 1) * hd]
        kh = k[:, h * hd:(h + 1) * hd]
        vh = v[:, h * hd:(h + 1) * hd]
        s = lax.dot_general(qh, kh, (((1,), (1,)), ((), ())),
                            preferred_element_type=jnp.float32) * scale
        s = jnp.where(same_batch, s, neg)
        m = jnp.max(s, axis=-1, keepdims=True)
        p = jnp.exp(s - m)
        p = p / jnp.sum(p, axis=-1, keepdims=True)
        outs.append(jnp.dot(p, vh, preferred_element_type=jnp.float32))
    return jnp.concatenate(outs, axis=-1)          # (Mq, E)


# ------------------------------ Pallas kernels ------------------------------

def _embed_kernel(x_ref, w_ref, b_ref, o_ref):
    o_ref[...] = (jnp.dot(x_ref[...], w_ref[...],
                          preferred_element_type=jnp.float32)
                  + b_ref[...]).astype(o_ref.dtype)


def _encoder_stack_kernel(h_ref,
                          in_w_ref, in_b_ref, out_w_ref, out_b_ref,
                          n1g_ref, n1b_ref, n2g_ref, n2b_ref,
                          l1w_ref, l1b_ref, l2w_ref, l2b_ref,
                          fng_ref, fnb_ref,
                          mem_ref, carry_ref, *, nhead, batch):
    l = pl.program_id(0)

    @pl.when(l == 0)
    def _():
        carry_ref[...] = h_ref[...].astype(jnp.float32)

    x = carry_ref[...]                             # (M, E) f32
    E = x.shape[-1]
    scale = 1.0 / math.sqrt(E // nhead)

    # --- self-attention (fused QKV projection) ---
    qkv = jnp.dot(x, in_w_ref[0], preferred_element_type=jnp.float32) + in_b_ref[0]
    q, k, v = qkv[:, :E], qkv[:, E:2 * E], qkv[:, 2 * E:]
    attn = _mha_heads(q, k, v, nhead=nhead, batch=batch, scale=scale)
    attn = jnp.dot(attn, out_w_ref[0],
                   preferred_element_type=jnp.float32) + out_b_ref[0]
    x1 = _ln(x + attn, n1g_ref[0], n1b_ref[0])

    # --- feed-forward ---
    hmid = jnp.maximum(
        jnp.dot(x1, l1w_ref[0], preferred_element_type=jnp.float32) + l1b_ref[0],
        0.0)
    ff = jnp.dot(hmid, l2w_ref[0], preferred_element_type=jnp.float32) + l2b_ref[0]
    x2 = _ln(x1 + ff, n2g_ref[0], n2b_ref[0])

    carry_ref[...] = x2

    @pl.when(l == pl.num_programs(0) - 1)
    def _():
        mem_ref[...] = _ln(x2, fng_ref[...], fnb_ref[...]).astype(mem_ref.dtype)


def _decoder_stack_kernel(h_ref, memv_ref,
                          sa_in_w_ref, sa_in_b_ref, sa_out_w_ref, sa_out_b_ref,
                          ca_q_w_ref, ca_q_b_ref, ca_kv_w_ref, ca_kv_b_ref,
                          ca_out_w_ref, ca_out_b_ref,
                          n1g_ref, n1b_ref, n2g_ref, n2b_ref, n3g_ref, n3b_ref,
                          l1w_ref, l1b_ref, l2w_ref, l2b_ref,
                          fng_ref, fnb_ref, fcw_ref, fcb_ref,
                          out_ref, carry_ref, *, nhead, batch):
    l = pl.program_id(0)

    @pl.when(l == 0)
    def _():
        carry_ref[...] = h_ref[...].astype(jnp.float32)

    x = carry_ref[...]                             # (M, E) f32
    mem = memv_ref[...].astype(jnp.float32)
    E = x.shape[-1]
    scale = 1.0 / math.sqrt(E // nhead)

    # --- decoder self-attention ---
    qkv = jnp.dot(x, sa_in_w_ref[0],
                  preferred_element_type=jnp.float32) + sa_in_b_ref[0]
    q, k, v = qkv[:, :E], qkv[:, E:2 * E], qkv[:, 2 * E:]
    sa = _mha_heads(q, k, v, nhead=nhead, batch=batch, scale=scale)
    sa = jnp.dot(sa, sa_out_w_ref[0],
                 preferred_element_type=jnp.float32) + sa_out_b_ref[0]
    x1 = _ln(x + sa, n1g_ref[0], n1b_ref[0])

    # --- cross-attention (K/V share one fused matmul over memory) ---
    q2 = jnp.dot(x1, ca_q_w_ref[0],
                 preferred_element_type=jnp.float32) + ca_q_b_ref[0]
    kv = jnp.dot(mem, ca_kv_w_ref[0],
                 preferred_element_type=jnp.float32) + ca_kv_b_ref[0]
    k2, v2 = kv[:, :E], kv[:, E:]
    ca = _mha_heads(q2, k2, v2, nhead=nhead, batch=batch, scale=scale)
    ca = jnp.dot(ca, ca_out_w_ref[0],
                 preferred_element_type=jnp.float32) + ca_out_b_ref[0]
    x2 = _ln(x1 + ca, n2g_ref[0], n2b_ref[0])

    # --- feed-forward ---
    hmid = jnp.maximum(
        jnp.dot(x2, l1w_ref[0], preferred_element_type=jnp.float32) + l1b_ref[0],
        0.0)
    ff = jnp.dot(hmid, l2w_ref[0], preferred_element_type=jnp.float32) + l2b_ref[0]
    x3 = _ln(x2 + ff, n3g_ref[0], n3b_ref[0])

    carry_ref[...] = x3

    @pl.when(l == pl.num_programs(0) - 1)
    def _():
        final = _ln(x3, fng_ref[...], fnb_ref[...])
        out_ref[...] = (jnp.dot(final, fcw_ref[...],
                                preferred_element_type=jnp.float32)
                        + fcb_ref[...]).astype(out_ref.dtype)


# ------------------------------ pallas_call glue ----------------------------

def _stacked_spec(shape):
    nd = len(shape)
    return pl.BlockSpec((1,) + shape, lambda l, _nd=nd: (l,) + (0,) * _nd)


def _const_spec(shape):
    nd = len(shape)
    return pl.BlockSpec(shape, lambda l, _nd=nd: (0,) * _nd)


def embed_linear(x2d, wt, b2):
    M, K = x2d.shape
    N = wt.shape[1]
    return pl.pallas_call(
        _embed_kernel,
        out_shape=jax.ShapeDtypeStruct((M, N), jnp.float32),
        grid=(1,),
        in_specs=[pl.BlockSpec((M, K), lambda i: (0, 0)),
                  pl.BlockSpec((K, N), lambda i: (0, 0)),
                  pl.BlockSpec((1, N), lambda i: (0, 0))],
        out_specs=pl.BlockSpec((M, N), lambda i: (0, 0)),
    )(x2d, wt, b2)


def encoder_stack(h, prep, nhead, batch):
    enc = prep["enc"]
    nl = enc["in_w"].shape[0]
    M, E = h.shape
    FF = enc["l1_w"].shape[-1]
    in_specs = [
        _const_spec((M, E)),                                       # h
        _stacked_spec((E, 3 * E)), _stacked_spec((1, 3 * E)),      # in_proj
        _stacked_spec((E, E)), _stacked_spec((1, E)),              # out_proj
        _stacked_spec((1, E)), _stacked_spec((1, E)),              # norm1
        _stacked_spec((1, E)), _stacked_spec((1, E)),              # norm2
        _stacked_spec((E, FF)), _stacked_spec((1, FF)),            # lin1
        _stacked_spec((FF, E)), _stacked_spec((1, E)),             # lin2
        _const_spec((1, E)), _const_spec((1, E)),                  # final enc LN
    ]
    return pl.pallas_call(
        functools.partial(_encoder_stack_kernel, nhead=nhead, batch=batch),
        out_shape=jax.ShapeDtypeStruct((M, E), jnp.float32),
        grid=(nl,),
        in_specs=in_specs,
        out_specs=pl.BlockSpec((M, E), lambda l: (0, 0)),
        scratch_shapes=[pltpu.VMEM((M, E), jnp.float32)],
        compiler_params=pltpu.CompilerParams(dimension_semantics=("arbitrary",)),
    )(h,
      enc["in_w"], enc["in_b"], enc["out_w"], enc["out_b"],
      enc["n1_g"], enc["n1_b"], enc["n2_g"], enc["n2_b"],
      enc["l1_w"], enc["l1_b"], enc["l2_w"], enc["l2_b"],
      prep["enc_norm_g"], prep["enc_norm_b"])


def decoder_stack(h, mem, prep, nhead, batch):
    dec = prep["dec"]
    nl = dec["sa_in_w"].shape[0]
    M, E = h.shape
    FF = dec["l1_w"].shape[-1]
    OUT = prep["fc_wt"].shape[1]
    in_specs = [
        _const_spec((M, E)), _const_spec((M, E)),                  # h, memory
        _stacked_spec((E, 3 * E)), _stacked_spec((1, 3 * E)),      # sa in_proj
        _stacked_spec((E, E)), _stacked_spec((1, E)),              # sa out_proj
        _stacked_spec((E, E)), _stacked_spec((1, E)),              # ca q
        _stacked_spec((E, 2 * E)), _stacked_spec((1, 2 * E)),      # ca kv
        _stacked_spec((E, E)), _stacked_spec((1, E)),              # ca out_proj
        _stacked_spec((1, E)), _stacked_spec((1, E)),              # norm1
        _stacked_spec((1, E)), _stacked_spec((1, E)),              # norm2
        _stacked_spec((1, E)), _stacked_spec((1, E)),              # norm3
        _stacked_spec((E, FF)), _stacked_spec((1, FF)),            # lin1
        _stacked_spec((FF, E)), _stacked_spec((1, E)),             # lin2
        _const_spec((1, E)), _const_spec((1, E)),                  # final dec LN
        _const_spec((E, OUT)), _const_spec((1, OUT)),              # fc
    ]
    return pl.pallas_call(
        functools.partial(_decoder_stack_kernel, nhead=nhead, batch=batch),
        out_shape=jax.ShapeDtypeStruct((M, OUT), jnp.float32),
        grid=(nl,),
        in_specs=in_specs,
        out_specs=pl.BlockSpec((M, OUT), lambda l: (0, 0)),
        scratch_shapes=[pltpu.VMEM((M, E), jnp.float32)],
        compiler_params=pltpu.CompilerParams(dimension_semantics=("arbitrary",)),
    )(h, mem,
      dec["sa_in_w"], dec["sa_in_b"], dec["sa_out_w"], dec["sa_out_b"],
      dec["ca_q_w"], dec["ca_q_b"], dec["ca_kv_w"], dec["ca_kv_b"],
      dec["ca_out_w"], dec["ca_out_b"],
      dec["n1_g"], dec["n1_b"], dec["n2_g"], dec["n2_b"], dec["n3_g"], dec["n3_b"],
      dec["l1_w"], dec["l1_b"], dec["l2_w"], dec["l2_b"],
      prep["dec_norm_g"], prep["dec_norm_b"], prep["fc_wt"], prep["fc_b2"])


def transformer_forward(x, prep, *, nhead):
    """x: (seq, batch, input_dim) — seq-first like PyTorch nn.Transformer."""
    S, B, IN = x.shape
    E = prep["embed_wt"].shape[1]
    OUT = prep["fc_wt"].shape[1]
    M = S * B
    h = embed_linear(x.reshape(M, IN), prep["embed_wt"], prep["embed_b2"])  # (M, E)
    mem = encoder_stack(h, prep, nhead, B)                                  # (M, E)
    y = decoder_stack(h, mem, prep, nhead, B)                               # (M, OUT)
    return y.reshape(S, B, OUT)


# ----------------------------- Parameter handling ---------------------------

def _xavier(key, shape):
    fan_out, fan_in = shape
    limit = math.sqrt(6.0 / (fan_in + fan_out))
    return jax.random.uniform(key, shape, jnp.float32, -limit, limit)


def init_mha(key, E):
    k1, k2 = jax.random.split(key)
    return dict(
        in_proj_weight=_xavier(k1, (3 * E, E)),
        in_proj_bias=jnp.zeros((3 * E,), jnp.float32),
        out_proj_weight=_xavier(k2, (E, E)),
        out_proj_bias=jnp.zeros((E,), jnp.float32),
    )


def init_encoder_layer(key, E, FF):
    ks = jax.random.split(key, 3)
    return dict(
        self_attn=init_mha(ks[0], E),
        lin1_w=_xavier(ks[1], (FF, E)), lin1_b=jnp.zeros((FF,), jnp.float32),
        lin2_w=_xavier(ks[2], (E, FF)), lin2_b=jnp.zeros((E,), jnp.float32),
        norm1_g=jnp.ones((E,), jnp.float32), norm1_b=jnp.zeros((E,), jnp.float32),
        norm2_g=jnp.ones((E,), jnp.float32), norm2_b=jnp.zeros((E,), jnp.float32),
    )


def init_decoder_layer(key, E, FF):
    ks = jax.random.split(key, 4)
    return dict(
        self_attn=init_mha(ks[0], E),
        cross_attn=init_mha(ks[1], E),
        lin1_w=_xavier(ks[2], (FF, E)), lin1_b=jnp.zeros((FF,), jnp.float32),
        lin2_w=_xavier(ks[3], (E, FF)), lin2_b=jnp.zeros((E,), jnp.float32),
        norm1_g=jnp.ones((E,), jnp.float32), norm1_b=jnp.zeros((E,), jnp.float32),
        norm2_g=jnp.ones((E,), jnp.float32), norm2_b=jnp.zeros((E,), jnp.float32),
        norm3_g=jnp.ones((E,), jnp.float32), norm3_b=jnp.zeros((E,), jnp.float32),
    )


def _stack(layers):
    return jax.tree_util.tree_map(lambda *xs: jnp.stack(xs, axis=0), *layers)


def init_params(key, input_dim, model_dim, num_encoder_layers,
                num_decoder_layers, output_dim, dim_feedforward):
    ks = jax.random.split(key, 2 + num_encoder_layers + num_decoder_layers)
    enc = [init_encoder_layer(ks[2 + i], model_dim, dim_feedforward)
           for i in range(num_encoder_layers)]
    dec = [init_decoder_layer(ks[2 + num_encoder_layers + i], model_dim,
                              dim_feedforward)
           for i in range(num_decoder_layers)]
    return dict(
        embed_w=_xavier(ks[0], (model_dim, input_dim)),
        embed_b=jnp.zeros((model_dim,), jnp.float32),
        fc_w=_xavier(ks[1], (output_dim, model_dim)),
        fc_b=jnp.zeros((output_dim,), jnp.float32),
        enc_norm_g=jnp.ones((model_dim,), jnp.float32),
        enc_norm_b=jnp.zeros((model_dim,), jnp.float32),
        dec_norm_g=jnp.ones((model_dim,), jnp.float32),
        dec_norm_b=jnp.zeros((model_dim,), jnp.float32),
        encoder_layers=_stack(enc),
        decoder_layers=_stack(dec),
    )


def prepare_params(params):
    """One-time transform: transpose PyTorch (out,in) weights to (in,out),
    reshape biases/norms to (layers, 1, dim), pre-split cross-attn Q vs KV."""
    def t(w):
        return jnp.swapaxes(w, -1, -2)

    E = params["embed_w"].shape[0]

    er = params["encoder_layers"]
    enc = dict(
        in_w=t(er["self_attn"]["in_proj_weight"]),            # (nl, E, 3E)
        in_b=er["self_attn"]["in_proj_bias"][:, None, :],
        out_w=t(er["self_attn"]["out_proj_weight"]),
        out_b=er["self_attn"]["out_proj_bias"][:, None, :],
        n1_g=er["norm1_g"][:, None, :], n1_b=er["norm1_b"][:, None, :],
        n2_g=er["norm2_g"][:, None, :], n2_b=er["norm2_b"][:, None, :],
        l1_w=t(er["lin1_w"]), l1_b=er["lin1_b"][:, None, :],
        l2_w=t(er["lin2_w"]), l2_b=er["lin2_b"][:, None, :],
    )

    dr = params["decoder_layers"]
    sa, ca = dr["self_attn"], dr["cross_attn"]
    caw, cab = ca["in_proj_weight"], ca["in_proj_bias"]        # (nl,3E,E),(nl,3E)
    wq, wk, wv = caw[:, :E], caw[:, E:2 * E], caw[:, 2 * E:]
    bq, bk, bv = cab[:, :E], cab[:, E:2 * E], cab[:, 2 * E:]
    dec = dict(
        sa_in_w=t(sa["in_proj_weight"]), sa_in_b=sa["in_proj_bias"][:, None, :],
        sa_out_w=t(sa["out_proj_weight"]), sa_out_b=sa["out_proj_bias"][:, None, :],
        ca_q_w=t(wq), ca_q_b=bq[:, None, :],
        ca_kv_w=jnp.concatenate([t(wk), t(wv)], axis=-1),      # (nl, E, 2E)
        ca_kv_b=jnp.concatenate([bk, bv], axis=-1)[:, None, :],
        ca_out_w=t(ca["out_proj_weight"]), ca_out_b=ca["out_proj_bias"][:, None, :],
        n1_g=dr["norm1_g"][:, None, :], n1_b=dr["norm1_b"][:, None, :],
        n2_g=dr["norm2_g"][:, None, :], n2_b=dr["norm2_b"][:, None, :],
        n3_g=dr["norm3_g"][:, None, :], n3_b=dr["norm3_b"][:, None, :],
        l1_w=t(dr["lin1_w"]), l1_b=dr["lin1_b"][:, None, :],
        l2_w=t(dr["lin2_w"]), l2_b=dr["lin2_b"][:, None, :],
    )

    return dict(
        embed_wt=jnp.transpose(params["embed_w"]),             # (IN, E)
        embed_b2=params["embed_b"][None, :],                   # (1, E)
        fc_wt=jnp.transpose(params["fc_w"]),                   # (E, OUT)
        fc_b2=params["fc_b"][None, :],                         # (1, OUT)
        enc_norm_g=params["enc_norm_g"][None, :],
        enc_norm_b=params["enc_norm_b"][None, :],
        dec_norm_g=params["dec_norm_g"][None, :],
        dec_norm_b=params["dec_norm_b"][None, :],
        enc=enc, dec=dec,
    )


# ----------------------------------- Main ------------------------------------

if __name__ == "__main__":
    INPUT_DIM, MODEL_DIM, NUM_HEADS, NUM_LAYERS, OUTPUT_DIM = 16, 32, 4, 2, 8
    NUM_DECODER_LAYERS = 6     # nn.Transformer default
    DIM_FEEDFORWARD = 2048     # nn.Transformer default
    SEQ, BATCH = 8, 2

    key = jax.random.PRNGKey(0)
    kp, kx = jax.random.split(key)
    params = init_params(kp, INPUT_DIM, MODEL_DIM, NUM_LAYERS,
                         NUM_DECODER_LAYERS, OUTPUT_DIM, DIM_FEEDFORWARD)
    prep = prepare_params(params)          # one-time transpose/stack, outside jit
    x = jax.random.normal(kx, (SEQ, BATCH, INPUT_DIM), jnp.float32)

    fwd = jax.jit(functools.partial(transformer_forward, nhead=NUM_HEADS))
    y = jax.block_until_ready(fwd(x, prep))

    assert y.shape == (SEQ, BATCH, OUTPUT_DIM), y.shape
    assert bool(jnp.all(jnp.isfinite(y)))
    print("KERNEL_OK")
</pallas_src>

<mosaic_0001>
module attributes {stable_mosaic.version = 11 : i64} {
  func.func @_embed_kernel(%arg0: i32, %arg1: memref<16x16xf32, #tpu.memory_space<vmem>>, %arg2: memref<16x32xf32, #tpu.memory_space<vmem>>, %arg3: memref<1x32xf32, #tpu.memory_space<vmem>>, %arg4: memref<16x32xf32, #tpu.memory_space<vmem>>) attributes {dimension_semantics = [#tpu.dimension_semantics<arbitrary>], iteration_bounds = array<i64: 1>, scalar_prefetch = 0 : i64, scratch_operands = 0 : i64, tpu.core_type = #tpu.core_type<tc>, window_params = [{pipeline_mode = #tpu.pipeline_mode<synchronous>, transform_indices = @transform_0, window_bounds = array<i64: 16, 16>}, {pipeline_mode = #tpu.pipeline_mode<synchronous>, transform_indices = @transform_1, window_bounds = array<i64: 16, 32>}, {pipeline_mode = #tpu.pipeline_mode<synchronous>, transform_indices = @transform_2, window_bounds = array<i64: 1, 32>}, {pipeline_mode = #tpu.pipeline_mode<synchronous>, transform_indices = @transform_3, window_bounds = array<i64: 16, 32>}]} {
    %c0 = arith.constant 0 : index
    %c0_0 = arith.constant 0 : index
    %0 = vector.load %arg1[%c0, %c0_0] : memref<16x16xf32, #tpu.memory_space<vmem>>, vector<16x16xf32>
    %c0_1 = arith.constant 0 : index
    %c0_2 = arith.constant 0 : index
    %1 = vector.load %arg2[%c0_1, %c0_2] : memref<16x32xf32, #tpu.memory_space<vmem>>, vector<16x32xf32>
    %cst = arith.constant dense<0.000000e+00> : vector<16x32xf32>
    %2 = tpu.matmul %0, %1, %cst {dimension_numbers = #tpu.dot_dimension_numbers<[1], [0], [0], [1], [0, 0, 1, 1], [], []>} : vector<16x16xf32>, vector<16x32xf32>, vector<16x32xf32> -> vector<16x32xf32>
    %c0_3 = arith.constant 0 : index
    %c0_4 = arith.constant 0 : index
    %3 = vector.load %arg3[%c0_3, %c0_4] : memref<1x32xf32, #tpu.memory_space<vmem>>, vector<1x32xf32>
    %4 = vector.broadcast %3 : vector<1x32xf32> to vector<16x32xf32>
    %5 = arith.addf %2, %4 : vector<16x32xf32>
    %c0_5 = arith.constant 0 : index
    %c0_6 = arith.constant 0 : index
    %6 = vector.load %arg4[%c0_5, %c0_6] : memref<16x32xf32, #tpu.memory_space<vmem>>, vector<16x32xf32>
    tpu.vector_store %arg4[%c0_5, %c0_6], %5 {strides = array<i32>} : memref<16x32xf32, #tpu.memory_space<vmem>>, vector<16x32xf32>,
    return
  }
  func.func @transform_0(%arg0: i32) -> (i32, i32) {
    %c0_i32 = arith.constant 0 : i32
    %c0_i32_0 = arith.constant 0 : i32
    %c0_i32_1 = arith.constant 0 : i32
    return %c0_i32, %c0_i32_0 : i32, i32
  }
  func.func @transform_1(%arg0: i32) -> (i32, i32) {
    %c0_i32 = arith.constant 0 : i32
    %c0_i32_0 = arith.constant 0 : i32
    %c0_i32_1 = arith.constant 0 : i32
    return %c0_i32, %c0_i32_0 : i32, i32
  }
  func.func @transform_2(%arg0: i32) -> (i32, i32) {
    %c0_i32 = arith.constant 0 : i32
    %c0_i32_0 = arith.constant 0 : i32
    %c0_i32_1 = arith.constant 0 : i32
    return %c0_i32, %c0_i32_0 : i32, i32
  }
  func.func @transform_3(%arg0: i32) -> (i32, i32) {
    %c0_i32 = arith.constant 0 : i32
    %c0_i32_0 = arith.constant 0 : i32
    %c0_i32_1 = arith.constant 0 : i32
    return %c0_i32, %c0_i32_0 : i32, i32
  }
}

module attributes {stable_mosaic.version = 11 : i64} {
  func.func @_encoder_stack_kernel(%arg0: i32, %arg1: memref<16x32xf32, #tpu.memory_space<vmem>>, %arg2: memref<1x32x96xf32, #tpu.memory_space<vmem>>, %arg3: memref<1x1x96xf32, #tpu.memory_space<vmem>>, %arg4: memref<1x32x32xf32, #tpu.memory_space<vmem>>, %arg5: memref<1x1x32xf32, #tpu.memory_space<vmem>>, %arg6: memref<1x1x32xf32, #tpu.memory_space<vmem>>, %arg7: memref<1x1x32xf32, #tpu.memory_space<vmem>>, %arg8: memref<1x1x32xf32, #tpu.memory_space<vmem>>, %arg9: memref<1x1x32xf32, #tpu.memory_space<vmem>>, %arg10: memref<1x32x2048xf32, #tpu.memory_space<vmem>>, %arg11: memref<1x1x2048xf32, #tpu.memory_space<vmem>>, %arg12: memref<1x2048x32xf32, #tpu.memory_space<vmem>>, %arg13: memref<1x1x32xf32, #tpu.memory_space<vmem>>, %arg14: memref<1x32xf32, #tpu.memory_space<vmem>>, %arg15: memref<1x32xf32, #tpu.memory_space<vmem>>, %arg16: memref<16x32xf32, #tpu.memory_space<vmem>>, %arg17: memref<16x32xf32, #tpu.memory_space<vmem>>) attributes {dimension_semantics = [#tpu.dimension_semantics<arbitrary>], iteration_bounds = array<i64: 2>, scalar_prefetch = 0 : i64, scratch_operands = 1 : i64, tpu.core_type = #tpu.core_type<tc>, window_params = [{pipeline_mode = #tpu.pipeline_mode<synchronous>, transform_indices = @transform_0, window_bounds = array<i64: 16, 32>}, {transform_indices = @transform_1, window_bounds = array<i64: 1, 32, 96>}, {transform_indices = @transform_2, window_bounds = array<i64: 1, 1, 96>}, {transform_indices = @transform_3, window_bounds = array<i64: 1, 32, 32>}, {transform_indices = @transform_4, window_bounds = array<i64: 1, 1, 32>}, {transform_indices = @transform_5, window_bounds = array<i64: 1, 1, 32>}, {transform_indices = @transform_6, window_bounds = array<i64: 1, 1, 32>}, {transform_indices = @transform_7, window_bounds = array<i64: 1, 1, 32>}, {transform_indices = @transform_8, window_bounds = array<i64: 1, 1, 32>}, {transform_indices = @transform_9, window_bounds = array<i64: 1, 32, 2048>}, {transform_indices = @transform_10, window_bounds = array<i64: 1, 1, 2048>}, {transform_indices = @transform_11, window_bounds = array<i64: 1, 2048, 32>}, {transform_indices = @transform_12, window_bounds = array<i64: 1, 1, 32>}, {pipeline_mode = #tpu.pipeline_mode<synchronous>, transform_indices = @transform_13, window_bounds = array<i64: 1, 32>}, {pipeline_mode = #tpu.pipeline_mode<synchronous>, transform_indices = @transform_14, window_bounds = array<i64: 1, 32>}, {pipeline_mode = #tpu.pipeline_mode<synchronous>, transform_indices = @transform_15, window_bounds = array<i64: 16, 32>}]} {
    %c0_i32 = arith.constant 0 : i32
    %0 = arith.cmpi eq, %arg0, %c0_i32 : i32
    %1 = arith.extui %0 : i1 to i32
    %c0_i32_0 = arith.constant 0 : i32
    %2 = arith.cmpi ne, %1, %c0_i32_0 : i32
    scf.if %2 {
      %c0_90 = arith.constant 0 : index
      %c0_91 = arith.constant 0 : index
      %199 = vector.load %arg1[%c0_90, %c0_91] : memref<16x32xf32, #tpu.memory_space<vmem>>, vector<16x32xf32>
      %c0_92 = arith.constant 0 : index
      %c0_93 = arith.constant 0 : index
      %200 = vector.load %arg17[%c0_92, %c0_93] : memref<16x32xf32, #tpu.memory_space<vmem>>, vector<16x32xf32>
      tpu.vector_store %arg17[%c0_92, %c0_93], %199 {strides = array<i32>} : memref<16x32xf32, #tpu.memory_space<vmem>>, vector<16x32xf32>,
    } else {
    }
    %c0 = arith.constant 0 : index
    %c0_1 = arith.constant 0 : index
    %3 = vector.load %arg17[%c0, %c0_1] : memref<16x32xf32, #tpu.memory_space<vmem>>, vector<16x32xf32>
    %c0_2 = arith.constant 0 : index
    %c0_3 = arith.constant 0 : index
    %c0_4 = arith.constant 0 : index
    %4 = vector.load %arg2[%c0_2, %c0_3, %c0_4] : memref<1x32x96xf32, #tpu.memory_space<vmem>>, vector<1x32x96xf32>
    %5 = vector.shape_cast %4 : vector<1x32x96xf32> to vector<32x96xf32>
    %cst = arith.constant dense<0.000000e+00> : vector<16x96xf32>
    %6 = tpu.matmul %3, %5, %cst {dimension_numbers = #tpu.dot_dimension_numbers<[1], [0], [0], [1], [0, 0, 1, 1], [], []>} : vector<16x32xf32>, vector<32x96xf32>, vector<16x96xf32> -> vector<16x96xf32>
    %c0_5 = arith.constant 0 : index
    %c0_6 = arith.constant 0 : index
    %c0_7 = arith.constant 0 : index
    %7 = vector.load %arg3[%c0_5, %c0_6, %c0_7] : memref<1x1x96xf32, #tpu.memory_space<vmem>>, vector<1x1x96xf32>
    %8 = vector.shape_cast %7 : vector<1x1x96xf32> to vector<1x96xf32>
    %9 = vector.broadcast %8 : vector<1x96xf32> to vector<16x96xf32>
    %10 = arith.addf %6, %9 : vector<16x96xf32>
    %11 = vector.extract_strided_slice %10 {offsets = [0, 0], sizes = [16, 32], strides = [1, 1]} : vector<16x96xf32> to vector<16x32xf32>
    %12 = vector.extract_strided_slice %10 {offsets = [0, 32], sizes = [16, 32], strides = [1, 1]} : vector<16x96xf32> to vector<16x32xf32>
    %13 = vector.extract_strided_slice %10 {offsets = [0, 64], sizes = [16, 32], strides = [1, 1]} : vector<16x96xf32> to vector<16x32xf32>
    %14 = tpu.iota {dimensions = array<i32: 0>} : vector<16x16xi32>
    %15 = tpu.iota {dimensions = array<i32: 1>} : vector<16x16xi32>
    %c2_i32 = arith.constant 2 : i32
    %c0_i32_8 = arith.constant 0 : i32
    %16 = arith.cmpi eq, %c2_i32, %c0_i32_8 : i32
    %c1_i32 = arith.constant 1 : i32
    %17 = arith.select %16, %c1_i32, %c2_i32 : i32
    %18 = vector.broadcast %17 : i32 to vector<16x16xi32>
    %19 = arith.remsi %14, %18 : vector<16x16xi32>
    %c0_i32_9 = arith.constant 0 : i32
    %20 = vector.broadcast %c0_i32_9 : i32 to vector<16x16xi32>
    %21 = arith.cmpi ne, %19, %20 : vector<16x16xi32>
    %c0_i32_10 = arith.constant 0 : i32
    %22 = vector.broadcast %c0_i32_10 : i32 to vector<16x16xi32>
    %23 = arith.cmpi slt, %19, %22 : vector<16x16xi32>
    %c0_i32_11 = arith.constant 0 : i32
    %24 = arith.cmpi slt, %17, %c0_i32_11 : i32
    %25 = vector.broadcast %24 : i1 to vector<16x16xi1>
    %26 = vector.broadcast %25 : vector<16x16xi1> to vector<16x16xi1>
    %27 = arith.xori %23, %26 : vector<16x16xi1>
    %28 = arith.andi %27, %21 : vector<16x16xi1>
    %29 = vector.broadcast %17 : i32 to vector<16x16xi32>
    %30 = arith.addi %19, %29 : vector<16x16xi32>
    %31 = arith.select %28, %30, %19 : vector<16x16xi1>, vector<16x16xi32>
    %c2_i32_12 = arith.constant 2 : i32
    %c0_i32_13 = arith.constant 0 : i32
    %32 = arith.cmpi eq, %c2_i32_12, %c0_i32_13 : i32
    %c1_i32_14 = arith.constant 1 : i32
    %33 = arith.select %32, %c1_i32_14, %c2_i32_12 : i32
    %34 = vector.broadcast %33 : i32 to vector<16x16xi32>
    %35 = arith.remsi %15, %34 : vector<16x16xi32>
    %c0_i32_15 = arith.constant 0 : i32
    %36 = vector.broadcast %c0_i32_15 : i32 to vector<16x16xi32>
    %37 = arith.cmpi ne, %35, %36 : vector<16x16xi32>
    %c0_i32_16 = arith.constant 0 : i32
    %38 = vector.broadcast %c0_i32_16 : i32 to vector<16x16xi32>
    %39 = arith.cmpi slt, %35, %38 : vector<16x16xi32>
    %c0_i32_17 = arith.constant 0 : i32
    %40 = arith.cmpi slt, %33, %c0_i32_17 : i32
    %41 = vector.broadcast %40 : i1 to vector<16x16xi1>
    %42 = vector.broadcast %41 : vector<16x16xi1> to vector<16x16xi1>
    %43 = arith.xori %39, %42 : vector<16x16xi1>
    %44 = arith.andi %43, %37 : vector<16x16xi1>
    %45 = vector.broadcast %33 : i32 to vector<16x16xi32>
    %46 = arith.addi %35, %45 : vector<16x16xi32>
    %47 = arith.select %44, %46, %35 : vector<16x16xi1>, vector<16x16xi32>
    %48 = arith.cmpi eq, %31, %47 : vector<16x16xi32>
    %49 = vector.extract_strided_slice %11 {offsets = [0, 0], sizes = [16, 8], strides = [1, 1]} : vector<16x32xf32> to vector<16x8xf32>
    %50 = vector.extract_strided_slice %12 {offsets = [0, 0], sizes = [16, 8], strides = [1, 1]} : vector<16x32xf32> to vector<16x8xf32>
    %51 = vector.extract_strided_slice %13 {offsets = [0, 0], sizes = [16, 8], strides = [1, 1]} : vector<16x32xf32> to vector<16x8xf32>
    %cst_18 = arith.constant dense<0.000000e+00> : vector<16x16xf32>
    %52 = tpu.matmul %49, %50, %cst_18 {dimension_numbers = #tpu.dot_dimension_numbers<[1], [1], [0], [0], [0, 0, 1, 0], [], []>} : vector<16x8xf32>, vector<16x8xf32>, vector<16x16xf32> -> vector<16x16xf32>
    %cst_19 = arith.constant 0.353553385 : f32
    %53 = vector.broadcast %cst_19 : f32 to vector<16x16xf32>
    %54 = arith.mulf %52, %53 : vector<16x16xf32>
    %cst_20 = arith.constant -1.000000e+30 : f32
    %55 = vector.broadcast %cst_20 : f32 to vector<16x16xf32>
    %56 = arith.select %48, %54, %55 : vector<16x16xi1>, vector<16x16xf32>
    %cst_21 = arith.constant dense<0xFF800000> : vector<16xf32>
    %57 = vector.multi_reduction <maximumf>, %56, %cst_21 [1] : vector<16x16xf32> to vector<16xf32>
    %58 = vector.shape_cast %57 : vector<16xf32> to vector<16x1xf32>
    %59 = vector.broadcast %58 : vector<16x1xf32> to vector<16x16xf32>
    %60 = arith.subf %56, %59 : vector<16x16xf32>
    %61 = math.exp %60 : vector<16x16xf32>
    %cst_22 = arith.constant dense<0.000000e+00> : vector<16xf32>
    %62 = vector.multi_reduction <add>, %61, %cst_22 [1] : vector<16x16xf32> to vector<16xf32>
    %63 = vector.shape_cast %62 : vector<16xf32> to vector<16x1xf32>
    %64 = vector.broadcast %63 : vector<16x1xf32> to vector<16x16xf32>
    %65 = arith.divf %61, %64 : vector<16x16xf32>
    %cst_23 = arith.constant dense<0.000000e+00> : vector<16x8xf32>
    %66 = tpu.matmul %65, %51, %cst_23 {dimension_numbers = #tpu.dot_dimension_numbers<[1], [0], [0], [1], [0, 0, 1, 1], [], []>} : vector<16x16xf32>, vector<16x8xf32>, vector<16x8xf32> -> vector<16x8xf32>
    %67 = vector.extract_strided_slice %11 {offsets = [0, 8], sizes = [16, 8], strides = [1, 1]} : vector<16x32xf32> to vector<16x8xf32>
    %68 = vector.extract_strided_slice %12 {offsets = [0, 8], sizes = [16, 8], strides = [1, 1]} : vector<16x32xf32> to vector<16x8xf32>
    %69 = vector.extract_strided_slice %13 {offsets = [0, 8], sizes = [16, 8], strides = [1, 1]} : vector<16x32xf32> to vector<16x8xf32>
    %cst_24 = arith.constant dense<0.000000e+00> : vector<16x16xf32>
    %70 = tpu.matmul %67, %68, %cst_24 {dimension_numbers = #tpu.dot_dimension_numbers<[1], [1], [0], [0], [0, 0, 1, 0], [], []>} : vector<16x8xf32>, vector<16x8xf32>, vector<16x16xf32> -> vector<16x16xf32>
    %cst_25 = arith.constant 0.353553385 : f32
    %71 = vector.broadcast %cst_25 : f32 to vector<16x16xf32>
    %72 = arith.mulf %70, %71 : vector<16x16xf32>
    %cst_26 = arith.constant -1.000000e+30 : f32
    %73 = vector.broadcast %cst_26 : f32 to vector<16x16xf32>
    %74 = arith.select %48, %72, %73 : vector<16x16xi1>, vector<16x16xf32>
    %cst_27 = arith.constant dense<0xFF800000> : vector<16xf32>
    %75 = vector.multi_reduction <maximumf>, %74, %cst_27 [1] : vector<16x16xf32> to vector<16xf32>
    %76 = vector.shape_cast %75 : vector<16xf32> to vector<16x1xf32>
    %77 = vector.broadcast %76 : vector<16x1xf32> to vector<16x16xf32>
    %78 = arith.subf %74, %77 : vector<16x16xf32>
    %79 = math.exp %78 : vector<16x16xf32>
    %cst_28 = arith.constant dense<0.000000e+00> : vector<16xf32>
    %80 = vector.multi_reduction <add>, %79, %cst_28 [1] : vector<16x16xf32> to vector<16xf32>
    %81 = vector.shape_cast %80 : vector<16xf32> to vector<16x1xf32>
    %82 = vector.broadcast %81 : vector<16x1xf32> to vector<16x16xf32>
    %83 = arith.divf %79, %82 : vector<16x16xf32>
    %cst_29 = arith.constant dense<0.000000e+00> : vector<16x8xf32>
    %84 = tpu.matmul %83, %69, %cst_29 {dimension_numbers = #tpu.dot_dimension_numbers<[1], [0], [0], [1], [0, 0, 1, 1], [], []>} : vector<16x16xf32>, vector<16x8xf32>, vector<16x8xf32> -> vector<16x8xf32>
    %85 = vector.extract_strided_slice %11 {offsets = [0, 16], sizes = [16, 8], strides = [1, 1]} : vector<16x32xf32> to vector<16x8xf32>
    %86 = vector.extract_strided_slice %12 {offsets = [0, 16], sizes = [16, 8], strides = [1, 1]} : vector<16x32xf32> to vector<16x8xf32>
    %87 = vector.extract_strided_slice %13 {offsets = [0, 16], sizes = [16, 8], strides = [1, 1]} : vector<16x32xf32> to vector<16x8xf32>
    %cst_30 = arith.constant dense<0.000000e+00> : vector<16x16xf32>
    %88 = tpu.matmul %85, %86, %cst_30 {dimension_numbers = #tpu.dot_dimension_numbers<[1], [1], [0], [0], [0, 0, 1, 0], [], []>} : vector<16x8xf32>, vector<16x8xf32>, vector<16x16xf32> -> vector<16x16xf32>
    %cst_31 = arith.constant 0.353553385 : f32
    %89 = vector.broadcast %cst_31 : f32 to vector<16x16xf32>
    %90 = arith.mulf %88, %89 : vector<16x16xf32>
    %cst_32 = arith.constant -1.000000e+30 : f32
    %91 = vector.broadcast %cst_32 : f32 to vector<16x16xf32>
    %92 = arith.select %48, %90, %91 : vector<16x16xi1>, vector<16x16xf32>
    %cst_33 = arith.constant dense<0xFF800000> : vector<16xf32>
    %93 = vector.multi_reduction <maximumf>, %92, %cst_33 [1] : vector<16x16xf32> to vector<16xf32>
    %94 = vector.shape_cast %93 : vector<16xf32> to vector<16x1xf32>
    %95 = vector.broadcast %94 : vector<16x1xf32> to vector<16x16xf32>
    %96 = arith.subf %92, %95 : vector<16x16xf32>
    %97 = math.exp %96 : vector<16x16xf32>
    %cst_34 = arith.constant dense<0.000000e+00> : vector<16xf32>
    %98 = vector.multi_reduction <add>, %97, %cst_34 [1] : vector<16x16xf32> to vector<16xf32>
    %99 = vector.shape_cast %98 : vector<16xf32> to vector<16x1xf32>
    %100 = vector.broadcast %99 : vector<16x1xf32> to vector<16x16xf32>
    %101 = arith.divf %97, %100 : vector<16x16xf32>
    %cst_35 = arith.constant dense<0.000000e+00> : vector<16x8xf32>
    %102 = tpu.matmul %101, %87, %cst_35 {dimension_numbers = #tpu.dot_dimension_numbers<[1], [0], [0], [1], [0, 0, 1, 1], [], []>} : vector<16x16xf32>, vector<16x8xf32>, vector<16x8xf32> -> vector<16x8xf32>
    %103 = vector.extract_strided_slice %11 {offsets = [0, 24], sizes = [16, 8], strides = [1, 1]} : vector<16x32xf32> to vector<16x8xf32>
    %104 = vector.extract_strided_slice %12 {offsets = [0, 24], sizes = [16, 8], strides = [1, 1]} : vector<16x32xf32> to vector<16x8xf32>
    %105 = vector.extract_strided_slice %13 {offsets = [0, 24], sizes = [16, 8], strides = [1, 1]} : vector<16x32xf32> to vector<16x8xf32>
    %cst_36 = arith.constant dense<0.000000e+00> : vector<16x16xf32>
    %106 = tpu.matmul %103, %104, %cst_36 {dimension_numbers = #tpu.dot_dimension_numbers<[1], [1], [0], [0], [0, 0, 1, 0], [], []>} : vector<16x8xf32>, vector<16x8xf32>, vector<16x16xf32> -> vector<16x16xf32>
    %cst_37 = arith.constant 0.353553385 : f32
    %107 = vector.broadcast %cst_37 : f32 to vector<16x16xf32>
    %108 = arith.mulf %106, %107 : vector<16x16xf32>
    %cst_38 = arith.constant -1.000000e+30 : f32
    %109 = vector.broadcast %cst_38 : f32 to vector<16x16xf32>
    %110 = arith.select %48, %108, %109 : vector<16x16xi1>, vector<16x16xf32>
    %cst_39 = arith.constant dense<0xFF800000> : vector<16xf32>
    %111 = vector.multi_reduction <maximumf>, %110, %cst_39 [1] : vector<16x16xf32> to vector<16xf32>
    %112 = vector.shape_cast %111 : vector<16xf32> to vector<16x1xf32>
    %113 = vector.broadcast %112 : vector<16x1xf32> to vector<16x16xf32>
    %114 = arith.subf %110, %113 : vector<16x16xf32>
    %115 = math.exp %114 : vector<16x16xf32>
    %cst_40 = arith.constant dense<0.000000e+00> : vector<16xf32>
    %116 = vector.multi_reduction <add>, %115, %cst_40 [1] : vector<16x16xf32> to vector<16xf32>
    %117 = vector.shape_cast %116 : vector<16xf32> to vector<16x1xf32>
    %118 = vector.broadcast %117 : vector<16x1xf32> to vector<16x16xf32>
    %119 = arith.divf %115, %118 : vector<16x16xf32>
    %cst_41 = arith.constant dense<0.000000e+00> : vector<16x8xf32>
    %120 = tpu.matmul %119, %105, %cst_41 {dimension_numbers = #tpu.dot_dimension_numbers<[1], [0], [0], [1], [0, 0, 1, 1], [], []>} : vector<16x16xf32>, vector<16x8xf32>, vector<16x8xf32> -> vector<16x8xf32>
    %121 = tpu.concatenate %66, %84, %102, %120 in 1 : vector<16x8xf32>, vector<16x8xf32>, vector<16x8xf32>, vector<16x8xf32> -> vector<16x32xf32>
    %c0_42 = arith.constant 0 : index
    %c0_43 = arith.constant 0 : index
    %c0_44 = arith.constant 0 : index
    %122 = vector.load %arg4[%c0_42, %c0_43, %c0_44] : memref<1x32x32xf32, #tpu.memory_space<vmem>>, vector<1x32x32xf32>
    %123 = vector.shape_cast %122 : vector<1x32x32xf32> to vector<32x32xf32>
    %cst_45 = arith.constant dense<0.000000e+00> : vector<16x32xf32>
    %124 = tpu.matmul %121, %123, %cst_45 {dimension_numbers = #tpu.dot_dimension_numbers<[1], [0], [0], [1], [0, 0, 1, 1], [], []>} : vector<16x32xf32>, vector<32x32xf32>, vector<16x32xf32> -> vector<16x32xf32>
    %c0_46 = arith.constant 0 : index
    %c0_47 = arith.constant 0 : index
    %c0_48 = arith.constant 0 : index
    %125 = vector.load %arg5[%c0_46, %c0_47, %c0_48] : memref<1x1x32xf32, #tpu.memory_space<vmem>>, vector<1x1x32xf32>
    %126 = vector.shape_cast %125 : vector<1x1x32xf32> to vector<1x32xf32>
    %127 = vector.broadcast %126 : vector<1x32xf32> to vector<16x32xf32>
    %128 = arith.addf %124, %127 : vector<16x32xf32>
    %129 = arith.addf %3, %128 : vector<16x32xf32>
    %c0_49 = arith.constant 0 : index
    %c0_50 = arith.constant 0 : index
    %c0_51 = arith.constant 0 : index
    %130 = vector.load %arg6[%c0_49, %c0_50, %c0_51] : memref<1x1x32xf32, #tpu.memory_space<vmem>>, vector<1x1x32xf32>
    %131 = vector.shape_cast %130 : vector<1x1x32xf32> to vector<1x32xf32>
    %c0_52 = arith.constant 0 : index
    %c0_53 = arith.constant 0 : index
    %c0_54 = arith.constant 0 : index
    %132 = vector.load %arg7[%c0_52, %c0_53, %c0_54] : memref<1x1x32xf32, #tpu.memory_space<vmem>>, vector<1x1x32xf32>
    %133 = vector.shape_cast %132 : vector<1x1x32xf32> to vector<1x32xf32>
    %cst_55 = arith.constant dense<0.000000e+00> : vector<16xf32>
    %134 = vector.multi_reduction <add>, %129, %cst_55 [1] : vector<16x32xf32> to vector<16xf32>
    %135 = vector.shape_cast %134 : vector<16xf32> to vector<16x1xf32>
    %cst_56 = arith.constant 3.200000e+01 : f32
    %136 = vector.broadcast %cst_56 : f32 to vector<16x1xf32>
    %137 = arith.divf %135, %136 : vector<16x1xf32>
    %138 = vector.broadcast %137 : vector<16x1xf32> to vector<16x32xf32>
    %139 = arith.subf %129, %138 : vector<16x32xf32>
    %140 = arith.mulf %139, %139 : vector<16x32xf32>
    %cst_57 = arith.constant dense<0.000000e+00> : vector<16xf32>
    %141 = vector.multi_reduction <add>, %140, %cst_57 [1] : vector<16x32xf32> to vector<16xf32>
    %142 = vector.shape_cast %141 : vector<16xf32> to vector<16x1xf32>
    %cst_58 = arith.constant 3.200000e+01 : f32
    %143 = vector.broadcast %cst_58 : f32 to vector<16x1xf32>
    %144 = arith.divf %142, %143 : vector<16x1xf32>
    %cst_59 = arith.constant 9.99999974E-6 : f32
    %145 = vector.broadcast %cst_59 : f32 to vector<16x1xf32>
    %146 = arith.addf %144, %145 : vector<16x1xf32>
    %147 = math.rsqrt %146 : vector<16x1xf32>
    %148 = vector.broadcast %147 : vector<16x1xf32> to vector<16x32xf32>
    %149 = arith.mulf %139, %148 : vector<16x32xf32>
    %150 = vector.broadcast %131 : vector<1x32xf32> to vector<16x32xf32>
    %151 = arith.mulf %149, %150 : vector<16x32xf32>
    %152 = vector.broadcast %133 : vector<1x32xf32> to vector<16x32xf32>
    %153 = arith.addf %151, %152 : vector<16x32xf32>
    %c0_60 = arith.constant 0 : index
    %c0_61 = arith.constant 0 : index
    %c0_62 = arith.constant 0 : index
    %154 = vector.load %arg10[%c0_60, %c0_61, %c0_62] : memref<1x32x2048xf32, #tpu.memory_space<vmem>>, vector<1x32x2048xf32>
    %155 = vector.shape_cast %154 : vector<1x32x2048xf32> to vector<32x2048xf32>
    %cst_63 = arith.constant dense<0.000000e+00> : vector<16x2048xf32>
    %156 = tpu.matmul %153, %155, %cst_63 {dimension_numbers = #tpu.dot_dimension_numbers<[1], [0], [0], [1], [0, 0, 1, 1], [], []>} : vector<16x32xf32>, vector<32x2048xf32>, vector<16x2048xf32> -> vector<16x2048xf32>
    %c0_64 = arith.constant 0 : index
    %c0_65 = arith.constant 0 : index
    %c0_66 = arith.constant 0 : index
    %157 = vector.load %arg11[%c0_64, %c0_65, %c0_66] : memref<1x1x2048xf32, #tpu.memory_space<vmem>>, vector<1x1x2048xf32>
    %158 = vector.shape_cast %157 : vector<1x1x2048xf32> to vector<1x2048xf32>
    %159 = vector.broadcast %158 : vector<1x2048xf32> to vector<16x2048xf32>
    %160 = arith.addf %156, %159 : vector<16x2048xf32>
    %cst_67 = arith.constant 0.000000e+00 : f32
    %161 = vector.broadcast %cst_67 : f32 to vector<16x2048xf32>
    %162 = arith.maximumf %160, %161 : vector<16x2048xf32>
    %c0_68 = arith.constant 0 : index
    %c0_69 = arith.constant 0 : index
    %c0_70 = arith.constant 0 : index
    %163 = vector.load %arg12[%c0_68, %c0_69, %c0_70] : memref<1x2048x32xf32, #tpu.memory_space<vmem>>, vector<1x2048x32xf32>
    %164 = vector.shape_cast %163 : vector<1x2048x32xf32> to vector<2048x32xf32>
    %cst_71 = arith.constant dense<0.000000e+00> : vector<16x32xf32>
    %165 = tpu.matmul %162, %164, %cst_71 {dimension_numbers = #tpu.dot_dimension_numbers<[1], [0], [0], [1], [0, 0, 1, 1], [], []>} : vector<16x2048xf32>, vector<2048x32xf32>, vector<16x32xf32> -> vector<16x32xf32>
    %c0_72 = arith.constant 0 : index
    %c0_73 = arith.constant 0 : index
    %c0_74 = arith.constant 0 : index
    %166 = vector.load %arg13[%c0_72, %c0_73, %c0_74] : memref<1x1x32xf32, #tpu.memory_space<vmem>>, vector<1x1x32xf32>
    %167 = vector.shape_cast %166 : vector<1x1x32xf32> to vector<1x32xf32>
    %168 = vector.broadcast %167 : vector<1x32xf32> to vector<16x32xf32>
    %169 = arith.addf %165, %168 : vector<16x32xf32>
    %170 = arith.addf %153, %169 : vector<16x32xf32>
    %c0_75 = arith.constant 0 : index
    %c0_76 = arith.constant 0 : index
    %c0_77 = arith.constant 0 : index
    %171 = vector.load %arg8[%c0_75, %c0_76, %c0_77] : memref<1x1x32xf32, #tpu.memory_space<vmem>>, vector<1x1x32xf32>
    %172 = vector.shape_cast %171 : vector<1x1x32xf32> to vector<1x32xf32>
    %c0_78 = arith.constant 0 : index
    %c0_79 = arith.constant 0 : index
    %c0_80 = arith.constant 0 : index
    %173 = vector.load %arg9[%c0_78, %c0_79, %c0_80] : memref<1x1x32xf32, #tpu.memory_space<vmem>>, vector<1x1x32xf32>
    %174 = vector.shape_cast %173 : vector<1x1x32xf32> to vector<1x32xf32>
    %cst_81 = arith.constant dense<0.000000e+00> : vector<16xf32>
    %175 = vector.multi_reduction <add>, %170, %cst_81 [1] : vector<16x32xf32> to vector<16xf32>
    %176 = vector.shape_cast %175 : vector<16xf32> to vector<16x1xf32>
    %cst_82 = arith.constant 3.200000e+01 : f32
    %177 = vector.broadcast %cst_82 : f32 to vector<16x1xf32>
    %178 = arith.divf %176, %177 : vector<16x1xf32>
    %179 = vector.broadcast %178 : vector<16x1xf32> to vector<16x32xf32>
    %180 = arith.subf %170, %179 : vector<16x32xf32>
    %181 = arith.mulf %180, %180 : vector<16x32xf32>
    %cst_83 = arith.constant dense<0.000000e+00> : vector<16xf32>
    %182 = vector.multi_reduction <add>, %181, %cst_83 [1] : vector<16x32xf32> to vector<16xf32>
    %183 = vector.shape_cast %182 : vector<16xf32> to vector<16x1xf32>
    %cst_84 = arith.constant 3.200000e+01 : f32
    %184 = vector.broadcast %cst_84 : f32 to vector<16x1xf32>
    %185 = arith.divf %183, %184 : vector<16x1xf32>
    %cst_85 = arith.constant 9.99999974E-6 : f32
    %186 = vector.broadcast %cst_85 : f32 to vector<16x1xf32>
    %187 = arith.addf %185, %186 : vector<16x1xf32>
    %188 = math.rsqrt %187 : vector<16x1xf32>
    %189 = vector.broadcast %188 : vector<16x1xf32> to vector<16x32xf32>
    %190 = arith.mulf %180, %189 : vector<16x32xf32>
    %191 = vector.broadcast %172 : vector<1x32xf32> to vector<16x32xf32>
    %192 = arith.mulf %190, %191 : vector<16x32xf32>
    %193 = vector.broadcast %174 : vector<1x32xf32> to vector<16x32xf32>
    %194 = arith.addf %192, %193 : vector<16x32xf32>
    %c0_86 = arith.constant 0 : index
    %c0_87 = arith.constant 0 : index
    %195 = vector.load %arg17[%c0_86, %c0_87] : memref<16x32xf32, #tpu.memory_space<vmem>>, vector<16x32xf32>
    tpu.vector_store %arg17[%c0_86, %c0_87], %194 {strides = array<i32>} : memref<16x32xf32, #tpu.memory_space<vmem>>, vector<16x32xf32>,
    %c1_i32_88 = arith.constant 1 : i32
    %196 = arith.cmpi eq, %arg0, %c1_i32_88 : i32
    %197 = arith.extui %196 : i1 to i32
    %c0_i32_89 = arith.constant 0 : i32
    %198 = arith.cmpi ne, %197, %c0_i32_89 : i32
    scf.if %198 {
      %c0_90 = arith.constant 0 : index
      %c0_91 = arith.constant 0 : index
      %199 = vector.load %arg14[%c0_90, %c0_91] : memref<1x32xf32, #tpu.memory_space<vmem>>, vector<1x32xf32>
      %c0_92 = arith.constant 0 : index
      %c0_93 = arith.constant 0 : index
      %200 = vector.load %arg15[%c0_92, %c0_93] : memref<1x32xf32, #tpu.memory_space<vmem>>, vector<1x32xf32>
      %cst_94 = arith.constant dense<0.000000e+00> : vector<16xf32>
      %201 = vector.multi_reduction <add>, %194, %cst_94 [1] : vector<16x32xf32> to vector<16xf32>
      %202 = vector.shape_cast %201 : vector<16xf32> to vector<16x1xf32>
      %cst_95 = arith.constant 3.200000e+01 : f32
      %203 = vector.broadcast %cst_95 : f32 to vector<16x1xf32>
      %204 = arith.divf %202, %203 : vector<16x1xf32>
      %205 = vector.broadcast %204 : vector<16x1xf32> to vector<16x32xf32>
      %206 = arith.subf %194, %205 : vector<16x32xf32>
      %207 = arith.mulf %206, %206 : vector<16x32xf32>
      %cst_96 = arith.constant dense<0.000000e+00> : vector<16xf32>
      %208 = vector.multi_reduction <add>, %207, %cst_96 [1] : vector<16x32xf32> to vector<16xf32>
      %209 = vector.shape_cast %208 : vector<16xf32> to vector<16x1xf32>
      %cst_97 = arith.constant 3.200000e+01 : f32
      %210 = vector.broadcast %cst_97 : f32 to vector<16x1xf32>
      %211 = arith.divf %209, %210 : vector<16x1xf32>
      %cst_98 = arith.constant 9.99999974E-6 : f32
      %212 = vector.broadcast %cst_98 : f32 to vector<16x1xf32>
      %213 = arith.addf %211, %212 : vector<16x1xf32>
      %214 = math.rsqrt %213 : vector<16x1xf32>
      %215 = vector.broadcast %214 : vector<16x1xf32> to vector<16x32xf32>
      %216 = arith.mulf %206, %215 : vector<16x32xf32>
      %217 = vector.broadcast %199 : vector<1x32xf32> to vector<16x32xf32>
      %218 = arith.mulf %216, %217 : vector<16x32xf32>
      %219 = vector.broadcast %200 : vector<1x32xf32> to vector<16x32xf32>
      %220 = arith.addf %218, %219 : vector<16x32xf32>
      %c0_99 = arith.constant 0 : index
      %c0_100 = arith.constant 0 : index
      %221 = vector.load %arg16[%c0_99, %c0_100] : memref<16x32xf32, #tpu.memory_space<vmem>>, vector<16x32xf32>
      tpu.vector_store %arg16[%c0_99, %c0_100], %220 {strides = array<i32>} : memref<16x32xf32, #tpu.memory_space<vmem>>, vector<16x32xf32>,
    } else {
    }
    return
  }
  func.func @transform_0(%arg0: i32) -> (i32, i32) {
    %c0_i32 = arith.constant 0 : i32
    %c0_i32_0 = arith.constant 0 : i32
    %c0_i32_1 = arith.constant 0 : i32
    return %c0_i32, %c0_i32_0 : i32, i32
  }
  func.func @transform_1(%arg0: i32) -> (i32, i32, i32) {
    %c0_i32 = arith.constant 0 : i32
    %c0_i32_0 = arith.constant 0 : i32
    %c0_i32_1 = arith.constant 0 : i32
    return %arg0, %c0_i32, %c0_i32_0 : i32, i32, i32
  }
  func.func @transform_2(%arg0: i32) -> (i32, i32, i32) {
    %c0_i32 = arith.constant 0 : i32
    %c0_i32_0 = arith.constant 0 : i32
    %c0_i32_1 = arith.constant 0 : i32
    return %arg0, %c0_i32, %c0_i32_0 : i32, i32, i32
  }
  func.func @transform_3(%arg0: i32) -> (i32, i32, i32) {
    %c0_i32 = arith.constant 0 : i32
    %c0_i32_0 = arith.constant 0 : i32
    %c0_i32_1 = arith.constant 0 : i32
    return %arg0, %c0_i32, %c0_i32_0 : i32, i32, i32
  }
  func.func @transform_4(%arg0: i32) -> (i32, i32, i32) {
    %c0_i32 = arith.constant 0 : i32
    %c0_i32_0 = arith.constant 0 : i32
    %c0_i32_1 = arith.constant 0 : i32
    return %arg0, %c0_i32, %c0_i32_0 : i32, i32, i32
  }
  func.func @transform_5(%arg0: i32) -> (i32, i32, i32) {
    %c0_i32 = arith.constant 0 : i32
    %c0_i32_0 = arith.constant 0 : i32
    %c0_i32_1 = arith.constant 0 : i32
    return %arg0, %c0_i32, %c0_i32_0 : i32, i32, i32
  }
  func.func @transform_6(%arg0: i32) -> (i32, i32, i32) {
    %c0_i32 = arith.constant 0 : i32
    %c0_i32_0 = arith.constant 0 : i32
    %c0_i32_1 = arith.constant 0 : i32
    return %arg0, %c0_i32, %c0_i32_0 : i32, i32, i32
  }
  func.func @transform_7(%arg0: i32) -> (i32, i32, i32) {
    %c0_i32 = arith.constant 0 : i32
    %c0_i32_0 = arith.constant 0 : i32
    %c0_i32_1 = arith.constant 0 : i32
    return %arg0, %c0_i32, %c0_i32_0 : i32, i32, i32
  }
  func.func @transform_8(%arg0: i32) -> (i32, i32, i32) {
    %c0_i32 = arith.constant 0 : i32
    %c0_i32_0 = arith.constant 0 : i32
    %c0_i32_1 = arith.constant 0 : i32
    return %arg0, %c0_i32, %c0_i32_0 : i32, i32, i32
  }
  func.func @transform_9(%arg0: i32) -> (i32, i32, i32) {
    %c0_i32 = arith.constant 0 : i32
    %c0_i32_0 = arith.constant 0 : i32
    %c0_i32_1 = arith.constant 0 : i32
    return %arg0, %c0_i32, %c0_i32_0 : i32, i32, i32
  }
  func.func @transform_10(%arg0: i32) -> (i32, i32, i32) {
    %c0_i32 = arith.constant 0 : i32
    %c0_i32_0 = arith.constant 0 : i32
    %c0_i32_1 = arith.constant 0 : i32
    return %arg0, %c0_i32, %c0_i32_0 : i32, i32, i32
  }
  func.func @transform_11(%arg0: i32) -> (i32, i32, i32) {
    %c0_i32 = arith.constant 0 : i32
    %c0_i32_0 = arith.constant 0 : i32
    %c0_i32_1 = arith.constant 0 : i32
    return %arg0, %c0_i32, %c0_i32_0 : i32, i32, i32
  }
  func.func @transform_12(%arg0: i32) -> (i32, i32, i32) {
    %c0_i32 = arith.constant 0 : i32
    %c0_i32_0 = arith.constant 0 : i32
    %c0_i32_1 = arith.constant 0 : i32
    return %arg0, %c0_i32, %c0_i32_0 : i32, i32, i32
  }
  func.func @transform_13(%arg0: i32) -> (i32, i32) {
    %c0_i32 = arith.constant 0 : i32
    %c0_i32_0 = arith.constant 0 : i32
    %c0_i32_1 = arith.constant 0 : i32
    return %c0_i32, %c0_i32_0 : i32, i32
  }
  func.func @transform_14(%arg0: i32) -> (i32, i32) {
    %c0_i32 = arith.constant 0 : i32
    %c0_i32_0 = arith.constant 0 : i32
    %c0_i32_1 = arith.constant 0 : i32
    return %c0_i32, %c0_i32_0 : i32, i32
  }
  func.func @transform_15(%arg0: i32) -> (i32, i32) {
    %c0_i32 = arith.constant 0 : i32
    %c0_i32_0 = arith.constant 0 : i32
    %c0_i32_1 = arith.constant 0 : i32
    return %c0_i32, %c0_i32_0 : i32, i32
  }
}

module attributes {stable_mosaic.version = 11 : i64} {
  func.func @_decoder_stack_kernel(%arg0: i32, %arg1: memref<16x32xf32, #tpu.memory_space<vmem>>, %arg2: memref<16x32xf32, #tpu.memory_space<vmem>>, %arg3: memref<1x32x96xf32, #tpu.memory_space<vmem>>, %arg4: memref<1x1x96xf32, #tpu.memory_space<vmem>>, %arg5: memref<1x32x32xf32, #tpu.memory_space<vmem>>, %arg6: memref<1x1x32xf32, #tpu.memory_space<vmem>>, %arg7: memref<1x32x32xf32, #tpu.memory_space<vmem>>, %arg8: memref<1x1x32xf32, #tpu.memory_space<vmem>>, %arg9: memref<1x32x64xf32, #tpu.memory_space<vmem>>, %arg10: memref<1x1x64xf32, #tpu.memory_space<vmem>>, %arg11: memref<1x32x32xf32, #tpu.memory_space<vmem>>, %arg12: memref<1x1x32xf32, #tpu.memory_space<vmem>>, %arg13: memref<1x1x32xf32, #tpu.memory_space<vmem>>, %arg14: memref<1x1x32xf32, #tpu.memory_space<vmem>>, %arg15: memref<1x1x32xf32, #tpu.memory_space<vmem>>, %arg16: memref<1x1x32xf32, #tpu.memory_space<vmem>>, %arg17: memref<1x1x32xf32, #tpu.memory_space<vmem>>, %arg18: memref<1x1x32xf32, #tpu.memory_space<vmem>>, %arg19: memref<1x32x2048xf32, #tpu.memory_space<vmem>>, %arg20: memref<1x1x2048xf32, #tpu.memory_space<vmem>>, %arg21: memref<1x2048x32xf32, #tpu.memory_space<vmem>>, %arg22: memref<1x1x32xf32, #tpu.memory_space<vmem>>, %arg23: memref<1x32xf32, #tpu.memory_space<vmem>>, %arg24: memref<1x32xf32, #tpu.memory_space<vmem>>, %arg25: memref<32x8xf32, #tpu.memory_space<vmem>>, %arg26: memref<1x8xf32, #tpu.memory_space<vmem>>, %arg27: memref<16x8xf32, #tpu.memory_space<vmem>>, %arg28: memref<16x32xf32, #tpu.memory_space<vmem>>) attributes {dimension_semantics = [#tpu.dimension_semantics<arbitrary>], iteration_bounds = array<i64: 6>, scalar_prefetch = 0 : i64, scratch_operands = 1 : i64, tpu.core_type = #tpu.core_type<tc>, window_params = [{pipeline_mode = #tpu.pipeline_mode<synchronous>, transform_indices = @transform_0, window_bounds = array<i64: 16, 32>}, {pipeline_mode = #tpu.pipeline_mode<synchronous>, transform_indices = @transform_1, window_bounds = array<i64: 16, 32>}, {transform_indices = @transform_2, window_bounds = array<i64: 1, 32, 96>}, {transform_indices = @transform_3, window_bounds = array<i64: 1, 1, 96>}, {transform_indices = @transform_4, window_bounds = array<i64: 1, 32, 32>}, {transform_indices = @transform_5, window_bounds = array<i64: 1, 1, 32>}, {transform_indices = @transform_6, window_bounds = array<i64: 1, 32, 32>}, {transform_indices = @transform_7, window_bounds = array<i64: 1, 1, 32>}, {transform_indices = @transform_8, window_bounds = array<i64: 1, 32, 64>}, {transform_indices = @transform_9, window_bounds = array<i64: 1, 1, 64>}, {transform_indices = @transform_10, window_bounds = array<i64: 1, 32, 32>}, {transform_indices = @transform_11, window_bounds = array<i64: 1, 1, 32>}, {transform_indices = @transform_12, window_bounds = array<i64: 1, 1, 32>}, {transform_indices = @transform_13, window_bounds = array<i64: 1, 1, 32>}, {transform_indices = @transform_14, window_bounds = array<i64: 1, 1, 32>}, {transform_indices = @transform_15, window_bounds = array<i64: 1, 1, 32>}, {transform_indices = @transform_16, window_bounds = array<i64: 1, 1, 32>}, {transform_indices = @transform_17, window_bounds = array<i64: 1, 1, 32>}, {transform_indices = @transform_18, window_bounds = array<i64: 1, 32, 2048>}, {transform_indices = @transform_19, window_bounds = array<i64: 1, 1, 2048>}, {transform_indices = @transform_20, window_bounds = array<i64: 1, 2048, 32>}, {transform_indices = @transform_21, window_bounds = array<i64: 1, 1, 32>}, {pipeline_mode = #tpu.pipeline_mode<synchronous>, transform_indices = @transform_22, window_bounds = array<i64: 1, 32>}, {pipeline_mode = #tpu.pipeline_mode<synchronous>, transform_indices = @transform_23, window_bounds = array<i64: 1, 32>}, {pipeline_mode = #tpu.pipeline_mode<synchronous>, transform_indices = @transform_24, window_bounds = array<i64: 32, 8>}, {pipeline_mode = #tpu.pipeline_mode<synchronous>, transform_indices = @transform_25, window_bounds = array<i64: 1, 8>}, {pipeline_mode = #tpu.pipeline_mode<synchronous>, transform_indices = @transform_26, window_bounds = array<i64: 16, 8>}]} {
    %c0_i32 = arith.constant 0 : i32
    %0 = arith.cmpi eq, %arg0, %c0_i32 : i32
    %1 = arith.extui %0 : i1 to i32
    %c0_i32_0 = arith.constant 0 : i32
    %2 = arith.cmpi ne, %1, %c0_i32_0 : i32
    scf.if %2 {
      %c0_159 = arith.constant 0 : index
      %c0_160 = arith.constant 0 : index
      %356 = vector.load %arg1[%c0_159, %c0_160] : memref<16x32xf32, #tpu.memory_space<vmem>>, vector<16x32xf32>
      %c0_161 = arith.constant 0 : index
      %c0_162 = arith.constant 0 : index
      %357 = vector.load %arg28[%c0_161, %c0_162] : memref<16x32xf32, #tpu.memory_space<vmem>>, vector<16x32xf32>
      tpu.vector_store %arg28[%c0_161, %c0_162], %356 {strides = array<i32>} : memref<16x32xf32, #tpu.memory_space<vmem>>, vector<16x32xf32>,
    } else {
    }
    %c0 = arith.constant 0 : index
    %c0_1 = arith.constant 0 : index
    %3 = vector.load %arg28[%c0, %c0_1] : memref<16x32xf32, #tpu.memory_space<vmem>>, vector<16x32xf32>
    %c0_2 = arith.constant 0 : index
    %c0_3 = arith.constant 0 : index
    %4 = vector.load %arg2[%c0_2, %c0_3] : memref<16x32xf32, #tpu.memory_space<vmem>>, vector<16x32xf32>
    %c0_4 = arith.constant 0 : index
    %c0_5 = arith.constant 0 : index
    %c0_6 = arith.constant 0 : index
    %5 = vector.load %arg3[%c0_4, %c0_5, %c0_6] : memref<1x32x96xf32, #tpu.memory_space<vmem>>, vector<1x32x96xf32>
    %6 = vector.shape_cast %5 : vector<1x32x96xf32> to vector<32x96xf32>
    %cst = arith.constant dense<0.000000e+00> : vector<16x96xf32>
    %7 = tpu.matmul %3, %6, %cst {dimension_numbers = #tpu.dot_dimension_numbers<[1], [0], [0], [1], [0, 0, 1, 1], [], []>} : vector<16x32xf32>, vector<32x96xf32>, vector<16x96xf32> -> vector<16x96xf32>
    %c0_7 = arith.constant 0 : index
    %c0_8 = arith.constant 0 : index
    %c0_9 = arith.constant 0 : index
    %8 = vector.load %arg4[%c0_7, %c0_8, %c0_9] : memref<1x1x96xf32, #tpu.memory_space<vmem>>, vector<1x1x96xf32>
    %9 = vector.shape_cast %8 : vector<1x1x96xf32> to vector<1x96xf32>
    %10 = vector.broadcast %9 : vector<1x96xf32> to vector<16x96xf32>
    %11 = arith.addf %7, %10 : vector<16x96xf32>
    %12 = vector.extract_strided_slice %11 {offsets = [0, 0], sizes = [16, 32], strides = [1, 1]} : vector<16x96xf32> to vector<16x32xf32>
    %13 = vector.extract_strided_slice %11 {offsets = [0, 32], sizes = [16, 32], strides = [1, 1]} : vector<16x96xf32> to vector<16x32xf32>
    %14 = vector.extract_strided_slice %11 {offsets = [0, 64], sizes = [16, 32], strides = [1, 1]} : vector<16x96xf32> to vector<16x32xf32>
    %15 = tpu.iota {dimensions = array<i32: 0>} : vector<16x16xi32>
    %16 = tpu.iota {dimensions = array<i32: 1>} : vector<16x16xi32>
    %c2_i32 = arith.constant 2 : i32
    %c0_i32_10 = arith.constant 0 : i32
    %17 = arith.cmpi eq, %c2_i32, %c0_i32_10 : i32
    %c1_i32 = arith.constant 1 : i32
    %18 = arith.select %17, %c1_i32, %c2_i32 : i32
    %19 = vector.broadcast %18 : i32 to vector<16x16xi32>
    %20 = arith.remsi %15, %19 : vector<16x16xi32>
    %c0_i32_11 = arith.constant 0 : i32
    %21 = vector.broadcast %c0_i32_11 : i32 to vector<16x16xi32>
    %22 = arith.cmpi ne, %20, %21 : vector<16x16xi32>
    %c0_i32_12 = arith.constant 0 : i32
    %23 = vector.broadcast %c0_i32_12 : i32 to vector<16x16xi32>
    %24 = arith.cmpi slt, %20, %23 : vector<16x16xi32>
    %c0_i32_13 = arith.constant 0 : i32
    %25 = arith.cmpi slt, %18, %c0_i32_13 : i32
    %26 = vector.broadcast %25 : i1 to vector<16x16xi1>
    %27 = vector.broadcast %26 : vector<16x16xi1> to vector<16x16xi1>
    %28 = arith.xori %24, %27 : vector<16x16xi1>
    %29 = arith.andi %28, %22 : vector<16x16xi1>
    %30 = vector.broadcast %18 : i32 to vector<16x16xi32>
    %31 = arith.addi %20, %30 : vector<16x16xi32>
    %32 = arith.select %29, %31, %20 : vector<16x16xi1>, vector<16x16xi32>
    %c2_i32_14 = arith.constant 2 : i32
    %c0_i32_15 = arith.constant 0 : i32
    %33 = arith.cmpi eq, %c2_i32_14, %c0_i32_15 : i32
    %c1_i32_16 = arith.constant 1 : i32
    %34 = arith.select %33, %c1_i32_16, %c2_i32_14 : i32
    %35 = vector.broadcast %34 : i32 to vector<16x16xi32>
    %36 = arith.remsi %16, %35 : vector<16x16xi32>
    %c0_i32_17 = arith.constant 0 : i32
    %37 = vector.broadcast %c0_i32_17 : i32 to vector<16x16xi32>
    %38 = arith.cmpi ne, %36, %37 : vector<16x16xi32>
    %c0_i32_18 = arith.constant 0 : i32
    %39 = vector.broadcast %c0_i32_18 : i32 to vector<16x16xi32>
    %40 = arith.cmpi slt, %36, %39 : vector<16x16xi32>
    %c0_i32_19 = arith.constant 0 : i32
    %41 = arith.cmpi slt, %34, %c0_i32_19 : i32
    %42 = vector.broadcast %41 : i1 to vector<16x16xi1>
    %43 = vector.broadcast %42 : vector<16x16xi1> to vector<16x16xi1>
    %44 = arith.xori %40, %43 : vector<16x16xi1>
    %45 = arith.andi %44, %38 : vector<16x16xi1>
    %46 = vector.broadcast %34 : i32 to vector<16x16xi32>
    %47 = arith.addi %36, %46 : vector<16x16xi32>
    %48 = arith.select %45, %47, %36 : vector<16x16xi1>, vector<16x16xi32>
    %49 = arith.cmpi eq, %32, %48 : vector<16x16xi32>
    %50 = vector.extract_strided_slice %12 {offsets = [0, 0], sizes = [16, 8], strides = [1, 1]} : vector<16x32xf32> to vector<16x8xf32>
    %51 = vector.extract_strided_slice %13 {offsets = [0, 0], sizes = [16, 8], strides = [1, 1]} : vector<16x32xf32> to vector<16x8xf32>
    %52 = vector.extract_strided_slice %14 {offsets = [0, 0], sizes = [16, 8], strides = [1, 1]} : vector<16x32xf32> to vector<16x8xf32>
    %cst_20 = arith.constant dense<0.000000e+00> : vector<16x16xf32>
    %53 = tpu.matmul %50, %51, %cst_20 {dimension_numbers = #tpu.dot_dimension_numbers<[1], [1], [0], [0], [0, 0, 1, 0], [], []>} : vector<16x8xf32>, vector<16x8xf32>, vector<16x16xf32> -> vector<16x16xf32>
    %cst_21 = arith.constant 0.353553385 : f32
    %54 = vector.broadcast %cst_21 : f32 to vector<16x16xf32>
    %55 = arith.mulf %53, %54 : vector<16x16xf32>
    %cst_22 = arith.constant -1.000000e+30 : f32
    %56 = vector.broadcast %cst_22 : f32 to vector<16x16xf32>
    %57 = arith.select %49, %55, %56 : vector<16x16xi1>, vector<16x16xf32>
    %cst_23 = arith.constant dense<0xFF800000> : vector<16xf32>
    %58 = vector.multi_reduction <maximumf>, %57, %cst_23 [1] : vector<16x16xf32> to vector<16xf32>
    %59 = vector.shape_cast %58 : vector<16xf32> to vector<16x1xf32>
    %60 = vector.broadcast %59 : vector<16x1xf32> to vector<16x16xf32>
    %61 = arith.subf %57, %60 : vector<16x16xf32>
    %62 = math.exp %61 : vector<16x16xf32>
    %cst_24 = arith.constant dense<0.000000e+00> : vector<16xf32>
    %63 = vector.multi_reduction <add>, %62, %cst_24 [1] : vector<16x16xf32> to vector<16xf32>
    %64 = vector.shape_cast %63 : vector<16xf32> to vector<16x1xf32>
    %65 = vector.broadcast %64 : vector<16x1xf32> to vector<16x16xf32>
    %66 = arith.divf %62, %65 : vector<16x16xf32>
    %cst_25 = arith.constant dense<0.000000e+00> : vector<16x8xf32>
    %67 = tpu.matmul %66, %52, %cst_25 {dimension_numbers = #tpu.dot_dimension_numbers<[1], [0], [0], [1], [0, 0, 1, 1], [], []>} : vector<16x16xf32>, vector<16x8xf32>, vector<16x8xf32> -> vector<16x8xf32>
    %68 = vector.extract_strided_slice %12 {offsets = [0, 8], sizes = [16, 8], strides = [1, 1]} : vector<16x32xf32> to vector<16x8xf32>
    %69 = vector.extract_strided_slice %13 {offsets = [0, 8], sizes = [16, 8], strides = [1, 1]} : vector<16x32xf32> to vector<16x8xf32>
    %70 = vector.extract_strided_slice %14 {offsets = [0, 8], sizes = [16, 8], strides = [1, 1]} : vector<16x32xf32> to vector<16x8xf32>
    %cst_26 = arith.constant dense<0.000000e+00> : vector<16x16xf32>
    %71 = tpu.matmul %68, %69, %cst_26 {dimension_numbers = #tpu.dot_dimension_numbers<[1], [1], [0], [0], [0, 0, 1, 0], [], []>} : vector<16x8xf32>, vector<16x8xf32>, vector<16x16xf32> -> vector<16x16xf32>
    %cst_27 = arith.constant 0.353553385 : f32
    %72 = vector.broadcast %cst_27 : f32 to vector<16x16xf32>
    %73 = arith.mulf %71, %72 : vector<16x16xf32>
    %cst_28 = arith.constant -1.000000e+30 : f32
    %74 = vector.broadcast %cst_28 : f32 to vector<16x16xf32>
    %75 = arith.select %49, %73, %74 : vector<16x16xi1>, vector<16x16xf32>
    %cst_29 = arith.constant dense<0xFF800000> : vector<16xf32>
    %76 = vector.multi_reduction <maximumf>, %75, %cst_29 [1] : vector<16x16xf32> to vector<16xf32>
    %77 = vector.shape_cast %76 : vector<16xf32> to vector<16x1xf32>
    %78 = vector.broadcast %77 : vector<16x1xf32> to vector<16x16xf32>
    %79 = arith.subf %75, %78 : vector<16x16xf32>
    %80 = math.exp %79 : vector<16x16xf32>
    %cst_30 = arith.constant dense<0.000000e+00> : vector<16xf32>
    %81 = vector.multi_reduction <add>, %80, %cst_30 [1] : vector<16x16xf32> to vector<16xf32>
    %82 = vector.shape_cast %81 : vector<16xf32> to vector<16x1xf32>
    %83 = vector.broadcast %82 : vector<16x1xf32> to vector<16x16xf32>
    %84 = arith.divf %80, %83 : vector<16x16xf32>
    %cst_31 = arith.constant dense<0.000000e+00> : vector<16x8xf32>
    %85 = tpu.matmul %84, %70, %cst_31 {dimension_numbers = #tpu.dot_dimension_numbers<[1], [0], [0], [1], [0, 0, 1, 1], [], []>} : vector<16x16xf32>, vector<16x8xf32>, vector<16x8xf32> -> vector<16x8xf32>
    %86 = vector.extract_strided_slice %12 {offsets = [0, 16], sizes = [16, 8], strides = [1, 1]} : vector<16x32xf32> to vector<16x8xf32>
    %87 = vector.extract_strided_slice %13 {offsets = [0, 16], sizes = [16, 8], strides = [1, 1]} : vector<16x32xf32> to vector<16x8xf32>
    %88 = vector.extract_strided_slice %14 {offsets = [0, 16], sizes = [16, 8], strides = [1, 1]} : vector<16x32xf32> to vector<16x8xf32>
    %cst_32 = arith.constant dense<0.000000e+00> : vector<16x16xf32>
    %89 = tpu.matmul %86, %87, %cst_32 {dimension_numbers = #tpu.dot_dimension_numbers<[1], [1], [0], [0], [0, 0, 1, 0], [], []>} : vector<16x8xf32>, vector<16x8xf32>, vector<16x16xf32> -> vector<16x16xf32>
    %cst_33 = arith.constant 0.353553385 : f32
    %90 = vector.broadcast %cst_33 : f32 to vector<16x16xf32>
    %91 = arith.mulf %89, %90 : vector<16x16xf32>
    %cst_34 = arith.constant -1.000000e+30 : f32
    %92 = vector.broadcast %cst_34 : f32 to vector<16x16xf32>
    %93 = arith.select %49, %91, %92 : vector<16x16xi1>, vector<16x16xf32>
    %cst_35 = arith.constant dense<0xFF800000> : vector<16xf32>
    %94 = vector.multi_reduction <maximumf>, %93, %cst_35 [1] : vector<16x16xf32> to vector<16xf32>
    %95 = vector.shape_cast %94 : vector<16xf32> to vector<16x1xf32>
    %96 = vector.broadcast %95 : vector<16x1xf32> to vector<16x16xf32>
    %97 = arith.subf %93, %96 : vector<16x16xf32>
    %98 = math.exp %97 : vector<16x16xf32>
    %cst_36 = arith.constant dense<0.000000e+00> : vector<16xf32>
    %99 = vector.multi_reduction <add>, %98, %cst_36 [1] : vector<16x16xf32> to vector<16xf32>
    %100 = vector.shape_cast %99 : vector<16xf32> to vector<16x1xf32>
    %101 = vector.broadcast %100 : vector<16x1xf32> to vector<16x16xf32>
    %102 = arith.divf %98, %101 : vector<16x16xf32>
    %cst_37 = arith.constant dense<0.000000e+00> : vector<16x8xf32>
    %103 = tpu.matmul %102, %88, %cst_37 {dimension_numbers = #tpu.dot_dimension_numbers<[1], [0], [0], [1], [0, 0, 1, 1], [], []>} : vector<16x16xf32>, vector<16x8xf32>, vector<16x8xf32> -> vector<16x8xf32>
    %104 = vector.extract_strided_slice %12 {offsets = [0, 24], sizes = [16, 8], strides = [1, 1]} : vector<16x32xf32> to vector<16x8xf32>
    %105 = vector.extract_strided_slice %13 {offsets = [0, 24], sizes = [16, 8], strides = [1, 1]} : vector<16x32xf32> to vector<16x8xf32>
    %106 = vector.extract_strided_slice %14 {offsets = [0, 24], sizes = [16, 8], strides = [1, 1]} : vector<16x32xf32> to vector<16x8xf32>
    %cst_38 = arith.constant dense<0.000000e+00> : vector<16x16xf32>
    %107 = tpu.matmul %104, %105, %cst_38 {dimension_numbers = #tpu.dot_dimension_numbers<[1], [1], [0], [0], [0, 0, 1, 0], [], []>} : vector<16x8xf32>, vector<16x8xf32>, vector<16x16xf32> -> vector<16x16xf32>
    %cst_39 = arith.constant 0.353553385 : f32
    %108 = vector.broadcast %cst_39 : f32 to vector<16x16xf32>
    %109 = arith.mulf %107, %108 : vector<16x16xf32>
    %cst_40 = arith.constant -1.000000e+30 : f32
    %110 = vector.broadcast %cst_40 : f32 to vector<16x16xf32>
    %111 = arith.select %49, %109, %110 : vector<16x16xi1>, vector<16x16xf32>
    %cst_41 = arith.constant dense<0xFF800000> : vector<16xf32>
    %112 = vector.multi_reduction <maximumf>, %111, %cst_41 [1] : vector<16x16xf32> to vector<16xf32>
    %113 = vector.shape_cast %112 : vector<16xf32> to vector<16x1xf32>
    %114 = vector.broadcast %113 : vector<16x1xf32> to vector<16x16xf32>
    %115 = arith.subf %111, %114 : vector<16x16xf32>
    %116 = math.exp %115 : vector<16x16xf32>
    %cst_42 = arith.constant dense<0.000000e+00> : vector<16xf32>
    %117 = vector.multi_reduction <add>, %116, %cst_42 [1] : vector<16x16xf32> to vector<16xf32>
    %118 = vector.shape_cast %117 : vector<16xf32> to vector<16x1xf32>
    %119 = vector.broadcast %118 : vector<16x1xf32> to vector<16x16xf32>
    %120 = arith.divf %116, %119 : vector<16x16xf32>
    %cst_43 = arith.constant dense<0.000000e+00> : vector<16x8xf32>
    %121 = tpu.matmul %120, %106, %cst_43 {dimension_numbers = #tpu.dot_dimension_numbers<[1], [0], [0], [1], [0, 0, 1, 1], [], []>} : vector<16x16xf32>, vector<16x8xf32>, vector<16x8xf32> -> vector<16x8xf32>
    %122 = tpu.concatenate %67, %85, %103, %121 in 1 : vector<16x8xf32>, vector<16x8xf32>, vector<16x8xf32>, vector<16x8xf32> -> vector<16x32xf32>
    %c0_44 = arith.constant 0 : index
    %c0_45 = arith.constant 0 : index
    %c0_46 = arith.constant 0 : index
    %123 = vector.load %arg5[%c0_44, %c0_45, %c0_46] : memref<1x32x32xf32, #tpu.memory_space<vmem>>, vector<1x32x32xf32>
    %124 = vector.shape_cast %123 : vector<1x32x32xf32> to vector<32x32xf32>
    %cst_47 = arith.constant dense<0.000000e+00> : vector<16x32xf32>
    %125 = tpu.matmul %122, %124, %cst_47 {dimension_numbers = #tpu.dot_dimension_numbers<[1], [0], [0], [1], [0, 0, 1, 1], [], []>} : vector<16x32xf32>, vector<32x32xf32>, vector<16x32xf32> -> vector<16x32xf32>
    %c0_48 = arith.constant 0 : index
    %c0_49 = arith.constant 0 : index
    %c0_50 = arith.constant 0 : index
    %126 = vector.load %arg6[%c0_48, %c0_49, %c0_50] : memref<1x1x32xf32, #tpu.memory_space<vmem>>, vector<1x1x32xf32>
    %127 = vector.shape_cast %126 : vector<1x1x32xf32> to vector<1x32xf32>
    %128 = vector.broadcast %127 : vector<1x32xf32> to vector<16x32xf32>
    %129 = arith.addf %125, %128 : vector<16x32xf32>
    %130 = arith.addf %3, %129 : vector<16x32xf32>
    %c0_51 = arith.constant 0 : index
    %c0_52 = arith.constant 0 : index
    %c0_53 = arith.constant 0 : index
    %131 = vector.load %arg13[%c0_51, %c0_52, %c0_53] : memref<1x1x32xf32, #tpu.memory_space<vmem>>, vector<1x1x32xf32>
    %132 = vector.shape_cast %131 : vector<1x1x32xf32> to vector<1x32xf32>
    %c0_54 = arith.constant 0 : index
    %c0_55 = arith.constant 0 : index
    %c0_56 = arith.constant 0 : index
    %133 = vector.load %arg14[%c0_54, %c0_55, %c0_56] : memref<1x1x32xf32, #tpu.memory_space<vmem>>, vector<1x1x32xf32>
    %134 = vector.shape_cast %133 : vector<1x1x32xf32> to vector<1x32xf32>
    %cst_57 = arith.constant dense<0.000000e+00> : vector<16xf32>
    %135 = vector.multi_reduction <add>, %130, %cst_57 [1] : vector<16x32xf32> to vector<16xf32>
    %136 = vector.shape_cast %135 : vector<16xf32> to vector<16x1xf32>
    %cst_58 = arith.constant 3.200000e+01 : f32
    %137 = vector.broadcast %cst_58 : f32 to vector<16x1xf32>
    %138 = arith.divf %136, %137 : vector<16x1xf32>
    %139 = vector.broadcast %138 : vector<16x1xf32> to vector<16x32xf32>
    %140 = arith.subf %130, %139 : vector<16x32xf32>
    %141 = arith.mulf %140, %140 : vector<16x32xf32>
    %cst_59 = arith.constant dense<0.000000e+00> : vector<16xf32>
    %142 = vector.multi_reduction <add>, %141, %cst_59 [1] : vector<16x32xf32> to vector<16xf32>
    %143 = vector.shape_cast %142 : vector<16xf32> to vector<16x1xf32>
    %cst_60 = arith.constant 3.200000e+01 : f32
    %144 = vector.broadcast %cst_60 : f32 to vector<16x1xf32>
    %145 = arith.divf %143, %144 : vector<16x1xf32>
    %cst_61 = arith.constant 9.99999974E-6 : f32
    %146 = vector.broadcast %cst_61 : f32 to vector<16x1xf32>
    %147 = arith.addf %145, %146 : vector<16x1xf32>
    %148 = math.rsqrt %147 : vector<16x1xf32>
    %149 = vector.broadcast %148 : vector<16x1xf32> to vector<16x32xf32>
    %150 = arith.mulf %140, %149 : vector<16x32xf32>
    %151 = vector.broadcast %132 : vector<1x32xf32> to vector<16x32xf32>
    %152 = arith.mulf %150, %151 : vector<16x32xf32>
    %153 = vector.broadcast %134 : vector<1x32xf32> to vector<16x32xf32>
    %154 = arith.addf %152, %153 : vector<16x32xf32>
    %c0_62 = arith.constant 0 : index
    %c0_63 = arith.constant 0 : index
    %c0_64 = arith.constant 0 : index
    %155 = vector.load %arg7[%c0_62, %c0_63, %c0_64] : memref<1x32x32xf32, #tpu.memory_space<vmem>>, vector<1x32x32xf32>
    %156 = vector.shape_cast %155 : vector<1x32x32xf32> to vector<32x32xf32>
    %cst_65 = arith.constant dense<0.000000e+00> : vector<16x32xf32>
    %157 = tpu.matmul %154, %156, %cst_65 {dimension_numbers = #tpu.dot_dimension_numbers<[1], [0], [0], [1], [0, 0, 1, 1], [], []>} : vector<16x32xf32>, vector<32x32xf32>, vector<16x32xf32> -> vector<16x32xf32>
    %c0_66 = arith.constant 0 : index
    %c0_67 = arith.constant 0 : index
    %c0_68 = arith.constant 0 : index
    %158 = vector.load %arg8[%c0_66, %c0_67, %c0_68] : memref<1x1x32xf32, #tpu.memory_space<vmem>>, vector<1x1x32xf32>
    %159 = vector.shape_cast %158 : vector<1x1x32xf32> to vector<1x32xf32>
    %160 = vector.broadcast %159 : vector<1x32xf32> to vector<16x32xf32>
    %161 = arith.addf %157, %160 : vector<16x32xf32>
    %c0_69 = arith.constant 0 : index
    %c0_70 = arith.constant 0 : index
    %c0_71 = arith.constant 0 : index
    %162 = vector.load %arg9[%c0_69, %c0_70, %c0_71] : memref<1x32x64xf32, #tpu.memory_space<vmem>>, vector<1x32x64xf32>
    %163 = vector.shape_cast %162 : vector<1x32x64xf32> to vector<32x64xf32>
    %cst_72 = arith.constant dense<0.000000e+00> : vector<16x64xf32>
    %164 = tpu.matmul %4, %163, %cst_72 {dimension_numbers = #tpu.dot_dimension_numbers<[1], [0], [0], [1], [0, 0, 1, 1], [], []>} : vector<16x32xf32>, vector<32x64xf32>, vector<16x64xf32> -> vector<16x64xf32>
    %c0_73 = arith.constant 0 : index
    %c0_74 = arith.constant 0 : index
    %c0_75 = arith.constant 0 : index
    %165 = vector.load %arg10[%c0_73, %c0_74, %c0_75] : memref<1x1x64xf32, #tpu.memory_space<vmem>>, vector<1x1x64xf32>
    %166 = vector.shape_cast %165 : vector<1x1x64xf32> to vector<1x64xf32>
    %167 = vector.broadcast %166 : vector<1x64xf32> to vector<16x64xf32>
    %168 = arith.addf %164, %167 : vector<16x64xf32>
    %169 = vector.extract_strided_slice %168 {offsets = [0, 0], sizes = [16, 32], strides = [1, 1]} : vector<16x64xf32> to vector<16x32xf32>
    %170 = vector.extract_strided_slice %168 {offsets = [0, 32], sizes = [16, 32], strides = [1, 1]} : vector<16x64xf32> to vector<16x32xf32>
    %171 = tpu.iota {dimensions = array<i32: 0>} : vector<16x16xi32>
    %172 = tpu.iota {dimensions = array<i32: 1>} : vector<16x16xi32>
    %c2_i32_76 = arith.constant 2 : i32
    %c0_i32_77 = arith.constant 0 : i32
    %173 = arith.cmpi eq, %c2_i32_76, %c0_i32_77 : i32
    %c1_i32_78 = arith.constant 1 : i32
    %174 = arith.select %173, %c1_i32_78, %c2_i32_76 : i32
    %175 = vector.broadcast %174 : i32 to vector<16x16xi32>
    %176 = arith.remsi %171, %175 : vector<16x16xi32>
    %c0_i32_79 = arith.constant 0 : i32
    %177 = vector.broadcast %c0_i32_79 : i32 to vector<16x16xi32>
    %178 = arith.cmpi ne, %176, %177 : vector<16x16xi32>
    %c0_i32_80 = arith.constant 0 : i32
    %179 = vector.broadcast %c0_i32_80 : i32 to vector<16x16xi32>
    %180 = arith.cmpi slt, %176, %179 : vector<16x16xi32>
    %c0_i32_81 = arith.constant 0 : i32
    %181 = arith.cmpi slt, %174, %c0_i32_81 : i32
    %182 = vector.broadcast %181 : i1 to vector<16x16xi1>
    %183 = vector.broadcast %182 : vector<16x16xi1> to vector<16x16xi1>
    %184 = arith.xori %180, %183 : vector<16x16xi1>
    %185 = arith.andi %184, %178 : vector<16x16xi1>
    %186 = vector.broadcast %174 : i32 to vector<16x16xi32>
    %187 = arith.addi %176, %186 : vector<16x16xi32>
    %188 = arith.select %185, %187, %176 : vector<16x16xi1>, vector<16x16xi32>
    %c2_i32_82 = arith.constant 2 : i32
    %c0_i32_83 = arith.constant 0 : i32
    %189 = arith.cmpi eq, %c2_i32_82, %c0_i32_83 : i32
    %c1_i32_84 = arith.constant 1 : i32
    %190 = arith.select %189, %c1_i32_84, %c2_i32_82 : i32
    %191 = vector.broadcast %190 : i32 to vector<16x16xi32>
    %192 = arith.remsi %172, %191 : vector<16x16xi32>
    %c0_i32_85 = arith.constant 0 : i32
    %193 = vector.broadcast %c0_i32_85 : i32 to vector<16x16xi32>
    %194 = arith.cmpi ne, %192, %193 : vector<16x16xi32>
    %c0_i32_86 = arith.constant 0 : i32
    %195 = vector.broadcast %c0_i32_86 : i32 to vector<16x16xi32>
    %196 = arith.cmpi slt, %192, %195 : vector<16x16xi32>
    %c0_i32_87 = arith.constant 0 : i32
    %197 = arith.cmpi slt, %190, %c0_i32_87 : i32
    %198 = vector.broadcast %197 : i1 to vector<16x16xi1>
    %199 = vector.broadcast %198 : vector<16x16xi1> to vector<16x16xi1>
    %200 = arith.xori %196, %199 : vector<16x16xi1>
    %201 = arith.andi %200, %194 : vector<16x16xi1>
    %202 = vector.broadcast %190 : i32 to vector<16x16xi32>
    %203 = arith.addi %192, %202 : vector<16x16xi32>
    %204 = arith.select %201, %203, %192 : vector<16x16xi1>, vector<16x16xi32>
    %205 = arith.cmpi eq, %188, %204 : vector<16x16xi32>
    %206 = vector.extract_strided_slice %161 {offsets = [0, 0], sizes = [16, 8], strides = [1, 1]} : vector<16x32xf32> to vector<16x8xf32>
    %207 = vector.extract_strided_slice %169 {offsets = [0, 0], sizes = [16, 8], strides = [1, 1]} : vector<16x32xf32> to vector<16x8xf32>
    %208 = vector.extract_strided_slice %170 {offsets = [0, 0], sizes = [16, 8], strides = [1, 1]} : vector<16x32xf32> to vector<16x8xf32>
    %cst_88 = arith.constant dense<0.000000e+00> : vector<16x16xf32>
    %209 = tpu.matmul %206, %207, %cst_88 {dimension_numbers = #tpu.dot_dimension_numbers<[1], [1], [0], [0], [0, 0, 1, 0], [], []>} : vector<16x8xf32>, vector<16x8xf32>, vector<16x16xf32> -> vector<16x16xf32>
    %cst_89 = arith.constant 0.353553385 : f32
    %210 = vector.broadcast %cst_89 : f32 to vector<16x16xf32>
    %211 = arith.mulf %209, %210 : vector<16x16xf32>
    %cst_90 = arith.constant -1.000000e+30 : f32
    %212 = vector.broadcast %cst_90 : f32 to vector<16x16xf32>
    %213 = arith.select %205, %211, %212 : vector<16x16xi1>, vector<16x16xf32>
    %cst_91 = arith.constant dense<0xFF800000> : vector<16xf32>
    %214 = vector.multi_reduction <maximumf>, %213, %cst_91 [1] : vector<16x16xf32> to vector<16xf32>
    %215 = vector.shape_cast %214 : vector<16xf32> to vector<16x1xf32>
    %216 = vector.broadcast %215 : vector<16x1xf32> to vector<16x16xf32>
    %217 = arith.subf %213, %216 : vector<16x16xf32>
    %218 = math.exp %217 : vector<16x16xf32>
    %cst_92 = arith.constant dense<0.000000e+00> : vector<16xf32>
    %219 = vector.multi_reduction <add>, %218, %cst_92 [1] : vector<16x16xf32> to vector<16xf32>
    %220 = vector.shape_cast %219 : vector<16xf32> to vector<16x1xf32>
    %221 = vector.broadcast %220 : vector<16x1xf32> to vector<16x16xf32>
    %222 = arith.divf %218, %221 : vector<16x16xf32>
    %cst_93 = arith.constant dense<0.000000e+00> : vector<16x8xf32>
    %223 = tpu.matmul %222, %208, %cst_93 {dimension_numbers = #tpu.dot_dimension_numbers<[1], [0], [0], [1], [0, 0, 1, 1], [], []>} : vector<16x16xf32>, vector<16x8xf32>, vector<16x8xf32> -> vector<16x8xf32>
    %224 = vector.extract_strided_slice %161 {offsets = [0, 8], sizes = [16, 8], strides = [1, 1]} : vector<16x32xf32> to vector<16x8xf32>
    %225 = vector.extract_strided_slice %169 {offsets = [0, 8], sizes = [16, 8], strides = [1, 1]} : vector<16x32xf32> to vector<16x8xf32>
    %226 = vector.extract_strided_slice %170 {offsets = [0, 8], sizes = [16, 8], strides = [1, 1]} : vector<16x32xf32> to vector<16x8xf32>
    %cst_94 = arith.constant dense<0.000000e+00> : vector<16x16xf32>
    %227 = tpu.matmul %224, %225, %cst_94 {dimension_numbers = #tpu.dot_dimension_numbers<[1], [1], [0], [0], [0, 0, 1, 0], [], []>} : vector<16x8xf32>, vector<16x8xf32>, vector<16x16xf32> -> vector<16x16xf32>
    %cst_95 = arith.constant 0.353553385 : f32
    %228 = vector.broadcast %cst_95 : f32 to vector<16x16xf32>
    %229 = arith.mulf %227, %228 : vector<16x16xf32>
    %cst_96 = arith.constant -1.000000e+30 : f32
    %230 = vector.broadcast %cst_96 : f32 to vector<16x16xf32>
    %231 = arith.select %205, %229, %230 : vector<16x16xi1>, vector<16x16xf32>
    %cst_97 = arith.constant dense<0xFF800000> : vector<16xf32>
    %232 = vector.multi_reduction <maximumf>, %231, %cst_97 [1] : vector<16x16xf32> to vector<16xf32>
    %233 = vector.shape_cast %232 : vector<16xf32> to vector<16x1xf32>
    %234 = vector.broadcast %233 : vector<16x1xf32> to vector<16x16xf32>
    %235 = arith.subf %231, %234 : vector<16x16xf32>
    %236 = math.exp %235 : vector<16x16xf32>
    %cst_98 = arith.constant dense<0.000000e+00> : vector<16xf32>
    %237 = vector.multi_reduction <add>, %236, %cst_98 [1] : vector<16x16xf32> to vector<16xf32>
    %238 = vector.shape_cast %237 : vector<16xf32> to vector<16x1xf32>
    %239 = vector.broadcast %238 : vector<16x1xf32> to vector<16x16xf32>
    %240 = arith.divf %236, %239 : vector<16x16xf32>
    %cst_99 = arith.constant dense<0.000000e+00> : vector<16x8xf32>
    %241 = tpu.matmul %240, %226, %cst_99 {dimension_numbers = #tpu.dot_dimension_numbers<[1], [0], [0], [1], [0, 0, 1, 1], [], []>} : vector<16x16xf32>, vector<16x8xf32>, vector<16x8xf32> -> vector<16x8xf32>
    %242 = vector.extract_strided_slice %161 {offsets = [0, 16], sizes = [16, 8], strides = [1, 1]} : vector<16x32xf32> to vector<16x8xf32>
    %243 = vector.extract_strided_slice %169 {offsets = [0, 16], sizes = [16, 8], strides = [1, 1]} : vector<16x32xf32> to vector<16x8xf32>
    %244 = vector.extract_strided_slice %170 {offsets = [0, 16], sizes = [16, 8], strides = [1, 1]} : vector<16x32xf32> to vector<16x8xf32>
    %cst_100 = arith.constant dense<0.000000e+00> : vector<16x16xf32>
    %245 = tpu.matmul %242, %243, %cst_100 {dimension_numbers = #tpu.dot_dimension_numbers<[1], [1], [0], [0], [0, 0, 1, 0], [], []>} : vector<16x8xf32>, vector<16x8xf32>, vector<16x16xf32> -> vector<16x16xf32>
    %cst_101 = arith.constant 0.353553385 : f32
    %246 = vector.broadcast %cst_101 : f32 to vector<16x16xf32>
    %247 = arith.mulf %245, %246 : vector<16x16xf32>
    %cst_102 = arith.constant -1.000000e+30 : f32
    %248 = vector.broadcast %cst_102 : f32 to vector<16x16xf32>
    %249 = arith.select %205, %247, %248 : vector<16x16xi1>, vector<16x16xf32>
    %cst_103 = arith.constant dense<0xFF800000> : vector<16xf32>
    %250 = vector.multi_reduction <maximumf>, %249, %cst_103 [1] : vector<16x16xf32> to vector<16xf32>
    %251 = vector.shape_cast %250 : vector<16xf32> to vector<16x1xf32>
    %252 = vector.broadcast %251 : vector<16x1xf32> to vector<16x16xf32>
    %253 = arith.subf %249, %252 : vector<16x16xf32>
    %254 = math.exp %253 : vector<16x16xf32>
    %cst_104 = arith.constant dense<0.000000e+00> : vector<16xf32>
    %255 = vector.multi_reduction <add>, %254, %cst_104 [1] : vector<16x16xf32> to vector<16xf32>
    %256 = vector.shape_cast %255 : vector<16xf32> to vector<16x1xf32>
    %257 = vector.broadcast %256 : vector<16x1xf32> to vector<16x16xf32>
    %258 = arith.divf %254, %257 : vector<16x16xf32>
    %cst_105 = arith.constant dense<0.000000e+00> : vector<16x8xf32>
    %259 = tpu.matmul %258, %244, %cst_105 {dimension_numbers = #tpu.dot_dimension_numbers<[1], [0], [0], [1], [0, 0, 1, 1], [], []>} : vector<16x16xf32>, vector<16x8xf32>, vector<16x8xf32> -> vector<16x8xf32>
    %260 = vector.extract_strided_slice %161 {offsets = [0, 24], sizes = [16, 8], strides = [1, 1]} : vector<16x32xf32> to vector<16x8xf32>
    %261 = vector.extract_strided_slice %169 {offsets = [0, 24], sizes = [16, 8], strides = [1, 1]} : vector<16x32xf32> to vector<16x8xf32>
    %262 = vector.extract_strided_slice %170 {offsets = [0, 24], sizes = [16, 8], strides = [1, 1]} : vector<16x32xf32> to vector<16x8xf32>
    %cst_106 = arith.constant dense<0.000000e+00> : vector<16x16xf32>
    %263 = tpu.matmul %260, %261, %cst_106 {dimension_numbers = #tpu.dot_dimension_numbers<[1], [1], [0], [0], [0, 0, 1, 0], [], []>} : vector<16x8xf32>, vector<16x8xf32>, vector<16x16xf32> -> vector<16x16xf32>
    %cst_107 = arith.constant 0.353553385 : f32
    %264 = vector.broadcast %cst_107 : f32 to vector<16x16xf32>
    %265 = arith.mulf %263, %264 : vector<16x16xf32>
    %cst_108 = arith.constant -1.000000e+30 : f32
    %266 = vector.broadcast %cst_108 : f32 to vector<16x16xf32>
    %267 = arith.select %205, %265, %266 : vector<16x16xi1>, vector<16x16xf32>
    %cst_109 = arith.constant dense<0xFF800000> : vector<16xf32>
    %268 = vector.multi_reduction <maximumf>, %267, %cst_109 [1] : vector<16x16xf32> to vector<16xf32>
    %269 = vector.shape_cast %268 : vector<16xf32> to vector<16x1xf32>
    %270 = vector.broadcast %269 : vector<16x1xf32> to vector<16x16xf32>
    %271 = arith.subf %267, %270 : vector<16x16xf32>
    %272 = math.exp %271 : vector<16x16xf32>
    %cst_110 = arith.constant dense<0.000000e+00> : vector<16xf32>
    %273 = vector.multi_reduction <add>, %272, %cst_110 [1] : vector<16x16xf32> to vector<16xf32>
    %274 = vector.shape_cast %273 : vector<16xf32> to vector<16x1xf32>
    %275 = vector.broadcast %274 : vector<16x1xf32> to vector<16x16xf32>
    %276 = arith.divf %272, %275 : vector<16x16xf32>
    %cst_111 = arith.constant dense<0.000000e+00> : vector<16x8xf32>
    %277 = tpu.matmul %276, %262, %cst_111 {dimension_numbers = #tpu.dot_dimension_numbers<[1], [0], [0], [1], [0, 0, 1, 1], [], []>} : vector<16x16xf32>, vector<16x8xf32>, vector<16x8xf32> -> vector<16x8xf32>
    %278 = tpu.concatenate %223, %241, %259, %277 in 1 : vector<16x8xf32>, vector<16x8xf32>, vector<16x8xf32>, vector<16x8xf32> -> vector<16x32xf32>
    %c0_112 = arith.constant 0 : index
    %c0_113 = arith.constant 0 : index
    %c0_114 = arith.constant 0 : index
    %279 = vector.load %arg11[%c0_112, %c0_113, %c0_114] : memref<1x32x32xf32, #tpu.memory_space<vmem>>, vector<1x32x32xf32>
    %280 = vector.shape_cast %279 : vector<1x32x32xf32> to vector<32x32xf32>
    %cst_115 = arith.constant dense<0.000000e+00> : vector<16x32xf32>
    %281 = tpu.matmul %278, %280, %cst_115 {dimension_numbers = #tpu.dot_dimension_numbers<[1], [0], [0], [1], [0, 0, 1, 1], [], []>} : vector<16x32xf32>, vector<32x32xf32>, vector<16x32xf32> -> vector<16x32xf32>
    %c0_116 = arith.constant 0 : index
    %c0_117 = arith.constant 0 : index
    %c0_118 = arith.constant 0 : index
    %282 = vector.load %arg12[%c0_116, %c0_117, %c0_118] : memref<1x1x32xf32, #tpu.memory_space<vmem>>, vector<1x1x32xf32>
    %283 = vector.shape_cast %282 : vector<1x1x32xf32> to vector<1x32xf32>
    %284 = vector.broadcast %283 : vector<1x32xf32> to vector<16x32xf32>
    %285 = arith.addf %281, %284 : vector<16x32xf32>
    %286 = arith.addf %154, %285 : vector<16x32xf32>
    %c0_119 = arith.constant 0 : index
    %c0_120 = arith.constant 0 : index
    %c0_121 = arith.constant 0 : index
    %287 = vector.load %arg15[%c0_119, %c0_120, %c0_121] : memref<1x1x32xf32, #tpu.memory_space<vmem>>, vector<1x1x32xf32>
    %288 = vector.shape_cast %287 : vector<1x1x32xf32> to vector<1x32xf32>
    %c0_122 = arith.constant 0 : index
    %c0_123 = arith.constant 0 : index
    %c0_124 = arith.constant 0 : index
    %289 = vector.load %arg16[%c0_122, %c0_123, %c0_124] : memref<1x1x32xf32, #tpu.memory_space<vmem>>, vector<1x1x32xf32>
    %290 = vector.shape_cast %289 : vector<1x1x32xf32> to vector<1x32xf32>
    %cst_125 = arith.constant dense<0.000000e+00> : vector<16xf32>
    %291 = vector.multi_reduction <add>, %286, %cst_125 [1] : vector<16x32xf32> to vector<16xf32>
    %292 = vector.shape_cast %291 : vector<16xf32> to vector<16x1xf32>
    %cst_126 = arith.constant 3.200000e+01 : f32
    %293 = vector.broadcast %cst_126 : f32 to vector<16x1xf32>
    %294 = arith.divf %292, %293 : vector<16x1xf32>
    %295 = vector.broadcast %294 : vector<16x1xf32> to vector<16x32xf32>
    %296 = arith.subf %286, %295 : vector<16x32xf32>
    %297 = arith.mulf %296, %296 : vector<16x32xf32>
    %cst_127 = arith.constant dense<0.000000e+00> : vector<16xf32>
    %298 = vector.multi_reduction <add>, %297, %cst_127 [1] : vector<16x32xf32> to vector<16xf32>
    %299 = vector.shape_cast %298 : vector<16xf32> to vector<16x1xf32>
    %cst_128 = arith.constant 3.200000e+01 : f32
    %300 = vector.broadcast %cst_128 : f32 to vector<16x1xf32>
    %301 = arith.divf %299, %300 : vector<16x1xf32>
    %cst_129 = arith.constant 9.99999974E-6 : f32
    %302 = vector.broadcast %cst_129 : f32 to vector<16x1xf32>
    %303 = arith.addf %301, %302 : vector<16x1xf32>
    %304 = math.rsqrt %303 : vector<16x1xf32>
    %305 = vector.broadcast %304 : vector<16x1xf32> to vector<16x32xf32>
    %306 = arith.mulf %296, %305 : vector<16x32xf32>
    %307 = vector.broadcast %288 : vector<1x32xf32> to vector<16x32xf32>
    %308 = arith.mulf %306, %307 : vector<16x32xf32>
    %309 = vector.broadcast %290 : vector<1x32xf32> to vector<16x32xf32>
    %310 = arith.addf %308, %309 : vector<16x32xf32>
    %c0_130 = arith.constant 0 : index
    %c0_131 = arith.constant 0 : index
    %c0_132 = arith.constant 0 : index
    %311 = vector.load %arg19[%c0_130, %c0_131, %c0_132] : memref<1x32x2048xf32, #tpu.memory_space<vmem>>, vector<1x32x2048xf32>
    %312 = vector.shape_cast %311 : vector<1x32x2048xf32> to vector<32x2048xf32>
    %cst_133 = arith.constant dense<0.000000e+00> : vector<16x2048xf32>
    %313 = tpu.matmul %310, %312, %cst_133 {dimension_numbers = #tpu.dot_dimension_numbers<[1], [0], [0], [1], [0, 0, 1, 1], [], []>} : vector<16x32xf32>, vector<32x2048xf32>, vector<16x2048xf32> -> vector<16x2048xf32>
    %c0_134 = arith.constant 0 : index
    %c0_135 = arith.constant 0 : index
    %c0_136 = arith.constant 0 : index
    %314 = vector.load %arg20[%c0_134, %c0_135, %c0_136] : memref<1x1x2048xf32, #tpu.memory_space<vmem>>, vector<1x1x2048xf32>
    %315 = vector.shape_cast %314 : vector<1x1x2048xf32> to vector<1x2048xf32>
    %316 = vector.broadcast %315 : vector<1x2048xf32> to vector<16x2048xf32>
    %317 = arith.addf %313, %316 : vector<16x2048xf32>
    %cst_137 = arith.constant 0.000000e+00 : f32
    %318 = vector.broadcast %cst_137 : f32 to vector<16x2048xf32>
    %319 = arith.maximumf %317, %318 : vector<16x2048xf32>
    %c0_138 = arith.constant 0 : index
    %c0_139 = arith.constant 0 : index
    %c0_140 = arith.constant 0 : index
    %320 = vector.load %arg21[%c0_138, %c0_139, %c0_140] : memref<1x2048x32xf32, #tpu.memory_space<vmem>>, vector<1x2048x32xf32>
    %321 = vector.shape_cast %320 : vector<1x2048x32xf32> to vector<2048x32xf32>
    %cst_141 = arith.constant dense<0.000000e+00> : vector<16x32xf32>
    %322 = tpu.matmul %319, %321, %cst_141 {dimension_numbers = #tpu.dot_dimension_numbers<[1], [0], [0], [1], [0, 0, 1, 1], [], []>} : vector<16x2048xf32>, vector<2048x32xf32>, vector<16x32xf32> -> vector<16x32xf32>
    %c0_142 = arith.constant 0 : index
    %c0_143 = arith.constant 0 : index
    %c0_144 = arith.constant 0 : index
    %323 = vector.load %arg22[%c0_142, %c0_143, %c0_144] : memref<1x1x32xf32, #tpu.memory_space<vmem>>, vector<1x1x32xf32>
    %324 = vector.shape_cast %323 : vector<1x1x32xf32> to vector<1x32xf32>
    %325 = vector.broadcast %324 : vector<1x32xf32> to vector<16x32xf32>
    %326 = arith.addf %322, %325 : vector<16x32xf32>
    %327 = arith.addf %310, %326 : vector<16x32xf32>
    %c0_145 = arith.constant 0 : index
    %c0_146 = arith.constant 0 : index
    %c0_147 = arith.constant 0 : index
    %328 = vector.load %arg17[%c0_145, %c0_146, %c0_147] : memref<1x1x32xf32, #tpu.memory_space<vmem>>, vector<1x1x32xf32>
    %329 = vector.shape_cast %328 : vector<1x1x32xf32> to vector<1x32xf32>
    %c0_148 = arith.constant 0 : index
    %c0_149 = arith.constant 0 : index
    %c0_150 = arith.constant 0 : index
    %330 = vector.load %arg18[%c0_148, %c0_149, %c0_150] : memref<1x1x32xf32, #tpu.memory_space<vmem>>, vector<1x1x32xf32>
    %331 = vector.shape_cast %330 : vector<1x1x32xf32> to vector<1x32xf32>
    %cst_151 = arith.constant dense<0.000000e+00> : vector<16xf32>
    %332 = vector.multi_reduction <add>, %327, %cst_151 [1] : vector<16x32xf32> to vector<16xf32>
    %333 = vector.shape_cast %332 : vector<16xf32> to vector<16x1xf32>
    %cst_152 = arith.constant 3.200000e+01 : f32
    %334 = vector.broadcast %cst_152 : f32 to vector<16x1xf32>
    %335 = arith.divf %333, %334 : vector<16x1xf32>
    %336 = vector.broadcast %335 : vector<16x1xf32> to vector<16x32xf32>
    %337 = arith.subf %327, %336 : vector<16x32xf32>
    %338 = arith.mulf %337, %337 : vector<16x32xf32>
    %cst_153 = arith.constant dense<0.000000e+00> : vector<16xf32>
    %339 = vector.multi_reduction <add>, %338, %cst_153 [1] : vector<16x32xf32> to vector<16xf32>
    %340 = vector.shape_cast %339 : vector<16xf32> to vector<16x1xf32>
    %cst_154 = arith.constant 3.200000e+01 : f32
    %341 = vector.broadcast %cst_154 : f32 to vector<16x1xf32>
    %342 = arith.divf %340, %341 : vector<16x1xf32>
    %cst_155 = arith.constant 9.99999974E-6 : f32
    %343 = vector.broadcast %cst_155 : f32 to vector<16x1xf32>
    %344 = arith.addf %342, %343 : vector<16x1xf32>
    %345 = math.rsqrt %344 : vector<16x1xf32>
    %346 = vector.broadcast %345 : vector<16x1xf32> to vector<16x32xf32>
    %347 = arith.mulf %337, %346 : vector<16x32xf32>
    %348 = vector.broadcast %329 : vector<1x32xf32> to vector<16x32xf32>
    %349 = arith.mulf %347, %348 : vector<16x32xf32>
    %350 = vector.broadcast %331 : vector<1x32xf32> to vector<16x32xf32>
    %351 = arith.addf %349, %350 : vector<16x32xf32>
    %c0_156 = arith.constant 0 : index
    %c0_157 = arith.constant 0 : index
    %352 = vector.load %arg28[%c0_156, %c0_157] : memref<16x32xf32, #tpu.memory_space<vmem>>, vector<16x32xf32>
    tpu.vector_store %arg28[%c0_156, %c0_157], %351 {strides = array<i32>} : memref<16x32xf32, #tpu.memory_space<vmem>>, vector<16x32xf32>,
    %c5_i32 = arith.constant 5 : i32
    %353 = arith.cmpi eq, %arg0, %c5_i32 : i32
    %354 = arith.extui %353 : i1 to i32
    %c0_i32_158 = arith.constant 0 : i32
    %355 = arith.cmpi ne, %354, %c0_i32_158 : i32
    scf.if %355 {
      %c0_159 = arith.constant 0 : index
      %c0_160 = arith.constant 0 : index
      %356 = vector.load %arg23[%c0_159, %c0_160] : memref<1x32xf32, #tpu.memory_space<vmem>>, vector<1x32xf32>
      %c0_161 = arith.constant 0 : index
      %c0_162 = arith.constant 0 : index
      %357 = vector.load %arg24[%c0_161, %c0_162] : memref<1x32xf32, #tpu.memory_space<vmem>>, vector<1x32xf32>
      %cst_163 = arith.constant dense<0.000000e+00> : vector<16xf32>
      %358 = vector.multi_reduction <add>, %351, %cst_163 [1] : vector<16x32xf32> to vector<16xf32>
      %359 = vector.shape_cast %358 : vector<16xf32> to vector<16x1xf32>
      %cst_164 = arith.constant 3.200000e+01 : f32
      %360 = vector.broadcast %cst_164 : f32 to vector<16x1xf32>
      %361 = arith.divf %359, %360 : vector<16x1xf32>
      %362 = vector.broadcast %361 : vector<16x1xf32> to vector<16x32xf32>
      %363 = arith.subf %351, %362 : vector<16x32xf32>
      %364 = arith.mulf %363, %363 : vector<16x32xf32>
      %cst_165 = arith.constant dense<0.000000e+00> : vector<16xf32>
      %365 = vector.multi_reduction <add>, %364, %cst_165 [1] : vector<16x32xf32> to vector<16xf32>
      %366 = vector.shape_cast %365 : vector<16xf32> to vector<16x1xf32>
      %cst_166 = arith.constant 3.200000e+01 : f32
      %367 = vector.broadcast %cst_166 : f32 to vector<16x1xf32>
      %368 = arith.divf %366, %367 : vector<16x1xf32>
      %cst_167 = arith.constant 9.99999974E-6 : f32
      %369 = vector.broadcast %cst_167 : f32 to vector<16x1xf32>
      %370 = arith.addf %368, %369 : vector<16x1xf32>
      %371 = math.rsqrt %370 : vector<16x1xf32>
      %372 = vector.broadcast %371 : vector<16x1xf32> to vector<16x32xf32>
      %373 = arith.mulf %363, %372 : vector<16x32xf32>
      %374 = vector.broadcast %356 : vector<1x32xf32> to vector<16x32xf32>
      %375 = arith.mulf %373, %374 : vector<16x32xf32>
      %376 = vector.broadcast %357 : vector<1x32xf32> to vector<16x32xf32>
      %377 = arith.addf %375, %376 : vector<16x32xf32>
      %c0_168 = arith.constant 0 : index
      %c0_169 = arith.constant 0 : index
      %378 = vector.load %arg25[%c0_168, %c0_169] : memref<32x8xf32, #tpu.memory_space<vmem>>, vector<32x8xf32>
      %cst_170 = arith.constant dense<0.000000e+00> : vector<16x8xf32>
      %379 = tpu.matmul %377, %378, %cst_170 {dimension_numbers = #tpu.dot_dimension_numbers<[1], [0], [0], [1], [0, 0, 1, 1], [], []>} : vector<16x32xf32>, vector<32x8xf32>, vector<16x8xf32> -> vector<16x8xf32>
      %c0_171 = arith.constant 0 : index
      %c0_172 = arith.constant 0 : index
      %380 = vector.load %arg26[%c0_171, %c0_172] : memref<1x8xf32, #tpu.memory_space<vmem>>, vector<1x8xf32>
      %381 = vector.broadcast %380 : vector<1x8xf32> to vector<16x8xf32>
      %382 = arith.addf %379, %381 : vector<16x8xf32>
      %c0_173 = arith.constant 0 : index
      %c0_174 = arith.constant 0 : index
      %383 = vector.load %arg27[%c0_173, %c0_174] : memref<16x8xf32, #tpu.memory_space<vmem>>, vector<16x8xf32>
      tpu.vector_store %arg27[%c0_173, %c0_174], %382 {strides = array<i32>} : memref<16x8xf32, #tpu.memory_space<vmem>>, vector<16x8xf32>,
    } else {
    }
    return
  }
  func.func @transform_0(%arg0: i32) -> (i32, i32) {
    %c0_i32 = arith.constant 0 : i32
    %c0_i32_0 = arith.constant 0 : i32
    %c0_i32_1 = arith.constant 0 : i32
    return %c0_i32, %c0_i32_0 : i32, i32
  }
  func.func @transform_1(%arg0: i32) -> (i32, i32) {
    %c0_i32 = arith.constant 0 : i32
    %c0_i32_0 = arith.constant 0 : i32
    %c0_i32_1 = arith.constant 0 : i32
    return %c0_i32, %c0_i32_0 : i32, i32
  }
  func.func @transform_2(%arg0: i32) -> (i32, i32, i32) {
    %c0_i32 = arith.constant 0 : i32
    %c0_i32_0 = arith.constant 0 : i32
    %c0_i32_1 = arith.constant 0 : i32
    return %arg0, %c0_i32, %c0_i32_0 : i32, i32, i32
  }
  func.func @transform_3(%arg0: i32) -> (i32, i32, i32) {
    %c0_i32 = arith.constant 0 : i32
    %c0_i32_0 = arith.constant 0 : i32
    %c0_i32_1 = arith.constant 0 : i32
    return %arg0, %c0_i32, %c0_i32_0 : i32, i32, i32
  }
  func.func @transform_4(%arg0: i32) -> (i32, i32, i32) {
    %c0_i32 = arith.constant 0 : i32
    %c0_i32_0 = arith.constant 0 : i32
    %c0_i32_1 = arith.constant 0 : i32
    return %arg0, %c0_i32, %c0_i32_0 : i32, i32, i32
  }
  func.func @transform_5(%arg0: i32) -> (i32, i32, i32) {
    %c0_i32 = arith.constant 0 : i32
    %c0_i32_0 = arith.constant 0 : i32
    %c0_i32_1 = arith.constant 0 : i32
    return %arg0, %c0_i32, %c0_i32_0 : i32, i32, i32
  }
  func.func @transform_6(%arg0: i32) -> (i32, i32, i32) {
    %c0_i32 = arith.constant 0 : i32
    %c0_i32_0 = arith.constant 0 : i32
    %c0_i32_1 = arith.constant 0 : i32
    return %arg0, %c0_i32, %c0_i32_0 : i32, i32, i32
  }
  func.func @transform_7(%arg0: i32) -> (i32, i32, i32) {
    %c0_i32 = arith.constant 0 : i32
    %c0_i32_0 = arith.constant 0 : i32
    %c0_i32_1 = arith.constant 0 : i32
    return %arg0, %c0_i32, %c0_i32_0 : i32, i32, i32
  }
  func.func @transform_8(%arg0: i32) -> (i32, i32, i32) {
    %c0_i32 = arith.constant 0 : i32
    %c0_i32_0 = arith.constant 0 : i32
    %c0_i32_1 = arith.constant 0 : i32
    return %arg0, %c0_i32, %c0_i32_0 : i32, i32, i32
  }
  func.func @transform_9(%arg0: i32) -> (i32, i32, i32) {
    %c0_i32 = arith.constant 0 : i32
    %c0_i32_0 = arith.constant 0 : i32
    %c0_i32_1 = arith.constant 0 : i32
    return %arg0, %c0_i32, %c0_i32_0 : i32, i32, i32
  }
  func.func @transform_10(%arg0: i32) -> (i32, i32, i32) {
    %c0_i32 = arith.constant 0 : i32
    %c0_i32_0 = arith.constant 0 : i32
    %c0_i32_1 = arith.constant 0 : i32
    return %arg0, %c0_i32, %c0_i32_0 : i32, i32, i32
  }
  func.func @transform_11(%arg0: i32) -> (i32, i32, i32) {
    %c0_i32 = arith.constant 0 : i32
    %c0_i32_0 = arith.constant 0 : i32
    %c0_i32_1 = arith.constant 0 : i32
    return %arg0, %c0_i32, %c0_i32_0 : i32, i32, i32
  }
  func.func @transform_12(%arg0: i32) -> (i32, i32, i32) {
    %c0_i32 = arith.constant 0 : i32
    %c0_i32_0 = arith.constant 0 : i32
    %c0_i32_1 = arith.constant 0 : i32
    return %arg0, %c0_i32, %c0_i32_0 : i32, i32, i32
  }
  func.func @transform_13(%arg0: i32) -> (i32, i32, i32) {
    %c0_i32 = arith.constant 0 : i32
    %c0_i32_0 = arith.constant 0 : i32
    %c0_i32_1 = arith.constant 0 : i32
    return %arg0, %c0_i32, %c0_i32_0 : i32, i32, i32
  }
  func.func @transform_14(%arg0: i32) -> (i32, i32, i32) {
    %c0_i32 = arith.constant 0 : i32
    %c0_i32_0 = arith.constant 0 : i32
    %c0_i32_1 = arith.constant 0 : i32
    return %arg0, %c0_i32, %c0_i32_0 : i32, i32, i32
  }
  func.func @transform_15(%arg0: i32) -> (i32, i32, i32) {
    %c0_i32 = arith.constant 0 : i32
    %c0_i32_0 = arith.constant 0 : i32
    %c0_i32_1 = arith.constant 0 : i32
    return %arg0, %c0_i32, %c0_i32_0 : i32, i32, i32
  }
  func.func @transform_16(%arg0: i32) -> (i32, i32, i32) {
    %c0_i32 = arith.constant 0 : i32
    %c0_i32_0 = arith.constant 0 : i32
    %c0_i32_1 = arith.constant 0 : i32
    return %arg0, %c0_i32, %c0_i32_0 : i32, i32, i32
  }
  func.func @transform_17(%arg0: i32) -> (i32, i32, i32) {
    %c0_i32 = arith.constant 0 : i32
    %c0_i32_0 = arith.constant 0 : i32
    %c0_i32_1 = arith.constant 0 : i32
    return %arg0, %c0_i32, %c0_i32_0 : i32, i32, i32
  }
  func.func @transform_18(%arg0: i32) -> (i32, i32, i32) {
    %c0_i32 = arith.constant 0 : i32
    %c0_i32_0 = arith.constant 0 : i32
    %c0_i32_1 = arith.constant 0 : i32
    return %arg0, %c0_i32, %c0_i32_0 : i32, i32, i32
  }
  func.func @transform_19(%arg0: i32) -> (i32, i32, i32) {
    %c0_i32 = arith.constant 0 : i32
    %c0_i32_0 = arith.constant 0 : i32
    %c0_i32_1 = arith.constant 0 : i32
    return %arg0, %c0_i32, %c0_i32_0 : i32, i32, i32
  }
  func.func @transform_20(%arg0: i32) -> (i32, i32, i32) {
    %c0_i32 = arith.constant 0 : i32
    %c0_i32_0 = arith.constant 0 : i32
    %c0_i32_1 = arith.constant 0 : i32
    return %arg0, %c0_i32, %c0_i32_0 : i32, i32, i32
  }
  func.func @transform_21(%arg0: i32) -> (i32, i32, i32) {
    %c0_i32 = arith.constant 0 : i32
    %c0_i32_0 = arith.constant 0 : i32
    %c0_i32_1 = arith.constant 0 : i32
    return %arg0, %c0_i32, %c0_i32_0 : i32, i32, i32
  }
  func.func @transform_22(%arg0: i32) -> (i32, i32) {
    %c0_i32 = arith.constant 0 : i32
    %c0_i32_0 = arith.constant 0 : i32
    %c0_i32_1 = arith.constant 0 : i32
    return %c0_i32, %c0_i32_0 : i32, i32
  }
  func.func @transform_23(%arg0: i32) -> (i32, i32) {
    %c0_i32 = arith.constant 0 : i32
    %c0_i32_0 = arith.constant 0 : i32
    %c0_i32_1 = arith.constant 0 : i32
    return %c0_i32, %c0_i32_0 : i32, i32
  }
  func.func @transform_24(%arg0: i32) -> (i32, i32) {
    %c0_i32 = arith.constant 0 : i32
    %c0_i32_0 = arith.constant 0 : i32
    %c0_i32_1 = arith.constant 0 : i32
    return %c0_i32, %c0_i32_0 : i32, i32
  }
  func.func @transform_25(%arg0: i32) -> (i32, i32) {
    %c0_i32 = arith.constant 0 : i32
    %c0_i32_0 = arith.constant 0 : i32
    %c0_i32_1 = arith.constant 0 : i32
    return %c0_i32, %c0_i32_0 : i32, i32
  }
  func.func @transform_26(%arg0: i32) -> (i32, i32) {
    %c0_i32 = arith.constant 0 : i32
    %c0_i32_0 = arith.constant 0 : i32
    %c0_i32_1 = arith.constant 0 : i32
    return %c0_i32, %c0_i32_0 : i32, i32
  }
}

</mosaic_0001>

<bundles_post_ra>
// kernel: transformer_forward.3
= control target key start
LH: loop header
LB: loop body
LE: loop exit
PB: predicated region body
PF: predicated region fallthrough
CT: control target
= control target key end

     0   :  { %8 = vsyncpa [#allocation3], 0  ;;  %s278_s0 = inlined_call_operand.hbm [shape: f32[16,16], index: 0, kind: input, shape index: {}]   ;;  %s279_s1 = inlined_call_operand.hbm [shape: f32[16,32], index: 1, kind: input, shape index: {}]   ;;  %s280_s2 = inlined_call_operand.hbm [shape: f32[1,32], index: 2, kind: input, shape index: {}]   ;;  %s281_s3 = inlined_call_operand.vmem [shape: f32[16,32], index: 3, kind: output, shape index: {}]  }
   0x1   :  { %9 = vsyncpa [#allocation5], 0  ;;  %s238_s12 = smov [#allocation4]   ;;  %s239_s14 = smov [#allocation2]  }
   0x2   :  { %s27_s13 = sshll.u32 %s238_s12, 4  ;;  %s15_s15 = sshll.u32 %s239_s14, 4  ;;  %s28_s13 = int_to_ptr.vmem [resolvable:$true] %s27_s13  ;;  %s16_s15 = int_to_ptr.vmem [resolvable:$true] %s15_s15 }
   0x3   :  { %s182_s16 = scalar_lea.vmem %s28_s13, 256  ;;  %p187_p1 = scmp.lt.s32.totalorder %s28_s13, %s28_s13 }
   0x4   :  { %p183_p0 = scmp.ne.s32.totalorder %s28_s13, %s182_s16  ;;  %p188_p2 = scmp.lt.s32.totalorder %s182_s16, %s182_s16 }
   0x6   :  { %p189_p3 = por %p188_p2, %p187_p1 }
   0x8   :  { %p190_p4 = pnand %p189_p3, %p183_p0 }
   0xa   :  { %193 = shalt.err (!%p190_p4)
}
   0xb   :  { %s240_s17 = smov 128   ;;  %s241_s18 = smov 8  }
   0xc   :  { %33 = dma.hbm_to_vmem [thread:$0]  %s279_s1, 256, %s28_s13, [#allocation5], %s240_s17, %s240_s17, %s241_s18  }
   0xd   :  { %s202_s21 = scalar_lea.vmem %s16_s15, 256  ;;  %p207_p6 = scmp.lt.s32.totalorder %s16_s15, %s16_s15 }
   0xe   :  { %p203_p5 = scmp.ne.s32.totalorder %s16_s15, %s202_s21  ;;  %p208_p7 = scmp.lt.s32.totalorder %s202_s21, %s202_s21 }
  0x10   :  { %p209_p8 = por %p208_p7, %p207_p6 }
  0x12   :  { %p210_p9 = pnand %p209_p8, %p203_p5 }
  0x14   :  { %213 = shalt.err (!%p210_p9)
}
  0x15   :  { %21 = dma.hbm_to_vmem [thread:$0]  %s278_s0, 256, %s16_s15, [#allocation3], %s240_s17, %s240_s17, %s241_s18  }
  0x16   :  { %s242_s24 = smov [#allocation6]  }
  0x17   :  { %s40_s25 = sshll.u32 %s242_s24, 4  ;;  %s41_s25 = int_to_ptr.vmem [resolvable:$true] %s40_s25 }
  0x18   :  { %s222_s26 = scalar_lea.vmem %s41_s25, 16  ;;  %s226_s27 = scalar_lea.vmem %s41_s25, 32 }
  0x19   :  { %p223_p10 = scmp.ne.s32.totalorder %s41_s25, %s222_s26  ;;  %p227_p11 = scmp.lt.s32.totalorder %s41_s25, %s41_s25 }
  0x1a   :  { %p228_p12 = scmp.lt.s32.totalorder %s226_s27, %s222_s26 }
  0x1c   :  { %p229_p13 = por %p228_p12, %p227_p11 }
  0x1e   :  { %p230_p0 = pnand %p229_p13, %p223_p10 }
  0x20   :  { %233 = shalt.err (!%p230_p0)
}
  0x21   :  { %43 = dma.hbm_to_vmem [thread:$0]  %s280_s2, 16, %s41_s25, [#allocation5]  }
  0x22   :  { %234 = dma.done.wait [#allocation3], 256  }
  0x23   :  { %235 = vsyncadd [#allocation3], 4294967040 }
  0x24   :  { %236 = dma.done.wait [#allocation5], 272  }
  0x25   :  { %237 = vsyncadd [#allocation5], 4294967024  ;;  %vm64_vm0 = vcmask 130048   ;;  %v56_v0 = vld [vmem:[#allocation4 + $0x8] sm:$0xff]  ;;  %v55_v1 = vld [vmem:[#allocation4] sm:$0xff]  ;;  %vm146_vm1 = vcmask 261120  }
  0x26   :  { %v53_v2 = vld [vmem:[#allocation2] sm:$0xff]  ;;  %162 = vmatprep.subr.mxu0 %v56_v0  ;;  %v54_v3 = vld [vmem:[#allocation2 + $0x8] sm:$0xff] }
  0x27   :  { %166 = vmatprep.mubr.msk.f32.mxu0 %vm64_vm0, %v53_v2  ;;  %163 = vmatpush3.msra.mxu0 %v56_v0  ;;  %v155_v4 = vld [vmem:[#allocation6] ss:$0 sm:$0xff] }
  0x28   :  { %164 = vmatprep.subr.mxu0 %v55_v1 }
  0x29   :  { %165 = vmatpush3.msra.mxu0 %v55_v1 }
  0x2a   :  { %167 = vmatmul.mubr.msk.f32.vlgmr.msra.gmra.mxu0 %vm64_vm0, %v54_v3 }
  0xea   :  { %v168_v5 = vpop.f32.mrf.mxu0 }
  0xeb   :  { %v143_v6 = vadd.f32 %v168_v5, %v155_v4 }
  0xec   :  { %v137_v7 = vpop.f32.mrf.mxu0 }
  0xed   :  { %148 = vst.msk [vmem:[%s281_s3 + $0x8] sm:$0xff] %vm146_vm1, %v143_v6  ;;  %v138_v8 = vadd.f32 %v155_v4, %v137_v7 }
  0xef   :  { %147 = vst.msk [vmem:[%s281_s3] sm:$0xff] %vm146_vm1, %v138_v8 }
  0xf0   :  { %153 = vsyncpa [#allocation3], 1 }
  0xf1   :  { %154 = vsyncpa [#allocation5], 1 }

// kernel: transformer_forward.4
= control target key start
LH: loop header
LB: loop body
LE: loop exit
PB: predicated region body
PF: predicated region fallthrough
CT: control target
= control target key end

     0   :  { %s4360_s18 = smov 0   ;;  %s5137_s0 = inlined_call_operand.vmem [shape: f32[16,32], index: 0, kind: input, shape index: {}]   ;;  %s5138_s1 = inlined_call_operand.vmem [shape: f32[2,32,96], index: 1, kind: input, shape index: {}]   ;;  %s5139_s2 = inlined_call_operand.vmem [shape: f32[2,1,96], index: 2, kind: input, shape index: {}]   ;;  %s5140_s3 = inlined_call_operand.vmem [shape: f32[2,32,32], index: 3, kind: input, shape index: {}]   ;;  %s5141_s4 = inlined_call_operand.vmem [shape: f32[2,1,32], index: 4, kind: input, shape index: {}]   ;;  %s5142_s5 = inlined_call_operand.vmem [shape: f32[2,1,32], index: 5, kind: input, shape index: {}]   ;;  %s5143_s6 = inlined_call_operand.vmem [shape: f32[2,1,32], index: 6, kind: input, shape index: {}]   ;;  %s5144_s7 = inlined_call_operand.vmem [shape: f32[2,1,32], index: 7, kind: input, shape index: {}]   ;;  %s5145_s8 = inlined_call_operand.vmem [shape: f32[2,1,32], index: 8, kind: input, shape index: {}]   ;;  %s5146_s9 = inlined_call_operand.vmem [shape: f32[2,32,2048], index: 9, kind: input, shape index: {}]   ;;  %s5147_s10 = inlined_call_operand.vmem [shape: f32[2,1,2048], index: 10, kind: input, shape index: {}]   ;;  %s5148_s11 = inlined_call_operand.vmem [shape: f32[2,2048,32], index: 11, kind: input, shape index: {}]   ;;  %s5149_s12 = inlined_call_operand.vmem [shape: f32[2,1,32], index: 12, kind: input, shape index: {}]   ;;  %s5150_s13 = inlined_call_operand.vmem [shape: f32[1,32], index: 13, kind: input, shape index: {}]   ;;  %s5151_s14 = inlined_call_operand.vmem [shape: f32[1,32], index: 14, kind: input, shape index: {}]   ;;  %s5152_s15 = inlined_call_operand.vmem [shape: f32[16,32], index: 15, kind: output, shape index: {}]  }
   0x1   :  { %5155 = sst [smem:[#allocation4_spill]] %s5138_s1 }
   0x2   :  { %5156 = sst [smem:[#allocation5_spill]] %s5139_s2 }
   0x3   :  { %5157 = sst [smem:[#allocation6_spill]] %s5140_s3 }
   0x4   :  { %5158 = sst [smem:[#allocation7_spill]] %s5150_s13 }
   0x5   :  { %5159 = sst [smem:[#allocation8_spill]] %s5151_s14 }
   0x6   :  { %5160 = sst [smem:[#allocation9_spill]] %s5152_s15 }
   0x7 LB: > { %5161 = sst [smem:[#allocation3_spill]] %s4263_s18  ;;  %s4366_s19 = sadd.s32 4294967295, %s4263_s18   ;;  %s4263_s18 = sphi %s4360_s18, %s25_s18  }
   0x8   : > { %p3693_p0 = scmp.ge.s32.totalorder %s4263_s18, 1  ;;  %p527_p1 = scmp.lt.s32.totalorder %s4263_s18, 3 }
   0xa   : > { %p528_p2 = pnand %p3693_p0, %p527_p1 }
   0xb   : > { %p610_p3 = scmp.lt.s32.totalorder (!%p528_p2), %s4366_s19, 1  ;;  %s5163_s1 = sld [smem:[#allocation4_spill]] (!%p528_p2) }
   0xc   : > { %531 = sbr.rel (%p528_p2) target bundleno = 4391 (0x1127), region = 80  ;;  %s5164_s3 = sld [smem:[#allocation6_spill]] (!%p528_p2) }
   0xd   : > { %p3703_p4 = scmp.ne.s32.totalorder (!%p528_p2), %s4366_s19, 0 }
  0x11   : > { %s4372_s20 = scalar_select %p610_p3, %s4366_s19, 1 }
  0x13   : > { %s3760_s21 = sshll.u32 %s4372_s20, 5  ;;  %s625_s18 = scalar_lea.vmem %s5141_s4, %s4372_s20 }
  0x14   : > { %s4382_s27 = scalar_lea.vmem %s5163_s1, %s3760_s21  ;;  %s4387_s30 = scalar_lea.vmem %s5164_s3, %s3760_s21 }
  0x15   : > { %s634_s1 = scalar_lea.vmem %s5144_s7, %s4372_s20  ;;  %s3762_s29 = sshll.u32 %s4372_s20, 9 }
  0x16   : > { %s4413_s17 = scalar_lea.vmem %s5146_s9, %s3762_s29  ;;  %s3700_s14 = sshll.u32 %s4372_s20, 4 }
  0x17   : > { %s4419_s22 = scalar_lea.vmem %s5147_s10, %s3700_s14  ;;  %s3763_s23 = sshll.u32 %s4372_s20, 11 }
  0x18   : > { %s4425_s26 = scalar_lea.vmem %s5148_s11, %s3763_s23  ;;  %s654_s21 = scalar_lea.vmem %s5149_s12, %s4372_s20 }
  0x19   : > { %658 = sbr.rel (%p3703_p4) target bundleno = 32 (0x20), region = 84 }
  0x1e   : > { %v659_v0 = vld [vmem:[%s5137_s0] sm:$0xff]  ;;  %vm661_vm0 = vcmask 261120   ;;  %v660_v1 = vld [vmem:[%s5137_s0 + $0x8] sm:$0xff] }
  0x1f   : > { %662 = vst.msk [vmem:[#allocation2] sm:$0xff] %vm661_vm0, %v659_v0  ;;  %663 = vst.msk [vmem:[#allocation2 + $0x8] sm:$0xff] %vm661_vm0, %v660_v1 }
  0x20 PF: > { %v669_v2 = vld [vmem:[%s4382_s27 + $0x18] sm:$0xff]  ;;  %v668_v3 = vld [vmem:[%s4382_s27 + $0x10] sm:$0xff]  ;;  %vm677_vm1 = vcmask 261120   ;;  %v667_v5 = vld [vmem:[%s4382_s27 + $0x8] sm:$0xff]  ;;  %s5165_s15 = sld [smem:[#allocation5_spill]]  ;;  %vm808_vm2 = vcmask 64512   ;;  %v759_v15 = vlaneseq }
  0x21   : > { %4112 = vmatprep.subr.mxu0 %v669_v2  ;;  %v666_v6 = vld [vmem:[%s4382_s27] sm:$0xff]  ;;  %s4265_s27 = smov 96   ;;  %vm896_vm5 = vcmask 130048   ;;  %s4266_s25 = smov 64   ;;  %vm1646_vm6 = vcmask 195584  }
  0x22   : > { %4113 = vmatpush3.msra.mxu0 %v669_v2  ;;  %v4469_v16 = vshrl.u32 %v759_v15, 7  ;;  %v763_v17 = vand.u32 127, %v759_v15  ;;  %s4267_s2 = smov 120   ;;  %s4268_s28 = smov 88  }
  0x23   : > { %4114 = vmatprep.subr.mxu0 %v668_v3  ;;  %s4269_s3 = smov 56   ;;  %s4270_s29 = smov 80  }
  0x24   : > { %4115 = vmatpush3.msra.mxu0 %v668_v3  ;;  %v761_v18 = vadd.s32 8, %v4469_v16  ;;  %v768_v19 = vand.u32 1, %v4469_v16  ;;  %v792_v21 = vand.u32 1, %v763_v17  ;;  %s4271_s13 = smov 112   ;;  %s4272_s16 = smov 48  }
  0x25   : > { %4116 = vmatprep.subr.mxu0 %v667_v5  ;;  %s4273_s24 = smov 72   ;;  %s4274_s14 = smov 104  }
  0x26   : > { %v4440_v4 = vld [vmem:[#allocation2] sm:$0xff]  ;;  %4117 = vmatpush3.msra.mxu0 %v667_v5  ;;  %v4446_v7 = vld [vmem:[#allocation2 + $0x8] sm:$0xff]  ;;  %s5166_s23 = scalar_lea.vmem %s5165_s15, %s4372_s20  ;;  %v775_v22 = vand.u32 1, %v761_v18  ;;  %vm4473_vm3 = vcmp.eq.s32.totalorder %v768_v19, %v792_v21  ;;  %s4275_s15 = smov 40  }
  0x27   : > { %4120 = vmatprep.mubr.msk.f32.mxu0 %vm677_vm1, %v4440_v4  ;;  %4118 = vmatprep.subr.mxu0 %v666_v6  ;;  %v3704_v8 = vld [vmem:[%s5166_s23] ss:$0 sm:$0xff]  ;;  %s4276_s23 = smov 8   ;;  %p3755_p5 = scmp.ne.s32.totalorder %s4366_s19, 1 }
  0x28   : > { %4119 = vmatpush3.msra.mxu0 %v666_v6  ;;  %vm4477_vm4 = vcmp.eq.s32.totalorder %v775_v22, %v792_v21 }
  0x29   : > { %4121 = vmatmul.mubr.msk.f32.vlgmr.msra.gmra.mxu0 %vm677_vm1, %v4446_v7 }
  0xe9   : > { %v4122_v9 = vpop.f32.mrf.mxu0 }
  0xea   : > { %v4455_v10 = vadd.f32 %v4122_v9, %v3704_v8 }
  0xeb   : > { %v750_v11 = vpop.f32.mrf.mxu0 }
  0xec   : > { %v4457_v12 = vadd.f32 %v3704_v8, %v750_v11  ;;  %806 = vrot.lane.b32.xlu0 %v4455_v10, %s4265_s27 }
  0xee   : > { %4127 = vmatprep.mubr.msk.f32.mxu1 %vm808_vm2, %v4457_v12 }
  0xf0   : > { %804 = vrot.lane.b32.xlu0 %v4457_v12, %s4265_s27  ;;  %s4277_s27 = smov 16  }
 0x15e   : > { %v807_v13 = vpop.permute.xlu0 %806 }
 0x15f   : > { %4123 = vmatprep.subr.msk.mxu1 %vm808_vm2, %v807_v13 }
 0x160   : > { %4124 = vmatpush3.xpose.msk.msra.mxu1 %vm808_vm2, %v807_v13 }
 0x162   : > { %v805_v14 = vpop.permute.xlu0 %804 }
 0x163   : > { %4125 = vmatprep.subr.msk.mxu1 %vm808_vm2, %v805_v14 }
 0x164   : > { %4126 = vmatpush3.xpose.msk.msra.mxu1 %vm808_vm2, %v805_v14 }
 0x167   : > { %4128 = vmatmul.mubr.msk.f32.vlgmr.msra.gmra.mxu1 %vm808_vm2, %v4455_v10 }
 0x227   : > { %v4129_v20 = vpop.f32.mrf.mxu1 }
 0x228   : > { %v893_v25 = vmul.f32 0.35355338, %v4129_v20 }
 0x229   : > { %v883_v23 = vpop.f32.mrf.mxu1 }
 0x22a   : > { %v892_v26 = vmul.f32 0.35355338, %v883_v23  ;;  %v895_v30 = vsel %vm4477_vm4, %v893_v25, -1e+30 }
 0x22b   : > { %v900_v31 = vsel %vm896_vm5, %v895_v30, -inf }
 0x22c   : > { %v894_v28 = vsel %vm4473_vm3, %v892_v26, -1e+30 }
 0x22d   : > { %v897_v29 = vsel %vm896_vm5, %v894_v28, -inf }
 0x22e   : > { %898 = vmax.xlane.f32.xlu1 %v897_v29 }
 0x232   : > { %901 = vmax.xlane.f32.xlu1 %v900_v31 }
 0x2b7   : > { %v899_v32 = vpop.xlane.xlu1 %898 }
 0x2b8   : > { %v903_v33 = vsub.f32 %v894_v28, %v899_v32 }
 0x2ba   : > { %v905_v34 = vmul.f32 1.442695, %v903_v33 }
 0x2bb   : > { %v902_v35 = vpop.xlane.xlu1 %901 }
 0x2bc   : > { %4213 = vpow2.f32 %v905_v34  ;;  %v904_v36 = vsub.f32 %v895_v30, %v902_v35 }
 0x2be   : > { %v907_v37 = vmul.f32 1.442695, %v904_v36 }
 0x2c0   : > { %4215 = vpow2.f32 %v907_v37 }
 0x2c9   : > { %v4214_v38 = vpop.eup %4213 }
 0x2ca   : > { %v909_v39 = vsel %vm896_vm5, %v4214_v38, 0.0 }
 0x2cb   : > { %910 = vadd.xlane.f32.xlu0 %v909_v39 }
 0x2cd   : > { %v4216_v40 = vpop.eup %4215 }
 0x2ce   : > { %v912_v41 = vsel %vm896_vm5, %v4216_v40, 0.0 }
 0x2cf   : > { %913 = vadd.xlane.f32.xlu1 %v912_v41 }
 0x2e0   : > { %921 = vrot.lane.b32.xlu1 %v4455_v10, %s4266_s25 }
 0x2e1   : > { %1006 = vrot.lane.b32.xlu0 %v4457_v12, %s4267_s2 }
 0x2e4   : > { %919 = vrot.lane.b32.xlu1 %v4457_v12, %s4266_s25  ;;  %s4278_s25 = smov 24  }
 0x2e8   : > { %1012 = vrot.lane.b32.xlu1 %v4455_v10, %s4268_s28 }
 0x2ec   : > { %1010 = vrot.lane.b32.xlu1 %v4457_v12, %s4268_s28 }
 0x2f0   : > { %1008 = vrot.lane.b32.xlu1 %v4455_v10, %s4267_s2 }
 0x354   : > { %v911_v42 = vpop.xlane.xlu0 %910 }
 0x355   : > { %4217 = vrcp.f32 %v911_v42 }
 0x358   : > { %v914_v43 = vpop.xlane.xlu1 %913  ;;  %v1007_v52 = vpop.permute.xlu0 %1006 }
 0x359   : > { %4219 = vrcp.f32 %v914_v43 }
 0x35c   : > { %v922_v44 = vpop.permute.xlu1 %921 }
 0x35d   : > { %4130 = vmatprep.subr.mxu1 %v922_v44 }
 0x35e   : > { %4131 = vmatpush3.msra.mxu1 %v922_v44 }
 0x360   : > { %v920_v45 = vpop.permute.xlu1 %919 }
 0x361   : > { %4132 = vmatprep.subr.mxu1 %v920_v45 }
 0x362   : > { %v4218_v46 = vpop.eup %4217  ;;  %4133 = vmatpush3.msra.mxu1 %v920_v45 }
 0x363   : > { %v916_v47 = vmul.f32 %v4218_v46, %v4214_v38 }
 0x364   : > { %v1013_v48 = vpop.permute.xlu1 %1012 }
 0x365   : > { %4134 = vmatprep.mubr.msk.f32.mxu1 %vm896_vm5, %v916_v47  ;;  %4137 = vmatprep.subr.msk.mxu1 %vm808_vm2, %v1013_v48 }
 0x366   : > { %v4220_v49 = vpop.eup %4219 }
 0x367   : > { %v918_v50 = vmul.f32 %v4220_v49, %v4216_v40 }
 0x368   : > { %v1011_v51 = vpop.permute.xlu1 %1010 }
 0x369   : > { %4135 = vmatmul.mubr.msk.f32.vlgmr.msra.gmra.mxu1 %vm896_vm5, %v918_v50 }
 0x36a   : > { %4138 = vmatpush3.xpose.msk.msra.mxu1 %vm808_vm2, %v1013_v48  ;;  %4141 = vmatprep.mubr.msk.f32.mxu1 %vm808_vm2, %v1007_v52 }
 0x36b   : > { %4139 = vmatprep.subr.msk.mxu1 %vm808_vm2, %v1011_v51 }
 0x36c   : > { %v1009_v53 = vpop.permute.xlu1 %1008 }
 0x36e   : > { %4140 = vmatpush3.xpose.msk.msra.mxu1 %vm808_vm2, %v1011_v51 }
 0x371   : > { %4142 = vmatmul.mubr.msk.f32.vlgmr.msra.gmra.mxu1 %vm808_vm2, %v1009_v53 }
 0x429   : > { %v4503_v54 = vpop.f32.mrf.mxu1 }
 0x42b   : > { %v4505_v55 = vpop.f32.mrf.mxu1 }
 0x431   : > { %v4143_v56 = vpop.f32.mrf.mxu1 }
 0x432   : > { %v1098_v57 = vmul.f32 0.35355338, %v4143_v56 }
 0x433   : > { %v1088_v58 = vpop.f32.mrf.mxu1 }
 0x434   : > { %v1097_v59 = vmul.f32 0.35355338, %v1088_v58  ;;  %v1100_v60 = vsel %vm4477_vm4, %v1098_v57, -1e+30 }
 0x435   : > { %v1104_v61 = vsel %vm896_vm5, %v1100_v60, -inf }
 0x436   : > { %1105 = vmax.xlane.f32.xlu0 %v1104_v61  ;;  %v1099_v62 = vsel %vm4473_vm3, %v1097_v59, -1e+30 }
 0x437   : > { %v1101_v63 = vsel %vm896_vm5, %v1099_v62, -inf }
 0x438   : > { %1102 = vmax.xlane.f32.xlu1 %v1101_v63 }
 0x449   : > { %1125 = vrot.lane.b32.xlu1 %v4455_v10, %s4269_s3 }
 0x44c   : > { %1123 = vrot.lane.b32.xlu0 %v4457_v12, %s4269_s3  ;;  %s5171_s3 = scalar_lea.vmem %s5142_s5, %s4372_s20 }
 0x44d   : > { %1216 = vrot.lane.b32.xlu1 %v4455_v10, %s4270_s29 }
 0x450   : > { %1210 = vrot.lane.b32.xlu0 %v4457_v12, %s4271_s13 }
 0x451   : > { %1214 = vrot.lane.b32.xlu1 %v4457_v12, %s4270_s29 }
 0x4bf   : > { %v1106_v0 = vpop.xlane.xlu0 %1105 }
 0x4c0   : > { %v1108_v1 = vsub.f32 %v1100_v60, %v1106_v0 }
 0x4c1   : > { %v1103_v2 = vpop.xlane.xlu1 %1102 }
 0x4c2   : > { %v1111_v3 = vmul.f32 1.442695, %v1108_v1  ;;  %v1107_v5 = vsub.f32 %v1099_v62, %v1103_v2 }
 0x4c3   : > { %v1124_v9 = vpop.permute.xlu0 %1123 }
 0x4c4   : > { %4221 = vpow2.f32 %v1111_v3  ;;  %v1109_v6 = vmul.f32 1.442695, %v1107_v5 }
 0x4c5   : > { %v1126_v8 = vpop.permute.xlu1 %1125 }
 0x4c6   : > { %4223 = vpow2.f32 %v1109_v6  ;;  %4144 = vmatprep.subr.mxu0 %v1126_v8 }
 0x4c7   : > { %4145 = vmatpush3.msra.mxu0 %v1126_v8  ;;  %v1211_v26 = vpop.permute.xlu0 %1210 }
 0x4c8   : > { %4146 = vmatprep.subr.mxu0 %v1124_v9 }
 0x4c9   : > { %4147 = vmatpush3.msra.mxu0 %v1124_v9  ;;  %v1217_v11 = vpop.permute.xlu1 %1216 }
 0x4ca   : > { %4151 = vmatprep.subr.msk.mxu0 %vm808_vm2, %v1217_v11 }
 0x4cd   : > { %v1215_v18 = vpop.permute.xlu1 %1214 }
 0x4d1   : > { %v4222_v13 = vpop.eup %4221 }
 0x4d2   : > { %v1116_v14 = vsel %vm896_vm5, %v4222_v13, 0.0 }
 0x4d3   : > { %v4224_v15 = vpop.eup %4223  ;;  %1117 = vadd.xlane.f32.xlu1 %v1116_v14 }
 0x4d4   : > { %v1113_v17 = vsel %vm896_vm5, %v4224_v15, 0.0 }
 0x4d7   : > { %1114 = vadd.xlane.f32.xlu1 %v1113_v17 }
 0x4e8   : > { %1212 = vrot.lane.b32.xlu1 %v4455_v10, %s4271_s13 }
 0x55c   : > { %v1118_v19 = vpop.xlane.xlu1 %1117 }
 0x55d   : > { %4225 = vrcp.f32 %v1118_v19 }
 0x560   : > { %v1115_v20 = vpop.xlane.xlu1 %1114 }
 0x561   : > { %4227 = vrcp.f32 %v1115_v20 }
 0x564   : > { %v1213_v28 = vpop.permute.xlu1 %1212 }
 0x56a   : > { %v4226_v21 = vpop.eup %4225 }
 0x56b   : > { %v1122_v25 = vmul.f32 %v4226_v21, %v4222_v13 }
 0x56e   : > { %v4228_v22 = vpop.eup %4227 }
 0x56f   : > { %v1120_v23 = vmul.f32 %v4228_v22, %v4224_v15 }
 0x571   : > { %4148 = vmatprep.mubr.msk.f32.mxu0 %vm896_vm5, %v1120_v23 }
 0x572   : > { %4149 = vmatmul.mubr.msk.f32.vlgmr.msra.gmra.mxu0 %vm896_vm5, %v1122_v25 }
 0x573   : > { %4152 = vmatpush3.xpose.msk.msra.mxu0 %vm808_vm2, %v1217_v11  ;;  %4155 = vmatprep.mubr.msk.f32.mxu0 %vm808_vm2, %v1211_v26 }
 0x574   : > { %4153 = vmatprep.subr.msk.mxu0 %vm808_vm2, %v1215_v18 }
 0x577   : > { %4154 = vmatpush3.xpose.msk.msra.mxu0 %vm808_vm2, %v1215_v18 }
 0x57a   : > { %4156 = vmatmul.mubr.msk.f32.vlgmr.msra.gmra.mxu0 %vm808_vm2, %v1213_v28 }
 0x632   : > { %v4529_v29 = vpop.f32.mrf.mxu0 }
 0x634   : > { %v4531_v30 = vpop.f32.mrf.mxu0 }
 0x63a   : > { %v4157_v31 = vpop.f32.mrf.mxu0 }
 0x63b   : > { %v1302_v32 = vmul.f32 0.35355338, %v4157_v31  ;;  %v1651_v31 = vld [vmem:[%s4387_s30 + $0x10] sm:$0xff] }
 0x63c   : > { %v1292_v33 = vpop.f32.mrf.mxu0 }
 0x63d   : > { %v1301_v34 = vmul.f32 0.35355338, %v1292_v33  ;;  %v1304_v35 = vsel %vm4477_vm4, %v1302_v32, -1e+30  ;;  %v1650_v32 = vld [vmem:[%s4387_s30 + $0x8] sm:$0xff]  ;;  %v1649_v33 = vld [vmem:[%s4387_s30] sm:$0xff] }
 0x63e   : > { %v1308_v36 = vsel %vm896_vm5, %v1304_v35, -inf }
 0x63f   : > { %1309 = vmax.xlane.f32.xlu1 %v1308_v36  ;;  %v1303_v37 = vsel %vm4473_vm3, %v1301_v34, -1e+30 }
 0x640   : > { %v1305_v38 = vsel %vm896_vm5, %v1303_v37, -inf }
 0x641   : > { %1306 = vmax.xlane.f32.xlu0 %v1305_v38 }
 0x650   : > { %1329 = vrot.lane.b32.xlu1 %v4455_v10, %s4272_s16 }
 0x654   : > { %1420 = vrot.lane.b32.xlu1 %v4455_v10, %s4273_s24 }
 0x658   : > { %1418 = vrot.lane.b32.xlu1 %v4457_v12, %s4273_s24 }
 0x65c   : > { %1416 = vrot.lane.b32.xlu1 %v4455_v10, %s4274_s14 }
 0x6c8   : > { %v1310_v39 = vpop.xlane.xlu1 %1309 }
 0x6c9   : > { %v1312_v40 = vsub.f32 %v1304_v35, %v1310_v39 }
 0x6ca   : > { %v1307_v41 = vpop.xlane.xlu0 %1306 }
 0x6cb   : > { %v1315_v42 = vmul.f32 1.442695, %v1312_v40  ;;  %v1311_v43 = vsub.f32 %v1303_v37, %v1307_v41 }
 0x6cc   : > { %v1330_v44 = vpop.permute.xlu1 %1329 }
 0x6cd   : > { %4229 = vpow2.f32 %v1315_v42  ;;  %v1313_v45 = vmul.f32 1.442695, %v1311_v43  ;;  %4158 = vmatprep.subr.mxu1 %v1330_v44 }
 0x6ce   : > { %4159 = vmatpush3.msra.mxu1 %v1330_v44 }
 0x6cf   : > { %4231 = vpow2.f32 %v1313_v45 }
 0x6d0   : > { %v1421_v53 = vpop.permute.xlu1 %1420 }
 0x6d4   : > { %v1419_v61 = vpop.permute.xlu1 %1418 }
 0x6d8   : > { %v1417_v62 = vpop.permute.xlu1 %1416 }
 0x6da   : > { %v4230_v46 = vpop.eup %4229 }
 0x6db   : > { %v1320_v47 = vsel %vm896_vm5, %v4230_v46, 0.0 }
 0x6dc   : > { %v4232_v48 = vpop.eup %4231  ;;  %1321 = vadd.xlane.f32.xlu0 %v1320_v47 }
 0x6dd   : > { %v1317_v49 = vsel %vm896_vm5, %v4232_v48, 0.0 }
 0x6e0   : > { %1318 = vadd.xlane.f32.xlu0 %v1317_v49 }
 0x6f6   : > { %1327 = vrot.lane.b32.xlu0 %v4457_v12, %s4272_s16  ;;  %s5172_s16 = scalar_lea.vmem %s5143_s6, %s4372_s20 }
 0x6fa   : > { %1414 = vrot.lane.b32.xlu0 %v4457_v12, %s4274_s14 }
 0x765   : > { %v1322_v50 = vpop.xlane.xlu0 %1321 }
 0x766   : > { %4233 = vrcp.f32 %v1322_v50 }
 0x769   : > { %v1319_v51 = vpop.xlane.xlu0 %1318 }
 0x76a   : > { %4235 = vrcp.f32 %v1319_v51 }
 0x76d   : > { %v1328_v52 = vpop.permute.xlu0 %1327 }
 0x76e   : > { %4160 = vmatprep.subr.mxu1 %v1328_v52 }
 0x76f   : > { %4161 = vmatpush3.msra.mxu1 %v1328_v52 }
 0x770   : > { %4165 = vmatprep.subr.msk.mxu1 %vm808_vm2, %v1421_v53 }
 0x771   : > { %v1415_v60 = vpop.permute.xlu0 %1414 }
 0x773   : > { %v4234_v56 = vpop.eup %4233 }
 0x774   : > { %v1326_v59 = vmul.f32 %v4234_v56, %v4230_v46 }
 0x777   : > { %v4236_v57 = vpop.eup %4235 }
 0x778   : > { %v1324_v58 = vmul.f32 %v4236_v57, %v4232_v48 }
 0x77a   : > { %4162 = vmatprep.mubr.msk.f32.mxu1 %vm896_vm5, %v1324_v58 }
 0x77b   : > { %4163 = vmatmul.mubr.msk.f32.vlgmr.msra.gmra.mxu1 %vm896_vm5, %v1326_v59 }
 0x77c   : > { %4166 = vmatpush3.xpose.msk.msra.mxu1 %vm808_vm2, %v1421_v53  ;;  %4169 = vmatprep.mubr.msk.f32.mxu1 %vm808_vm2, %v1415_v60 }
 0x77d   : > { %4167 = vmatprep.subr.msk.mxu1 %vm808_vm2, %v1419_v61 }
 0x780   : > { %4168 = vmatpush3.xpose.msk.msra.mxu1 %vm808_vm2, %v1419_v61 }
 0x783   : > { %4170 = vmatmul.mubr.msk.f32.vlgmr.msra.gmra.mxu1 %vm808_vm2, %v1417_v62 }
 0x83b   : > { %v4164_v63 = vpop.f32.mrf.mxu1 }
 0x83d   : > { %v1405_v0 = vpop.f32.mrf.mxu1 }
 0x843   : > { %v4171_v1 = vpop.f32.mrf.mxu1 }
 0x844   : > { %v1506_v2 = vmul.f32 0.35355338, %v4171_v1  ;;  %v1837_v1 = vld [vmem:[%s4413_s17 + $0x188] sm:$0xff] }
 0x845   : > { %v1496_v3 = vpop.f32.mrf.mxu1  ;;  %1966 = vmatprep.subr.mxu1 %v1837_v1  ;;  %v1796_v1 = vld [vmem:[%s4413_s17 + $0x40] sm:$0xff] }
 0x846   : > { %v1505_v5 = vmul.f32 0.35355338, %v1496_v3  ;;  %v1508_v6 = vsel %vm4477_vm4, %v1506_v2, -1e+30  ;;  %v1839_v2 = vld [vmem:[%s4413_s17 + $0x198] sm:$0xff]  ;;  %v1836_v3 = vld [vmem:[%s4413_s17 + $0x180] sm:$0xff] }
 0x847   : > { %v1512_v8 = vsel %vm896_vm5, %v1508_v6, -inf  ;;  %1967 = vmatpush1.msra.mxu1 %v1836_v3  ;;  %v1849_v3 = vld [vmem:[%s4413_s17 + $0x1e8] sm:$0xff] }
 0x848   : > { %1513 = vmax.xlane.f32.xlu1 %v1512_v8  ;;  %v1507_v9 = vsel %vm4473_vm3, %v1505_v5, -1e+30  ;;  %v1838_v5 = vld [vmem:[%s4413_s17 + $0x190] sm:$0xff]  ;;  %v1823_v8 = vld [vmem:[%s4413_s17 + $0x118] sm:$0xff] }
 0x849   : > { %v1509_v11 = vsel %vm896_vm5, %v1507_v9, -inf }
 0x84a   : > { %1510 = vmax.xlane.f32.xlu0 %v1509_v11  ;;  %v1822_v11 = vld [vmem:[%s4413_s17 + $0x110] sm:$0xff] }
 0x859   : > { %1533 = vrot.lane.b32.xlu1 %v4455_v10, %s4275_s15 }
 0x85d   : > { %1620 = vrot.lane.b32.xlu1 %v4531_v30, %s4276_s23 }
 0x861   : > { %1622 = vrot.lane.b32.xlu1 %v4529_v29, %s4276_s23 }
 0x865   : > { %1630 = vrot.lane.b32.xlu1 %v4164_v63, %s4277_s27 }
 0x8d1   : > { %v1514_v27 = vpop.xlane.xlu1 %1513 }
 0x8d2   : > { %v1516_v13 = vsub.f32 %v1508_v6, %v1514_v27  ;;  %v1821_v6 = vld [vmem:[%s4413_s17 + $0x108] sm:$0xff] }
 0x8d3   : > { %v1511_v14 = vpop.xlane.xlu0 %1510  ;;  %1968 = vmatprep.subr.mxu1 %v1821_v6  ;;  %v1805_v27 = vld [vmem:[%s4413_s17 + $0x88] sm:$0xff]  ;;  %v1848_v6 = vld [vmem:[%s4413_s17 + $0x1e0] sm:$0xff] }
 0x8d4   : > { %v1519_v15 = vmul.f32 1.442695, %v1516_v13  ;;  %v1515_v17 = vsub.f32 %v1507_v9, %v1511_v14  ;;  %v1820_v9 = vld [vmem:[%s4413_s17 + $0x100] sm:$0xff]  ;;  %v1807_v13 = vld [vmem:[%s4413_s17 + $0x98] sm:$0xff] }
 0x8d5   : > { %v1534_v24 = vpop.permute.xlu1 %1533  ;;  %1969 = vmatpush1.msra.mxu1 %v1820_v9  ;;  %v1804_v14 = vld [vmem:[%s4413_s17 + $0x80] sm:$0xff]  ;;  %v1833_v9 = vld [vmem:[%s4413_s17 + $0x168] sm:$0xff] }
 0x8d6   : > { %4237 = vpow2.f32 %v1519_v15  ;;  %v1517_v18 = vmul.f32 1.442695, %v1515_v17  ;;  %4172 = vmatprep.subr.mxu0 %v1534_v24  ;;  %1970 = vmatprep.subr.mxu1 %v1805_v27  ;;  %v1806_v15 = vld [vmem:[%s4413_s17 + $0x90] sm:$0xff]  ;;  %v1789_v17 = vld [vmem:[%s4413_s17 + $0x8] sm:$0xff]  ;;  %v1832_v27 = vld [vmem:[%s4413_s17 + $0x160] sm:$0xff] }
 0x8d7   : > { %4173 = vmatpush3.msra.mxu0 %v1534_v24  ;;  %1971 = vmatpush1.msra.mxu1 %v1804_v14  ;;  %v1791_v24 = vld [vmem:[%s4413_s17 + $0x18] sm:$0xff]  ;;  %v1817_v14 = vld [vmem:[%s4413_s17 + $0xe8] sm:$0xff] }
 0x8d8   : > { %4239 = vpow2.f32 %v1517_v18  ;;  %1972 = vmatprep.subr.mxu1 %v1789_v17  ;;  %v1788_v18 = vld [vmem:[%s4413_s17] sm:$0xff] }
 0x8d9   : > { %v1621_v36 = vpop.permute.xlu1 %1620  ;;  %1973 = vmatpush1.msra.mxu1 %v1788_v18  ;;  %v1816_v17 = vld [vmem:[%s4413_s17 + $0xe0] sm:$0xff]  ;;  %v1801_v18 = vld [vmem:[%s4413_s17 + $0x68] sm:$0xff] }
 0x8da   : > { %v1642_v40 = vsel %vm808_vm2, %v4505_v55, %v1621_v36  ;;  %v3731_v55 = vld [vmem:[%s625_s18] ss:$0 sm:$0xff]  ;;  %s5176_s18 = sld [smem:[#allocation9_spill]] (!%p3755_p5) }
 0x8dd   : > { %v1623_v37 = vpop.permute.xlu1 %1622 }
 0x8de   : > { %v1643_v42 = vsel %vm808_vm2, %v4503_v54, %v1623_v37  ;;  %v1840_v37 = vld [vmem:[%s4413_s17 + $0x1a0] sm:$0xff] }
 0x8e0   : > { %s5177_s28 = smov (!%p3755_p5), %s5176_s18 }
 0x8e1   : > { %v1631_v38 = vpop.permute.xlu1 %1630 }
 0x8e2   : > { %v1645_v45 = vsel %vm896_vm5, %v1643_v42, %v1631_v38  ;;  %v1842_v38 = vld [vmem:[%s4413_s17 + $0x1b0] sm:$0xff]  ;;  %v1824_v42 = vld [vmem:[%s4413_s17 + $0x120] sm:$0xff] }
 0x8e3   : > { %v4238_v19 = vpop.eup %4237 }
 0x8e4   : > { %v1524_v10 = vsel %vm896_vm5, %v4238_v19, 0.0 }
 0x8e5   : > { %v4240_v20 = vpop.eup %4239  ;;  %1525 = vadd.xlane.f32.xlu0 %v1524_v10  ;;  %v4279_v10 = vmov 0.0  }
 0x8e6   : > { %v1521_v21 = vsel %vm896_vm5, %v4240_v20, 0.0  ;;  %2006 = vmatprep.mubr.f32.mxu1 %v4279_v10 }
 0x8e9   : > { %1522 = vadd.xlane.f32.xlu0 %v1521_v21  ;;  %v1843_v21 = vld [vmem:[%s4413_s17 + $0x1b8] sm:$0xff] }
 0x8ff   : > { %1531 = vrot.lane.b32.xlu0 %v4457_v12, %s4275_s15  ;;  %v1652_v12 = vld [vmem:[%s4387_s30 + $0x18] sm:$0xff]  ;;  %s5173_s15 = scalar_lea.vmem %s5145_s8, %s4372_s20  ;;  %s5174_s20 = sld [smem:[#allocation7_spill]] (!%p3755_p5) }
 0x903   : > { %1628 = vrot.lane.b32.xlu0 %v1405_v0, %s4277_s27 }
 0x96e   : > { %v1526_v22 = vpop.xlane.xlu0 %1525 }
 0x96f   : > { %4241 = vrcp.f32 %v1526_v22 }
 0x972   : > { %v1523_v23 = vpop.xlane.xlu0 %1522 }
 0x973   : > { %4243 = vrcp.f32 %v1523_v23 }
 0x976   : > { %v1532_v25 = vpop.permute.xlu0 %1531 }
 0x977   : > { %4174 = vmatprep.subr.mxu0 %v1532_v25 }
 0x978   : > { %4175 = vmatpush3.msra.mxu0 %v1532_v25 }
 0x979   : > { %4179 = vmatprep.subr.mxu0 %v1652_v12 }
 0x97a   : > { %v1629_v39 = vpop.permute.xlu0 %1628 }
 0x97b   : > { %v1644_v43 = vsel %vm896_vm5, %v1642_v40, %v1629_v39  ;;  %v1825_v39 = vld [vmem:[%s4413_s17 + $0x128] sm:$0xff]  ;;  %v1827_v40 = vld [vmem:[%s4413_s17 + $0x138] sm:$0xff] }
 0x97c   : > { %v4242_v26 = vpop.eup %4241 }
 0x97d   : > { %v1530_v30 = vmul.f32 %v4242_v26, %v4238_v19  ;;  %v1790_v19 = vld [vmem:[%s4413_s17 + $0x10] sm:$0xff] }
 0x980   : > { %v4244_v28 = vpop.eup %4243 }
 0x981   : > { %v1528_v29 = vmul.f32 %v4244_v28, %v4240_v20  ;;  %v1841_v20 = vld [vmem:[%s4413_s17 + $0x1a8] sm:$0xff] }
 0x982   : > { %2120 = vmatprep.subr.mxu1 %v1841_v20  ;;  %v1800_v20 = vld [vmem:[%s4413_s17 + $0x60] sm:$0xff] }
 0x983   : > { %4176 = vmatprep.mubr.msk.f32.mxu0 %vm896_vm5, %v1528_v29 }
 0x984   : > { %4177 = vmatmul.mubr.msk.f32.vlgmr.msra.gmra.mxu0 %vm896_vm5, %v1530_v30 }
 0x985   : > { %4180 = vmatpush3.msra.mxu0 %v1652_v12  ;;  %v3734_v12 = vld [vmem:[%s5171_s3] ss:$0 sm:$0xff] }
 0x986   : > { %4181 = vmatprep.subr.mxu0 %v1651_v31 }
 0x987   : > { %4182 = vmatpush3.msra.mxu0 %v1651_v31 }
 0x988   : > { %4183 = vmatprep.subr.mxu0 %v1650_v32 }
 0x989   : > { %4184 = vmatpush3.msra.mxu0 %v1650_v32  ;;  %v3735_v32 = vld [vmem:[%s5172_s16] ss:$0 sm:$0xff] }
 0x98a   : > { %4185 = vmatprep.subr.mxu0 %v1649_v33 }
 0x98b   : > { %4186 = vmatpush3.msra.mxu0 %v1649_v33 }
 0x98c   : > { %2043 = vmatprep.subr.mxu0 %v1839_v2  ;;  %v1798_v2 = vld [vmem:[%s4413_s17 + $0x50] sm:$0xff] }
 0xa44   : > { %v4178_v34 = vpop.f32.mrf.mxu0 }
 0xa45   : > { %1638 = vrot.lane.b32.xlu1 %v4178_v34, %s4278_s25 }
 0xa46   : > { %v1609_v35 = vpop.f32.mrf.mxu0 }
 0xa47   : > { %1636 = vrot.lane.b32.xlu0 %v1609_v35, %s4278_s25  ;;  %s5175_s25 = sld [smem:[#allocation8_spill]] (!%p3755_p5) }
 0xab7   : > { %v1639_v41 = vpop.permute.xlu1 %1638 }
 0xab8   : > { %v1648_v47 = vsel %vm1646_vm6, %v1645_v45, %v1639_v41  ;;  %v1809_v45 = vld [vmem:[%s4413_s17 + $0xa8] sm:$0xff] }
 0xab9   : > { %v1637_v44 = vpop.permute.xlu0 %1636 }
 0xaba   : > { %v1647_v46 = vsel %vm1646_vm6, %v1644_v43, %v1637_v44  ;;  %v1826_v43 = vld [vmem:[%s4413_s17 + $0x130] sm:$0xff] }
 0xabb   : > { %4187 = vmatprep.mubr.msk.f32.mxu0 %vm677_vm1, %v1647_v46  ;;  %v1811_v46 = vld [vmem:[%s4413_s17 + $0xb8] sm:$0xff] }
 0xabc   : > { %4188 = vmatmul.mubr.msk.f32.vlgmr.msra.gmra.mxu0 %vm677_vm1, %v1648_v47  ;;  %v1808_v47 = vld [vmem:[%s4413_s17 + $0xa0] sm:$0xff] }
 0xabd   : > { %2044 = vmatpush1.msra.mxu0 %v1838_v5  ;;  %2083 = vmatprep.mubr.f32.mxu0 %v4279_v10  ;;  %v1851_v5 = vld [vmem:[%s4413_s17 + $0x1f8] sm:$0xff] }
 0xabe   : > { %2045 = vmatprep.subr.mxu0 %v1823_v8  ;;  %v1850_v8 = vld [vmem:[%s4413_s17 + $0x1f0] sm:$0xff] }
 0xabf   : > { %2046 = vmatpush1.msra.mxu0 %v1822_v11  ;;  %v1835_v11 = vld [vmem:[%s4413_s17 + $0x178] sm:$0xff] }
 0xac0   : > { %2047 = vmatprep.subr.mxu0 %v1807_v13  ;;  %v1834_v13 = vld [vmem:[%s4413_s17 + $0x170] sm:$0xff] }
 0xac1   : > { %2048 = vmatpush1.msra.mxu0 %v1806_v15  ;;  %v1819_v15 = vld [vmem:[%s4413_s17 + $0xf8] sm:$0xff] }
 0xac2   : > { %2049 = vmatprep.subr.mxu0 %v1791_v24  ;;  %v1818_v24 = vld [vmem:[%s4413_s17 + $0xf0] sm:$0xff] }
 0xac3   : > { %2050 = vmatpush1.msra.mxu0 %v1790_v19  ;;  %v1803_v19 = vld [vmem:[%s4413_s17 + $0x78] sm:$0xff] }
 0xac4   : > { %2197 = vmatprep.subr.mxu0 %v1843_v21  ;;  %v1802_v21 = vld [vmem:[%s4413_s17 + $0x70] sm:$0xff] }
 0xb7c   : > { %v4189_v48 = vpop.f32.mrf.mxu0 }
 0xb7d   : > { %v1738_v49 = vadd.f32 %v4189_v48, %v3731_v55  ;;  %v1793_v48 = vld [vmem:[%s4413_s17 + $0x28] sm:$0xff] }
 0xb7e   : > { %v1732_v50 = vpop.f32.mrf.mxu0 }
 0xb7f   : > { %v1733_v54 = vadd.f32 %v3731_v55, %v1732_v50  ;;  %v1742_v51 = vadd.f32 %v1738_v49, %v4446_v7  ;;  %v1810_v55 = vld [vmem:[%s4413_s17 + $0xb0] sm:$0xff]  ;;  %v1795_v49 = vld [vmem:[%s4413_s17 + $0x38] sm:$0xff]  ;;  %v1792_v50 = vld [vmem:[%s4413_s17 + $0x20] sm:$0xff] }
 0xb81   : > { %v1748_v52 = vsel %vm677_vm1, %v1742_v51, 0.0  ;;  %v1741_v53 = vadd.f32 %v1733_v54, %v4440_v4  ;;  %v1794_v54 = vld [vmem:[%s4413_s17 + $0x30] sm:$0xff] }
 0xb82   : > { %1749 = vadd.xlane.f32.xlu1 %v1748_v52  ;;  %v1847_v52 = vld [vmem:[%s4413_s17 + $0x1d8] sm:$0xff] }
 0xb83   : > { %v1745_v56 = vsel %vm677_vm1, %v1741_v53, 0.0 }
 0xb84   : > { %1746 = vadd.xlane.f32.xlu0 %v1745_v56  ;;  %v1846_v56 = vld [vmem:[%s4413_s17 + $0x1d0] sm:$0xff] }
 0xc0b   : > { %v1750_v57 = vpop.xlane.xlu1 %1749 }
 0xc0c   : > { %v1753_v58 = vmul.f32 0.03125, %v1750_v57  ;;  %v1829_v57 = vld [vmem:[%s4413_s17 + $0x148] sm:$0xff] }
 0xc0d   : > { %v1747_v59 = vpop.xlane.xlu0 %1746 }
 0xc0e   : > { %v1752_v60 = vmul.f32 0.03125, %v1747_v59  ;;  %v1755_v61 = vsub.f32 %v1742_v51, %v1753_v58  ;;  %v1845_v51 = vld [vmem:[%s4413_s17 + $0x1c8] sm:$0xff]  ;;  %v1831_v58 = vld [vmem:[%s4413_s17 + $0x158] sm:$0xff]  ;;  %v1828_v59 = vld [vmem:[%s4413_s17 + $0x140] sm:$0xff] }
 0xc10   : > { %v1754_v62 = vsub.f32 %v1741_v53, %v1752_v60  ;;  %v1757_v4 = vmul.f32 %v1755_v61, %v1755_v61  ;;  %v1844_v53 = vld [vmem:[%s4413_s17 + $0x1c0] sm:$0xff]  ;;  %v1830_v60 = vld [vmem:[%s4413_s17 + $0x150] sm:$0xff] }
 0xc12   : > { %v1756_v7 = vmul.f32 %v1754_v62, %v1754_v62  ;;  %v1761_v0 = vsel %vm677_vm1, %v1757_v4, 0.0  ;;  %v1797_v4 = vld [vmem:[%s4413_s17 + $0x48] sm:$0xff] }
 0xc14   : > { %v1758_v63 = vsel %vm677_vm1, %v1756_v7, 0.0  ;;  %v1812_v7 = vld [vmem:[%s4413_s17 + $0xc0] sm:$0xff] }
 0xc15   : > { %1759 = vadd.xlane.f32.xlu0 %v1758_v63  ;;  %v1814_v63 = vld [vmem:[%s4413_s17 + $0xd0] sm:$0xff] }
 0xc19   : > { %1762 = vadd.xlane.f32.xlu0 %v1761_v0  ;;  %v1799_v0 = vld [vmem:[%s4413_s17 + $0x58] sm:$0xff] }
 0xc9e   : > { %v1760_v22 = vpop.xlane.xlu0 %1759 }
 0xc9f   : > { %v1764_v23 = vmul.f32 0.03125, %v1760_v22  ;;  %v2621_v22 = vld [vmem:[%s4425_s26 + $0xf8] sm:$0xff] }
 0xca1   : > { %v1766_v25 = vadd.f32 1e-05, %v1764_v23  ;;  %v2653_v23 = vld [vmem:[%s4425_s26 + $0x1f8] sm:$0xff] }
 0xca2   : > { %v1763_v26 = vpop.xlane.xlu0 %1762 }
 0xca3   : > { %4245 = vrsqrt.f32 %v1766_v25  ;;  %v1765_v28 = vmul.f32 0.03125, %v1763_v26  ;;  %v2605_v25 = vld [vmem:[%s4425_s26 + $0x78] sm:$0xff] }
 0xca4   : > { %v2637_v26 = vld [vmem:[%s4425_s26 + $0x178] sm:$0xff] }
 0xca5   : > { %v1767_v29 = vadd.f32 1e-05, %v1765_v28  ;;  %v2620_v28 = vld [vmem:[%s4425_s26 + $0xf0] sm:$0xff] }
 0xca7   : > { %4247 = vrsqrt.f32 %v1767_v29  ;;  %v2652_v29 = vld [vmem:[%s4425_s26 + $0x1f0] sm:$0xff] }
 0xcb0   : > { %v4246_v30 = vpop.eup %4245 }
 0xcb1   : > { %v1770_v31 = vmul.f32 %v4246_v30, %v1754_v62  ;;  %v1815_v62 = vld [vmem:[%s4413_s17 + $0xd8] sm:$0xff]  ;;  %v2604_v30 = vld [vmem:[%s4425_s26 + $0x70] sm:$0xff] }
 0xcb3   : > { %v1778_v33 = vmul.f32 %v3734_v12, %v1770_v31  ;;  %v2651_v31 = vld [vmem:[%s4425_s26 + $0x1e8] sm:$0xff] }
 0xcb4   : > { %v4248_v34 = vpop.eup %4247 }
 0xcb5   : > { %v4622_v35 = vadd.f32 %v3735_v32, %v1778_v33  ;;  %v1771_v36 = vmul.f32 %v4248_v34, %v1755_v61  ;;  %v1813_v61 = vld [vmem:[%s4413_s17 + $0xc8] sm:$0xff]  ;;  %v2618_v34 = vld [vmem:[%s4425_s26 + $0xe0] sm:$0xff] }
 0xcb6   : > { %v2635_v33 = vld [vmem:[%s4425_s26 + $0x168] sm:$0xff] }
 0xcb7   : > { %v1779_v41 = vmul.f32 %v3734_v12, %v1771_v36  ;;  %3736 = vmatmul.mubr.msk.f32.vlgmr.msra.gmra.mxu1 %vm677_vm1, %v4622_v35  ;;  %3738 = vmatmul.mubr.msk.f32.vlgmr.msra.gmra.mxu0 %vm677_vm1, %v4622_v35  ;;  %v2636_v12 = vld [vmem:[%s4425_s26 + $0x170] sm:$0xff]  ;;  %v2650_v36 = vld [vmem:[%s4425_s26 + $0x1e0] sm:$0xff] }
 0xcb8   : > { %2121 = vmatpush1.msra.mxu1 %v1840_v37  ;;  %2198 = vmatpush1.msra.mxu0 %v1842_v38  ;;  %v2602_v37 = vld [vmem:[%s4425_s26 + $0x60] sm:$0xff] }
 0xcb9   : > { %v4634_v44 = vadd.f32 %v3735_v32, %v1779_v41  ;;  %2122 = vmatprep.subr.mxu1 %v1825_v39  ;;  %2199 = vmatprep.subr.mxu0 %v1827_v40  ;;  %v2603_v32 = vld [vmem:[%s4425_s26 + $0x68] sm:$0xff]  ;;  %v2634_v38 = vld [vmem:[%s4425_s26 + $0x160] sm:$0xff]  ;;  %v2617_v39 = vld [vmem:[%s4425_s26 + $0xd8] sm:$0xff] }
 0xcba   : > { %2012 = vmatprep.mubr.f32.mxu1 %v4279_v10  ;;  %2089 = vmatprep.mubr.f32.mxu0 %v4279_v10  ;;  %v2649_v40 = vld [vmem:[%s4425_s26 + $0x1d8] sm:$0xff] }
 0xcbb   : > { %2123 = vmatpush1.msra.mxu1 %v1824_v42  ;;  %2200 = vmatpush1.msra.mxu0 %v1826_v43  ;;  %v2601_v41 = vld [vmem:[%s4425_s26 + $0x58] sm:$0xff]  ;;  %v2616_v43 = vld [vmem:[%s4425_s26 + $0xd0] sm:$0xff] }
 0xcbc   : > { %3737 = vmatmul.mubr.msk.f32.gmra.mxu1 %vm677_vm1, %v4634_v44  ;;  %3739 = vmatmul.mubr.msk.f32.gmra.mxu0 %vm677_vm1, %v4634_v44  ;;  %v2633_v42 = vld [vmem:[%s4425_s26 + $0x158] sm:$0xff] }
 0xcbd   : > { %2124 = vmatprep.subr.mxu1 %v1809_v45  ;;  %2201 = vmatprep.subr.mxu0 %v1811_v46  ;;  %v2648_v45 = vld [vmem:[%s4425_s26 + $0x1d0] sm:$0xff] }
 0xcbe   : > { %2125 = vmatpush1.msra.mxu1 %v1808_v47  ;;  %2202 = vmatpush1.msra.mxu0 %v1810_v55  ;;  %v2600_v46 = vld [vmem:[%s4425_s26 + $0x50] sm:$0xff]  ;;  %v2615_v55 = vld [vmem:[%s4425_s26 + $0xc8] sm:$0xff] }
 0xcbf   : > { %2126 = vmatprep.subr.mxu1 %v1793_v48  ;;  %2203 = vmatprep.subr.mxu0 %v1795_v49  ;;  %v2632_v47 = vld [vmem:[%s4425_s26 + $0x150] sm:$0xff]  ;;  %v2647_v48 = vld [vmem:[%s4425_s26 + $0x1c8] sm:$0xff] }
 0xcc0   : > { %2127 = vmatpush1.msra.mxu1 %v1792_v50  ;;  %2160 = vmatprep.mubr.f32.mxu1 %v4279_v10  ;;  %v2599_v49 = vld [vmem:[%s4425_s26 + $0x48] sm:$0xff] }
 0xcc1   : > { %2204 = vmatpush1.msra.mxu0 %v1794_v54  ;;  %2237 = vmatprep.mubr.f32.mxu0 %v4279_v10  ;;  %v2631_v50 = vld [vmem:[%s4425_s26 + $0x148] sm:$0xff]  ;;  %v2614_v54 = vld [vmem:[%s4425_s26 + $0xc0] sm:$0xff] }
 0xcc2   : > { %3740 = vmatmul.mubr.msk.f32.vlgmr.msra.gmra.mxu1 %vm677_vm1, %v4622_v35  ;;  %3742 = vmatmul.mubr.msk.f32.vlgmr.msra.gmra.mxu0 %vm677_vm1, %v4622_v35 }
 0xcc3   : > { %2274 = vmatprep.subr.mxu1 %v1845_v51  ;;  %2351 = vmatprep.subr.mxu0 %v1847_v52  ;;  %v2646_v51 = vld [vmem:[%s4425_s26 + $0x1c0] sm:$0xff] }
 0xcc4   : > { %2275 = vmatpush1.msra.mxu1 %v1844_v53  ;;  %2352 = vmatpush1.msra.mxu0 %v1846_v56  ;;  %v2598_v52 = vld [vmem:[%s4425_s26 + $0x40] sm:$0xff]  ;;  %v2613_v56 = vld [vmem:[%s4425_s26 + $0xb8] sm:$0xff] }
 0xcc5   : > { %2276 = vmatprep.subr.mxu1 %v1829_v57  ;;  %2353 = vmatprep.subr.mxu0 %v1831_v58  ;;  %v2630_v53 = vld [vmem:[%s4425_s26 + $0x140] sm:$0xff]  ;;  %v2645_v57 = vld [vmem:[%s4425_s26 + $0x1b8] sm:$0xff] }
 0xcc6   : > { %2166 = vmatprep.mubr.f32.mxu1 %v4279_v10  ;;  %2243 = vmatprep.mubr.f32.mxu0 %v4279_v10  ;;  %v2597_v58 = vld [vmem:[%s4425_s26 + $0x38] sm:$0xff] }
 0xcc7   : > { %2277 = vmatpush1.msra.mxu1 %v1828_v59  ;;  %2354 = vmatpush1.msra.mxu0 %v1830_v60  ;;  %v2629_v59 = vld [vmem:[%s4425_s26 + $0x138] sm:$0xff]  ;;  %v2612_v60 = vld [vmem:[%s4425_s26 + $0xb0] sm:$0xff] }
 0xcc8   : > { %3741 = vmatmul.mubr.msk.f32.gmra.mxu1 %vm677_vm1, %v4634_v44  ;;  %3743 = vmatmul.mubr.msk.f32.gmra.mxu0 %vm677_vm1, %v4634_v44 }
 0xcc9   : > { %2278 = vmatprep.subr.mxu1 %v1813_v61  ;;  %2355 = vmatprep.subr.mxu0 %v1815_v62  ;;  %v2644_v61 = vld [vmem:[%s4425_s26 + $0x1b0] sm:$0xff] }
 0xcca   : > { %2279 = vmatpush1.msra.mxu1 %v1812_v7  ;;  %2356 = vmatpush1.msra.mxu0 %v1814_v63  ;;  %v2596_v62 = vld [vmem:[%s4425_s26 + $0x30] sm:$0xff]  ;;  %v2611_v63 = vld [vmem:[%s4425_s26 + $0xa8] sm:$0xff] }
 0xccb   : > { %2280 = vmatprep.subr.mxu1 %v1797_v4  ;;  %2357 = vmatprep.subr.mxu0 %v1799_v0  ;;  %v2628_v7 = vld [vmem:[%s4425_s26 + $0x130] sm:$0xff]  ;;  %v2643_v4 = vld [vmem:[%s4425_s26 + $0x1a8] sm:$0xff] }
 0xccc   : > { %2281 = vmatpush1.msra.mxu1 %v1796_v1  ;;  %2314 = vmatprep.mubr.f32.mxu1 %v4279_v10  ;;  %v2595_v0 = vld [vmem:[%s4425_s26 + $0x28] sm:$0xff] }
 0xccd   : > { %2358 = vmatpush1.msra.mxu0 %v1798_v2  ;;  %2391 = vmatprep.mubr.f32.mxu0 %v4279_v10  ;;  %v2627_v1 = vld [vmem:[%s4425_s26 + $0x128] sm:$0xff]  ;;  %v2610_v2 = vld [vmem:[%s4425_s26 + $0xa0] sm:$0xff] }
 0xcce   : > { %3744 = vmatmul.mubr.msk.f32.vlgmr.msra.gmra.mxu1 %vm677_vm1, %v4622_v35  ;;  %3746 = vmatmul.mubr.msk.f32.vlgmr.msra.gmra.mxu0 %vm677_vm1, %v4622_v35 }
 0xccf   : > { %2428 = vmatprep.subr.mxu1 %v1849_v3  ;;  %2505 = vmatprep.subr.mxu0 %v1851_v5  ;;  %v2642_v3 = vld [vmem:[%s4425_s26 + $0x1a0] sm:$0xff] }
 0xcd0   : > { %2429 = vmatpush1.msra.mxu1 %v1848_v6  ;;  %2506 = vmatpush1.msra.mxu0 %v1850_v8  ;;  %v2594_v5 = vld [vmem:[%s4425_s26 + $0x20] sm:$0xff]  ;;  %v2609_v8 = vld [vmem:[%s4425_s26 + $0x98] sm:$0xff] }
 0xcd1   : > { %2430 = vmatprep.subr.mxu1 %v1833_v9  ;;  %2507 = vmatprep.subr.mxu0 %v1835_v11  ;;  %v2626_v6 = vld [vmem:[%s4425_s26 + $0x120] sm:$0xff]  ;;  %v2641_v9 = vld [vmem:[%s4425_s26 + $0x198] sm:$0xff] }
 0xcd2   : > { %2320 = vmatprep.mubr.f32.mxu1 %v4279_v10  ;;  %2397 = vmatprep.mubr.f32.mxu0 %v4279_v10  ;;  %v2593_v11 = vld [vmem:[%s4425_s26 + $0x18] sm:$0xff] }
 0xcd3   : > { %2431 = vmatpush1.msra.mxu1 %v1832_v27  ;;  %2508 = vmatpush1.msra.mxu0 %v1834_v13  ;;  %v2625_v27 = vld [vmem:[%s4425_s26 + $0x118] sm:$0xff]  ;;  %v2608_v13 = vld [vmem:[%s4425_s26 + $0x90] sm:$0xff] }
 0xcd4   : > { %3745 = vmatmul.mubr.msk.f32.gmra.mxu1 %vm677_vm1, %v4634_v44  ;;  %3747 = vmatmul.mubr.msk.f32.gmra.mxu0 %vm677_vm1, %v4634_v44 }
 0xcd5   : > { %2432 = vmatprep.subr.mxu1 %v1817_v14  ;;  %2509 = vmatprep.subr.mxu0 %v1819_v15  ;;  %v2640_v14 = vld [vmem:[%s4425_s26 + $0x190] sm:$0xff] }
 0xcd6   : > { %2433 = vmatpush1.msra.mxu1 %v1816_v17  ;;  %2510 = vmatpush1.msra.mxu0 %v1818_v24  ;;  %v2592_v15 = vld [vmem:[%s4425_s26 + $0x10] sm:$0xff]  ;;  %v2607_v24 = vld [vmem:[%s4425_s26 + $0x88] sm:$0xff] }
 0xcd7   : > { %2434 = vmatprep.subr.mxu1 %v1801_v18  ;;  %2511 = vmatprep.subr.mxu0 %v1803_v19  ;;  %v2624_v17 = vld [vmem:[%s4425_s26 + $0x110] sm:$0xff]  ;;  %v2639_v18 = vld [vmem:[%s4425_s26 + $0x188] sm:$0xff] }
 0xcd8   : > { %2435 = vmatpush1.msra.mxu1 %v1800_v20  ;;  %2468 = vmatprep.mubr.f32.mxu1 %v4279_v10  ;;  %v2591_v19 = vld [vmem:[%s4425_s26 + $0x8] sm:$0xff] }
 0xcd9   : > { %2512 = vmatpush1.msra.mxu0 %v1802_v21  ;;  %2545 = vmatprep.mubr.f32.mxu0 %v4279_v10  ;;  %v2623_v20 = vld [vmem:[%s4425_s26 + $0x108] sm:$0xff]  ;;  %v2606_v21 = vld [vmem:[%s4425_s26 + $0x80] sm:$0xff] }
 0xcda   : > { %3748 = vmatmul.mubr.msk.f32.vlgmr.msra.gmra.mxu1 %vm677_vm1, %v4622_v35  ;;  %3750 = vmatmul.mubr.msk.f32.vlgmr.msra.gmra.mxu0 %vm677_vm1, %v4622_v35 }
 0xcdb   : > { %2474 = vmatprep.mubr.f32.mxu1 %v4279_v10  ;;  %2551 = vmatprep.mubr.f32.mxu0 %v4279_v10  ;;  %v2619_v10 = vld [vmem:[%s4425_s26 + $0xe8] sm:$0xff] }
 0xcdc   : > { %3808 = vmatprep.subr.mxu1 %v2621_v22  ;;  %3846 = vmatprep.subr.mxu0 %v2653_v23  ;;  %v2638_v22 = vld [vmem:[%s4425_s26 + $0x180] sm:$0xff] }
 0xcdd   : > { %3809 = vmatpush3.msra.mxu1 %v2605_v25  ;;  %3847 = vmatpush3.msra.mxu0 %v2637_v26  ;;  %v2590_v23 = vld [vmem:[%s4425_s26] sm:$0xff]  ;;  %v2685_v26 = vld [vmem:[%s4425_s26 + $0x2f8] sm:$0xff] }
 0xcde   : > { %3749 = vmatmul.mubr.msk.f32.gmra.mxu1 %vm677_vm1, %v4634_v44  ;;  %3751 = vmatmul.mubr.msk.f32.gmra.mxu0 %vm677_vm1, %v4634_v44  ;;  %v2622_v25 = vld [vmem:[%s4425_s26 + $0x100] sm:$0xff] }
 0xcdf   : > { %3810 = vmatprep.subr.mxu1 %v2620_v28  ;;  %3848 = vmatprep.subr.mxu0 %v2652_v29  ;;  %v2717_v28 = vld [vmem:[%s4425_s26 + $0x3f8] sm:$0xff]  ;;  %v1874_v29 = vsub.s32 4, %v4469_v16 }
 0xce0   : > { %3811 = vmatpush3.msra.mxu1 %v2604_v30  ;;  %3849 = vmatpush3.msra.mxu0 %v2636_v12  ;;  %v1882_v30 = vsub.s32 6, %v4469_v16  ;;  %v4787_v12 = vld [vmem:[%s4419_s22 + $0x8] sm:$0xff] }
 0xce1   : > { %3812 = vmatprep.subr.mxu1 %v2619_v10  ;;  %3850 = vmatprep.subr.mxu0 %v2651_v31  ;;  %v4792_v10 = vrot.slane %v4787_v12, %v1874_v29 }
 0xce2   : > { %3813 = vmatpush3.msra.mxu1 %v2603_v32  ;;  %3851 = vmatpush3.msra.mxu0 %v2635_v33  ;;  %v4797_v31 = vrot.slane %v4787_v12, %v1882_v30  ;;  %v1858_v32 = vsub.s32 0, %v4469_v16  ;;  %v1866_v33 = vsub.s32 2, %v4469_v16 }
 0xce3   : > { %3814 = vmatprep.subr.mxu1 %v2618_v34  ;;  %3852 = vmatprep.subr.mxu0 %v2650_v36  ;;  %v4802_v34 = vld [vmem:[%s4419_s22] sm:$0xff]  ;;  %v1862_v36 = vsub.s32 1, %v4469_v16 }
 0xce4   : > { %3815 = vmatpush3.msra.mxu1 %v2602_v37  ;;  %3853 = vmatpush3.msra.mxu0 %v2634_v38  ;;  %v1870_v37 = vsub.s32 3, %v4469_v16  ;;  %v1859_v38 = vrot.slane %v4802_v34, %v1858_v32 }
 0xce5   : > { %3816 = vmatprep.subr.mxu1 %v2617_v39  ;;  %3854 = vmatprep.subr.mxu0 %v2649_v40  ;;  %v1867_v39 = vrot.slane %v4802_v34, %v1866_v33  ;;  %v1863_v40 = vrot.slane %v4802_v34, %v1862_v36 }
 0xce6   : > { %3817 = vmatpush3.msra.mxu1 %v2601_v41  ;;  %3855 = vmatpush3.msra.mxu0 %v2633_v42  ;;  %v1871_v41 = vrot.slane %v4802_v34, %v1870_v37 }
 0xce7   : > { %3818 = vmatprep.subr.mxu1 %v2616_v43  ;;  %3856 = vmatprep.subr.mxu0 %v2648_v45 }
 0xce8   : > { %3819 = vmatpush3.msra.mxu1 %v2600_v46  ;;  %3857 = vmatpush3.msra.mxu0 %v2632_v47 }
 0xce9   : > { %3820 = vmatprep.subr.mxu1 %v2615_v55  ;;  %3858 = vmatprep.subr.mxu0 %v2647_v48 }
 0xcea   : > { %3821 = vmatpush3.msra.mxu1 %v2599_v49  ;;  %3859 = vmatpush3.msra.mxu0 %v2631_v50 }
 0xceb   : > { %3822 = vmatprep.subr.mxu1 %v2614_v54  ;;  %3860 = vmatprep.subr.mxu0 %v2646_v51 }
 0xcec   : > { %3823 = vmatpush3.msra.mxu1 %v2598_v52  ;;  %3861 = vmatpush3.msra.mxu0 %v2630_v53 }
 0xced   : > { %3824 = vmatprep.subr.mxu1 %v2613_v56  ;;  %3862 = vmatprep.subr.mxu0 %v2645_v57  ;;  %v2669_v57 = vld [vmem:[%s4425_s26 + $0x278] sm:$0xff] }
 0xcee   : > { %3825 = vmatpush3.msra.mxu1 %v2597_v58  ;;  %3863 = vmatpush3.msra.mxu0 %v2629_v59  ;;  %v2701_v58 = vld [vmem:[%s4425_s26 + $0x378] sm:$0xff]  ;;  %v1878_v59 = vsub.s32 5, %v4469_v16 }
 0xcef   : > { %3826 = vmatprep.subr.mxu1 %v2612_v60  ;;  %3864 = vmatprep.subr.mxu0 %v2644_v61  ;;  %v1886_v60 = vsub.s32 7, %v4469_v16  ;;  %v2812_v16 = vld [vmem:[%s4425_s26 + $0x6f0] sm:$0xff] }
 0xcf0   : > { %3827 = vmatpush3.msra.mxu1 %v2596_v62  ;;  %3865 = vmatpush3.msra.mxu0 %v2628_v7 }
 0xcf1   : > { %3828 = vmatprep.subr.mxu1 %v2611_v63  ;;  %3866 = vmatprep.subr.mxu0 %v2643_v4  ;;  %v2684_v63 = vld [vmem:[%s4425_s26 + $0x2f0] sm:$0xff] }
 0xcf2   : > { %3829 = vmatpush3.msra.mxu1 %v2595_v0  ;;  %3867 = vmatpush3.msra.mxu0 %v2627_v1  ;;  %v2716_v4 = vld [vmem:[%s4425_s26 + $0x3f0] sm:$0xff] }
 0xcf3   : > { %3830 = vmatprep.subr.mxu1 %v2610_v2  ;;  %3868 = vmatprep.subr.mxu0 %v2642_v3  ;;  %v2668_v3 = vld [vmem:[%s4425_s26 + $0x270] sm:$0xff] }
 0xcf4   : > { %3831 = vmatpush3.msra.mxu1 %v2594_v5  ;;  %3869 = vmatpush3.msra.mxu0 %v2626_v6  ;;  %v2700_v5 = vld [vmem:[%s4425_s26 + $0x370] sm:$0xff] }
 0xcf5   : > { %3832 = vmatprep.subr.mxu1 %v2609_v8  ;;  %3870 = vmatprep.subr.mxu0 %v2641_v9  ;;  %v4829_v9 = vrot.slane %v4802_v34, %v1878_v59 }
 0xcf6   : > { %3833 = vmatpush3.msra.mxu1 %v2593_v11  ;;  %3871 = vmatpush3.msra.mxu0 %v2625_v27  ;;  %v4834_v11 = vrot.slane %v4802_v34, %v1886_v60  ;;  %v2683_v27 = vld [vmem:[%s4425_s26 + $0x2e8] sm:$0xff] }
 0xcf7   : > { %3834 = vmatprep.subr.mxu1 %v2608_v13  ;;  %3872 = vmatprep.subr.mxu0 %v2640_v14  ;;  %v2715_v13 = vld [vmem:[%s4425_s26 + $0x3e8] sm:$0xff] }
 0xcf8   : > { %3835 = vmatpush3.msra.mxu1 %v2592_v15  ;;  %3873 = vmatpush3.msra.mxu0 %v2624_v17 }
 0xcf9   : > { %3836 = vmatprep.subr.mxu1 %v2607_v24  ;;  %3874 = vmatprep.subr.mxu0 %v2639_v18  ;;  %v2667_v18 = vld [vmem:[%s4425_s26 + $0x268] sm:$0xff] }
 0xcfa   : > { %3837 = vmatpush3.msra.mxu1 %v2591_v19  ;;  %3875 = vmatpush3.msra.mxu0 %v2623_v20  ;;  %v2699_v19 = vld [vmem:[%s4425_s26 + $0x368] sm:$0xff] }
 0xcfb   : > { %3838 = vmatprep.subr.mxu1 %v2606_v21  ;;  %3876 = vmatprep.subr.mxu0 %v2638_v22  ;;  %v2682_v22 = vld [vmem:[%s4425_s26 + $0x2e0] sm:$0xff] }
 0xcfc   : > { %3839 = vmatpush3.msra.mxu1 %v2590_v23  ;;  %3877 = vmatpush3.msra.mxu0 %v2622_v25  ;;  %v2714_v23 = vld [vmem:[%s4425_s26 + $0x3e0] sm:$0xff] }
 0xcfd   : > { %3884 = vmatprep.subr.mxu1 %v2685_v26  ;;  %3922 = vmatprep.subr.mxu0 %v2717_v28  ;;  %v2666_v28 = vld [vmem:[%s4425_s26 + $0x260] sm:$0xff] }
 0xd77   : > { %v2008_v42 = vpop.f32.mrf.mxu1  ;;  %v2085_v43 = vpop.f32.mrf.mxu0 }
 0xd78   : > { %v2009_v45 = vadd.f32 %v2008_v42, %v1859_v38  ;;  %v2086_v46 = vadd.f32 %v2085_v43, %v1867_v39  ;;  %v2713_v42 = vld [vmem:[%s4425_s26 + $0x3d8] sm:$0xff] }
 0xd79   : > { %v2010_v47 = vpop.f32.mrf.mxu1  ;;  %v2087_v55 = vpop.f32.mrf.mxu0  ;;  %v2665_v43 = vld [vmem:[%s4425_s26 + $0x258] sm:$0xff] }
 0xd7a   : > { %v2011_v48 = vadd.f32 %v2010_v47, %v1863_v40  ;;  %v2088_v49 = vadd.f32 %v2087_v55, %v1871_v41  ;;  %v2558_v53 = vmax.f32 %v2009_v45, 0.0  ;;  %v2560_v56 = vmax.f32 %v2086_v46, 0.0  ;;  %v2697_v45 = vld [vmem:[%s4425_s26 + $0x358] sm:$0xff]  ;;  %v2680_v46 = vld [vmem:[%s4425_s26 + $0x2d0] sm:$0xff] }
 0xd7b   : > { %v2712_v47 = vld [vmem:[%s4425_s26 + $0x3d0] sm:$0xff] }
 0xd7c   : > { %v2559_v50 = vmax.f32 %v2011_v48, 0.0  ;;  %v2561_v54 = vmax.f32 %v2088_v49, 0.0  ;;  %v2014_v51 = vpop.f32.mrf.mxu1  ;;  %v2091_v52 = vpop.f32.mrf.mxu0  ;;  %v2664_v55 = vld [vmem:[%s4425_s26 + $0x250] sm:$0xff]  ;;  %v2679_v49 = vld [vmem:[%s4425_s26 + $0x2c8] sm:$0xff] }
 0xd7d   : > { %v2015_v61 = vadd.f32 %v2014_v51, %v1859_v38  ;;  %v2092_v0 = vadd.f32 %v2091_v52, %v1867_v39  ;;  %v2698_v38 = vld [vmem:[%s4425_s26 + $0x360] sm:$0xff]  ;;  %v2681_v39 = vld [vmem:[%s4425_s26 + $0x2d8] sm:$0xff]  ;;  %v2696_v48 = vld [vmem:[%s4425_s26 + $0x350] sm:$0xff] }
 0xd7e   : > { %v2016_v62 = vpop.f32.mrf.mxu1  ;;  %v2093_v7 = vpop.f32.mrf.mxu0  ;;  %2917 = vmatprep.mubr.f32.mxu1 %v2559_v50  ;;  %2992 = vmatprep.mubr.f32.mxu0 %v2561_v54  ;;  %v2711_v50 = vld [vmem:[%s4425_s26 + $0x3c8] sm:$0xff]  ;;  %v2678_v52 = vld [vmem:[%s4425_s26 + $0x2c0] sm:$0xff] }
 0xd7f   : > { %v2017_v1 = vadd.f32 %v2016_v62, %v1863_v40  ;;  %v2094_v2 = vadd.f32 %v2093_v7, %v1871_v41  ;;  %2918 = vmatmul.mubr.f32.vlgmr.msra.gmra.mxu1 %v2558_v53  ;;  %2993 = vmatmul.mubr.f32.vlgmr.msra.gmra.mxu0 %v2560_v56  ;;  %v2574_v17 = vmax.f32 %v2015_v61, 0.0  ;;  %v2576_v24 = vmax.f32 %v2092_v0, 0.0  ;;  %v2663_v54 = vld [vmem:[%s4425_s26 + $0x248] sm:$0xff]  ;;  %v2710_v53 = vld [vmem:[%s4425_s26 + $0x3c0] sm:$0xff]  ;;  %v2709_v61 = vld [vmem:[%s4425_s26 + $0x3b8] sm:$0xff] }
 0xd80   : > { %3885 = vmatpush3.msra.mxu1 %v2669_v57  ;;  %3923 = vmatpush3.msra.mxu0 %v2701_v58  ;;  %v2695_v51 = vld [vmem:[%s4425_s26 + $0x348] sm:$0xff]  ;;  %v2662_v56 = vld [vmem:[%s4425_s26 + $0x240] sm:$0xff]  ;;  %v2677_v58 = vld [vmem:[%s4425_s26 + $0x2b8] sm:$0xff] }
 0xd81   : > { %v2575_v6 = vmax.f32 %v2017_v1, 0.0  ;;  %v2577_v8 = vmax.f32 %v2094_v2, 0.0  ;;  %3886 = vmatprep.subr.mxu1 %v2684_v63  ;;  %3924 = vmatprep.subr.mxu0 %v2716_v4  ;;  %v2694_v57 = vld [vmem:[%s4425_s26 + $0x340] sm:$0xff]  ;;  %v2661_v62 = vld [vmem:[%s4425_s26 + $0x238] sm:$0xff]  ;;  %v2676_v63 = vld [vmem:[%s4425_s26 + $0x2b0] sm:$0xff] }
 0xd82   : > { %v4838_v14 = vpop.f32.mrf.mxu1  ;;  %v4840_v15 = vpop.f32.mrf.mxu0  ;;  %3887 = vmatpush3.msra.mxu1 %v2668_v3  ;;  %3925 = vmatpush3.msra.mxu0 %v2700_v5  ;;  %v2693_v7 = vld [vmem:[%s4425_s26 + $0x338] sm:$0xff]  ;;  %v2708_v4 = vld [vmem:[%s4425_s26 + $0x3b0] sm:$0xff]  ;;  %v2675_v2 = vld [vmem:[%s4425_s26 + $0x2a8] sm:$0xff] }
 0xd83   : > { %2922 = vmatprep.mubr.f32.mxu1 %v2575_v6  ;;  %2997 = vmatprep.mubr.f32.mxu0 %v2577_v8  ;;  %v2660_v0 = vld [vmem:[%s4425_s26 + $0x230] sm:$0xff]  ;;  %v2707_v3 = vld [vmem:[%s4425_s26 + $0x3a8] sm:$0xff] }
 0xd84   : > { %v2164_v20 = vpop.f32.mrf.mxu1  ;;  %v2241_v21 = vpop.f32.mrf.mxu0  ;;  %3888 = vmatprep.subr.mxu1 %v2683_v27  ;;  %3926 = vmatprep.subr.mxu0 %v2715_v13  ;;  %v2692_v1 = vld [vmem:[%s4425_s26 + $0x330] sm:$0xff]  ;;  %v2659_v5 = vld [vmem:[%s4425_s26 + $0x228] sm:$0xff]  ;;  %v2674_v27 = vld [vmem:[%s4425_s26 + $0x2a0] sm:$0xff] }
 0xd85   : > { %v2165_v25 = vadd.f32 %v2164_v20, %v4829_v9  ;;  %v2242_v26 = vadd.f32 %v2241_v21, %v4834_v11  ;;  %2923 = vmatmul.mubr.f32.gmra.mxu1 %v2574_v17  ;;  %2998 = vmatmul.mubr.f32.gmra.mxu0 %v2576_v24  ;;  %v2691_v6 = vld [vmem:[%s4425_s26 + $0x328] sm:$0xff]  ;;  %v2706_v13 = vld [vmem:[%s4425_s26 + $0x3a0] sm:$0xff]  ;;  %v2705_v20 = vld [vmem:[%s4425_s26 + $0x398] sm:$0xff]  ;;  %v1875_v21 = vrot.slane %v4802_v34, %v1874_v29 }
 0xd86   : > { %3889 = vmatpush3.msra.mxu1 %v2667_v18  ;;  %3927 = vmatpush3.msra.mxu0 %v2699_v19  ;;  %v2658_v24 = vld [vmem:[%s4425_s26 + $0x220] sm:$0xff]  ;;  %v2673_v19 = vld [vmem:[%s4425_s26 + $0x298] sm:$0xff]  ;;  %v2656_v29 = vld [vmem:[%s4425_s26 + $0x210] sm:$0xff] }
 0xd87   : > { %v2563_v40 = vmax.f32 %v2165_v25, 0.0  ;;  %v2565_v41 = vmax.f32 %v2242_v26, 0.0  ;;  %3890 = vmatprep.subr.mxu1 %v2682_v22  ;;  %3928 = vmatprep.subr.mxu0 %v2714_v23  ;;  %v2690_v18 = vld [vmem:[%s4425_s26 + $0x320] sm:$0xff]  ;;  %v1883_v22 = vrot.slane %v4802_v34, %v1882_v30  ;;  %v2657_v23 = vld [vmem:[%s4425_s26 + $0x218] sm:$0xff]  ;;  %v2688_v30 = vld [vmem:[%s4425_s26 + $0x310] sm:$0xff] }
 0xd88   : > { %3891 = vmatpush3.msra.mxu1 %v2666_v28  ;;  %3929 = vmatpush3.msra.mxu0 %v2698_v38  ;;  %v4878_v8 = vpop.f32.mrf.mxu1  ;;  %v2245_v17 = vpop.f32.mrf.mxu0  ;;  %v2689_v25 = vld [vmem:[%s4425_s26 + $0x318] sm:$0xff]  ;;  %v2672_v28 = vld [vmem:[%s4425_s26 + $0x290] sm:$0xff]  ;;  %v2671_v34 = vld [vmem:[%s4425_s26 + $0x288] sm:$0xff] }
 0xd89   : > { %3892 = vmatprep.subr.mxu1 %v2681_v39  ;;  %3067 = vmatprep.mubr.f32.mxu1 %v2563_v40  ;;  %v2704_v38 = vld [vmem:[%s4425_s26 + $0x390] sm:$0xff]  ;;  %v2703_v40 = vld [vmem:[%s4425_s26 + $0x388] sm:$0xff] }
 0xd8a   : > { %3930 = vmatprep.subr.mxu0 %v2713_v42  ;;  %3142 = vmatprep.mubr.f32.mxu0 %v2565_v41  ;;  %v2170_v26 = vpop.f32.mrf.mxu1  ;;  %v2247_v39 = vpop.f32.mrf.mxu0  ;;  %v2163_v41 = vadd.f32 %v4838_v14, %v1875_v21  ;;  %v2240_v42 = vadd.f32 %v4840_v15, %v1883_v22  ;;  %v2654_v15 = vld [vmem:[%s4425_s26 + $0x200] sm:$0xff] }
 0xd8b   : > { %3893 = vmatpush3.msra.mxu1 %v2665_v43  ;;  %3931 = vmatpush3.msra.mxu0 %v2697_v45  ;;  %v2655_v43 = vld [vmem:[%s4425_s26 + $0x208] sm:$0xff]  ;;  %v2248_v14 = vadd.f32 %v2247_v39, %v4834_v11  ;;  %v2781_v11 = vld [vmem:[%s4425_s26 + $0x5f8] sm:$0xff]  ;;  %v2776_v39 = vld [vmem:[%s4425_s26 + $0x5d0] sm:$0xff] }
 0xd8c   : > { %3894 = vmatprep.subr.mxu1 %v2680_v46  ;;  %3932 = vmatprep.subr.mxu0 %v2712_v47  ;;  %v2687_v45 = vld [vmem:[%s4425_s26 + $0x308] sm:$0xff]  ;;  %v2670_v47 = vld [vmem:[%s4425_s26 + $0x280] sm:$0xff] }
 0xd8d   : > { %3895 = vmatpush3.msra.mxu1 %v2664_v55  ;;  %3933 = vmatpush3.msra.mxu0 %v2696_v48  ;;  %v2702_v55 = vld [vmem:[%s4425_s26 + $0x380] sm:$0xff]  ;;  %v2171_v48 = vadd.f32 %v2170_v26, %v4829_v9  ;;  %v2749_v9 = vld [vmem:[%s4425_s26 + $0x4f8] sm:$0xff] }
 0xd8e   : > { %3896 = vmatprep.subr.mxu1 %v2679_v49  ;;  %3934 = vmatprep.subr.mxu0 %v2711_v50  ;;  %v4904_v46 = vpop.f32.mrf.mxu1  ;;  %v4910_v49 = vpop.f32.mrf.mxu0  ;;  %v2686_v50 = vld [vmem:[%s4425_s26 + $0x300] sm:$0xff]  ;;  %v2729_v26 = vld [vmem:[%s4425_s26 + $0x458] sm:$0xff] }
 0xd8f   : > { %3897 = vmatpush3.msra.mxu1 %v2663_v54  ;;  %3935 = vmatpush3.msra.mxu0 %v2695_v51  ;;  %v2562_v54 = vmax.f32 %v2163_v41, 0.0  ;;  %v2564_v51 = vmax.f32 %v2240_v42, 0.0  ;;  %v2727_v41 = vld [vmem:[%s4425_s26 + $0x448] sm:$0xff] }
 0xd90   : > { %3898 = vmatprep.subr.mxu1 %v2678_v52  ;;  %3936 = vmatprep.subr.mxu0 %v2710_v53  ;;  %v4917_v52 = vrot.slane %v4787_v12, %v1862_v36  ;;  %v2318_v53 = vpop.f32.mrf.mxu1  ;;  %v2246_v36 = vadd.f32 %v2245_v17, %v1883_v22  ;;  %v2762_v22 = vld [vmem:[%s4425_s26 + $0x560] sm:$0xff]  ;;  %v2759_v42 = vld [vmem:[%s4425_s26 + $0x548] sm:$0xff] }
 0xd91   : > { %3899 = vmatpush3.msra.mxu1 %v2662_v56  ;;  %3937 = vmatpush3.msra.mxu0 %v2694_v57  ;;  %v4924_v56 = vrot.slane %v4787_v12, %v1870_v37  ;;  %v2169_v57 = vadd.f32 %v4878_v8, %v1875_v21  ;;  %v2748_v37 = vld [vmem:[%s4425_s26 + $0x4f0] sm:$0xff]  ;;  %v2747_v8 = vld [vmem:[%s4425_s26 + $0x4e8] sm:$0xff]  ;;  %v2730_v21 = vld [vmem:[%s4425_s26 + $0x460] sm:$0xff] }
 0xd92   : > { %3900 = vmatprep.subr.mxu1 %v2677_v58  ;;  %3938 = vmatprep.subr.mxu0 %v2709_v61  ;;  %v2579_v58 = vmax.f32 %v2171_v48, 0.0  ;;  %v2581_v61 = vmax.f32 %v2248_v14, 0.0  ;;  %v2741_v48 = vld [vmem:[%s4425_s26 + $0x4b8] sm:$0xff] }
 0xd93   : > { %3901 = vmatpush3.msra.mxu1 %v2661_v62  ;;  %3939 = vmatpush3.msra.mxu0 %v2693_v7  ;;  %v2395_v62 = vpop.f32.mrf.mxu0  ;;  %v2733_v7 = vld [vmem:[%s4425_s26 + $0x478] sm:$0xff] }
 0xd94   : > { %3902 = vmatprep.subr.mxu1 %v2676_v63  ;;  %3940 = vmatprep.subr.mxu0 %v2708_v4  ;;  %v2765_v63 = vld [vmem:[%s4425_s26 + $0x578] sm:$0xff]  ;;  %v2780_v4 = vld [vmem:[%s4425_s26 + $0x5f0] sm:$0xff] }
 0xd95   : > { %3903 = vmatpush3.msra.mxu1 %v2660_v0  ;;  %3941 = vmatpush3.msra.mxu0 %v2692_v1  ;;  %v2319_v0 = vadd.f32 %v2318_v53, %v4917_v52  ;;  %v2732_v1 = vld [vmem:[%s4425_s26 + $0x470] sm:$0xff]  ;;  %v2773_v14 = vld [vmem:[%s4425_s26 + $0x5b8] sm:$0xff]  ;;  %v2739_v53 = vld [vmem:[%s4425_s26 + $0x4a8] sm:$0xff] }
 0xd96   : > { %3904 = vmatprep.subr.mxu1 %v2675_v2  ;;  %3942 = vmatprep.subr.mxu0 %v2707_v3  ;;  %v2764_v2 = vld [vmem:[%s4425_s26 + $0x570] sm:$0xff]  ;;  %v2396_v3 = vadd.f32 %v2395_v62, %v4924_v56  ;;  %v2738_v62 = vld [vmem:[%s4425_s26 + $0x4a0] sm:$0xff] }
 0xd97   : > { %3905 = vmatpush3.msra.mxu1 %v2659_v5  ;;  %3943 = vmatpush3.msra.mxu0 %v2691_v6  ;;  %v2578_v5 = vmax.f32 %v2169_v57, 0.0  ;;  %v2580_v6 = vmax.f32 %v2246_v36, 0.0  ;;  %v2567_v17 = vmax.f32 %v2319_v0, 0.0  ;;  %v2771_v57 = vld [vmem:[%s4425_s26 + $0x5a8] sm:$0xff]  ;;  %v2737_v0 = vld [vmem:[%s4425_s26 + $0x498] sm:$0xff] }
 0xd98   : > { %3906 = vmatprep.subr.mxu1 %v2674_v27  ;;  %3944 = vmatprep.subr.mxu0 %v2706_v13  ;;  %v2779_v27 = vld [vmem:[%s4425_s26 + $0x5e8] sm:$0xff] }
 0xd99   : > { %3907 = vmatpush3.msra.mxu1 %v2658_v24  ;;  %3945 = vmatpush3.msra.mxu0 %v2690_v18  ;;  %v2731_v13 = vld [vmem:[%s4425_s26 + $0x468] sm:$0xff]  ;;  %v2569_v18 = vmax.f32 %v2396_v3, 0.0  ;;  %v1899_v3 = vrot.slane %v4787_v12, %v1866_v33  ;;  %v2752_v33 = vld [vmem:[%s4425_s26 + $0x510] sm:$0xff] }
 0xd9a   : > { %3908 = vmatprep.subr.mxu1 %v2673_v19  ;;  %3946 = vmatprep.subr.mxu0 %v2705_v20  ;;  %v2763_v24 = vld [vmem:[%s4425_s26 + $0x568] sm:$0xff]  ;;  %v2746_v19 = vld [vmem:[%s4425_s26 + $0x4e0] sm:$0xff] }
 0xd9b   : > { %3909 = vmatpush3.msra.mxu1 %v2657_v23  ;;  %3947 = vmatpush3.msra.mxu0 %v2689_v25  ;;  %v2778_v20 = vld [vmem:[%s4425_s26 + $0x5e0] sm:$0xff]  ;;  %v2745_v23 = vld [vmem:[%s4425_s26 + $0x4d8] sm:$0xff]  ;;  %v2723_v36 = vld [vmem:[%s4425_s26 + $0x428] sm:$0xff] }
 0xd9c   : > { %3910 = vmatprep.subr.mxu1 %v2672_v28  ;;  %3948 = vmatprep.subr.mxu0 %v2704_v38  ;;  %v2777_v25 = vld [vmem:[%s4425_s26 + $0x5d8] sm:$0xff]  ;;  %v2744_v38 = vld [vmem:[%s4425_s26 + $0x4d0] sm:$0xff] }
 0xd9d   : > { %3911 = vmatpush3.msra.mxu1 %v2656_v29  ;;  %3949 = vmatpush3.msra.mxu0 %v2688_v30  ;;  %v2761_v28 = vld [vmem:[%s4425_s26 + $0x558] sm:$0xff]  ;;  %v2728_v29 = vld [vmem:[%s4425_s26 + $0x450] sm:$0xff] }
 0xd9e   : > { %3912 = vmatprep.subr.mxu1 %v2671_v34  ;;  %3950 = vmatprep.subr.mxu0 %v2703_v40  ;;  %v2760_v30 = vld [vmem:[%s4425_s26 + $0x550] sm:$0xff]  ;;  %v2743_v34 = vld [vmem:[%s4425_s26 + $0x4c8] sm:$0xff] }
 0xd9f   : > { %3913 = vmatpush3.msra.mxu1 %v2655_v43  ;;  %3951 = vmatpush3.msra.mxu0 %v2687_v45  ;;  %v2775_v40 = vld [vmem:[%s4425_s26 + $0x5c8] sm:$0xff]  ;;  %v2742_v43 = vld [vmem:[%s4425_s26 + $0x4c0] sm:$0xff] }
 0xda0   : > { %3914 = vmatprep.subr.mxu1 %v2670_v47  ;;  %3952 = vmatprep.subr.mxu0 %v2702_v55  ;;  %v2774_v45 = vld [vmem:[%s4425_s26 + $0x5c0] sm:$0xff] }
 0xda1   : > { %3915 = vmatpush3.msra.mxu1 %v2654_v15  ;;  %3953 = vmatpush3.msra.mxu0 %v2686_v50  ;;  %v2726_v47 = vld [vmem:[%s4425_s26 + $0x440] sm:$0xff]  ;;  %v2725_v15 = vld [vmem:[%s4425_s26 + $0x438] sm:$0xff] }
 0xda2   : > { %3068 = vmatmul.mubr.f32.vlgmr.msra.gmra.mxu1 %v2562_v54  ;;  %3143 = vmatmul.mubr.f32.vlgmr.msra.gmra.mxu0 %v2564_v51  ;;  %v2758_v55 = vld [vmem:[%s4425_s26 + $0x540] sm:$0xff]  ;;  %v2757_v50 = vld [vmem:[%s4425_s26 + $0x538] sm:$0xff]  ;;  %v2740_v54 = vld [vmem:[%s4425_s26 + $0x4b0] sm:$0xff] }
 0xda3   : > { %3960 = vmatprep.subr.mxu1 %v2749_v9  ;;  %3998 = vmatprep.subr.mxu0 %v2781_v11  ;;  %v2772_v51 = vld [vmem:[%s4425_s26 + $0x5b0] sm:$0xff] }
 0xda4   : > { %3072 = vmatprep.mubr.f32.mxu1 %v2579_v58  ;;  %3147 = vmatprep.mubr.f32.mxu0 %v2581_v61  ;;  %v2724_v9 = vld [vmem:[%s4425_s26 + $0x430] sm:$0xff]  ;;  %v2755_v58 = vld [vmem:[%s4425_s26 + $0x528] sm:$0xff]  ;;  %v4971_v61 = vpop.f32.mrf.mxu1 }
 0xda5   : > { %3961 = vmatpush3.msra.mxu1 %v2733_v7  ;;  %3999 = vmatpush3.msra.mxu0 %v2765_v63  ;;  %v2756_v11 = vld [vmem:[%s4425_s26 + $0x530] sm:$0xff]  ;;  %v2770_v7 = vld [vmem:[%s4425_s26 + $0x5a0] sm:$0xff]  ;;  %v2399_v63 = vpop.f32.mrf.mxu0 }
 0xda6   : > { %3962 = vmatprep.subr.mxu1 %v2748_v37  ;;  %4000 = vmatprep.subr.mxu0 %v2780_v4  ;;  %v2722_v37 = vld [vmem:[%s4425_s26 + $0x420] sm:$0xff] }
 0xda7   : > { %3963 = vmatpush3.msra.mxu1 %v2732_v1  ;;  %4001 = vmatpush3.msra.mxu0 %v2764_v2  ;;  %v2754_v4 = vld [vmem:[%s4425_s26 + $0x520] sm:$0xff]  ;;  %v2769_v1 = vld [vmem:[%s4425_s26 + $0x598] sm:$0xff]  ;;  %v1891_v2 = vrot.slane %v4787_v12, %v1858_v32  ;;  %v2720_v32 = vld [vmem:[%s4425_s26 + $0x410] sm:$0xff] }
 0xda8   : > { %3073 = vmatmul.mubr.f32.gmra.mxu1 %v2578_v5  ;;  %3148 = vmatmul.mubr.f32.gmra.mxu0 %v2580_v6  ;;  %v2721_v5 = vld [vmem:[%s4425_s26 + $0x418] sm:$0xff] }
 0xda9   : > { %3964 = vmatprep.subr.mxu1 %v2747_v8  ;;  %4002 = vmatprep.subr.mxu0 %v2779_v27  ;;  %v2753_v6 = vld [vmem:[%s4425_s26 + $0x518] sm:$0xff]  ;;  %v2324_v8 = vpop.f32.mrf.mxu1  ;;  %v2736_v27 = vld [vmem:[%s4425_s26 + $0x490] sm:$0xff] }
 0xdaa   : > { %3965 = vmatpush3.msra.mxu1 %v2731_v13  ;;  %3217 = vmatprep.mubr.f32.mxu1 %v2567_v17  ;;  %v2768_v13 = vld [vmem:[%s4425_s26 + $0x590] sm:$0xff]  ;;  %v2401_v17 = vpop.f32.mrf.mxu0 }
 0xdab   : > { %4003 = vmatpush3.msra.mxu0 %v2763_v24  ;;  %3292 = vmatprep.mubr.f32.mxu0 %v2569_v18  ;;  %v2735_v24 = vld [vmem:[%s4425_s26 + $0x488] sm:$0xff] }
 0xdac   : > { %3966 = vmatprep.subr.mxu1 %v2746_v19  ;;  %4004 = vmatprep.subr.mxu0 %v2778_v20  ;;  %v2767_v18 = vld [vmem:[%s4425_s26 + $0x588] sm:$0xff]  ;;  %v2317_v19 = vadd.f32 %v4904_v46, %v1891_v2  ;;  %v2394_v20 = vadd.f32 %v4910_v49, %v1899_v3  ;;  %v2402_v46 = vadd.f32 %v2401_v17, %v4924_v56  ;;  %v2718_v49 = vld [vmem:[%s4425_s26 + $0x400] sm:$0xff]  ;;  %v2845_v56 = vld [vmem:[%s4425_s26 + $0x7f8] sm:$0xff] }
 0xdad   : > { %3967 = vmatpush3.msra.mxu1 %v2730_v21  ;;  %4005 = vmatpush3.msra.mxu0 %v2762_v22  ;;  %v2719_v21 = vld [vmem:[%s4425_s26 + $0x408] sm:$0xff] }
 0xdae   : > { %3968 = vmatprep.subr.mxu1 %v2745_v23  ;;  %4006 = vmatprep.subr.mxu0 %v2777_v25  ;;  %v2751_v22 = vld [vmem:[%s4425_s26 + $0x508] sm:$0xff]  ;;  %v4997_v23 = vpop.f32.mrf.mxu1  ;;  %v2734_v25 = vld [vmem:[%s4425_s26 + $0x480] sm:$0xff] }
 0xdaf   : > { %3969 = vmatpush3.msra.mxu1 %v2729_v26  ;;  %4007 = vmatpush3.msra.mxu0 %v2761_v28  ;;  %v2766_v26 = vld [vmem:[%s4425_s26 + $0x580] sm:$0xff]  ;;  %v2325_v28 = vadd.f32 %v2324_v8, %v4917_v52  ;;  %v2813_v52 = vld [vmem:[%s4425_s26 + $0x6f8] sm:$0xff]  ;;  %v2807_v8 = vld [vmem:[%s4425_s26 + $0x6c8] sm:$0xff] }
 0xdb0   : > { %3970 = vmatprep.subr.mxu1 %v2744_v38  ;;  %4008 = vmatprep.subr.mxu0 %v2776_v39  ;;  %v5003_v38 = vpop.f32.mrf.mxu0  ;;  %v2750_v39 = vld [vmem:[%s4425_s26 + $0x500] sm:$0xff]  ;;  %v2823_v17 = vld [vmem:[%s4425_s26 + $0x748] sm:$0xff] }
 0xdb1   : > { %3971 = vmatpush3.msra.mxu1 %v2728_v29  ;;  %4009 = vmatpush3.msra.mxu0 %v2760_v30  ;;  %v2566_v29 = vmax.f32 %v2317_v19, 0.0  ;;  %v2568_v30 = vmax.f32 %v2394_v20, 0.0  ;;  %v2805_v19 = vld [vmem:[%s4425_s26 + $0x6b8] sm:$0xff] }
 0xdb2   : > { %3972 = vmatprep.subr.mxu1 %v2743_v34  ;;  %4010 = vmatprep.subr.mxu0 %v2775_v40  ;;  %v5010_v34 = vrot.slane %v4787_v12, %v1878_v59  ;;  %v2472_v40 = vpop.f32.mrf.mxu1  ;;  %v2400_v59 = vadd.f32 %v2399_v63, %v1899_v3  ;;  %v2826_v63 = vld [vmem:[%s4425_s26 + $0x760] sm:$0xff]  ;;  %v2840_v3 = vld [vmem:[%s4425_s26 + $0x7d0] sm:$0xff]  ;;  %v2837_v20 = vld [vmem:[%s4425_s26 + $0x7b8] sm:$0xff] }
 0xdb3   : > { %3973 = vmatpush3.msra.mxu1 %v2727_v41  ;;  %4011 = vmatpush3.msra.mxu0 %v2759_v42  ;;  %v5017_v41 = vrot.slane %v4787_v12, %v1886_v60  ;;  %v2323_v42 = vadd.f32 %v4971_v61, %v1891_v2  ;;  %v2844_v12 = vld [vmem:[%s4425_s26 + $0x7f0] sm:$0xff]  ;;  %v2810_v61 = vld [vmem:[%s4425_s26 + $0x6e0] sm:$0xff] }
 0xdb4   : > { %3974 = vmatprep.subr.mxu1 %v2742_v43  ;;  %4012 = vmatprep.subr.mxu0 %v2774_v45  ;;  %v2583_v43 = vmax.f32 %v2325_v28, 0.0  ;;  %v2585_v45 = vmax.f32 %v2402_v46, 0.0  ;;  %v2473_v60 = vadd.f32 %v2472_v40, %v5010_v34  ;;  %v2808_v2 = vld [vmem:[%s4425_s26 + $0x6d0] sm:$0xff]  ;;  %v2476_v40 = vpop.f32.mrf.mxu1 }
 0xdb5   : > { %3975 = vmatpush3.msra.mxu1 %v2726_v47  ;;  %4013 = vmatpush3.msra.mxu0 %v2758_v55  ;;  %v2549_v47 = vpop.f32.mrf.mxu0  ;;  %v2797_v55 = vld [vmem:[%s4425_s26 + $0x678] sm:$0xff]  ;;  %v2788_v28 = vld [vmem:[%s4425_s26 + $0x630] sm:$0xff] }
 0xdb6   : > { %3976 = vmatprep.subr.mxu1 %v2741_v48  ;;  %4014 = vmatprep.subr.mxu0 %v2773_v14  ;;  %v2829_v48 = vld [vmem:[%s4425_s26 + $0x778] sm:$0xff]  ;;  %v2796_v14 = vld [vmem:[%s4425_s26 + $0x670] sm:$0xff] }
 0xdb7   : > { %3977 = vmatpush3.msra.mxu1 %v2725_v15  ;;  %4015 = vmatpush3.msra.mxu0 %v2757_v50  ;;  %v2828_v15 = vld [vmem:[%s4425_s26 + $0x770] sm:$0xff]  ;;  %v2550_v50 = vadd.f32 %v2549_v47, %v5017_v41  ;;  %v2833_v47 = vld [vmem:[%s4425_s26 + $0x798] sm:$0xff] }
 0xdb8   : > { %3978 = vmatprep.subr.mxu1 %v2740_v54  ;;  %4016 = vmatprep.subr.mxu0 %v2772_v51  ;;  %v2582_v54 = vmax.f32 %v2323_v42, 0.0  ;;  %v2584_v51 = vmax.f32 %v2400_v59, 0.0  ;;  %v2820_v46 = vld [vmem:[%s4425_s26 + $0x730] sm:$0xff]  ;;  %v2553_v42 = vpop.f32.mrf.mxu0  ;;  %v2786_v59 = vld [vmem:[%s4425_s26 + $0x620] sm:$0xff] }
 0xdb9   : > { %3979 = vmatpush3.msra.mxu1 %v2724_v9  ;;  %4017 = vmatpush3.msra.mxu0 %v2756_v11  ;;  %v2811_v9 = vld [vmem:[%s4425_s26 + $0x6e8] sm:$0xff] }
 0xdba   : > { %3980 = vmatprep.subr.mxu1 %v2739_v53  ;;  %4018 = vmatprep.subr.mxu0 %v2771_v57  ;;  %v2843_v11 = vld [vmem:[%s4425_s26 + $0x7e8] sm:$0xff]  ;;  %v2571_v57 = vmax.f32 %v2473_v60, 0.0  ;;  %v2478_v60 = vpop.f32.mrf.mxu1 }
 0xdbb   : > { %3981 = vmatpush3.msra.mxu1 %v2723_v36  ;;  %4019 = vmatpush3.msra.mxu0 %v2755_v58  ;;  %v2795_v53 = vld [vmem:[%s4425_s26 + $0x668] sm:$0xff]  ;;  %v2573_v58 = vmax.f32 %v2550_v50, 0.0  ;;  %v2816_v50 = vld [vmem:[%s4425_s26 + $0x710] sm:$0xff] }
 0xdbc   : > { %3982 = vmatprep.subr.mxu1 %v2738_v62  ;;  %4020 = vmatprep.subr.mxu0 %v2770_v7  ;;  %v2827_v36 = vld [vmem:[%s4425_s26 + $0x768] sm:$0xff]  ;;  %v2842_v62 = vld [vmem:[%s4425_s26 + $0x7e0] sm:$0xff] }
 0xdbd   : > { %3983 = vmatpush3.msra.mxu1 %v2722_v37  ;;  %4021 = vmatpush3.msra.mxu0 %v2754_v4  ;;  %v2794_v7 = vld [vmem:[%s4425_s26 + $0x660] sm:$0xff]  ;;  %v2809_v37 = vld [vmem:[%s4425_s26 + $0x6d8] sm:$0xff] }
 0xdbe   : > { %3984 = vmatprep.subr.mxu1 %v2737_v0  ;;  %4022 = vmatprep.subr.mxu0 %v2769_v1  ;;  %v2841_v4 = vld [vmem:[%s4425_s26 + $0x7d8] sm:$0xff] }
 0xdbf   : > { %3985 = vmatpush3.msra.mxu1 %v2721_v5  ;;  %4023 = vmatpush3.msra.mxu0 %v2753_v6  ;;  %v2793_v0 = vld [vmem:[%s4425_s26 + $0x658] sm:$0xff]  ;;  %v2792_v5 = vld [vmem:[%s4425_s26 + $0x650] sm:$0xff] }
 0xdc0   : > { %3986 = vmatprep.subr.mxu1 %v2736_v27  ;;  %4024 = vmatprep.subr.mxu0 %v2768_v13  ;;  %v2825_v1 = vld [vmem:[%s4425_s26 + $0x758] sm:$0xff]  ;;  %v2824_v6 = vld [vmem:[%s4425_s26 + $0x750] sm:$0xff]  ;;  %v2839_v27 = vld [vmem:[%s4425_s26 + $0x7c8] sm:$0xff] }
 0xdc1   : > { %3987 = vmatpush3.msra.mxu1 %v2720_v32  ;;  %4025 = vmatpush3.msra.mxu0 %v2752_v33  ;;  %v2791_v13 = vld [vmem:[%s4425_s26 + $0x648] sm:$0xff]  ;;  %v2806_v32 = vld [vmem:[%s4425_s26 + $0x6c0] sm:$0xff] }
 0xdc2   : > { %3988 = vmatprep.subr.mxu1 %v2735_v24  ;;  %4026 = vmatprep.subr.mxu0 %v2767_v18  ;;  %v2838_v33 = vld [vmem:[%s4425_s26 + $0x7c0] sm:$0xff] }
 0xdc3   : > { %3989 = vmatpush3.msra.mxu1 %v2719_v21  ;;  %4027 = vmatpush3.msra.mxu0 %v2751_v22  ;;  %v2790_v24 = vld [vmem:[%s4425_s26 + $0x640] sm:$0xff]  ;;  %v2789_v21 = vld [vmem:[%s4425_s26 + $0x638] sm:$0xff] }
 0xdc4   : > { %3990 = vmatprep.subr.mxu1 %v2734_v25  ;;  %4028 = vmatprep.subr.mxu0 %v2766_v26  ;;  %v2822_v18 = vld [vmem:[%s4425_s26 + $0x740] sm:$0xff]  ;;  %v2821_v22 = vld [vmem:[%s4425_s26 + $0x738] sm:$0xff]  ;;  %v2804_v25 = vld [vmem:[%s4425_s26 + $0x6b0] sm:$0xff] }
 0xdc5   : > { %3991 = vmatpush3.msra.mxu1 %v2718_v49  ;;  %4029 = vmatpush3.msra.mxu0 %v2750_v39  ;;  %v2836_v26 = vld [vmem:[%s4425_s26 + $0x7b0] sm:$0xff]  ;;  %v2803_v49 = vld [vmem:[%s4425_s26 + $0x6a8] sm:$0xff] }
 0xdc6   : > { %3218 = vmatmul.mubr.f32.vlgmr.msra.gmra.mxu1 %v2566_v29  ;;  %3293 = vmatmul.mubr.f32.vlgmr.msra.gmra.mxu0 %v2568_v30  ;;  %v2835_v39 = vld [vmem:[%s4425_s26 + $0x7a8] sm:$0xff] }
 0xdc7   : > { %4036 = vmatprep.subr.mxu1 %v2813_v52  ;;  %4074 = vmatprep.subr.mxu0 %v2845_v56  ;;  %v2787_v29 = vld [vmem:[%s4425_s26 + $0x628] sm:$0xff]  ;;  %v2802_v52 = vld [vmem:[%s4425_s26 + $0x6a0] sm:$0xff] }
 0xdc8   : > { %3222 = vmatprep.mubr.f32.mxu1 %v2583_v43  ;;  %3297 = vmatprep.mubr.f32.mxu0 %v2585_v45  ;;  %v2819_v30 = vld [vmem:[%s4425_s26 + $0x728] sm:$0xff]  ;;  %v2834_v56 = vld [vmem:[%s4425_s26 + $0x7a0] sm:$0xff]  ;;  %v2801_v45 = vld [vmem:[%s4425_s26 + $0x698] sm:$0xff] }
 0xdc9   : > { %4037 = vmatpush3.msra.mxu1 %v2797_v55  ;;  %4075 = vmatpush3.msra.mxu0 %v2829_v48  ;;  %v2818_v43 = vld [vmem:[%s4425_s26 + $0x720] sm:$0xff]  ;;  %v2785_v55 = vld [vmem:[%s4425_s26 + $0x618] sm:$0xff] }
 0xdca   : > { %4038 = vmatprep.subr.mxu1 %v2812_v16  ;;  %4076 = vmatprep.subr.mxu0 %v2844_v12  ;;  %v2817_v48 = vld [vmem:[%s4425_s26 + $0x718] sm:$0xff]  ;;  %v2800_v16 = vld [vmem:[%s4425_s26 + $0x690] sm:$0xff] }
 0xdcb   : > { %4039 = vmatpush3.msra.mxu1 %v2796_v14  ;;  %4077 = vmatpush3.msra.mxu0 %v2828_v15  ;;  %v2832_v12 = vld [vmem:[%s4425_s26 + $0x790] sm:$0xff]  ;;  %v2555_v14 = vpop.f32.mrf.mxu0 }
 0xdcc   : > { %3223 = vmatmul.mubr.f32.gmra.mxu1 %v2582_v54  ;;  %3298 = vmatmul.mubr.f32.gmra.mxu0 %v2584_v51  ;;  %v2784_v15 = vld [vmem:[%s4425_s26 + $0x610] sm:$0xff]  ;;  %v2799_v54 = vld [vmem:[%s4425_s26 + $0x688] sm:$0xff] }
 0xdcd   : > { %4040 = vmatprep.subr.mxu1 %v2811_v9  ;;  %4078 = vmatprep.subr.mxu0 %v2843_v11  ;;  %v2831_v51 = vld [vmem:[%s4425_s26 + $0x788] sm:$0xff]  ;;  %v2471_v9 = vadd.f32 %v4997_v23, %v4792_v10  ;;  %v2548_v11 = vadd.f32 %v5003_v38, %v4797_v31 }
 0xdce   : > { %4041 = vmatpush3.msra.mxu1 %v2795_v53  ;;  %3367 = vmatprep.mubr.f32.mxu1 %v2571_v57  ;;  %v2783_v53 = vld [vmem:[%s4425_s26 + $0x608] sm:$0xff] }
 0xdcf   : > { %4079 = vmatpush3.msra.mxu0 %v2827_v36  ;;  %3442 = vmatprep.mubr.f32.mxu0 %v2573_v58  ;;  %v2815_v57 = vld [vmem:[%s4425_s26 + $0x708] sm:$0xff]  ;;  %v2479_v36 = vadd.f32 %v2478_v60, %v5010_v34  ;;  %v2556_v58 = vadd.f32 %v2555_v14, %v5017_v41  ;;  %v2570_v23 = vmax.f32 %v2471_v9, 0.0  ;;  %v2572_v38 = vmax.f32 %v2548_v11, 0.0 }
 0xdd0   : > { %4042 = vmatprep.subr.mxu1 %v2810_v61  ;;  %4080 = vmatprep.subr.mxu0 %v2842_v62  ;;  %v2798_v61 = vld [vmem:[%s4425_s26 + $0x680] sm:$0xff] }
 0xdd1   : > { %4043 = vmatpush3.msra.mxu1 %v2794_v7  ;;  %4081 = vmatpush3.msra.mxu0 %v2826_v63  ;;  %v2830_v62 = vld [vmem:[%s4425_s26 + $0x780] sm:$0xff]  ;;  %v2587_v34 = vmax.f32 %v2479_v36, 0.0  ;;  %v2589_v41 = vmax.f32 %v2556_v58, 0.0 }
 0xdd2   : > { %4044 = vmatprep.subr.mxu1 %v2809_v37  ;;  %4082 = vmatprep.subr.mxu0 %v2841_v4  ;;  %v2782_v7 = vld [vmem:[%s4425_s26 + $0x600] sm:$0xff]  ;;  %v2477_v37 = vadd.f32 %v2476_v40, %v4792_v10  ;;  %v2554_v4 = vadd.f32 %v2553_v42, %v4797_v31 }
 0xdd3   : > { %4045 = vmatpush3.msra.mxu1 %v2793_v0  ;;  %4083 = vmatpush3.msra.mxu0 %v2825_v1  ;;  %v2814_v63 = vld [vmem:[%s4425_s26 + $0x700] sm:$0xff] }
 0xdd4   : > { %4046 = vmatprep.subr.mxu1 %v2808_v2  ;;  %4084 = vmatprep.subr.mxu0 %v2840_v3  ;;  %v2586_v0 = vmax.f32 %v2477_v37, 0.0  ;;  %v2588_v1 = vmax.f32 %v2554_v4, 0.0 }
 0xdd5   : > { %4047 = vmatpush3.msra.mxu1 %v2792_v5  ;;  %4085 = vmatpush3.msra.mxu0 %v2824_v6 }
 0xdd6   : > { %4048 = vmatprep.subr.mxu1 %v2807_v8  ;;  %4086 = vmatprep.subr.mxu0 %v2839_v27 }
 0xdd7   : > { %4049 = vmatpush3.msra.mxu1 %v2791_v13  ;;  %4087 = vmatpush3.msra.mxu0 %v2823_v17 }
 0xdd8   : > { %4050 = vmatprep.subr.mxu1 %v2806_v32  ;;  %4088 = vmatprep.subr.mxu0 %v2838_v33 }
 0xdd9   : > { %4051 = vmatpush3.msra.mxu1 %v2790_v24  ;;  %4089 = vmatpush3.msra.mxu0 %v2822_v18 }
 0xdda   : > { %4052 = vmatprep.subr.mxu1 %v2805_v19  ;;  %4090 = vmatprep.subr.mxu0 %v2837_v20 }
 0xddb   : > { %4053 = vmatpush3.msra.mxu1 %v2789_v21  ;;  %4091 = vmatpush3.msra.mxu0 %v2821_v22  ;;  %v3752_v21 = vld [vmem:[%s654_s21] ss:$0 sm:$0xff] }
 0xddc   : > { %4054 = vmatprep.subr.mxu1 %v2804_v25  ;;  %4092 = vmatprep.subr.mxu0 %v2836_v26 }
 0xddd   : > { %4055 = vmatpush3.msra.mxu1 %v2788_v28  ;;  %4093 = vmatpush3.msra.mxu0 %v2820_v46 }
 0xdde   : > { %4056 = vmatprep.subr.mxu1 %v2803_v49  ;;  %4094 = vmatprep.subr.mxu0 %v2835_v39 }
 0xddf   : > { %4057 = vmatpush3.msra.mxu1 %v2787_v29  ;;  %4095 = vmatpush3.msra.mxu0 %v2819_v30 }
 0xde0   : > { %4058 = vmatprep.subr.mxu1 %v2802_v52  ;;  %4096 = vmatprep.subr.mxu0 %v2834_v56 }
 0xde1   : > { %4059 = vmatpush3.msra.mxu1 %v2786_v59  ;;  %4097 = vmatpush3.msra.mxu0 %v2818_v43 }
 0xde2   : > { %4060 = vmatprep.subr.mxu1 %v2801_v45  ;;  %4098 = vmatprep.subr.mxu0 %v2833_v47 }
 0xde3   : > { %4061 = vmatpush3.msra.mxu1 %v2785_v55  ;;  %4099 = vmatpush3.msra.mxu0 %v2817_v48 }
 0xde4   : > { %4062 = vmatprep.subr.mxu1 %v2800_v16  ;;  %4100 = vmatprep.subr.mxu0 %v2832_v12 }
 0xde5   : > { %4063 = vmatpush3.msra.mxu1 %v2784_v15  ;;  %4101 = vmatpush3.msra.mxu0 %v2816_v50 }
 0xde6   : > { %4064 = vmatprep.subr.mxu1 %v2799_v54  ;;  %4102 = vmatprep.subr.mxu0 %v2831_v51 }
 0xde7   : > { %4065 = vmatpush3.msra.mxu1 %v2783_v53  ;;  %4103 = vmatpush3.msra.mxu0 %v2815_v57 }
 0xde8   : > { %4066 = vmatprep.subr.mxu1 %v2798_v61  ;;  %4104 = vmatprep.subr.mxu0 %v2830_v62 }
 0xde9   : > { %4067 = vmatpush3.msra.mxu1 %v2782_v7  ;;  %4105 = vmatpush3.msra.mxu0 %v2814_v63 }
 0xdea   : > { %3368 = vmatmul.mubr.f32.vlgmr.msra.gmra.mxu1 %v2570_v23  ;;  %3443 = vmatmul.mubr.f32.vlgmr.msra.gmra.mxu0 %v2572_v38 }
 0xdeb   : > { %3372 = vmatprep.mubr.f32.mxu1 %v2587_v34  ;;  %3447 = vmatprep.mubr.f32.mxu0 %v2589_v41 }
 0xdee   : > { %3373 = vmatmul.mubr.f32.gmra.mxu1 %v2586_v0  ;;  %3448 = vmatmul.mubr.f32.gmra.mxu0 %v2588_v1 }
 0xe3f   : > { %v3840_v2 = vpop.f32.mrf.mxu1  ;;  %v3878_v3 = vpop.f32.mrf.mxu0 }
 0xe41   : > { %v3841_v10 = vpop.f32.mrf.mxu1  ;;  %v3879_v5 = vpop.f32.mrf.mxu0 }
 0xe42   : > { %v3842_v20 = vadd.f32 %v3841_v10, %v3840_v2  ;;  %v3880_v39 = vadd.f32 %v3879_v5, %v3878_v3 }
 0xe44   : > { %v2920_v28 = vadd.f32 %v3842_v20, %v3752_v21 }
 0xe45   : > { %v3843_v31 = vpop.f32.mrf.mxu1  ;;  %v3881_v6 = vpop.f32.mrf.mxu0 }
 0xe46   : > { %v2995_v52 = vadd.f32 %v3880_v39, %v2920_v28 }
 0xe47   : > { %v3844_v8 = vpop.f32.mrf.mxu1  ;;  %v3882_v27 = vpop.f32.mrf.mxu0 }
 0xe48   : > { %v3845_v46 = vadd.f32 %v3844_v8, %v3843_v31  ;;  %v3883_v42 = vadd.f32 %v3882_v27, %v3881_v6 }
 0xe4a   : > { %v2925_v56 = vadd.f32 %v3845_v46, %v3752_v21 }
 0xe4c   : > { %v3000_v47 = vadd.f32 %v3883_v42, %v2925_v56 }
 0xe62   : > { %v3916_v13 = vpop.f32.mrf.mxu1  ;;  %v3954_v17 = vpop.f32.mrf.mxu0 }
 0xe64   : > { %v3917_v32 = vpop.f32.mrf.mxu1  ;;  %v3955_v33 = vpop.f32.mrf.mxu0 }
 0xe65   : > { %v3918_v29 = vadd.f32 %v3917_v32, %v3916_v13  ;;  %v3956_v55 = vadd.f32 %v3955_v33, %v3954_v17 }
 0xe67   : > { %v3070_v59 = vadd.f32 %v3918_v29, %v2995_v52  ;;  %v3754_v29 = vld [vmem:[%s5173_s15] ss:$0 sm:$0xff] }
 0xe68   : > { %v3919_v24 = vpop.f32.mrf.mxu1  ;;  %v3957_v18 = vpop.f32.mrf.mxu0 }
 0xe69   : > { %v3145_v12 = vadd.f32 %v3956_v55, %v3070_v59 }
 0xe6a   : > { %v3920_v19 = vpop.f32.mrf.mxu1  ;;  %v3958_v22 = vpop.f32.mrf.mxu0 }
 0xe6b   : > { %v3921_v43 = vadd.f32 %v3920_v19, %v3919_v24  ;;  %v3959_v15 = vadd.f32 %v3958_v22, %v3957_v18 }
 0xe6d   : > { %v3075_v60 = vadd.f32 %v3921_v43, %v3000_v47 }
 0xe6f   : > { %v3150_v11 = vadd.f32 %v3959_v15, %v3075_v60 }
 0xe86   : > { %v3992_v25 = vpop.f32.mrf.mxu1  ;;  %v4030_v26 = vpop.f32.mrf.mxu0 }
 0xe88   : > { %v3993_v49 = vpop.f32.mrf.mxu1  ;;  %v4031_v30 = vpop.f32.mrf.mxu0 }
 0xe89   : > { %v3994_v48 = vadd.f32 %v3993_v49, %v3992_v25  ;;  %v4032_v53 = vadd.f32 %v4031_v30, %v4030_v26  ;;  %v3753_v49 = vld [vmem:[%s634_s1] ss:$0 sm:$0xff] }
 0xe8b   : > { %v3220_v50 = vadd.f32 %v3994_v48, %v3145_v12 }
 0xe8c   : > { %v3995_v40 = vpop.f32.mrf.mxu1  ;;  %v4033_v45 = vpop.f32.mrf.mxu0 }
 0xe8d   : > { %v3295_v58 = vadd.f32 %v4032_v53, %v3220_v50 }
 0xe8e   : > { %v3996_v16 = vpop.f32.mrf.mxu1  ;;  %v4034_v14 = vpop.f32.mrf.mxu0 }
 0xe8f   : > { %v3997_v54 = vadd.f32 %v3996_v16, %v3995_v40  ;;  %v4035_v23 = vadd.f32 %v4034_v14, %v4033_v45 }
 0xe91   : > { %v3225_v61 = vadd.f32 %v3997_v54, %v3150_v11 }
 0xe93   : > { %v3300_v41 = vadd.f32 %v4035_v23, %v3225_v61 }
 0xeaa   : > { %v4068_v51 = vpop.f32.mrf.mxu1  ;;  %v4106_v9 = vpop.f32.mrf.mxu0 }
 0xeac   : > { %v4069_v57 = vpop.f32.mrf.mxu1  ;;  %v4107_v36 = vpop.f32.mrf.mxu0 }
 0xead   : > { %v4070_v62 = vadd.f32 %v4069_v57, %v4068_v51  ;;  %v4108_v37 = vadd.f32 %v4107_v36, %v4106_v9 }
 0xeae   : > { %v4071_v7 = vpop.f32.mrf.mxu1  ;;  %v4109_v63 = vpop.f32.mrf.mxu0 }
 0xeaf   : > { %v3370_v38 = vadd.f32 %v4070_v62, %v3295_v58 }
 0xeb0   : > { %v4072_v4 = vpop.f32.mrf.mxu1  ;;  %v4110_v34 = vpop.f32.mrf.mxu0 }
 0xeb1   : > { %v3445_v0 = vadd.f32 %v4108_v37, %v3370_v38  ;;  %v4073_v1 = vadd.f32 %v4072_v4, %v4071_v7  ;;  %v4111_v3 = vadd.f32 %v4110_v34, %v4109_v63 }
 0xeb3   : > { %v3375_v2 = vadd.f32 %v4073_v1, %v3300_v41  ;;  %v3453_v10 = vadd.f32 %v3445_v0, %v4622_v35 }
 0xeb5   : > { %v3450_v5 = vadd.f32 %v4111_v3, %v3375_v2  ;;  %v3457_v31 = vsel %vm677_vm1, %v3453_v10, 0.0 }
 0xeb6   : > { %3458 = vadd.xlane.f32.xlu1 %v3457_v31 }
 0xeb7   : > { %v3454_v6 = vadd.f32 %v3450_v5, %v4634_v44 }
 0xeb9   : > { %v3460_v8 = vsel %vm677_vm1, %v3454_v6, 0.0 }
 0xeba   : > { %3461 = vadd.xlane.f32.xlu0 %v3460_v8 }
 0xf3f   : > { %v3459_v27 = vpop.xlane.xlu1 %3458 }
 0xf40   : > { %v3463_v13 = vmul.f32 0.03125, %v3459_v27 }
 0xf42   : > { %v3465_v17 = vsub.f32 %v3453_v10, %v3463_v13 }
 0xf43   : > { %v3462_v32 = vpop.xlane.xlu0 %3461 }
 0xf44   : > { %v3464_v33 = vmul.f32 0.03125, %v3462_v32  ;;  %v3467_v24 = vmul.f32 %v3465_v17, %v3465_v17 }
 0xf46   : > { %v3466_v18 = vsub.f32 %v3454_v6, %v3464_v33  ;;  %v3469_v19 = vsel %vm677_vm1, %v3467_v24, 0.0 }
 0xf47   : > { %3470 = vadd.xlane.f32.xlu1 %v3469_v19 }
 0xf48   : > { %v3468_v35 = vmul.f32 %v3466_v18, %v3466_v18 }
 0xf4a   : > { %v3472_v20 = vsel %vm677_vm1, %v3468_v35, 0.0 }
 0xf4b   : > { %3473 = vadd.xlane.f32.xlu0 %v3472_v20 }
 0xfd0   : > { %v3471_v44 = vpop.xlane.xlu1 %3470 }
 0xfd1   : > { %v3475_v21 = vmul.f32 0.03125, %v3471_v44 }
 0xfd3   : > { %v3477_v22 = vadd.f32 1e-05, %v3475_v21 }
 0xfd4   : > { %v3474_v25 = vpop.xlane.xlu0 %3473 }
 0xfd5   : > { %4249 = vrsqrt.f32 %v3477_v22  ;;  %v3476_v26 = vmul.f32 0.03125, %v3474_v25 }
 0xfd7   : > { %v3478_v28 = vadd.f32 1e-05, %v3476_v26 }
 0xfd9   : > { %4251 = vrsqrt.f32 %v3478_v28 }
 0xfe2   : > { %v4250_v46 = vpop.eup %4249 }
 0xfe3   : > { %v3481_v39 = vmul.f32 %v4250_v46, %v3465_v17 }
 0xfe5   : > { %v3489_v30 = vmul.f32 %v3753_v49, %v3481_v39 }
 0xfe6   : > { %v4252_v52 = vpop.eup %4251 }
 0xfe7   : > { %v3497_v56 = vadd.f32 %v3754_v29, %v3489_v30  ;;  %v3482_v40 = vmul.f32 %v4252_v52, %v3466_v18 }
 0xfe9   : > { %3499 = vst.msk [vmem:[#allocation2] sm:$0xff] %vm677_vm1, %v3497_v56  ;;  %v3490_v42 = vmul.f32 %v3753_v49, %v3482_v40  ;;  %3504 = sbr.rel (%p3755_p5) target bundleno = 4391 (0x1127), region = 88 }
 0xfeb   : > { %v3498_v59 = vadd.f32 %v3754_v29, %v3490_v42 }
 0xfed   : > { %3500 = vst.msk [vmem:[#allocation2 + $0x8] sm:$0xff] %vm677_vm1, %v3498_v59 }
 0xfee   : > { %v3507_v43 = vsel %vm677_vm1, %v3497_v56, 0.0  ;;  %v3510_v45 = vsel %vm677_vm1, %v3498_v59, 0.0  ;;  %v3756_v61 = vld [vmem:[%s5174_s20] ss:$0 sm:$0xff] }
 0xfef   : > { %3508 = vadd.xlane.f32.xlu0 %v3507_v43  ;;  %v3757_v7 = vld [vmem:[%s5175_s25] ss:$0 sm:$0xff] }
 0xff3   : > { %3511 = vadd.xlane.f32.xlu0 %v3510_v45 }
0x1078   : > { %v3509_v47 = vpop.xlane.xlu0 %3508 }
0x1079   : > { %v3513_v55 = vmul.f32 0.03125, %v3509_v47 }
0x107b   : > { %v3515_v48 = vsub.f32 %v3497_v56, %v3513_v55 }
0x107c   : > { %v3512_v16 = vpop.xlane.xlu0 %3511 }
0x107d   : > { %v3514_v12 = vmul.f32 0.03125, %v3512_v16  ;;  %v3517_v60 = vmul.f32 %v3515_v48, %v3515_v48 }
0x107f   : > { %v3516_v14 = vsub.f32 %v3498_v59, %v3514_v12  ;;  %v3519_v15 = vsel %vm677_vm1, %v3517_v60, 0.0 }
0x1080   : > { %3520 = vadd.xlane.f32.xlu1 %v3519_v15 }
0x1081   : > { %v3518_v50 = vmul.f32 %v3516_v14, %v3516_v14 }
0x1083   : > { %v3522_v54 = vsel %vm677_vm1, %v3518_v50, 0.0 }
0x1084   : > { %3523 = vadd.xlane.f32.xlu1 %v3522_v54 }
0x1109   : > { %v3521_v51 = vpop.xlane.xlu1 %3520 }
0x110a   : > { %v3525_v9 = vmul.f32 0.03125, %v3521_v51 }
0x110c   : > { %v3527_v11 = vadd.f32 1e-05, %v3525_v9 }
0x110d   : > { %v3524_v53 = vpop.xlane.xlu1 %3523 }
0x110e   : > { %4253 = vrsqrt.f32 %v3527_v11  ;;  %v3526_v57 = vmul.f32 0.03125, %v3524_v53 }
0x1110   : > { %v3528_v36 = vadd.f32 1e-05, %v3526_v57 }
0x1112   : > { %4255 = vrsqrt.f32 %v3528_v36 }
0x111b   : > { %v4254_v58 = vpop.eup %4253 }
0x111c   : > { %v3531_v62 = vmul.f32 %v4254_v58, %v3515_v48 }
0x111e   : > { %v3539_v63 = vmul.f32 %v3756_v61, %v3531_v62 }
0x111f   : > { %v4256_v23 = vpop.eup %4255 }
0x1120   : > { %v3547_v38 = vadd.f32 %v3757_v7, %v3539_v63  ;;  %v3532_v37 = vmul.f32 %v4256_v23, %v3516_v14 }
0x1122   : > { %3549 = vst.msk [vmem:[%s5176_s18] sm:$0xff] %vm677_vm1, %v3547_v38  ;;  %v3540_v4 = vmul.f32 %v3756_v61, %v3532_v37 }
0x1124   : > { %v3548_v34 = vadd.f32 %v3757_v7, %v3540_v4 }
0x1126   : > { %3550 = vst.msk [vmem:[%s5177_s28 + $0x8] sm:$0xff] %vm677_vm1, %v3548_v34 }
0x1127 PF: > { %s5178_s13 = sld [smem:[#allocation3_spill]] }
0x112d   : > { %s25_s18 = sadd.s32 1, %s5178_s13  }
0x112e   : > { %p22_p6 = scmp.ge.s32.totalorder %s25_s18, 4  }
0x1130   :  { %24 = sbr.rel (!%p22_p6) target bundleno = 7 (0x7), region = 147 }

// kernel: transformer_forward.5
= control target key start
LH: loop header
LB: loop body
LE: loop exit
PB: predicated region body
PF: predicated region fallthrough
CT: control target
= control target key end

     0   :  { %s7542_s0 = inlined_call_operand.vmem [shape: f32[16,32], index: 0, kind: input, shape index: {}]   ;;  %s7543_s1 = inlined_call_operand.vmem [shape: f32[16,32], index: 1, kind: input, shape index: {}]   ;;  %s7544_s2 = inlined_call_operand.vmem [shape: f32[6,32,96], index: 2, kind: input, shape index: {}]   ;;  %s7545_s3 = inlined_call_operand.vmem [shape: f32[6,1,96], index: 3, kind: input, shape index: {}]   ;;  %s7546_s4 = inlined_call_operand.vmem [shape: f32[6,32,32], index: 4, kind: input, shape index: {}]   ;;  %s7547_s5 = inlined_call_operand.vmem [shape: f32[6,1,32], index: 5, kind: input, shape index: {}]   ;;  %s7548_s6 = inlined_call_operand.vmem [shape: f32[6,32,32], index: 6, kind: input, shape index: {}]   ;;  %s7549_s7 = inlined_call_operand.vmem [shape: f32[6,1,32], index: 7, kind: input, shape index: {}]   ;;  %s7550_s8 = inlined_call_operand.vmem [shape: f32[6,32,64], index: 8, kind: input, shape index: {}]   ;;  %s7551_s9 = inlined_call_operand.vmem [shape: f32[6,1,64], index: 9, kind: input, shape index: {}]   ;;  %s7552_s10 = inlined_call_operand.vmem [shape: f32[6,32,32], index: 10, kind: input, shape index: {}]   ;;  %s7553_s11 = inlined_call_operand.vmem [shape: f32[6,1,32], index: 11, kind: input, shape index: {}]   ;;  %s7554_s12 = inlined_call_operand.vmem [shape: f32[6,1,32], index: 12, kind: input, shape index: {}]   ;;  %s7555_s13 = inlined_call_operand.vmem [shape: f32[6,1,32], index: 13, kind: input, shape index: {}]   ;;  %s7556_s14 = inlined_call_operand.vmem [shape: f32[6,1,32], index: 14, kind: input, shape index: {}]   ;;  %s7557_s15 = inlined_call_operand.vmem [shape: f32[6,1,32], index: 15, kind: input, shape index: {}]   ;;  %s7558_s16 = inlined_call_operand.vmem [shape: f32[6,1,32], index: 16, kind: input, shape index: {}]   ;;  %s7559_s17 = inlined_call_operand.vmem [shape: f32[6,1,32], index: 17, kind: input, shape index: {}]   ;;  %s7560_s18 = inlined_call_operand.vmem [shape: f32[6,32,2048], index: 18, kind: input, shape index: {}]   ;;  %s7561_s19 = inlined_call_operand.vmem [shape: f32[6,1,2048], index: 19, kind: input, shape index: {}]   ;;  %s7562_s20 = inlined_call_operand.vmem [shape: f32[6,2048,32], index: 20, kind: input, shape index: {}]   ;;  %s7563_s21 = inlined_call_operand.vmem [shape: f32[6,1,32], index: 21, kind: input, shape index: {}]   ;;  %s7564_s22 = inlined_call_operand.vmem [shape: f32[1,32], index: 22, kind: input, shape index: {}]   ;;  %s7565_s23 = inlined_call_operand.vmem [shape: f32[1,32], index: 23, kind: input, shape index: {}]   ;;  %s7566_s24 = inlined_call_operand.vmem [shape: f32[32,8], index: 24, kind: input, shape index: {}]   ;;  %s7567_s25 = inlined_call_operand.vmem [shape: f32[1,8], index: 25, kind: input, shape index: {}]   ;;  %s7568_s26 = inlined_call_operand.hbm [shape: f32[16,8], index: 26, kind: output, shape index: {}]  }
   0x1   :  { %7586 = sst [smem:[#allocation11_spill]] %s7542_s0 }
   0x2   :  { %7587 = sst [smem:[#allocation12_spill]] %s7543_s1 }
   0x3   :  { %7588 = sst [smem:[#allocation13_spill]] %s7544_s2 }
   0x4   :  { %7589 = sst [smem:[#allocation14_spill]] %s7545_s3 }
   0x5   :  { %7590 = sst [smem:[#allocation15_spill]] %s7546_s4 }
   0x6   :  { %7591 = sst [smem:[#allocation16_spill]] %s7547_s5 }
   0x7   :  { %7592 = sst [smem:[#allocation17_spill]] %s7548_s6 }
   0x8   :  { %7593 = sst [smem:[#allocation18_spill]] %s7549_s7 }
   0x9   :  { %7594 = sst [smem:[#allocation19_spill]] %s7550_s8 }
   0xa   :  { %7595 = sst [smem:[#allocation20_spill]] %s7551_s9 }
   0xb   :  { %7596 = sst [smem:[#allocation21_spill]] %s7552_s10 }
   0xc   :  { %7597 = sst [smem:[#allocation22_spill]] %s7564_s22 }
   0xd   :  { %7598 = sst [smem:[#allocation23_spill]] %s7565_s23 }
   0xe   :  { %7599 = sst [smem:[#allocation24_spill]] %s7566_s24 }
   0xf   :  { %7600 = sst [smem:[#allocation25_spill]] %s7567_s25 }
  0x10   :  { %7601 = sst [smem:[#allocation26_spill]] %s7568_s26 }
  0x11   :  { %31 = vsyncpa [#allocation4], 0  ;;  %s6481_s27 = smov 0  }
  0x12 LB: > { %7602 = sst [smem:[#allocation6_spill]] %s6327_s27  ;;  %s6487_s3 = sadd.s32 4294967295, %s6327_s27   ;;  %s6327_s27 = sphi %s6481_s27, %s37_s27  }
  0x13   : > { %7603 = sst [smem:[#allocation7_spill]] %s6487_s3  ;;  %p5480_p0 = scmp.ge.s32.totalorder %s6327_s27, 1 }
  0x14   : > { %p873_p1 = scmp.lt.s32.totalorder %s6327_s27, 7 }
  0x16   : > { %p874_p2 = pnand %p5480_p0, %p873_p1 }
  0x18   : > { %877 = sbr.rel (%p874_p2) target bundleno = 7338 (0x1caa), region = 124 }
  0x1d   : > { %p1008_p3 = scmp.lt.s32.totalorder %s6487_s3, 5  ;;  %s7605_s2 = sld [smem:[#allocation13_spill]] }
  0x1e   : > { %s7607_s1 = sld [smem:[#allocation15_spill]] }
  0x1f   : > { %s6493_s7 = scalar_select %p1008_p3, %s6487_s3, 5 }
  0x20   : > { %s7610_s4 = sld [smem:[#allocation17_spill]] }
  0x21   : > { %s5593_s28 = sshll.u32 %s6493_s7, 5  ;;  %s7613_s10 = sld [smem:[#allocation19_spill]] }
  0x22   : > { %s7615_s24 = sld [smem:[#allocation21_spill]]  ;;  %s5598_s30 = sshll.u32 %s6493_s7, 9 }
  0x23   : > { %s6503_s5 = scalar_lea.vmem %s7605_s2, %s5593_s28  ;;  %s1053_s2 = scalar_lea.vmem %s7555_s13, %s6493_s7 }
  0x24   : > { %7606 = sst [smem:[#allocation8_spill]] %s6503_s5  ;;  %s6508_s27 = scalar_lea.vmem %s7607_s1, %s5593_s28 }
  0x25   : > { %7608 = sst [smem:[#allocation9_spill]] %s6508_s27  ;;  %s5493_s27 = sshll.u32 %s6493_s7, 4 }
  0x26   : > { %s6517_s29 = scalar_lea.vmem %s7610_s4, %s5593_s28  ;;  %s6575_s23 = scalar_lea.vmem %s7561_s19, %s5493_s27 }
  0x27   : > { %7611 = sst [smem:[#allocation10_spill]] %s6517_s29  ;;  %s6526_s6 = scalar_lea.vmem %s7613_s10, %s5593_s28 }
  0x28   : > { %s6535_s8 = scalar_lea.vmem %s7615_s24, %s5593_s28  ;;  %s6569_s10 = scalar_lea.vmem %s7560_s18, %s5598_s30 }
  0x29   : > { %s5599_s22 = sshll.u32 %s6493_s7, 11  ;;  %s7616_s29 = sld [smem:[#allocation7_spill]] }
  0x2a   : > { %s6581_s24 = scalar_lea.vmem %s7562_s20, %s5599_s22 }
  0x2f   : > { %p5496_p4 = scmp.ne.s32.totalorder %s7616_s29, 0 }
  0x30   : > { %s7617_s5 = sld [smem:[#allocation11_spill]] (!%p5496_p4) }
  0x31   : > { %1086 = sbr.rel (%p5496_p4) target bundleno = 56 (0x38), region = 128 }
  0x36   : > { %v1087_v0 = vld [vmem:[%s7617_s5] sm:$0xff]  ;;  %vm1089_vm0 = vcmask 261120   ;;  %v1088_v1 = vld [vmem:[%s7617_s5 + $0x8] sm:$0xff] }
  0x37   : > { %1090 = vst.msk [vmem:[#allocation2] sm:$0xff] %vm1089_vm0, %v1087_v0  ;;  %1091 = vst.msk [vmem:[#allocation2 + $0x8] sm:$0xff] %vm1089_vm0, %v1088_v1 }
  0x38 PF: > { %s7618_s28 = sld [smem:[#allocation8_spill]]  ;;  %vm1107_vm1 = vcmask 261120   ;;  %vm1238_vm2 = vcmask 64512   ;;  %s6329_s0 = smov 96   ;;  %v1189_v15 = vlaneseq  ;;  %vm1326_vm5 = vcmask 130048  }
  0x39   : > { %s7619_s22 = sld [smem:[#allocation14_spill]]  ;;  %s6330_s4 = smov 64   ;;  %vm2076_vm6 = vcmask 195584  }
  0x3a   : > { %v6627_v16 = vshrl.u32 %v1189_v15, 7  ;;  %v1193_v17 = vand.u32 127, %v1189_v15  ;;  %s6331_s3 = smov 120   ;;  %s6332_s30 = smov 88  }
  0x3b   : > { %s6333_s25 = smov 56   ;;  %s6334_s27 = smov 80  }
  0x3c   : > { %v1191_v18 = vadd.s32 8, %v6627_v16  ;;  %v1198_v19 = vand.u32 1, %v6627_v16  ;;  %v1222_v21 = vand.u32 1, %v1193_v17  ;;  %s6336_s29 = smov 48   ;;  %s7584_s1 = smov 72  }
  0x3d   : > { %s7630_s9 = scalar_lea.vmem %s7554_s12, %s6493_s7 }
  0x3e   : > { %v1099_v2 = vld [vmem:[%s7618_s28 + $0x18] sm:$0xff]  ;;  %v1098_v3 = vld [vmem:[%s7618_s28 + $0x10] sm:$0xff]  ;;  %v6596_v4 = vld [vmem:[#allocation2] sm:$0xff]  ;;  %v1205_v22 = vand.u32 1, %v1191_v18  ;;  %vm6631_vm3 = vcmp.eq.s32.totalorder %v1198_v19, %v1222_v21 }
  0x3f   : > { %6004 = vmatprep.subr.mxu0 %v1099_v2  ;;  %v1097_v5 = vld [vmem:[%s7618_s28 + $0x8] sm:$0xff]  ;;  %6012 = vmatprep.mubr.msk.f32.mxu0 %vm1107_vm1, %v6596_v4  ;;  %v1096_v6 = vld [vmem:[%s7618_s28] sm:$0xff]  ;;  %s7620_s26 = scalar_lea.vmem %s7619_s22, %s6493_s7  ;;  %s6335_s28 = smov 112  }
  0x40   : > { %6005 = vmatpush3.msra.mxu0 %v1099_v2  ;;  %v6602_v7 = vld [vmem:[#allocation2 + $0x8] sm:$0xff]  ;;  %v5497_v8 = vld [vmem:[%s7620_s26] ss:$0 sm:$0xff]  ;;  %vm6635_vm4 = vcmp.eq.s32.totalorder %v1205_v22, %v1222_v21  ;;  %s6338_s22 = smov 104   ;;  %s6339_s26 = smov 40  }
  0x41   : > { %6006 = vmatprep.subr.mxu0 %v1098_v3 }
  0x42   : > { %6007 = vmatpush3.msra.mxu0 %v1098_v3 }
  0x43   : > { %6008 = vmatprep.subr.mxu0 %v1097_v5 }
  0x44   : > { %6009 = vmatpush3.msra.mxu0 %v1097_v5 }
  0x45   : > { %6010 = vmatprep.subr.mxu0 %v1096_v6 }
  0x46   : > { %6011 = vmatpush3.msra.mxu0 %v1096_v6 }
  0x47   : > { %6013 = vmatmul.mubr.msk.f32.vlgmr.msra.gmra.mxu0 %vm1107_vm1, %v6602_v7 }
 0x107   : > { %v6014_v9 = vpop.f32.mrf.mxu0 }
 0x108   : > { %v6611_v10 = vadd.f32 %v6014_v9, %v5497_v8 }
 0x109   : > { %v1180_v11 = vpop.f32.mrf.mxu0 }
 0x10a   : > { %v6613_v12 = vadd.f32 %v5497_v8, %v1180_v11  ;;  %1236 = vrot.lane.b32.xlu0 %v6611_v10, %s6329_s0 }
 0x10c   : > { %6019 = vmatprep.mubr.msk.f32.mxu1 %vm1238_vm2, %v6613_v12 }
 0x10e   : > { %1234 = vrot.lane.b32.xlu0 %v6613_v12, %s6329_s0 }
 0x17c   : > { %v1237_v13 = vpop.permute.xlu0 %1236 }
 0x17d   : > { %6015 = vmatprep.subr.msk.mxu1 %vm1238_vm2, %v1237_v13 }
 0x17e   : > { %6016 = vmatpush3.xpose.msk.msra.mxu1 %vm1238_vm2, %v1237_v13 }
 0x180   : > { %v1235_v14 = vpop.permute.xlu0 %1234 }
 0x181   : > { %6017 = vmatprep.subr.msk.mxu1 %vm1238_vm2, %v1235_v14 }
 0x182   : > { %6018 = vmatpush3.xpose.msk.msra.mxu1 %vm1238_vm2, %v1235_v14 }
 0x185   : > { %6020 = vmatmul.mubr.msk.f32.vlgmr.msra.gmra.mxu1 %vm1238_vm2, %v6611_v10 }
 0x245   : > { %v6021_v20 = vpop.f32.mrf.mxu1 }
 0x246   : > { %v1323_v25 = vmul.f32 0.35355338, %v6021_v20 }
 0x247   : > { %v1313_v23 = vpop.f32.mrf.mxu1 }
 0x248   : > { %v1322_v26 = vmul.f32 0.35355338, %v1313_v23  ;;  %v1325_v30 = vsel %vm6635_vm4, %v1323_v25, -1e+30 }
 0x249   : > { %v1330_v31 = vsel %vm1326_vm5, %v1325_v30, -inf }
 0x24a   : > { %v1324_v28 = vsel %vm6631_vm3, %v1322_v26, -1e+30 }
 0x24b   : > { %v1327_v29 = vsel %vm1326_vm5, %v1324_v28, -inf }
 0x24c   : > { %1328 = vmax.xlane.f32.xlu1 %v1327_v29 }
 0x250   : > { %1331 = vmax.xlane.f32.xlu1 %v1330_v31 }
 0x2d5   : > { %v1329_v32 = vpop.xlane.xlu1 %1328 }
 0x2d6   : > { %v1333_v33 = vsub.f32 %v1324_v28, %v1329_v32 }
 0x2d8   : > { %v1335_v34 = vmul.f32 1.442695, %v1333_v33 }
 0x2d9   : > { %v1332_v35 = vpop.xlane.xlu1 %1331 }
 0x2da   : > { %6213 = vpow2.f32 %v1335_v34  ;;  %v1334_v36 = vsub.f32 %v1325_v30, %v1332_v35 }
 0x2dc   : > { %v1337_v37 = vmul.f32 1.442695, %v1334_v36 }
 0x2de   : > { %6215 = vpow2.f32 %v1337_v37 }
 0x2e7   : > { %v6214_v38 = vpop.eup %6213 }
 0x2e8   : > { %v1339_v39 = vsel %vm1326_vm5, %v6214_v38, 0.0 }
 0x2e9   : > { %1340 = vadd.xlane.f32.xlu0 %v1339_v39 }
 0x2eb   : > { %v6216_v40 = vpop.eup %6215 }
 0x2ec   : > { %v1342_v41 = vsel %vm1326_vm5, %v6216_v40, 0.0 }
 0x2ed   : > { %1343 = vadd.xlane.f32.xlu1 %v1342_v41 }
 0x2fe   : > { %1351 = vrot.lane.b32.xlu1 %v6611_v10, %s6330_s4 }
 0x2ff   : > { %1436 = vrot.lane.b32.xlu0 %v6613_v12, %s6331_s3 }
 0x302   : > { %1349 = vrot.lane.b32.xlu1 %v6613_v12, %s6330_s4  ;;  %s7582_s4 = smov 8  }
 0x306   : > { %1442 = vrot.lane.b32.xlu1 %v6611_v10, %s6332_s30 }
 0x30a   : > { %1440 = vrot.lane.b32.xlu1 %v6613_v12, %s6332_s30 }
 0x30e   : > { %1438 = vrot.lane.b32.xlu1 %v6611_v10, %s6331_s3 }
 0x372   : > { %v1341_v42 = vpop.xlane.xlu0 %1340 }
 0x373   : > { %6217 = vrcp.f32 %v1341_v42 }
 0x376   : > { %v1344_v43 = vpop.xlane.xlu1 %1343  ;;  %v1437_v52 = vpop.permute.xlu0 %1436 }
 0x377   : > { %6219 = vrcp.f32 %v1344_v43 }
 0x37a   : > { %v1352_v44 = vpop.permute.xlu1 %1351 }
 0x37b   : > { %6022 = vmatprep.subr.mxu1 %v1352_v44 }
 0x37c   : > { %6023 = vmatpush3.msra.mxu1 %v1352_v44 }
 0x37e   : > { %v1350_v45 = vpop.permute.xlu1 %1349 }
 0x37f   : > { %6024 = vmatprep.subr.mxu1 %v1350_v45 }
 0x380   : > { %v6218_v46 = vpop.eup %6217  ;;  %6025 = vmatpush3.msra.mxu1 %v1350_v45 }
 0x381   : > { %v1346_v47 = vmul.f32 %v6218_v46, %v6214_v38 }
 0x382   : > { %v1443_v48 = vpop.permute.xlu1 %1442 }
 0x383   : > { %6026 = vmatprep.mubr.msk.f32.mxu1 %vm1326_vm5, %v1346_v47  ;;  %6029 = vmatprep.subr.msk.mxu1 %vm1238_vm2, %v1443_v48 }
 0x384   : > { %v6220_v49 = vpop.eup %6219 }
 0x385   : > { %v1348_v50 = vmul.f32 %v6220_v49, %v6216_v40 }
 0x386   : > { %v1441_v51 = vpop.permute.xlu1 %1440 }
 0x387   : > { %6027 = vmatmul.mubr.msk.f32.vlgmr.msra.gmra.mxu1 %vm1326_vm5, %v1348_v50 }
 0x388   : > { %6030 = vmatpush3.xpose.msk.msra.mxu1 %vm1238_vm2, %v1443_v48  ;;  %6033 = vmatprep.mubr.msk.f32.mxu1 %vm1238_vm2, %v1437_v52 }
 0x389   : > { %6031 = vmatprep.subr.msk.mxu1 %vm1238_vm2, %v1441_v51 }
 0x38a   : > { %v1439_v53 = vpop.permute.xlu1 %1438 }
 0x38c   : > { %6032 = vmatpush3.xpose.msk.msra.mxu1 %vm1238_vm2, %v1441_v51 }
 0x38f   : > { %6034 = vmatmul.mubr.msk.f32.vlgmr.msra.gmra.mxu1 %vm1238_vm2, %v1439_v53 }
 0x447   : > { %v6665_v54 = vpop.f32.mrf.mxu1 }
 0x449   : > { %v6667_v55 = vpop.f32.mrf.mxu1 }
 0x44f   : > { %v6035_v56 = vpop.f32.mrf.mxu1 }
 0x450   : > { %v1528_v57 = vmul.f32 0.35355338, %v6035_v56 }
 0x451   : > { %v1518_v58 = vpop.f32.mrf.mxu1 }
 0x452   : > { %v1527_v59 = vmul.f32 0.35355338, %v1518_v58  ;;  %v1530_v60 = vsel %vm6635_vm4, %v1528_v57, -1e+30 }
 0x453   : > { %v1534_v61 = vsel %vm1326_vm5, %v1530_v60, -inf }
 0x454   : > { %1535 = vmax.xlane.f32.xlu0 %v1534_v61  ;;  %v1529_v62 = vsel %vm6631_vm3, %v1527_v59, -1e+30 }
 0x455   : > { %v1531_v63 = vsel %vm1326_vm5, %v1529_v62, -inf }
 0x456   : > { %1532 = vmax.xlane.f32.xlu1 %v1531_v63 }
 0x467   : > { %1555 = vrot.lane.b32.xlu1 %v6611_v10, %s6333_s25 }
 0x46a   : > { %1553 = vrot.lane.b32.xlu0 %v6613_v12, %s6333_s25  ;;  %s7580_s25 = smov 16  }
 0x46b   : > { %1646 = vrot.lane.b32.xlu1 %v6611_v10, %s6334_s27 }
 0x46e   : > { %1640 = vrot.lane.b32.xlu0 %v6613_v12, %s6335_s28 }
 0x46f   : > { %1644 = vrot.lane.b32.xlu1 %v6613_v12, %s6334_s27 }
 0x4dd   : > { %v1536_v0 = vpop.xlane.xlu0 %1535 }
 0x4de   : > { %v1538_v1 = vsub.f32 %v1530_v60, %v1536_v0 }
 0x4df   : > { %v1533_v2 = vpop.xlane.xlu1 %1532 }
 0x4e0   : > { %v1541_v3 = vmul.f32 1.442695, %v1538_v1  ;;  %v1537_v5 = vsub.f32 %v1529_v62, %v1533_v2 }
 0x4e1   : > { %v1554_v9 = vpop.permute.xlu0 %1553 }
 0x4e2   : > { %6221 = vpow2.f32 %v1541_v3  ;;  %v1539_v6 = vmul.f32 1.442695, %v1537_v5 }
 0x4e3   : > { %v1556_v8 = vpop.permute.xlu1 %1555 }
 0x4e4   : > { %6223 = vpow2.f32 %v1539_v6  ;;  %6036 = vmatprep.subr.mxu0 %v1556_v8 }
 0x4e5   : > { %6037 = vmatpush3.msra.mxu0 %v1556_v8  ;;  %v1641_v26 = vpop.permute.xlu0 %1640 }
 0x4e6   : > { %6038 = vmatprep.subr.mxu0 %v1554_v9 }
 0x4e7   : > { %6039 = vmatpush3.msra.mxu0 %v1554_v9  ;;  %v1647_v11 = vpop.permute.xlu1 %1646 }
 0x4e8   : > { %6043 = vmatprep.subr.msk.mxu0 %vm1238_vm2, %v1647_v11 }
 0x4eb   : > { %v1645_v18 = vpop.permute.xlu1 %1644 }
 0x4ef   : > { %v6222_v13 = vpop.eup %6221 }
 0x4f0   : > { %v1546_v14 = vsel %vm1326_vm5, %v6222_v13, 0.0 }
 0x4f1   : > { %v6224_v15 = vpop.eup %6223  ;;  %1547 = vadd.xlane.f32.xlu1 %v1546_v14 }
 0x4f2   : > { %v1543_v17 = vsel %vm1326_vm5, %v6224_v15, 0.0 }
 0x4f5   : > { %1544 = vadd.xlane.f32.xlu1 %v1543_v17 }
 0x506   : > { %1642 = vrot.lane.b32.xlu1 %v6611_v10, %s6335_s28 }
 0x57a   : > { %v1548_v19 = vpop.xlane.xlu1 %1547 }
 0x57b   : > { %6225 = vrcp.f32 %v1548_v19 }
 0x57e   : > { %v1545_v20 = vpop.xlane.xlu1 %1544 }
 0x57f   : > { %6227 = vrcp.f32 %v1545_v20 }
 0x582   : > { %v1643_v28 = vpop.permute.xlu1 %1642 }
 0x588   : > { %v6226_v21 = vpop.eup %6225 }
 0x589   : > { %v1552_v25 = vmul.f32 %v6226_v21, %v6222_v13 }
 0x58c   : > { %v6228_v22 = vpop.eup %6227 }
 0x58d   : > { %v1550_v23 = vmul.f32 %v6228_v22, %v6224_v15 }
 0x58f   : > { %6040 = vmatprep.mubr.msk.f32.mxu0 %vm1326_vm5, %v1550_v23 }
 0x590   : > { %6041 = vmatmul.mubr.msk.f32.vlgmr.msra.gmra.mxu0 %vm1326_vm5, %v1552_v25 }
 0x591   : > { %6044 = vmatpush3.xpose.msk.msra.mxu0 %vm1238_vm2, %v1647_v11  ;;  %6047 = vmatprep.mubr.msk.f32.mxu0 %vm1238_vm2, %v1641_v26 }
 0x592   : > { %6045 = vmatprep.subr.msk.mxu0 %vm1238_vm2, %v1645_v18 }
 0x595   : > { %6046 = vmatpush3.xpose.msk.msra.mxu0 %vm1238_vm2, %v1645_v18 }
 0x598   : > { %6048 = vmatmul.mubr.msk.f32.vlgmr.msra.gmra.mxu0 %vm1238_vm2, %v1643_v28 }
 0x650   : > { %v6695_v29 = vpop.f32.mrf.mxu0 }
 0x652   : > { %v6697_v30 = vpop.f32.mrf.mxu0 }
 0x658   : > { %v6049_v31 = vpop.f32.mrf.mxu0 }
 0x659   : > { %v1732_v32 = vmul.f32 0.35355338, %v6049_v31 }
 0x65a   : > { %v1722_v33 = vpop.f32.mrf.mxu0 }
 0x65b   : > { %v1731_v34 = vmul.f32 0.35355338, %v1722_v33  ;;  %v1734_v35 = vsel %vm6635_vm4, %v1732_v32, -1e+30 }
 0x65c   : > { %v1738_v36 = vsel %vm1326_vm5, %v1734_v35, -inf }
 0x65d   : > { %1739 = vmax.xlane.f32.xlu1 %v1738_v36  ;;  %v1733_v37 = vsel %vm6631_vm3, %v1731_v34, -1e+30 }
 0x65e   : > { %v1735_v38 = vsel %vm1326_vm5, %v1733_v37, -inf }
 0x65f   : > { %1736 = vmax.xlane.f32.xlu0 %v1735_v38 }
 0x66e   : > { %1759 = vrot.lane.b32.xlu1 %v6611_v10, %s6336_s29 }
 0x672   : > { %1850 = vrot.lane.b32.xlu1 %v6611_v10, %s7584_s1 }
 0x676   : > { %1848 = vrot.lane.b32.xlu1 %v6613_v12, %s7584_s1  ;;  %s7631_s1 = sld [smem:[#allocation20_spill]] }
 0x67a   : > { %1846 = vrot.lane.b32.xlu1 %v6611_v10, %s6338_s22 }
 0x6e6   : > { %v1740_v39 = vpop.xlane.xlu1 %1739 }
 0x6e7   : > { %v1742_v40 = vsub.f32 %v1734_v35, %v1740_v39 }
 0x6e8   : > { %v1737_v41 = vpop.xlane.xlu0 %1736 }
 0x6e9   : > { %v1745_v42 = vmul.f32 1.442695, %v1742_v40  ;;  %v1741_v43 = vsub.f32 %v1733_v37, %v1737_v41 }
 0x6ea   : > { %v1760_v44 = vpop.permute.xlu1 %1759 }
 0x6eb   : > { %6229 = vpow2.f32 %v1745_v42  ;;  %v1743_v45 = vmul.f32 1.442695, %v1741_v43  ;;  %6050 = vmatprep.subr.mxu1 %v1760_v44 }
 0x6ec   : > { %6051 = vmatpush3.msra.mxu1 %v1760_v44 }
 0x6ed   : > { %6231 = vpow2.f32 %v1743_v45 }
 0x6ee   : > { %v1851_v53 = vpop.permute.xlu1 %1850 }
 0x6f2   : > { %v1849_v61 = vpop.permute.xlu1 %1848 }
 0x6f6   : > { %v1847_v62 = vpop.permute.xlu1 %1846 }
 0x6f8   : > { %v6230_v46 = vpop.eup %6229 }
 0x6f9   : > { %v1750_v47 = vsel %vm1326_vm5, %v6230_v46, 0.0 }
 0x6fa   : > { %v6232_v48 = vpop.eup %6231  ;;  %1751 = vadd.xlane.f32.xlu0 %v1750_v47 }
 0x6fb   : > { %v1747_v49 = vsel %vm1326_vm5, %v6232_v48, 0.0 }
 0x6fe   : > { %1748 = vadd.xlane.f32.xlu0 %v1747_v49 }
 0x714   : > { %1757 = vrot.lane.b32.xlu0 %v6613_v12, %s6336_s29  ;;  %s7625_s29 = sld [smem:[#allocation9_spill]] }
 0x718   : > { %1844 = vrot.lane.b32.xlu0 %v6613_v12, %s6338_s22 }
 0x71a   : > { %v2081_v33 = vld [vmem:[%s7625_s29 + $0x10] sm:$0xff]  ;;  %v2080_v34 = vld [vmem:[%s7625_s29 + $0x8] sm:$0xff]  ;;  %v2079_v35 = vld [vmem:[%s7625_s29] sm:$0xff] }
 0x783   : > { %v1752_v50 = vpop.xlane.xlu0 %1751 }
 0x784   : > { %6233 = vrcp.f32 %v1752_v50 }
 0x787   : > { %v1749_v51 = vpop.xlane.xlu0 %1748 }
 0x788   : > { %6235 = vrcp.f32 %v1749_v51 }
 0x78b   : > { %v1758_v52 = vpop.permute.xlu0 %1757 }
 0x78c   : > { %6052 = vmatprep.subr.mxu1 %v1758_v52 }
 0x78d   : > { %6053 = vmatpush3.msra.mxu1 %v1758_v52 }
 0x78e   : > { %6057 = vmatprep.subr.msk.mxu1 %vm1238_vm2, %v1851_v53 }
 0x78f   : > { %v1845_v60 = vpop.permute.xlu0 %1844 }
 0x791   : > { %v6234_v56 = vpop.eup %6233 }
 0x792   : > { %v1756_v59 = vmul.f32 %v6234_v56, %v6230_v46 }
 0x795   : > { %v6236_v57 = vpop.eup %6235 }
 0x796   : > { %v1754_v58 = vmul.f32 %v6236_v57, %v6232_v48 }
 0x798   : > { %6054 = vmatprep.mubr.msk.f32.mxu1 %vm1326_vm5, %v1754_v58 }
 0x799   : > { %6055 = vmatmul.mubr.msk.f32.vlgmr.msra.gmra.mxu1 %vm1326_vm5, %v1756_v59 }
 0x79a   : > { %6058 = vmatpush3.xpose.msk.msra.mxu1 %vm1238_vm2, %v1851_v53  ;;  %6061 = vmatprep.mubr.msk.f32.mxu1 %vm1238_vm2, %v1845_v60 }
 0x79b   : > { %6059 = vmatprep.subr.msk.mxu1 %vm1238_vm2, %v1849_v61 }
 0x79e   : > { %6060 = vmatpush3.xpose.msk.msra.mxu1 %vm1238_vm2, %v1849_v61 }
 0x7a1   : > { %6062 = vmatmul.mubr.msk.f32.vlgmr.msra.gmra.mxu1 %vm1238_vm2, %v1847_v62 }
 0x859   : > { %v6056_v63 = vpop.f32.mrf.mxu1 }
 0x85b   : > { %v1835_v0 = vpop.f32.mrf.mxu1 }
 0x861   : > { %v6063_v1 = vpop.f32.mrf.mxu1 }
 0x862   : > { %v1936_v2 = vmul.f32 0.35355338, %v6063_v1 }
 0x863   : > { %v1926_v3 = vpop.f32.mrf.mxu1 }
 0x864   : > { %v1935_v5 = vmul.f32 0.35355338, %v1926_v3  ;;  %v1938_v6 = vsel %vm6635_vm4, %v1936_v2, -1e+30  ;;  %v2313_v3 = vld [vmem:[%s6526_s6 + $0x18] sm:$0xff] }
 0x865   : > { %v1942_v8 = vsel %vm1326_vm5, %v1938_v6, -inf }
 0x866   : > { %1943 = vmax.xlane.f32.xlu1 %v1942_v8  ;;  %v1937_v9 = vsel %vm6631_vm3, %v1935_v5, -1e+30  ;;  %v2312_v5 = vld [vmem:[%s6526_s6 + $0x10] sm:$0xff] }
 0x867   : > { %v1939_v11 = vsel %vm1326_vm5, %v1937_v9, -inf }
 0x868   : > { %1940 = vmax.xlane.f32.xlu0 %v1939_v11 }
 0x877   : > { %1963 = vrot.lane.b32.xlu1 %v6611_v10, %s6339_s26 }
 0x87b   : > { %2050 = vrot.lane.b32.xlu1 %v6697_v30, %s7582_s4 }
 0x87f   : > { %2052 = vrot.lane.b32.xlu1 %v6695_v29, %s7582_s4  ;;  %s7628_s4 = sld [smem:[#allocation10_spill]] }
 0x883   : > { %2060 = vrot.lane.b32.xlu1 %v6056_v63, %s7580_s25 }
 0x885   : > { %v2220_v11 = vld [vmem:[%s7628_s4 + $0x10] sm:$0xff] }
 0x8ef   : > { %v1944_v13 = vpop.xlane.xlu1 %1943 }
 0x8f0   : > { %v1946_v14 = vsub.f32 %v1938_v6, %v1944_v13  ;;  %v2221_v6 = vld [vmem:[%s7628_s4 + $0x18] sm:$0xff]  ;;  %v2310_v13 = vld [vmem:[%s6526_s6] sm:$0xff] }
 0x8f1   : > { %v1941_v15 = vpop.xlane.xlu0 %1940  ;;  %6082 = vmatprep.subr.mxu1 %v2221_v6 }
 0x8f2   : > { %v1949_v17 = vmul.f32 1.442695, %v1946_v14  ;;  %v1945_v18 = vsub.f32 %v1937_v9, %v1941_v15  ;;  %v2311_v9 = vld [vmem:[%s6526_s6 + $0x8] sm:$0xff]  ;;  %6083 = vmatpush3.msra.mxu1 %v2221_v6 }
 0x8f3   : > { %v1964_v19 = vpop.permute.xlu1 %1963  ;;  %v2219_v14 = vld [vmem:[%s7628_s4 + $0x8] sm:$0xff]  ;;  %6084 = vmatprep.subr.mxu1 %v2220_v11 }
 0x8f4   : > { %6237 = vpow2.f32 %v1949_v17  ;;  %v1947_v20 = vmul.f32 1.442695, %v1945_v18  ;;  %6064 = vmatprep.subr.mxu0 %v1964_v19  ;;  %6085 = vmatpush3.msra.mxu1 %v2220_v11  ;;  %v2218_v17 = vld [vmem:[%s7628_s4] sm:$0xff]  ;;  %s7633_s4 = sld [smem:[#allocation18_spill]] }
 0x8f5   : > { %6065 = vmatpush3.msra.mxu0 %v1964_v19  ;;  %6086 = vmatprep.subr.mxu1 %v2219_v14 }
 0x8f6   : > { %6239 = vpow2.f32 %v1947_v20  ;;  %6087 = vmatpush3.msra.mxu1 %v2219_v14 }
 0x8f7   : > { %v2051_v38 = vpop.permute.xlu1 %2050  ;;  %6088 = vmatprep.subr.mxu1 %v2218_v17 }
 0x8f8   : > { %v2072_v42 = vsel %vm1238_vm2, %v6667_v55, %v2051_v38  ;;  %6089 = vmatpush3.msra.mxu1 %v2218_v17 }
 0x8fb   : > { %v2053_v39 = vpop.permute.xlu1 %2052 }
 0x8fc   : > { %v2073_v44 = vsel %vm1238_vm2, %v6665_v54, %v2053_v39 }
 0x8ff   : > { %v2061_v40 = vpop.permute.xlu1 %2060 }
 0x900   : > { %v2075_v47 = vsel %vm1326_vm5, %v2073_v44, %v2061_v40 }
 0x901   : > { %v6238_v10 = vpop.eup %6237 }
 0x902   : > { %v1954_v21 = vsel %vm1326_vm5, %v6238_v10, 0.0 }
 0x903   : > { %v6240_v22 = vpop.eup %6239  ;;  %1955 = vadd.xlane.f32.xlu0 %v1954_v21 }
 0x904   : > { %v1951_v23 = vsel %vm1326_vm5, %v6240_v22, 0.0 }
 0x907   : > { %1952 = vadd.xlane.f32.xlu0 %v1951_v23 }
 0x91d   : > { %1961 = vrot.lane.b32.xlu0 %v6613_v12, %s6339_s26  ;;  %v2082_v12 = vld [vmem:[%s7625_s29 + $0x18] sm:$0xff]  ;;  %s7578_s26 = smov 24   ;;  %s7634_s29 = scalar_lea.vmem %s7633_s4, %s6493_s7 }
 0x91e   : > { %s7641_s4 = scalar_lea.vmem %s7557_s15, %s6493_s7 }
 0x921   : > { %2058 = vrot.lane.b32.xlu0 %v1835_v0, %s7580_s25 }
 0x98c   : > { %v1956_v25 = vpop.xlane.xlu0 %1955 }
 0x98d   : > { %6241 = vrcp.f32 %v1956_v25  ;;  %v5527_v25 = vld [vmem:[%s7630_s9] ss:$0 sm:$0xff]  ;;  %s7632_s9 = scalar_lea.vmem %s7631_s1, %s6493_s7 }
 0x990   : > { %v1953_v26 = vpop.xlane.xlu0 %1952 }
 0x991   : > { %6243 = vrcp.f32 %v1953_v26 }
 0x994   : > { %v1962_v28 = vpop.permute.xlu0 %1961 }
 0x995   : > { %6066 = vmatprep.subr.mxu0 %v1962_v28 }
 0x996   : > { %6067 = vmatpush3.msra.mxu0 %v1962_v28  ;;  %v5528_v28 = vld [vmem:[%s1053_s2] ss:$0 sm:$0xff] }
 0x997   : > { %6071 = vmatprep.subr.mxu0 %v2082_v12 }
 0x998   : > { %v2059_v41 = vpop.permute.xlu0 %2058 }
 0x999   : > { %v2074_v45 = vsel %vm1326_vm5, %v2072_v42, %v2059_v41  ;;  %v5529_v41 = vld [vmem:[%s7634_s29] ss:$0 sm:$0xff] }
 0x99a   : > { %v6242_v29 = vpop.eup %6241 }
 0x99b   : > { %v1960_v32 = vmul.f32 %v6242_v29, %v6238_v10 }
 0x99e   : > { %v6244_v30 = vpop.eup %6243 }
 0x99f   : > { %v1958_v31 = vmul.f32 %v6244_v30, %v6240_v22 }
 0x9a1   : > { %6068 = vmatprep.mubr.msk.f32.mxu0 %vm1326_vm5, %v1958_v31 }
 0x9a2   : > { %6069 = vmatmul.mubr.msk.f32.vlgmr.msra.gmra.mxu0 %vm1326_vm5, %v1960_v32 }
 0x9a3   : > { %6072 = vmatpush3.msra.mxu0 %v2082_v12 }
 0x9a4   : > { %6073 = vmatprep.subr.mxu0 %v2081_v33 }
 0x9a5   : > { %6074 = vmatpush3.msra.mxu0 %v2081_v33 }
 0x9a6   : > { %6075 = vmatprep.subr.mxu0 %v2080_v34 }
 0x9a7   : > { %6076 = vmatpush3.msra.mxu0 %v2080_v34  ;;  %v5532_v34 = vld [vmem:[%s7632_s9] ss:$0 sm:$0xff]  ;;  %s7640_s9 = scalar_lea.vmem %s7556_s14, %s6493_s7 }
 0x9a8   : > { %6077 = vmatprep.subr.mxu0 %v2079_v35 }
 0x9a9   : > { %6078 = vmatpush3.msra.mxu0 %v2079_v35 }
 0x9aa   : > { %6093 = vmatprep.subr.mxu0 %v2313_v3 }
 0xa62   : > { %v6070_v36 = vpop.f32.mrf.mxu0 }
 0xa63   : > { %2068 = vrot.lane.b32.xlu1 %v6070_v36, %s7578_s26 }
 0xa64   : > { %v2039_v37 = vpop.f32.mrf.mxu0 }
 0xa65   : > { %2066 = vrot.lane.b32.xlu0 %v2039_v37, %s7578_s26  ;;  %s7626_s26 = sld [smem:[#allocation16_spill]] }
 0xa6b   : > { %s7627_s25 = scalar_lea.vmem %s7626_s26, %s6493_s7  ;;  %s7629_s26 = sld [smem:[#allocation12_spill]] }
 0xa6c   : > { %v5524_v55 = vld [vmem:[%s7627_s25] ss:$0 sm:$0xff] }
 0xa71   : > { %v1094_v8 = vld [vmem:[%s7629_s26] sm:$0xff]  ;;  %v1095_v15 = vld [vmem:[%s7629_s26 + $0x8] sm:$0xff] }
 0xad5   : > { %v2069_v43 = vpop.permute.xlu1 %2068 }
 0xad6   : > { %v2078_v49 = vsel %vm2076_vm6, %v2075_v47, %v2069_v43 }
 0xad7   : > { %v2067_v46 = vpop.permute.xlu0 %2066 }
 0xad8   : > { %v2077_v48 = vsel %vm2076_vm6, %v2074_v45, %v2067_v46 }
 0xad9   : > { %6079 = vmatprep.mubr.msk.f32.mxu0 %vm1107_vm1, %v2077_v48 }
 0xada   : > { %6080 = vmatmul.mubr.msk.f32.vlgmr.msra.gmra.mxu0 %vm1107_vm1, %v2078_v49 }
 0xadb   : > { %6094 = vmatpush3.msra.mxu0 %v2313_v3  ;;  %6101 = vmatprep.mubr.msk.f32.mxu0 %vm1107_vm1, %v1094_v8 }
 0xadc   : > { %6095 = vmatprep.subr.mxu0 %v2312_v5 }
 0xadd   : > { %6096 = vmatpush3.msra.mxu0 %v2312_v5 }
 0xade   : > { %6097 = vmatprep.subr.mxu0 %v2311_v9 }
 0xadf   : > { %6098 = vmatpush3.msra.mxu0 %v2311_v9 }
 0xae0   : > { %6099 = vmatprep.subr.mxu0 %v2310_v13 }
 0xae1   : > { %6100 = vmatpush3.msra.mxu0 %v2310_v13 }
 0xae2   : > { %6102 = vmatmul.mubr.msk.f32.vlgmr.msra.gmra.mxu0 %vm1107_vm1, %v1095_v15 }
 0xb9a   : > { %v6081_v50 = vpop.f32.mrf.mxu0 }
 0xb9b   : > { %v2168_v54 = vadd.f32 %v6081_v50, %v5524_v55 }
 0xb9c   : > { %v2162_v51 = vpop.f32.mrf.mxu0 }
 0xb9d   : > { %v2163_v52 = vadd.f32 %v5524_v55, %v2162_v51  ;;  %v2172_v53 = vadd.f32 %v2168_v54, %v6602_v7 }
 0xb9f   : > { %v2178_v56 = vsel %vm1107_vm1, %v2172_v53, 0.0  ;;  %v2171_v57 = vadd.f32 %v2163_v52, %v6596_v4 }
 0xba0   : > { %2179 = vadd.xlane.f32.xlu1 %v2178_v56 }
 0xba1   : > { %v2175_v58 = vsel %vm1107_vm1, %v2171_v57, 0.0 }
 0xba2   : > { %2176 = vadd.xlane.f32.xlu0 %v2175_v58  ;;  %v6103_v35 = vpop.f32.mrf.mxu0 }
 0xba3   : > { %v6809_v36 = vadd.f32 %v6103_v35, %v5532_v34 }
 0xba4   : > { %v2393_v37 = vpop.f32.mrf.mxu0 }
 0xba5   : > { %6104 = vmatprep.subr.msk.mxu1 %vm1238_vm2, %v6809_v36  ;;  %v6815_v38 = vadd.f32 %v5532_v34, %v2393_v37 }
 0xbb1   : > { %2608 = vrot.lane.b32.xlu1 %v6809_v36, %s6331_s3 }
 0xc29   : > { %v2180_v59 = vpop.xlane.xlu1 %2179 }
 0xc2a   : > { %v2183_v60 = vmul.f32 0.03125, %v2180_v59 }
 0xc2b   : > { %v2177_v61 = vpop.xlane.xlu0 %2176 }
 0xc2c   : > { %v2182_v62 = vmul.f32 0.03125, %v2177_v61  ;;  %v2185_v63 = vsub.f32 %v2172_v53, %v2183_v60 }
 0xc2d   : > { %v2609_v39 = vpop.permute.xlu1 %2608 }
 0xc2e   : > { %v2184_v0 = vsub.f32 %v2171_v57, %v2182_v62  ;;  %v2187_v2 = vmul.f32 %v2185_v63, %v2185_v63 }
 0xc30   : > { %v2186_v7 = vmul.f32 %v2184_v0, %v2184_v0  ;;  %v2191_v4 = vsel %vm1107_vm1, %v2187_v2, 0.0 }
 0xc32   : > { %v2188_v1 = vsel %vm1107_vm1, %v2186_v7, 0.0 }
 0xc33   : > { %2189 = vadd.xlane.f32.xlu0 %v2188_v1 }
 0xc37   : > { %2192 = vadd.xlane.f32.xlu0 %v2191_v4 }
 0xc4d   : > { %2606 = vrot.lane.b32.xlu0 %v6815_v38, %s6331_s3 }
 0xcbc   : > { %v2190_v18 = vpop.xlane.xlu0 %2189 }
 0xcbd   : > { %v2194_v19 = vmul.f32 0.03125, %v2190_v18 }
 0xcbf   : > { %v2196_v20 = vadd.f32 1e-05, %v2194_v19 }
 0xcc0   : > { %v2193_v10 = vpop.xlane.xlu0 %2192 }
 0xcc1   : > { %6245 = vrsqrt.f32 %v2196_v20  ;;  %v2195_v21 = vmul.f32 0.03125, %v2193_v10 }
 0xcc3   : > { %v2197_v22 = vadd.f32 1e-05, %v2195_v21 }
 0xcc4   : > { %v2607_v45 = vpop.permute.xlu0 %2606 }
 0xcc5   : > { %6247 = vrsqrt.f32 %v2197_v22 }
 0xcce   : > { %v6246_v23 = vpop.eup %6245 }
 0xccf   : > { %v2200_v26 = vmul.f32 %v6246_v23, %v2184_v0 }
 0xcd1   : > { %v2208_v29 = vmul.f32 %v5527_v25, %v2200_v26 }
 0xcd2   : > { %v6248_v30 = vpop.eup %6247 }
 0xcd3   : > { %v2201_v31 = vmul.f32 %v6248_v30, %v2185_v63  ;;  %v6796_v32 = vadd.f32 %v5528_v28, %v2208_v29 }
 0xcd5   : > { %v2209_v12 = vmul.f32 %v5527_v25, %v2201_v31  ;;  %6090 = vmatprep.mubr.msk.f32.mxu1 %vm1107_vm1, %v6796_v32 }
 0xcd7   : > { %v6800_v33 = vadd.f32 %v5528_v28, %v2209_v12 }
 0xcd9   : > { %6091 = vmatmul.mubr.msk.f32.vlgmr.msra.gmra.mxu1 %vm1107_vm1, %v6800_v33 }
 0xcda   : > { %6105 = vmatpush3.xpose.msk.msra.mxu1 %vm1238_vm2, %v6809_v36 }
 0xcdb   : > { %6106 = vmatprep.subr.msk.mxu1 %vm1238_vm2, %v6815_v38 }
 0xcde   : > { %6107 = vmatpush3.xpose.msk.msra.mxu1 %vm1238_vm2, %v6815_v38 }
 0xcdf   : > { %6118 = vmatprep.subr.msk.mxu1 %vm1238_vm2, %v2609_v39 }
 0xd99   : > { %v6092_v40 = vpop.f32.mrf.mxu1 }
 0xd9a   : > { %v6833_v44 = vadd.f32 %v6092_v40, %v5529_v41 }
 0xd9b   : > { %v2301_v42 = vpop.f32.mrf.mxu1 }
 0xd9c   : > { %v6831_v43 = vadd.f32 %v5529_v41, %v2301_v42 }
 0xd9e   : > { %2602 = vrot.lane.b32.xlu1 %v6831_v43, %s6331_s3  ;;  %6108 = vmatprep.mubr.msk.f32.mxu1 %vm1238_vm2, %v6831_v43 }
 0xd9f   : > { %6109 = vmatmul.mubr.msk.f32.vlgmr.msra.gmra.mxu1 %vm1238_vm2, %v6833_v44 }
 0xda0   : > { %6119 = vmatpush3.xpose.msk.msra.mxu1 %vm1238_vm2, %v2609_v39 }
 0xda1   : > { %6120 = vmatprep.subr.msk.mxu1 %vm1238_vm2, %v2607_v45 }
 0xda2   : > { %2604 = vrot.lane.b32.xlu1 %v6833_v44, %s6331_s3  ;;  %s7636_s3 = smov 8  }
 0xda4   : > { %6121 = vmatpush3.xpose.msk.msra.mxu1 %vm1238_vm2, %v2607_v45 }
 0xe10   : > { %v2603_v46 = vpop.permute.xlu1 %2602 }
 0xe11   : > { %6122 = vmatprep.mubr.msk.f32.mxu1 %vm1238_vm2, %v2603_v46 }
 0xe14   : > { %v2605_v47 = vpop.permute.xlu1 %2604 }
 0xe15   : > { %6123 = vmatmul.mubr.msk.f32.vlgmr.msra.gmra.mxu1 %vm1238_vm2, %v2605_v47 }
 0xe5f   : > { %v6110_v48 = vpop.f32.mrf.mxu1 }
 0xe60   : > { %v2490_v49 = vmul.f32 0.35355338, %v6110_v48 }
 0xe61   : > { %v2480_v55 = vpop.f32.mrf.mxu1 }
 0xe62   : > { %v2489_v50 = vmul.f32 0.35355338, %v2480_v55  ;;  %v2492_v54 = vsel %vm6635_vm4, %v2490_v49, -1e+30 }
 0xe63   : > { %v2496_v51 = vsel %vm1326_vm5, %v2492_v54, -inf }
 0xe64   : > { %2497 = vmax.xlane.f32.xlu1 %v2496_v51  ;;  %v2491_v52 = vsel %vm6631_vm3, %v2489_v50, -1e+30 }
 0xe65   : > { %v2493_v53 = vsel %vm1326_vm5, %v2491_v52, -inf }
 0xe66   : > { %2494 = vmax.xlane.f32.xlu0 %v2493_v53 }
 0xe75   : > { %2517 = vrot.lane.b32.xlu1 %v6809_v36, %s6329_s0 }
 0xe79   : > { %2721 = vrot.lane.b32.xlu1 %v6809_v36, %s6332_s30 }
 0xe7d   : > { %2719 = vrot.lane.b32.xlu1 %v6815_v38, %s6332_s30  ;;  %s7637_s30 = smov 16  }
 0xed5   : > { %v6124_v56 = vpop.f32.mrf.mxu1 }
 0xed6   : > { %v2694_v58 = vmul.f32 0.35355338, %v6124_v56 }
 0xed7   : > { %v2684_v57 = vpop.f32.mrf.mxu1 }
 0xed8   : > { %v2693_v59 = vmul.f32 0.35355338, %v2684_v57  ;;  %v2696_v62 = vsel %vm6635_vm4, %v2694_v58, -1e+30 }
 0xed9   : > { %v2700_v63 = vsel %vm1326_vm5, %v2696_v62, -inf }
 0xeda   : > { %v2695_v60 = vsel %vm6631_vm3, %v2693_v59, -1e+30 }
 0xedb   : > { %v2697_v61 = vsel %vm1326_vm5, %v2695_v60, -inf }
 0xedc   : > { %2698 = vmax.xlane.f32.xlu0 %v2697_v61 }
 0xee0   : > { %2701 = vmax.xlane.f32.xlu0 %v2700_v63 }
 0xeed   : > { %v2498_v0 = vpop.xlane.xlu1 %2497 }
 0xeee   : > { %v2500_v3 = vsub.f32 %v2492_v54, %v2498_v0 }
 0xeef   : > { %v2495_v7 = vpop.xlane.xlu0 %2494 }
 0xef0   : > { %v2499_v1 = vsub.f32 %v2491_v52, %v2495_v7  ;;  %v2503_v5 = vmul.f32 1.442695, %v2500_v3 }
 0xef1   : > { %v2518_v2 = vpop.permute.xlu1 %2517 }
 0xef2   : > { %v2501_v4 = vmul.f32 1.442695, %v2499_v1  ;;  %6111 = vmatprep.subr.mxu0 %v2518_v2 }
 0xef3   : > { %6112 = vmatpush3.msra.mxu0 %v2518_v2 }
 0xef4   : > { %6249 = vpow2.f32 %v2501_v4 }
 0xef5   : > { %6251 = vpow2.f32 %v2503_v5  ;;  %v2722_v10 = vpop.permute.xlu1 %2721 }
 0xef6   : > { %2515 = vrot.lane.b32.xlu0 %v6815_v38, %s6329_s0  ;;  %s7635_s0 = smov 72  }
 0xef9   : > { %v2720_v26 = vpop.permute.xlu1 %2719 }
 0xf01   : > { %v6250_v6 = vpop.eup %6249 }
 0xf02   : > { %v2505_v8 = vsel %vm1326_vm5, %v6250_v6, 0.0  ;;  %v6252_v9 = vpop.eup %6251 }
 0xf03   : > { %2506 = vadd.xlane.f32.xlu1 %v2505_v8  ;;  %v2508_v11 = vsel %vm1326_vm5, %v6252_v9, 0.0 }
 0xf14   : > { %2810 = vrot.lane.b32.xlu1 %v6815_v38, %s6335_s28 }
 0xf15   : > { %2509 = vadd.xlane.f32.xlu0 %v2508_v11 }
 0xf65   : > { %v2699_v13 = vpop.xlane.xlu0 %2698 }
 0xf66   : > { %v2703_v14 = vsub.f32 %v2695_v60, %v2699_v13 }
 0xf68   : > { %v2705_v15 = vmul.f32 1.442695, %v2703_v14 }
 0xf69   : > { %v2702_v17 = vpop.xlane.xlu0 %2701 }
 0xf6a   : > { %6253 = vpow2.f32 %v2705_v15  ;;  %v2704_v18 = vsub.f32 %v2696_v62, %v2702_v17 }
 0xf6c   : > { %v2707_v19 = vmul.f32 1.442695, %v2704_v18 }
 0xf6d   : > { %v2516_v20 = vpop.permute.xlu0 %2515 }
 0xf6e   : > { %6255 = vpow2.f32 %v2707_v19  ;;  %6113 = vmatprep.subr.mxu0 %v2516_v20 }
 0xf6f   : > { %6114 = vmatpush3.msra.mxu0 %v2516_v20 }
 0xf70   : > { %6125 = vmatprep.subr.mxu0 %v2722_v10 }
 0xf77   : > { %v6254_v21 = vpop.eup %6253 }
 0xf78   : > { %v2709_v22 = vsel %vm1326_vm5, %v6254_v21, 0.0 }
 0xf79   : > { %2710 = vadd.xlane.f32.xlu1 %v2709_v22 }
 0xf7b   : > { %v6256_v23 = vpop.eup %6255 }
 0xf7c   : > { %v2712_v25 = vsel %vm1326_vm5, %v6256_v23, 0.0 }
 0xf7d   : > { %2713 = vadd.xlane.f32.xlu0 %v2712_v25 }
 0xf8a   : > { %2808 = vrot.lane.b32.xlu1 %v6833_v44, %s6335_s28 }
 0xf8c   : > { %v2507_v28 = vpop.xlane.xlu1 %2506 }
 0xf8d   : > { %6257 = vrcp.f32 %v2507_v28 }
 0xf90   : > { %v2811_v35 = vpop.permute.xlu1 %2810 }
 0xf93   : > { %2812 = vrot.lane.b32.xlu0 %v6809_v36, %s6335_s28 }
 0xf97   : > { %2806 = vrot.lane.b32.xlu0 %v6831_v43, %s6335_s28  ;;  %s7645_s28 = sld [smem:[#allocation7_spill]] }
 0xf9a   : > { %v6258_v29 = vpop.eup %6257 }
 0xf9b   : > { %v2512_v30 = vmul.f32 %v6258_v29, %v6250_v6 }
 0xf9d   : > { %6115 = vmatprep.mubr.msk.f32.mxu0 %vm1326_vm5, %v2512_v30  ;;  %p5583_p5 = scmp.ne.s32.totalorder %s7645_s28, 5 }
 0xf9e   : > { %v2510_v31 = vpop.xlane.xlu0 %2509  ;;  %s7646_s6 = sld [smem:[#allocation24_spill]] (!%p5583_p5) }
 0xf9f   : > { %6259 = vrcp.f32 %v2510_v31  ;;  %s7647_s29 = sld [smem:[#allocation22_spill]] (!%p5583_p5) }
 0xfa0   : > { %s7649_s28 = sld [smem:[#allocation25_spill]] (!%p5583_p5) }
 0xfac   : > { %v6260_v12 = vpop.eup %6259 }
 0xfad   : > { %v2514_v34 = vmul.f32 %v6260_v12, %v6252_v9 }
 0xfaf   : > { %6116 = vmatmul.mubr.msk.f32.vlgmr.msra.gmra.mxu0 %vm1326_vm5, %v2514_v34 }
 0xfb0   : > { %6126 = vmatpush3.msra.mxu0 %v2722_v10 }
 0xfb1   : > { %6127 = vmatprep.subr.mxu0 %v2720_v26 }
 0xfb2   : > { %6128 = vmatpush3.msra.mxu0 %v2720_v26 }
0x1002   : > { %v2711_v37 = vpop.xlane.xlu1 %2710 }
0x1003   : > { %6261 = vrcp.f32 %v2711_v37 }
0x1006   : > { %v2714_v39 = vpop.xlane.xlu0 %2713  ;;  %v2809_v48 = vpop.permute.xlu1 %2808 }
0x1007   : > { %6263 = vrcp.f32 %v2714_v39 }
0x100a   : > { %v2813_v40 = vpop.permute.xlu0 %2812 }
0x100b   : > { %6132 = vmatprep.subr.msk.mxu0 %vm1238_vm2, %v2813_v40 }
0x100e   : > { %v2807_v47 = vpop.permute.xlu0 %2806 }
0x1010   : > { %v6262_v41 = vpop.eup %6261 }
0x1011   : > { %v2716_v42 = vmul.f32 %v6262_v41, %v6254_v21 }
0x1013   : > { %6129 = vmatprep.mubr.msk.f32.mxu0 %vm1326_vm5, %v2716_v42 }
0x1014   : > { %v6264_v45 = vpop.eup %6263 }
0x1015   : > { %v2718_v46 = vmul.f32 %v6264_v45, %v6256_v23 }
0x1017   : > { %6130 = vmatmul.mubr.msk.f32.vlgmr.msra.gmra.mxu0 %vm1326_vm5, %v2718_v46 }
0x1018   : > { %6133 = vmatpush3.xpose.msk.msra.mxu0 %vm1238_vm2, %v2813_v40  ;;  %6136 = vmatprep.mubr.msk.f32.mxu0 %vm1238_vm2, %v2807_v47 }
0x1019   : > { %6134 = vmatprep.subr.msk.mxu0 %vm1238_vm2, %v2811_v35 }
0x101c   : > { %6135 = vmatpush3.xpose.msk.msra.mxu0 %vm1238_vm2, %v2811_v35 }
0x101f   : > { %6137 = vmatmul.mubr.msk.f32.vlgmr.msra.gmra.mxu0 %vm1238_vm2, %v2809_v48 }
0x106f   : > { %v6890_v49 = vpop.f32.mrf.mxu0 }
0x1071   : > { %v6892_v55 = vpop.f32.mrf.mxu0 }
0x10d7   : > { %v6894_v50 = vpop.f32.mrf.mxu0 }
0x10d9   : > { %v6896_v54 = vpop.f32.mrf.mxu0 }
0x10df   : > { %v6138_v51 = vpop.f32.mrf.mxu0 }
0x10e0   : > { %v2898_v52 = vmul.f32 0.35355338, %v6138_v51  ;;  %v3246_v51 = vld [vmem:[%s6535_s8 + $0x10] sm:$0xff] }
0x10e1   : > { %v2888_v53 = vpop.f32.mrf.mxu0 }
0x10e2   : > { %v2897_v56 = vmul.f32 0.35355338, %v2888_v53  ;;  %v2900_v57 = vsel %vm6635_vm4, %v2898_v52, -1e+30  ;;  %v3245_v52 = vld [vmem:[%s6535_s8 + $0x8] sm:$0xff]  ;;  %v3244_v53 = vld [vmem:[%s6535_s8] sm:$0xff] }
0x10e3   : > { %v2904_v58 = vsel %vm1326_vm5, %v2900_v57, -inf }
0x10e4   : > { %2905 = vmax.xlane.f32.xlu1 %v2904_v58  ;;  %v2899_v59 = vsel %vm6631_vm3, %v2897_v56, -1e+30 }
0x10e5   : > { %v2901_v60 = vsel %vm1326_vm5, %v2899_v59, -inf }
0x10e6   : > { %2902 = vmax.xlane.f32.xlu0 %v2901_v60 }
0x10f5   : > { %2925 = vrot.lane.b32.xlu1 %v6809_v36, %s6334_s27 }
0x10f9   : > { %3016 = vrot.lane.b32.xlu1 %v6809_v36, %s6338_s22 }
0x10fd   : > { %3014 = vrot.lane.b32.xlu1 %v6815_v38, %s6338_s22 }
0x1101   : > { %3012 = vrot.lane.b32.xlu1 %v6833_v44, %s6338_s22 }
0x116d   : > { %v2906_v61 = vpop.xlane.xlu1 %2905 }
0x116e   : > { %v2908_v62 = vsub.f32 %v2900_v57, %v2906_v61 }
0x116f   : > { %v2903_v63 = vpop.xlane.xlu0 %2902 }
0x1170   : > { %v2911_v0 = vmul.f32 1.442695, %v2908_v62  ;;  %v2907_v7 = vsub.f32 %v2899_v59, %v2903_v63 }
0x1171   : > { %v2926_v1 = vpop.permute.xlu1 %2925 }
0x1172   : > { %6265 = vpow2.f32 %v2911_v0  ;;  %v2909_v2 = vmul.f32 1.442695, %v2907_v7  ;;  %6139 = vmatprep.subr.mxu1 %v2926_v1 }
0x1173   : > { %6140 = vmatpush3.msra.mxu1 %v2926_v1 }
0x1174   : > { %6267 = vpow2.f32 %v2909_v2 }
0x1175   : > { %v3017_v11 = vpop.permute.xlu1 %3016 }
0x117f   : > { %v6266_v4 = vpop.eup %6265 }
0x1180   : > { %v2916_v3 = vsel %vm1326_vm5, %v6266_v4, 0.0 }
0x1181   : > { %v6268_v5 = vpop.eup %6267  ;;  %2917 = vadd.xlane.f32.xlu0 %v2916_v3 }
0x1182   : > { %v2913_v6 = vsel %vm1326_vm5, %v6268_v5, 0.0 }
0x1185   : > { %2914 = vadd.xlane.f32.xlu0 %v2913_v6 }
0x119b   : > { %2923 = vrot.lane.b32.xlu0 %v6815_v38, %s6334_s27  ;;  %s7638_s27 = smov 24  }
0x119f   : > { %3010 = vrot.lane.b32.xlu0 %v6831_v43, %s6338_s22  ;;  %v3015_v43 = vpop.permute.xlu1 %3014  ;;  %s7639_s22 = scalar_lea.vmem %s7553_s11, %s6493_s7 }
0x11a3   : > { %v3013_v19 = vpop.permute.xlu1 %3012 }
0x120a   : > { %v2918_v44 = vpop.xlane.xlu0 %2917 }
0x120b   : > { %6269 = vrcp.f32 %v2918_v44 }
0x120e   : > { %v2915_v8 = vpop.xlane.xlu0 %2914 }
0x120f   : > { %6271 = vrcp.f32 %v2915_v8 }
0x1212   : > { %v2924_v9 = vpop.permute.xlu0 %2923 }
0x1213   : > { %6141 = vmatprep.subr.mxu1 %v2924_v9 }
0x1214   : > { %6142 = vmatpush3.msra.mxu1 %v2924_v9 }
0x1215   : > { %6146 = vmatprep.subr.msk.mxu1 %vm1238_vm2, %v3017_v11 }
0x1216   : > { %v3011_v18 = vpop.permute.xlu0 %3010 }
0x1218   : > { %v6270_v13 = vpop.eup %6269 }
0x1219   : > { %v2922_v17 = vmul.f32 %v6270_v13, %v6266_v4 }
0x121c   : > { %v6272_v14 = vpop.eup %6271 }
0x121d   : > { %v2920_v15 = vmul.f32 %v6272_v14, %v6268_v5 }
0x121f   : > { %6143 = vmatprep.mubr.msk.f32.mxu1 %vm1326_vm5, %v2920_v15 }
0x1220   : > { %6144 = vmatmul.mubr.msk.f32.vlgmr.msra.gmra.mxu1 %vm1326_vm5, %v2922_v17 }
0x1221   : > { %6147 = vmatpush3.xpose.msk.msra.mxu1 %vm1238_vm2, %v3017_v11  ;;  %6150 = vmatprep.mubr.msk.f32.mxu1 %vm1238_vm2, %v3011_v18 }
0x1222   : > { %6148 = vmatprep.subr.msk.mxu1 %vm1238_vm2, %v3015_v43 }
0x1225   : > { %6149 = vmatpush3.xpose.msk.msra.mxu1 %vm1238_vm2, %v3015_v43 }
0x1228   : > { %6151 = vmatmul.mubr.msk.f32.vlgmr.msra.gmra.mxu1 %vm1238_vm2, %v3013_v19 }
0x12e0   : > { %v6145_v20 = vpop.f32.mrf.mxu1 }
0x12e2   : > { %v3001_v10 = vpop.f32.mrf.mxu1 }
0x12e8   : > { %v6152_v21 = vpop.f32.mrf.mxu1 }
0x12e9   : > { %v3102_v22 = vmul.f32 0.35355338, %v6152_v21  ;;  %v3431_v21 = vld [vmem:[%s6569_s10 + $0x188] sm:$0xff] }
0x12ea   : > { %v3092_v23 = vpop.f32.mrf.mxu1  ;;  %3560 = vmatprep.subr.mxu1 %v3431_v21  ;;  %v3390_v21 = vld [vmem:[%s6569_s10 + $0x40] sm:$0xff] }
0x12eb   : > { %v3101_v25 = vmul.f32 0.35355338, %v3092_v23  ;;  %v3104_v26 = vsel %vm6635_vm4, %v3102_v22, -1e+30  ;;  %v3433_v22 = vld [vmem:[%s6569_s10 + $0x198] sm:$0xff]  ;;  %v3430_v23 = vld [vmem:[%s6569_s10 + $0x180] sm:$0xff] }
0x12ec   : > { %v3108_v28 = vsel %vm1326_vm5, %v3104_v26, -inf  ;;  %3561 = vmatpush1.msra.mxu1 %v3430_v23  ;;  %v3443_v23 = vld [vmem:[%s6569_s10 + $0x1e8] sm:$0xff] }
0x12ed   : > { %3109 = vmax.xlane.f32.xlu1 %v3108_v28  ;;  %v3103_v29 = vsel %vm6631_vm3, %v3101_v25, -1e+30  ;;  %v3432_v25 = vld [vmem:[%s6569_s10 + $0x190] sm:$0xff]  ;;  %v3417_v28 = vld [vmem:[%s6569_s10 + $0x118] sm:$0xff] }
0x12ee   : > { %v3105_v30 = vsel %vm1326_vm5, %v3103_v29, -inf }
0x12ef   : > { %3106 = vmax.xlane.f32.xlu0 %v3105_v30  ;;  %v3416_v30 = vld [vmem:[%s6569_s10 + $0x110] sm:$0xff] }
0x12fe   : > { %3129 = vrot.lane.b32.xlu1 %v6809_v36, %s7635_s0 }
0x1302   : > { %3216 = vrot.lane.b32.xlu1 %v6896_v54, %s7636_s3 }
0x1306   : > { %3218 = vrot.lane.b32.xlu1 %v6894_v50, %s7636_s3  ;;  %s7643_s3 = scalar_lea.vmem %s7558_s16, %s6493_s7 }
0x130a   : > { %3226 = vrot.lane.b32.xlu1 %v6145_v20, %s7637_s30 }
0x1376   : > { %v3110_v27 = vpop.xlane.xlu1 %3109 }
0x1377   : > { %v3112_v31 = vsub.f32 %v3104_v26, %v3110_v27  ;;  %v3415_v26 = vld [vmem:[%s6569_s10 + $0x108] sm:$0xff] }
0x1378   : > { %v3107_v12 = vpop.xlane.xlu0 %3106  ;;  %3562 = vmatprep.subr.mxu1 %v3415_v26  ;;  %v3399_v27 = vld [vmem:[%s6569_s10 + $0x88] sm:$0xff]  ;;  %v3442_v26 = vld [vmem:[%s6569_s10 + $0x1e0] sm:$0xff] }
0x1379   : > { %v3115_v34 = vmul.f32 1.442695, %v3112_v31  ;;  %v3111_v24 = vsub.f32 %v3103_v29, %v3107_v12  ;;  %v3414_v29 = vld [vmem:[%s6569_s10 + $0x100] sm:$0xff]  ;;  %v3401_v31 = vld [vmem:[%s6569_s10 + $0x98] sm:$0xff] }
0x137a   : > { %v3130_v35 = vpop.permute.xlu1 %3129  ;;  %3563 = vmatpush1.msra.mxu1 %v3414_v29  ;;  %v3398_v12 = vld [vmem:[%s6569_s10 + $0x80] sm:$0xff]  ;;  %v3427_v29 = vld [vmem:[%s6569_s10 + $0x168] sm:$0xff] }
0x137b   : > { %6273 = vpow2.f32 %v3115_v34  ;;  %v3113_v37 = vmul.f32 1.442695, %v3111_v24  ;;  %6153 = vmatprep.subr.mxu0 %v3130_v35  ;;  %3564 = vmatprep.subr.mxu1 %v3399_v27  ;;  %v3400_v34 = vld [vmem:[%s6569_s10 + $0x90] sm:$0xff]  ;;  %v3383_v24 = vld [vmem:[%s6569_s10 + $0x8] sm:$0xff]  ;;  %v3426_v27 = vld [vmem:[%s6569_s10 + $0x160] sm:$0xff] }
0x137c   : > { %6154 = vmatpush3.msra.mxu0 %v3130_v35  ;;  %3565 = vmatpush1.msra.mxu1 %v3398_v12  ;;  %v3385_v35 = vld [vmem:[%s6569_s10 + $0x18] sm:$0xff]  ;;  %v3411_v12 = vld [vmem:[%s6569_s10 + $0xe8] sm:$0xff] }
0x137d   : > { %6275 = vpow2.f32 %v3113_v37  ;;  %3566 = vmatprep.subr.mxu1 %v3383_v24  ;;  %v3382_v37 = vld [vmem:[%s6569_s10] sm:$0xff] }
0x137e   : > { %v3217_v58 = vpop.permute.xlu1 %3216  ;;  %3567 = vmatpush1.msra.mxu1 %v3382_v37  ;;  %v3410_v24 = vld [vmem:[%s6569_s10 + $0xe0] sm:$0xff]  ;;  %v3395_v37 = vld [vmem:[%s6569_s10 + $0x68] sm:$0xff] }
0x137f   : > { %v3238_v62 = vsel %vm1238_vm2, %v6892_v55, %v3217_v58  ;;  %v5559_v55 = vld [vmem:[%s7639_s22] ss:$0 sm:$0xff] }
0x1382   : > { %v3219_v59 = vpop.permute.xlu1 %3218 }
0x1383   : > { %v3239_v0 = vsel %vm1238_vm2, %v6890_v49, %v3219_v59  ;;  %v3434_v59 = vld [vmem:[%s6569_s10 + $0x1a0] sm:$0xff] }
0x1386   : > { %v3227_v60 = vpop.permute.xlu1 %3226 }
0x1387   : > { %v3241_v2 = vsel %vm1326_vm5, %v3239_v0, %v3227_v60  ;;  %v3436_v60 = vld [vmem:[%s6569_s10 + $0x1b0] sm:$0xff]  ;;  %v3418_v0 = vld [vmem:[%s6569_s10 + $0x120] sm:$0xff] }
0x1388   : > { %v6274_v36 = vpop.eup %6273 }
0x1389   : > { %v3120_v39 = vsel %vm1326_vm5, %v6274_v36, 0.0 }
0x138a   : > { %v6276_v40 = vpop.eup %6275  ;;  %3121 = vadd.xlane.f32.xlu0 %v3120_v39  ;;  %v6343_v39 = vmov 0.0  }
0x138b   : > { %v3117_v41 = vsel %vm1326_vm5, %v6276_v40, 0.0  ;;  %3600 = vmatprep.mubr.f32.mxu1 %v6343_v39 }
0x138e   : > { %3118 = vadd.xlane.f32.xlu0 %v3117_v41  ;;  %v3437_v41 = vld [vmem:[%s6569_s10 + $0x1b8] sm:$0xff] }
0x13a4   : > { %3127 = vrot.lane.b32.xlu0 %v6815_v38, %s7635_s0  ;;  %v3247_v38 = vld [vmem:[%s6535_s8 + $0x18] sm:$0xff]  ;;  %s7644_s8 = scalar_lea.vmem %s7559_s17, %s6493_s7 }
0x13a8   : > { %3224 = vrot.lane.b32.xlu0 %v3001_v10, %s7637_s30  ;;  %s7648_s30 = sld [smem:[#allocation23_spill]] (!%p5583_p5) }
0x1413   : > { %v3122_v42 = vpop.xlane.xlu0 %3121 }
0x1414   : > { %6277 = vrcp.f32 %v3122_v42 }
0x1417   : > { %v3119_v45 = vpop.xlane.xlu0 %3118 }
0x1418   : > { %6279 = vrcp.f32 %v3119_v45 }
0x141b   : > { %v3128_v46 = vpop.permute.xlu0 %3127 }
0x141c   : > { %6155 = vmatprep.subr.mxu0 %v3128_v46 }
0x141d   : > { %6156 = vmatpush3.msra.mxu0 %v3128_v46 }
0x141e   : > { %6160 = vmatprep.subr.mxu0 %v3247_v38 }
0x141f   : > { %v3225_v61 = vpop.permute.xlu0 %3224 }
0x1420   : > { %v3240_v7 = vsel %vm1326_vm5, %v3238_v62, %v3225_v61  ;;  %v3419_v61 = vld [vmem:[%s6569_s10 + $0x128] sm:$0xff]  ;;  %v3421_v62 = vld [vmem:[%s6569_s10 + $0x138] sm:$0xff] }
0x1421   : > { %v6278_v47 = vpop.eup %6277 }
0x1422   : > { %v3126_v54 = vmul.f32 %v6278_v47, %v6274_v36  ;;  %v3384_v36 = vld [vmem:[%s6569_s10 + $0x10] sm:$0xff] }
0x1425   : > { %v6280_v48 = vpop.eup %6279 }
0x1426   : > { %v3124_v50 = vmul.f32 %v6280_v48, %v6276_v40  ;;  %v3435_v40 = vld [vmem:[%s6569_s10 + $0x1a8] sm:$0xff] }
0x1427   : > { %3714 = vmatprep.subr.mxu1 %v3435_v40  ;;  %v3394_v40 = vld [vmem:[%s6569_s10 + $0x60] sm:$0xff] }
0x1428   : > { %6157 = vmatprep.mubr.msk.f32.mxu0 %vm1326_vm5, %v3124_v50 }
0x1429   : > { %6158 = vmatmul.mubr.msk.f32.vlgmr.msra.gmra.mxu0 %vm1326_vm5, %v3126_v54 }
0x142a   : > { %6161 = vmatpush3.msra.mxu0 %v3247_v38  ;;  %v5562_v38 = vld [vmem:[%s7640_s9] ss:$0 sm:$0xff] }
0x142b   : > { %6162 = vmatprep.subr.mxu0 %v3246_v51 }
0x142c   : > { %6163 = vmatpush3.msra.mxu0 %v3246_v51 }
0x142d   : > { %6164 = vmatprep.subr.mxu0 %v3245_v52 }
0x142e   : > { %6165 = vmatpush3.msra.mxu0 %v3245_v52  ;;  %v5563_v52 = vld [vmem:[%s7641_s4] ss:$0 sm:$0xff] }
0x142f   : > { %6166 = vmatprep.subr.mxu0 %v3244_v53 }
0x1430   : > { %6167 = vmatpush3.msra.mxu0 %v3244_v53 }
0x1431   : > { %3637 = vmatprep.subr.mxu0 %v3433_v22  ;;  %v3392_v22 = vld [vmem:[%s6569_s10 + $0x50] sm:$0xff] }
0x14e9   : > { %v6159_v56 = vpop.f32.mrf.mxu0 }
0x14ea   : > { %3234 = vrot.lane.b32.xlu1 %v6159_v56, %s7638_s27 }
0x14eb   : > { %v3205_v57 = vpop.f32.mrf.mxu0 }
0x14ec   : > { %3232 = vrot.lane.b32.xlu0 %v3205_v57, %s7638_s27 }
0x155c   : > { %v3235_v63 = vpop.permute.xlu1 %3234 }
0x155d   : > { %v3243_v3 = vsel %vm2076_vm6, %v3241_v2, %v3235_v63  ;;  %v3403_v2 = vld [vmem:[%s6569_s10 + $0xa8] sm:$0xff] }
0x155e   : > { %v3233_v1 = vpop.permute.xlu0 %3232 }
0x155f   : > { %v3242_v4 = vsel %vm2076_vm6, %v3240_v7, %v3233_v1  ;;  %v3420_v7 = vld [vmem:[%s6569_s10 + $0x130] sm:$0xff] }
0x1560   : > { %6168 = vmatprep.mubr.msk.f32.mxu0 %vm1107_vm1, %v3242_v4  ;;  %v3405_v4 = vld [vmem:[%s6569_s10 + $0xb8] sm:$0xff] }
0x1561   : > { %6169 = vmatmul.mubr.msk.f32.vlgmr.msra.gmra.mxu0 %vm1107_vm1, %v3243_v3  ;;  %v3402_v3 = vld [vmem:[%s6569_s10 + $0xa0] sm:$0xff] }
0x1562   : > { %3638 = vmatpush1.msra.mxu0 %v3432_v25  ;;  %3677 = vmatprep.mubr.f32.mxu0 %v6343_v39  ;;  %v3445_v25 = vld [vmem:[%s6569_s10 + $0x1f8] sm:$0xff] }
0x1563   : > { %3639 = vmatprep.subr.mxu0 %v3417_v28  ;;  %v3444_v28 = vld [vmem:[%s6569_s10 + $0x1f0] sm:$0xff] }
0x1564   : > { %3640 = vmatpush1.msra.mxu0 %v3416_v30  ;;  %v3429_v30 = vld [vmem:[%s6569_s10 + $0x178] sm:$0xff] }
0x1565   : > { %3641 = vmatprep.subr.mxu0 %v3401_v31  ;;  %v3428_v31 = vld [vmem:[%s6569_s10 + $0x170] sm:$0xff] }
0x1566   : > { %3642 = vmatpush1.msra.mxu0 %v3400_v34  ;;  %v3413_v34 = vld [vmem:[%s6569_s10 + $0xf8] sm:$0xff] }
0x1567   : > { %3643 = vmatprep.subr.mxu0 %v3385_v35  ;;  %v3412_v35 = vld [vmem:[%s6569_s10 + $0xf0] sm:$0xff] }
0x1568   : > { %3644 = vmatpush1.msra.mxu0 %v3384_v36  ;;  %v3397_v36 = vld [vmem:[%s6569_s10 + $0x78] sm:$0xff] }
0x1569   : > { %3791 = vmatprep.subr.mxu0 %v3437_v41  ;;  %v3396_v41 = vld [vmem:[%s6569_s10 + $0x70] sm:$0xff] }
0x1621   : > { %v6170_v5 = vpop.f32.mrf.mxu0 }
0x1622   : > { %v3333_v49 = vadd.f32 %v6170_v5, %v5559_v55  ;;  %v3387_v5 = vld [vmem:[%s6569_s10 + $0x28] sm:$0xff] }
0x1623   : > { %v3327_v6 = vpop.f32.mrf.mxu0 }
0x1624   : > { %v3337_v44 = vadd.f32 %v3333_v49, %v6800_v33  ;;  %v3328_v8 = vadd.f32 %v5559_v55, %v3327_v6  ;;  %v3404_v55 = vld [vmem:[%s6569_s10 + $0xb0] sm:$0xff]  ;;  %v3389_v49 = vld [vmem:[%s6569_s10 + $0x38] sm:$0xff]  ;;  %v3386_v6 = vld [vmem:[%s6569_s10 + $0x20] sm:$0xff] }
0x1626   : > { %v3343_v9 = vsel %vm1107_vm1, %v3337_v44, 0.0  ;;  %v3336_v11 = vadd.f32 %v3328_v8, %v6796_v32  ;;  %v3439_v8 = vld [vmem:[%s6569_s10 + $0x1c8] sm:$0xff] }
0x1627   : > { %3344 = vadd.xlane.f32.xlu1 %v3343_v9  ;;  %v3441_v9 = vld [vmem:[%s6569_s10 + $0x1d8] sm:$0xff] }
0x1628   : > { %v3340_v13 = vsel %vm1107_vm1, %v3336_v11, 0.0 }
0x1629   : > { %3341 = vadd.xlane.f32.xlu0 %v3340_v13  ;;  %v3440_v13 = vld [vmem:[%s6569_s10 + $0x1d0] sm:$0xff] }
0x16b0   : > { %v3345_v14 = vpop.xlane.xlu1 %3344 }
0x16b1   : > { %v3347_v15 = vmul.f32 0.03125, %v3345_v14  ;;  %v3423_v14 = vld [vmem:[%s6569_s10 + $0x148] sm:$0xff] }
0x16b2   : > { %v3342_v17 = vpop.xlane.xlu0 %3341 }
0x16b3   : > { %v3346_v18 = vmul.f32 0.03125, %v3342_v17  ;;  %v3349_v43 = vsub.f32 %v3337_v44, %v3347_v15  ;;  %v3388_v44 = vld [vmem:[%s6569_s10 + $0x30] sm:$0xff]  ;;  %v3425_v15 = vld [vmem:[%s6569_s10 + $0x158] sm:$0xff]  ;;  %v3422_v17 = vld [vmem:[%s6569_s10 + $0x140] sm:$0xff] }
0x16b5   : > { %v3348_v33 = vsub.f32 %v3336_v11, %v3346_v18  ;;  %v3351_v32 = vmul.f32 %v3349_v43, %v3349_v43  ;;  %v3438_v11 = vld [vmem:[%s6569_s10 + $0x1c0] sm:$0xff]  ;;  %v3424_v18 = vld [vmem:[%s6569_s10 + $0x150] sm:$0xff] }
0x16b7   : > { %v3350_v19 = vmul.f32 %v3348_v33, %v3348_v33  ;;  %v3355_v10 = vsel %vm1107_vm1, %v3351_v32, 0.0  ;;  %v3391_v32 = vld [vmem:[%s6569_s10 + $0x48] sm:$0xff] }
0x16b9   : > { %v3352_v20 = vsel %vm1107_vm1, %v3350_v19, 0.0  ;;  %v3406_v19 = vld [vmem:[%s6569_s10 + $0xc0] sm:$0xff] }
0x16ba   : > { %3353 = vadd.xlane.f32.xlu0 %v3352_v20  ;;  %v3408_v20 = vld [vmem:[%s6569_s10 + $0xd0] sm:$0xff] }
0x16be   : > { %3356 = vadd.xlane.f32.xlu0 %v3355_v10  ;;  %v3393_v10 = vld [vmem:[%s6569_s10 + $0x58] sm:$0xff] }
0x1743   : > { %v3354_v42 = vpop.xlane.xlu0 %3353 }
0x1744   : > { %v3358_v45 = vmul.f32 0.03125, %v3354_v42  ;;  %v4215_v42 = vld [vmem:[%s6581_s24 + $0xf8] sm:$0xff] }
0x1746   : > { %v3360_v46 = vadd.f32 1e-05, %v3358_v45  ;;  %v4247_v45 = vld [vmem:[%s6581_s24 + $0x1f8] sm:$0xff] }
0x1747   : > { %v3357_v47 = vpop.xlane.xlu0 %3356 }
0x1748   : > { %6281 = vrsqrt.f32 %v3360_v46  ;;  %v3359_v48 = vmul.f32 0.03125, %v3357_v47  ;;  %v4199_v46 = vld [vmem:[%s6581_s24 + $0x78] sm:$0xff] }
0x1749   : > { %v4231_v47 = vld [vmem:[%s6581_s24 + $0x178] sm:$0xff] }
0x174a   : > { %v3361_v50 = vadd.f32 1e-05, %v3359_v48  ;;  %v4214_v48 = vld [vmem:[%s6581_s24 + $0xf0] sm:$0xff] }
0x174c   : > { %6283 = vrsqrt.f32 %v3361_v50  ;;  %v4246_v50 = vld [vmem:[%s6581_s24 + $0x1f0] sm:$0xff] }
0x1755   : > { %v6282_v54 = vpop.eup %6281 }
0x1756   : > { %v3364_v51 = vmul.f32 %v6282_v54, %v3348_v33  ;;  %v3409_v33 = vld [vmem:[%s6569_s10 + $0xd8] sm:$0xff]  ;;  %v4198_v54 = vld [vmem:[%s6581_s24 + $0x70] sm:$0xff] }
0x1758   : > { %v3372_v53 = vmul.f32 %v5562_v38, %v3364_v51  ;;  %v4245_v51 = vld [vmem:[%s6581_s24 + $0x1e8] sm:$0xff] }
0x1759   : > { %v6284_v56 = vpop.eup %6283 }
0x175a   : > { %v7003_v57 = vadd.f32 %v5563_v52, %v3372_v53  ;;  %v3365_v58 = vmul.f32 %v6284_v56, %v3349_v43  ;;  %v3407_v43 = vld [vmem:[%s6569_s10 + $0xc8] sm:$0xff]  ;;  %v4212_v56 = vld [vmem:[%s6581_s24 + $0xe0] sm:$0xff] }
0x175b   : > { %v4229_v53 = vld [vmem:[%s6581_s24 + $0x168] sm:$0xff] }
0x175c   : > { %v3373_v63 = vmul.f32 %v5562_v38, %v3365_v58  ;;  %5564 = vmatmul.mubr.msk.f32.vlgmr.msra.gmra.mxu1 %vm1107_vm1, %v7003_v57  ;;  %5566 = vmatmul.mubr.msk.f32.vlgmr.msra.gmra.mxu0 %vm1107_vm1, %v7003_v57  ;;  %v4230_v38 = vld [vmem:[%s6581_s24 + $0x170] sm:$0xff]  ;;  %v4244_v58 = vld [vmem:[%s6581_s24 + $0x1e0] sm:$0xff] }
0x175d   : > { %3715 = vmatpush1.msra.mxu1 %v3434_v59  ;;  %3792 = vmatpush1.msra.mxu0 %v3436_v60  ;;  %v4196_v59 = vld [vmem:[%s6581_s24 + $0x60] sm:$0xff] }
0x175e   : > { %v7015_v1 = vadd.f32 %v5563_v52, %v3373_v63  ;;  %3716 = vmatprep.subr.mxu1 %v3419_v61  ;;  %3793 = vmatprep.subr.mxu0 %v3421_v62  ;;  %v4197_v52 = vld [vmem:[%s6581_s24 + $0x68] sm:$0xff]  ;;  %v4228_v60 = vld [vmem:[%s6581_s24 + $0x160] sm:$0xff]  ;;  %v4211_v61 = vld [vmem:[%s6581_s24 + $0xd8] sm:$0xff] }
0x175f   : > { %3606 = vmatprep.mubr.f32.mxu1 %v6343_v39  ;;  %3683 = vmatprep.mubr.f32.mxu0 %v6343_v39  ;;  %v4243_v62 = vld [vmem:[%s6581_s24 + $0x1d8] sm:$0xff] }
0x1760   : > { %3717 = vmatpush1.msra.mxu1 %v3418_v0  ;;  %3794 = vmatpush1.msra.mxu0 %v3420_v7  ;;  %v4195_v63 = vld [vmem:[%s6581_s24 + $0x58] sm:$0xff]  ;;  %v4210_v7 = vld [vmem:[%s6581_s24 + $0xd0] sm:$0xff] }
0x1761   : > { %5565 = vmatmul.mubr.msk.f32.gmra.mxu1 %vm1107_vm1, %v7015_v1  ;;  %5567 = vmatmul.mubr.msk.f32.gmra.mxu0 %vm1107_vm1, %v7015_v1  ;;  %v4227_v0 = vld [vmem:[%s6581_s24 + $0x158] sm:$0xff] }
0x1762   : > { %3718 = vmatprep.subr.mxu1 %v3403_v2  ;;  %3795 = vmatprep.subr.mxu0 %v3405_v4  ;;  %v4242_v2 = vld [vmem:[%s6581_s24 + $0x1d0] sm:$0xff] }
0x1763   : > { %3719 = vmatpush1.msra.mxu1 %v3402_v3  ;;  %3796 = vmatpush1.msra.mxu0 %v3404_v55  ;;  %v4194_v4 = vld [vmem:[%s6581_s24 + $0x50] sm:$0xff]  ;;  %v4209_v55 = vld [vmem:[%s6581_s24 + $0xc8] sm:$0xff] }
0x1764   : > { %3720 = vmatprep.subr.mxu1 %v3387_v5  ;;  %3797 = vmatprep.subr.mxu0 %v3389_v49  ;;  %v4226_v3 = vld [vmem:[%s6581_s24 + $0x150] sm:$0xff]  ;;  %v4241_v5 = vld [vmem:[%s6581_s24 + $0x1c8] sm:$0xff] }
0x1765   : > { %3721 = vmatpush1.msra.mxu1 %v3386_v6  ;;  %3754 = vmatprep.mubr.f32.mxu1 %v6343_v39  ;;  %v4193_v49 = vld [vmem:[%s6581_s24 + $0x48] sm:$0xff] }
0x1766   : > { %3798 = vmatpush1.msra.mxu0 %v3388_v44  ;;  %3831 = vmatprep.mubr.f32.mxu0 %v6343_v39  ;;  %v4225_v6 = vld [vmem:[%s6581_s24 + $0x148] sm:$0xff]  ;;  %v4208_v44 = vld [vmem:[%s6581_s24 + $0xc0] sm:$0xff] }
0x1767   : > { %5568 = vmatmul.mubr.msk.f32.vlgmr.msra.gmra.mxu1 %vm1107_vm1, %v7003_v57  ;;  %5570 = vmatmul.mubr.msk.f32.vlgmr.msra.gmra.mxu0 %vm1107_vm1, %v7003_v57 }
0x1768   : > { %3868 = vmatprep.subr.mxu1 %v3439_v8  ;;  %3945 = vmatprep.subr.mxu0 %v3441_v9  ;;  %v4240_v8 = vld [vmem:[%s6581_s24 + $0x1c0] sm:$0xff] }
0x1769   : > { %3869 = vmatpush1.msra.mxu1 %v3438_v11  ;;  %3946 = vmatpush1.msra.mxu0 %v3440_v13  ;;  %v4192_v9 = vld [vmem:[%s6581_s24 + $0x40] sm:$0xff]  ;;  %v4207_v13 = vld [vmem:[%s6581_s24 + $0xb8] sm:$0xff] }
0x176a   : > { %3870 = vmatprep.subr.mxu1 %v3423_v14  ;;  %3947 = vmatprep.subr.mxu0 %v3425_v15  ;;  %v4224_v11 = vld [vmem:[%s6581_s24 + $0x140] sm:$0xff]  ;;  %v4239_v14 = vld [vmem:[%s6581_s24 + $0x1b8] sm:$0xff] }
0x176b   : > { %3760 = vmatprep.mubr.f32.mxu1 %v6343_v39  ;;  %3837 = vmatprep.mubr.f32.mxu0 %v6343_v39  ;;  %v4191_v15 = vld [vmem:[%s6581_s24 + $0x38] sm:$0xff] }
0x176c   : > { %3871 = vmatpush1.msra.mxu1 %v3422_v17  ;;  %3948 = vmatpush1.msra.mxu0 %v3424_v18  ;;  %v4223_v17 = vld [vmem:[%s6581_s24 + $0x138] sm:$0xff]  ;;  %v4206_v18 = vld [vmem:[%s6581_s24 + $0xb0] sm:$0xff] }
0x176d   : > { %5569 = vmatmul.mubr.msk.f32.gmra.mxu1 %vm1107_vm1, %v7015_v1  ;;  %5571 = vmatmul.mubr.msk.f32.gmra.mxu0 %vm1107_vm1, %v7015_v1 }
0x176e   : > { %3872 = vmatprep.subr.mxu1 %v3407_v43  ;;  %3949 = vmatprep.subr.mxu0 %v3409_v33  ;;  %v4238_v43 = vld [vmem:[%s6581_s24 + $0x1b0] sm:$0xff] }
0x176f   : > { %3873 = vmatpush1.msra.mxu1 %v3406_v19  ;;  %3950 = vmatpush1.msra.mxu0 %v3408_v20  ;;  %v4190_v33 = vld [vmem:[%s6581_s24 + $0x30] sm:$0xff]  ;;  %v4205_v20 = vld [vmem:[%s6581_s24 + $0xa8] sm:$0xff] }
0x1770   : > { %3874 = vmatprep.subr.mxu1 %v3391_v32  ;;  %3951 = vmatprep.subr.mxu0 %v3393_v10  ;;  %v4222_v19 = vld [vmem:[%s6581_s24 + $0x130] sm:$0xff]  ;;  %v4237_v32 = vld [vmem:[%s6581_s24 + $0x1a8] sm:$0xff] }
0x1771   : > { %3875 = vmatpush1.msra.mxu1 %v3390_v21  ;;  %3908 = vmatprep.mubr.f32.mxu1 %v6343_v39  ;;  %v4189_v10 = vld [vmem:[%s6581_s24 + $0x28] sm:$0xff] }
0x1772   : > { %3952 = vmatpush1.msra.mxu0 %v3392_v22  ;;  %3985 = vmatprep.mubr.f32.mxu0 %v6343_v39  ;;  %v4221_v21 = vld [vmem:[%s6581_s24 + $0x128] sm:$0xff]  ;;  %v4204_v22 = vld [vmem:[%s6581_s24 + $0xa0] sm:$0xff] }
0x1773   : > { %5572 = vmatmul.mubr.msk.f32.vlgmr.msra.gmra.mxu1 %vm1107_vm1, %v7003_v57  ;;  %5574 = vmatmul.mubr.msk.f32.vlgmr.msra.gmra.mxu0 %vm1107_vm1, %v7003_v57 }
0x1774   : > { %4022 = vmatprep.subr.mxu1 %v3443_v23  ;;  %4099 = vmatprep.subr.mxu0 %v3445_v25  ;;  %v4236_v23 = vld [vmem:[%s6581_s24 + $0x1a0] sm:$0xff] }
0x1775   : > { %4023 = vmatpush1.msra.mxu1 %v3442_v26  ;;  %4100 = vmatpush1.msra.mxu0 %v3444_v28  ;;  %v4188_v25 = vld [vmem:[%s6581_s24 + $0x20] sm:$0xff]  ;;  %v4203_v28 = vld [vmem:[%s6581_s24 + $0x98] sm:$0xff] }
0x1776   : > { %4024 = vmatprep.subr.mxu1 %v3427_v29  ;;  %4101 = vmatprep.subr.mxu0 %v3429_v30  ;;  %v4220_v26 = vld [vmem:[%s6581_s24 + $0x120] sm:$0xff]  ;;  %v4235_v29 = vld [vmem:[%s6581_s24 + $0x198] sm:$0xff] }
0x1777   : > { %3914 = vmatprep.mubr.f32.mxu1 %v6343_v39  ;;  %3991 = vmatprep.mubr.f32.mxu0 %v6343_v39  ;;  %v4187_v30 = vld [vmem:[%s6581_s24 + $0x18] sm:$0xff] }
0x1778   : > { %4025 = vmatpush1.msra.mxu1 %v3426_v27  ;;  %4102 = vmatpush1.msra.mxu0 %v3428_v31  ;;  %v4219_v27 = vld [vmem:[%s6581_s24 + $0x118] sm:$0xff]  ;;  %v4202_v31 = vld [vmem:[%s6581_s24 + $0x90] sm:$0xff] }
0x1779   : > { %5573 = vmatmul.mubr.msk.f32.gmra.mxu1 %vm1107_vm1, %v7015_v1  ;;  %5575 = vmatmul.mubr.msk.f32.gmra.mxu0 %vm1107_vm1, %v7015_v1 }
0x177a   : > { %4026 = vmatprep.subr.mxu1 %v3411_v12  ;;  %4103 = vmatprep.subr.mxu0 %v3413_v34  ;;  %v4234_v12 = vld [vmem:[%s6581_s24 + $0x190] sm:$0xff] }
0x177b   : > { %4027 = vmatpush1.msra.mxu1 %v3410_v24  ;;  %4104 = vmatpush1.msra.mxu0 %v3412_v35  ;;  %v4186_v34 = vld [vmem:[%s6581_s24 + $0x10] sm:$0xff]  ;;  %v4201_v35 = vld [vmem:[%s6581_s24 + $0x88] sm:$0xff] }
0x177c   : > { %4028 = vmatprep.subr.mxu1 %v3395_v37  ;;  %4105 = vmatprep.subr.mxu0 %v3397_v36  ;;  %v4218_v24 = vld [vmem:[%s6581_s24 + $0x110] sm:$0xff]  ;;  %v4233_v37 = vld [vmem:[%s6581_s24 + $0x188] sm:$0xff] }
0x177d   : > { %4029 = vmatpush1.msra.mxu1 %v3394_v40  ;;  %4062 = vmatprep.mubr.f32.mxu1 %v6343_v39  ;;  %v4185_v36 = vld [vmem:[%s6581_s24 + $0x8] sm:$0xff] }
0x177e   : > { %4106 = vmatpush1.msra.mxu0 %v3396_v41  ;;  %4139 = vmatprep.mubr.f32.mxu0 %v6343_v39  ;;  %v4217_v40 = vld [vmem:[%s6581_s24 + $0x108] sm:$0xff]  ;;  %v4200_v41 = vld [vmem:[%s6581_s24 + $0x80] sm:$0xff] }
0x177f   : > { %5576 = vmatmul.mubr.msk.f32.vlgmr.msra.gmra.mxu1 %vm1107_vm1, %v7003_v57  ;;  %5578 = vmatmul.mubr.msk.f32.vlgmr.msra.gmra.mxu0 %vm1107_vm1, %v7003_v57 }
0x1780   : > { %4068 = vmatprep.mubr.f32.mxu1 %v6343_v39  ;;  %4145 = vmatprep.mubr.f32.mxu0 %v6343_v39  ;;  %v4213_v39 = vld [vmem:[%s6581_s24 + $0xe8] sm:$0xff] }
0x1781   : > { %5694 = vmatprep.subr.mxu1 %v4215_v42  ;;  %5732 = vmatprep.subr.mxu0 %v4247_v45  ;;  %v4232_v42 = vld [vmem:[%s6581_s24 + $0x180] sm:$0xff] }
0x1782   : > { %5695 = vmatpush3.msra.mxu1 %v4199_v46  ;;  %5733 = vmatpush3.msra.mxu0 %v4231_v47  ;;  %v4184_v45 = vld [vmem:[%s6581_s24] sm:$0xff]  ;;  %v4279_v47 = vld [vmem:[%s6581_s24 + $0x2f8] sm:$0xff] }
0x1783   : > { %5577 = vmatmul.mubr.msk.f32.gmra.mxu1 %vm1107_vm1, %v7015_v1  ;;  %5579 = vmatmul.mubr.msk.f32.gmra.mxu0 %vm1107_vm1, %v7015_v1  ;;  %v4216_v46 = vld [vmem:[%s6581_s24 + $0x100] sm:$0xff] }
0x1784   : > { %5696 = vmatprep.subr.mxu1 %v4214_v48  ;;  %5734 = vmatprep.subr.mxu0 %v4246_v50  ;;  %v4311_v48 = vld [vmem:[%s6581_s24 + $0x3f8] sm:$0xff]  ;;  %v3468_v50 = vsub.s32 4, %v6627_v16 }
0x1785   : > { %5697 = vmatpush3.msra.mxu1 %v4198_v54  ;;  %5735 = vmatpush3.msra.mxu0 %v4230_v38  ;;  %v3476_v54 = vsub.s32 6, %v6627_v16  ;;  %v7168_v38 = vld [vmem:[%s6575_s23 + $0x8] sm:$0xff] }
0x1786   : > { %5698 = vmatprep.subr.mxu1 %v4213_v39  ;;  %5736 = vmatprep.subr.mxu0 %v4245_v51  ;;  %v7173_v39 = vrot.slane %v7168_v38, %v3468_v50 }
0x1787   : > { %5699 = vmatpush3.msra.mxu1 %v4197_v52  ;;  %5737 = vmatpush3.msra.mxu0 %v4229_v53  ;;  %v7178_v51 = vrot.slane %v7168_v38, %v3476_v54  ;;  %v3452_v52 = vsub.s32 0, %v6627_v16  ;;  %v3460_v53 = vsub.s32 2, %v6627_v16 }
0x1788   : > { %5700 = vmatprep.subr.mxu1 %v4212_v56  ;;  %5738 = vmatprep.subr.mxu0 %v4244_v58  ;;  %v7183_v56 = vld [vmem:[%s6575_s23] sm:$0xff]  ;;  %v3456_v58 = vsub.s32 1, %v6627_v16 }
0x1789   : > { %5701 = vmatpush3.msra.mxu1 %v4196_v59  ;;  %5739 = vmatpush3.msra.mxu0 %v4228_v60  ;;  %v3464_v59 = vsub.s32 3, %v6627_v16  ;;  %v3453_v60 = vrot.slane %v7183_v56, %v3452_v52 }
0x178a   : > { %5702 = vmatprep.subr.mxu1 %v4211_v61  ;;  %5740 = vmatprep.subr.mxu0 %v4243_v62  ;;  %v3461_v61 = vrot.slane %v7183_v56, %v3460_v53  ;;  %v3457_v62 = vrot.slane %v7183_v56, %v3456_v58 }
0x178b   : > { %5703 = vmatpush3.msra.mxu1 %v4195_v63  ;;  %5741 = vmatpush3.msra.mxu0 %v4227_v0  ;;  %v3465_v63 = vrot.slane %v7183_v56, %v3464_v59 }
0x178c   : > { %5704 = vmatprep.subr.mxu1 %v4210_v7  ;;  %5742 = vmatprep.subr.mxu0 %v4242_v2 }
0x178d   : > { %5705 = vmatpush3.msra.mxu1 %v4194_v4  ;;  %5743 = vmatpush3.msra.mxu0 %v4226_v3 }
0x178e   : > { %5706 = vmatprep.subr.mxu1 %v4209_v55  ;;  %5744 = vmatprep.subr.mxu0 %v4241_v5 }
0x178f   : > { %5707 = vmatpush3.msra.mxu1 %v4193_v49  ;;  %5745 = vmatpush3.msra.mxu0 %v4225_v6 }
0x1790   : > { %5708 = vmatprep.subr.mxu1 %v4208_v44  ;;  %5746 = vmatprep.subr.mxu0 %v4240_v8 }
0x1791   : > { %5709 = vmatpush3.msra.mxu1 %v4192_v9  ;;  %5747 = vmatpush3.msra.mxu0 %v4224_v11 }
0x1792   : > { %5710 = vmatprep.subr.mxu1 %v4207_v13  ;;  %5748 = vmatprep.subr.mxu0 %v4239_v14  ;;  %v4263_v14 = vld [vmem:[%s6581_s24 + $0x278] sm:$0xff] }
0x1793   : > { %5711 = vmatpush3.msra.mxu1 %v4191_v15  ;;  %5749 = vmatpush3.msra.mxu0 %v4223_v17  ;;  %v4295_v15 = vld [vmem:[%s6581_s24 + $0x378] sm:$0xff]  ;;  %v3472_v17 = vsub.s32 5, %v6627_v16 }
0x1794   : > { %5712 = vmatprep.subr.mxu1 %v4206_v18  ;;  %5750 = vmatprep.subr.mxu0 %v4238_v43  ;;  %v3480_v18 = vsub.s32 7, %v6627_v16  ;;  %v4406_v16 = vld [vmem:[%s6581_s24 + $0x6f0] sm:$0xff] }
0x1795   : > { %5713 = vmatpush3.msra.mxu1 %v4190_v33  ;;  %5751 = vmatpush3.msra.mxu0 %v4222_v19 }
0x1796   : > { %5714 = vmatprep.subr.mxu1 %v4205_v20  ;;  %5752 = vmatprep.subr.mxu0 %v4237_v32  ;;  %v4278_v20 = vld [vmem:[%s6581_s24 + $0x2f0] sm:$0xff] }
0x1797   : > { %5715 = vmatpush3.msra.mxu1 %v4189_v10  ;;  %5753 = vmatpush3.msra.mxu0 %v4221_v21  ;;  %v4310_v32 = vld [vmem:[%s6581_s24 + $0x3f0] sm:$0xff] }
0x1798   : > { %5716 = vmatprep.subr.mxu1 %v4204_v22  ;;  %5754 = vmatprep.subr.mxu0 %v4236_v23  ;;  %v4262_v23 = vld [vmem:[%s6581_s24 + $0x270] sm:$0xff] }
0x1799   : > { %5717 = vmatpush3.msra.mxu1 %v4188_v25  ;;  %5755 = vmatpush3.msra.mxu0 %v4220_v26  ;;  %v4294_v25 = vld [vmem:[%s6581_s24 + $0x370] sm:$0xff] }
0x179a   : > { %5718 = vmatprep.subr.mxu1 %v4203_v28  ;;  %5756 = vmatprep.subr.mxu0 %v4235_v29  ;;  %v7210_v29 = vrot.slane %v7183_v56, %v3472_v17 }
0x179b   : > { %5719 = vmatpush3.msra.mxu1 %v4187_v30  ;;  %5757 = vmatpush3.msra.mxu0 %v4219_v27  ;;  %v7215_v30 = vrot.slane %v7183_v56, %v3480_v18  ;;  %v4277_v27 = vld [vmem:[%s6581_s24 + $0x2e8] sm:$0xff] }
0x179c   : > { %5720 = vmatprep.subr.mxu1 %v4202_v31  ;;  %5758 = vmatprep.subr.mxu0 %v4234_v12  ;;  %v4309_v31 = vld [vmem:[%s6581_s24 + $0x3e8] sm:$0xff] }
0x179d   : > { %5721 = vmatpush3.msra.mxu1 %v4186_v34  ;;  %5759 = vmatpush3.msra.mxu0 %v4218_v24 }
0x179e   : > { %5722 = vmatprep.subr.mxu1 %v4201_v35  ;;  %5760 = vmatprep.subr.mxu0 %v4233_v37  ;;  %v4261_v37 = vld [vmem:[%s6581_s24 + $0x268] sm:$0xff] }
0x179f   : > { %5723 = vmatpush3.msra.mxu1 %v4185_v36  ;;  %5761 = vmatpush3.msra.mxu0 %v4217_v40  ;;  %v4293_v36 = vld [vmem:[%s6581_s24 + $0x368] sm:$0xff] }
0x17a0   : > { %5724 = vmatprep.subr.mxu1 %v4200_v41  ;;  %5762 = vmatprep.subr.mxu0 %v4232_v42  ;;  %v4276_v42 = vld [vmem:[%s6581_s24 + $0x2e0] sm:$0xff] }
0x17a1   : > { %5725 = vmatpush3.msra.mxu1 %v4184_v45  ;;  %5763 = vmatpush3.msra.mxu0 %v4216_v46  ;;  %v4308_v45 = vld [vmem:[%s6581_s24 + $0x3e0] sm:$0xff] }
0x17a2   : > { %5770 = vmatprep.subr.mxu1 %v4279_v47  ;;  %5808 = vmatprep.subr.mxu0 %v4311_v48  ;;  %v4260_v48 = vld [vmem:[%s6581_s24 + $0x260] sm:$0xff] }
0x181c   : > { %v3602_v0 = vpop.f32.mrf.mxu1  ;;  %v3679_v7 = vpop.f32.mrf.mxu0 }
0x181d   : > { %v3603_v2 = vadd.f32 %v3602_v0, %v3453_v60  ;;  %v3680_v4 = vadd.f32 %v3679_v7, %v3461_v61  ;;  %v4307_v0 = vld [vmem:[%s6581_s24 + $0x3d8] sm:$0xff] }
0x181e   : > { %v3604_v3 = vpop.f32.mrf.mxu1  ;;  %v3681_v55 = vpop.f32.mrf.mxu0  ;;  %v4259_v7 = vld [vmem:[%s6581_s24 + $0x258] sm:$0xff] }
0x181f   : > { %v3605_v5 = vadd.f32 %v3604_v3, %v3457_v62  ;;  %v3682_v49 = vadd.f32 %v3681_v55, %v3465_v63  ;;  %v4152_v11 = vmax.f32 %v3603_v2, 0.0  ;;  %v4154_v13 = vmax.f32 %v3680_v4, 0.0  ;;  %v4291_v2 = vld [vmem:[%s6581_s24 + $0x358] sm:$0xff]  ;;  %v4274_v4 = vld [vmem:[%s6581_s24 + $0x2d0] sm:$0xff] }
0x1820   : > { %v4306_v3 = vld [vmem:[%s6581_s24 + $0x3d0] sm:$0xff] }
0x1821   : > { %v4153_v6 = vmax.f32 %v3605_v5, 0.0  ;;  %v4155_v44 = vmax.f32 %v3682_v49, 0.0  ;;  %v3608_v8 = vpop.f32.mrf.mxu1  ;;  %v3685_v9 = vpop.f32.mrf.mxu0  ;;  %v4258_v55 = vld [vmem:[%s6581_s24 + $0x250] sm:$0xff]  ;;  %v4273_v49 = vld [vmem:[%s6581_s24 + $0x2c8] sm:$0xff] }
0x1822   : > { %v3609_v43 = vadd.f32 %v3608_v8, %v3453_v60  ;;  %v3686_v10 = vadd.f32 %v3685_v9, %v3461_v61  ;;  %v4292_v60 = vld [vmem:[%s6581_s24 + $0x360] sm:$0xff]  ;;  %v4275_v61 = vld [vmem:[%s6581_s24 + $0x2d8] sm:$0xff]  ;;  %v4290_v5 = vld [vmem:[%s6581_s24 + $0x350] sm:$0xff] }
0x1823   : > { %v3610_v33 = vpop.f32.mrf.mxu1  ;;  %v3687_v19 = vpop.f32.mrf.mxu0  ;;  %4511 = vmatprep.mubr.f32.mxu1 %v4153_v6  ;;  %4586 = vmatprep.mubr.f32.mxu0 %v4155_v44  ;;  %v4305_v6 = vld [vmem:[%s6581_s24 + $0x3c8] sm:$0xff]  ;;  %v4272_v9 = vld [vmem:[%s6581_s24 + $0x2c0] sm:$0xff] }
0x1824   : > { %v3611_v21 = vadd.f32 %v3610_v33, %v3457_v62  ;;  %v3688_v22 = vadd.f32 %v3687_v19, %v3465_v63  ;;  %4512 = vmatmul.mubr.f32.vlgmr.msra.gmra.mxu1 %v4152_v11  ;;  %4587 = vmatmul.mubr.f32.vlgmr.msra.gmra.mxu0 %v4154_v13  ;;  %v4168_v24 = vmax.f32 %v3609_v43, 0.0  ;;  %v4170_v35 = vmax.f32 %v3686_v10, 0.0  ;;  %v4257_v44 = vld [vmem:[%s6581_s24 + $0x248] sm:$0xff]  ;;  %v4304_v11 = vld [vmem:[%s6581_s24 + $0x3c0] sm:$0xff]  ;;  %v4303_v43 = vld [vmem:[%s6581_s24 + $0x3b8] sm:$0xff] }
0x1825   : > { %5771 = vmatpush3.msra.mxu1 %v4263_v14  ;;  %5809 = vmatpush3.msra.mxu0 %v4295_v15  ;;  %v4289_v8 = vld [vmem:[%s6581_s24 + $0x348] sm:$0xff]  ;;  %v4256_v13 = vld [vmem:[%s6581_s24 + $0x240] sm:$0xff]  ;;  %v4271_v15 = vld [vmem:[%s6581_s24 + $0x2b8] sm:$0xff] }
0x1826   : > { %v4169_v26 = vmax.f32 %v3611_v21, 0.0  ;;  %v4171_v28 = vmax.f32 %v3688_v22, 0.0  ;;  %5772 = vmatprep.subr.mxu1 %v4278_v20  ;;  %5810 = vmatprep.subr.mxu0 %v4310_v32  ;;  %v4288_v14 = vld [vmem:[%s6581_s24 + $0x340] sm:$0xff]  ;;  %v4255_v33 = vld [vmem:[%s6581_s24 + $0x238] sm:$0xff]  ;;  %v4270_v20 = vld [vmem:[%s6581_s24 + $0x2b0] sm:$0xff] }
0x1827   : > { %v7219_v12 = vpop.f32.mrf.mxu1  ;;  %v7221_v34 = vpop.f32.mrf.mxu0  ;;  %5773 = vmatpush3.msra.mxu1 %v4262_v23  ;;  %5811 = vmatpush3.msra.mxu0 %v4294_v25  ;;  %v4287_v19 = vld [vmem:[%s6581_s24 + $0x338] sm:$0xff]  ;;  %v4302_v32 = vld [vmem:[%s6581_s24 + $0x3b0] sm:$0xff]  ;;  %v4269_v22 = vld [vmem:[%s6581_s24 + $0x2a8] sm:$0xff] }
0x1828   : > { %4516 = vmatprep.mubr.f32.mxu1 %v4169_v26  ;;  %4591 = vmatprep.mubr.f32.mxu0 %v4171_v28  ;;  %v4254_v10 = vld [vmem:[%s6581_s24 + $0x230] sm:$0xff]  ;;  %v4301_v23 = vld [vmem:[%s6581_s24 + $0x3a8] sm:$0xff] }
0x1829   : > { %v3758_v40 = vpop.f32.mrf.mxu1  ;;  %v3835_v41 = vpop.f32.mrf.mxu0  ;;  %5774 = vmatprep.subr.mxu1 %v4277_v27  ;;  %5812 = vmatprep.subr.mxu0 %v4309_v31  ;;  %v4286_v21 = vld [vmem:[%s6581_s24 + $0x330] sm:$0xff]  ;;  %v4253_v25 = vld [vmem:[%s6581_s24 + $0x228] sm:$0xff]  ;;  %v4268_v27 = vld [vmem:[%s6581_s24 + $0x2a0] sm:$0xff] }
0x182a   : > { %v3759_v46 = vadd.f32 %v3758_v40, %v7210_v29  ;;  %v3836_v47 = vadd.f32 %v3835_v41, %v7215_v30  ;;  %4517 = vmatmul.mubr.f32.gmra.mxu1 %v4168_v24  ;;  %4592 = vmatmul.mubr.f32.gmra.mxu0 %v4170_v35  ;;  %v4285_v26 = vld [vmem:[%s6581_s24 + $0x328] sm:$0xff]  ;;  %v4300_v31 = vld [vmem:[%s6581_s24 + $0x3a0] sm:$0xff]  ;;  %v4299_v40 = vld [vmem:[%s6581_s24 + $0x398] sm:$0xff]  ;;  %v3469_v41 = vrot.slane %v7183_v56, %v3468_v50 }
0x182b   : > { %5775 = vmatpush3.msra.mxu1 %v4261_v37  ;;  %5813 = vmatpush3.msra.mxu0 %v4293_v36  ;;  %v4252_v35 = vld [vmem:[%s6581_s24 + $0x220] sm:$0xff]  ;;  %v4267_v36 = vld [vmem:[%s6581_s24 + $0x298] sm:$0xff]  ;;  %v4250_v50 = vld [vmem:[%s6581_s24 + $0x210] sm:$0xff] }
0x182c   : > { %v4157_v62 = vmax.f32 %v3759_v46, 0.0  ;;  %v4159_v63 = vmax.f32 %v3836_v47, 0.0  ;;  %5776 = vmatprep.subr.mxu1 %v4276_v42  ;;  %5814 = vmatprep.subr.mxu0 %v4308_v45  ;;  %v4284_v37 = vld [vmem:[%s6581_s24 + $0x320] sm:$0xff]  ;;  %v3477_v42 = vrot.slane %v7183_v56, %v3476_v54  ;;  %v4251_v45 = vld [vmem:[%s6581_s24 + $0x218] sm:$0xff]  ;;  %v4282_v54 = vld [vmem:[%s6581_s24 + $0x310] sm:$0xff] }
0x182d   : > { %5777 = vmatpush3.msra.mxu1 %v4260_v48  ;;  %5815 = vmatpush3.msra.mxu0 %v4292_v60  ;;  %v7259_v28 = vpop.f32.mrf.mxu1  ;;  %v3839_v24 = vpop.f32.mrf.mxu0  ;;  %v4283_v46 = vld [vmem:[%s6581_s24 + $0x318] sm:$0xff]  ;;  %v4266_v48 = vld [vmem:[%s6581_s24 + $0x290] sm:$0xff]  ;;  %v4265_v56 = vld [vmem:[%s6581_s24 + $0x288] sm:$0xff] }
0x182e   : > { %5778 = vmatprep.subr.mxu1 %v4275_v61  ;;  %4661 = vmatprep.mubr.f32.mxu1 %v4157_v62  ;;  %v4298_v60 = vld [vmem:[%s6581_s24 + $0x390] sm:$0xff]  ;;  %v4297_v62 = vld [vmem:[%s6581_s24 + $0x388] sm:$0xff] }
0x182f   : > { %5816 = vmatprep.subr.mxu0 %v4307_v0  ;;  %4736 = vmatprep.mubr.f32.mxu0 %v4159_v63  ;;  %v3764_v47 = vpop.f32.mrf.mxu1  ;;  %v3841_v61 = vpop.f32.mrf.mxu0  ;;  %v3757_v63 = vadd.f32 %v7219_v12, %v3469_v41  ;;  %v3834_v0 = vadd.f32 %v7221_v34, %v3477_v42  ;;  %v4248_v34 = vld [vmem:[%s6581_s24 + $0x200] sm:$0xff] }
0x1830   : > { %5779 = vmatpush3.msra.mxu1 %v4259_v7  ;;  %5817 = vmatpush3.msra.mxu0 %v4291_v2  ;;  %v4249_v7 = vld [vmem:[%s6581_s24 + $0x208] sm:$0xff]  ;;  %v3842_v12 = vadd.f32 %v3841_v61, %v7215_v30  ;;  %v4375_v30 = vld [vmem:[%s6581_s24 + $0x5f8] sm:$0xff]  ;;  %v4370_v61 = vld [vmem:[%s6581_s24 + $0x5d0] sm:$0xff] }
0x1831   : > { %5780 = vmatprep.subr.mxu1 %v4274_v4  ;;  %5818 = vmatprep.subr.mxu0 %v4306_v3  ;;  %v4281_v2 = vld [vmem:[%s6581_s24 + $0x308] sm:$0xff]  ;;  %v4264_v3 = vld [vmem:[%s6581_s24 + $0x280] sm:$0xff] }
0x1832   : > { %5781 = vmatpush3.msra.mxu1 %v4258_v55  ;;  %5819 = vmatpush3.msra.mxu0 %v4290_v5  ;;  %v4296_v55 = vld [vmem:[%s6581_s24 + $0x380] sm:$0xff]  ;;  %v3765_v5 = vadd.f32 %v3764_v47, %v7210_v29  ;;  %v4343_v29 = vld [vmem:[%s6581_s24 + $0x4f8] sm:$0xff] }
0x1833   : > { %5782 = vmatprep.subr.mxu1 %v4273_v49  ;;  %5820 = vmatprep.subr.mxu0 %v4305_v6  ;;  %v7285_v4 = vpop.f32.mrf.mxu1  ;;  %v7291_v49 = vpop.f32.mrf.mxu0  ;;  %v4280_v6 = vld [vmem:[%s6581_s24 + $0x300] sm:$0xff]  ;;  %v4323_v47 = vld [vmem:[%s6581_s24 + $0x458] sm:$0xff] }
0x1834   : > { %5783 = vmatpush3.msra.mxu1 %v4257_v44  ;;  %5821 = vmatpush3.msra.mxu0 %v4289_v8  ;;  %v4156_v44 = vmax.f32 %v3757_v63, 0.0  ;;  %v4158_v8 = vmax.f32 %v3834_v0, 0.0  ;;  %v4321_v63 = vld [vmem:[%s6581_s24 + $0x448] sm:$0xff] }
0x1835   : > { %5784 = vmatprep.subr.mxu1 %v4272_v9  ;;  %5822 = vmatprep.subr.mxu0 %v4304_v11  ;;  %v7298_v9 = vrot.slane %v7168_v38, %v3456_v58  ;;  %v3912_v11 = vpop.f32.mrf.mxu1  ;;  %v3840_v58 = vadd.f32 %v3839_v24, %v3477_v42  ;;  %v4356_v42 = vld [vmem:[%s6581_s24 + $0x560] sm:$0xff]  ;;  %v4353_v0 = vld [vmem:[%s6581_s24 + $0x548] sm:$0xff] }
0x1836   : > { %5785 = vmatpush3.msra.mxu1 %v4256_v13  ;;  %5823 = vmatpush3.msra.mxu0 %v4288_v14  ;;  %v7305_v13 = vrot.slane %v7168_v38, %v3464_v59  ;;  %v3763_v14 = vadd.f32 %v7259_v28, %v3469_v41  ;;  %v4342_v59 = vld [vmem:[%s6581_s24 + $0x4f0] sm:$0xff]  ;;  %v4341_v28 = vld [vmem:[%s6581_s24 + $0x4e8] sm:$0xff]  ;;  %v4324_v41 = vld [vmem:[%s6581_s24 + $0x460] sm:$0xff] }
0x1837   : > { %5786 = vmatprep.subr.mxu1 %v4271_v15  ;;  %5824 = vmatprep.subr.mxu0 %v4303_v43  ;;  %v4173_v15 = vmax.f32 %v3765_v5, 0.0  ;;  %v4175_v43 = vmax.f32 %v3842_v12, 0.0  ;;  %v4335_v5 = vld [vmem:[%s6581_s24 + $0x4b8] sm:$0xff] }
0x1838   : > { %5787 = vmatpush3.msra.mxu1 %v4255_v33  ;;  %5825 = vmatpush3.msra.mxu0 %v4287_v19  ;;  %v3989_v33 = vpop.f32.mrf.mxu0  ;;  %v4327_v19 = vld [vmem:[%s6581_s24 + $0x478] sm:$0xff] }
0x1839   : > { %5788 = vmatprep.subr.mxu1 %v4270_v20  ;;  %5826 = vmatprep.subr.mxu0 %v4302_v32  ;;  %v4359_v20 = vld [vmem:[%s6581_s24 + $0x578] sm:$0xff]  ;;  %v4374_v32 = vld [vmem:[%s6581_s24 + $0x5f0] sm:$0xff] }
0x183a   : > { %5789 = vmatpush3.msra.mxu1 %v4254_v10  ;;  %5827 = vmatpush3.msra.mxu0 %v4286_v21  ;;  %v3913_v10 = vadd.f32 %v3912_v11, %v7298_v9  ;;  %v4326_v21 = vld [vmem:[%s6581_s24 + $0x470] sm:$0xff]  ;;  %v4367_v12 = vld [vmem:[%s6581_s24 + $0x5b8] sm:$0xff]  ;;  %v4333_v11 = vld [vmem:[%s6581_s24 + $0x4a8] sm:$0xff] }
0x183b   : > { %5790 = vmatprep.subr.mxu1 %v4269_v22  ;;  %5828 = vmatprep.subr.mxu0 %v4301_v23  ;;  %v4358_v22 = vld [vmem:[%s6581_s24 + $0x570] sm:$0xff]  ;;  %v3990_v23 = vadd.f32 %v3989_v33, %v7305_v13  ;;  %v4332_v33 = vld [vmem:[%s6581_s24 + $0x4a0] sm:$0xff] }
0x183c   : > { %5791 = vmatpush3.msra.mxu1 %v4253_v25  ;;  %5829 = vmatpush3.msra.mxu0 %v4285_v26  ;;  %v4172_v25 = vmax.f32 %v3763_v14, 0.0  ;;  %v4174_v26 = vmax.f32 %v3840_v58, 0.0  ;;  %v4161_v24 = vmax.f32 %v3913_v10, 0.0  ;;  %v4365_v14 = vld [vmem:[%s6581_s24 + $0x5a8] sm:$0xff]  ;;  %v4331_v10 = vld [vmem:[%s6581_s24 + $0x498] sm:$0xff] }
0x183d   : > { %5792 = vmatprep.subr.mxu1 %v4268_v27  ;;  %5830 = vmatprep.subr.mxu0 %v4300_v31  ;;  %v4373_v27 = vld [vmem:[%s6581_s24 + $0x5e8] sm:$0xff] }
0x183e   : > { %5793 = vmatpush3.msra.mxu1 %v4252_v35  ;;  %5831 = vmatpush3.msra.mxu0 %v4284_v37  ;;  %v4325_v31 = vld [vmem:[%s6581_s24 + $0x468] sm:$0xff]  ;;  %v4163_v37 = vmax.f32 %v3990_v23, 0.0  ;;  %v3493_v23 = vrot.slane %v7168_v38, %v3460_v53  ;;  %v4346_v53 = vld [vmem:[%s6581_s24 + $0x510] sm:$0xff] }
0x183f   : > { %5794 = vmatprep.subr.mxu1 %v4267_v36  ;;  %5832 = vmatprep.subr.mxu0 %v4299_v40  ;;  %v4357_v35 = vld [vmem:[%s6581_s24 + $0x568] sm:$0xff]  ;;  %v4340_v36 = vld [vmem:[%s6581_s24 + $0x4e0] sm:$0xff] }
0x1840   : > { %5795 = vmatpush3.msra.mxu1 %v4251_v45  ;;  %5833 = vmatpush3.msra.mxu0 %v4283_v46  ;;  %v4372_v40 = vld [vmem:[%s6581_s24 + $0x5e0] sm:$0xff]  ;;  %v4339_v45 = vld [vmem:[%s6581_s24 + $0x4d8] sm:$0xff]  ;;  %v4317_v58 = vld [vmem:[%s6581_s24 + $0x428] sm:$0xff] }
0x1841   : > { %5796 = vmatprep.subr.mxu1 %v4266_v48  ;;  %5834 = vmatprep.subr.mxu0 %v4298_v60  ;;  %v4371_v46 = vld [vmem:[%s6581_s24 + $0x5d8] sm:$0xff]  ;;  %v4338_v60 = vld [vmem:[%s6581_s24 + $0x4d0] sm:$0xff] }
0x1842   : > { %5797 = vmatpush3.msra.mxu1 %v4250_v50  ;;  %5835 = vmatpush3.msra.mxu0 %v4282_v54  ;;  %v4355_v48 = vld [vmem:[%s6581_s24 + $0x558] sm:$0xff]  ;;  %v4322_v50 = vld [vmem:[%s6581_s24 + $0x450] sm:$0xff] }
0x1843   : > { %5798 = vmatprep.subr.mxu1 %v4265_v56  ;;  %5836 = vmatprep.subr.mxu0 %v4297_v62  ;;  %v4354_v54 = vld [vmem:[%s6581_s24 + $0x550] sm:$0xff]  ;;  %v4337_v56 = vld [vmem:[%s6581_s24 + $0x4c8] sm:$0xff] }
0x1844   : > { %5799 = vmatpush3.msra.mxu1 %v4249_v7  ;;  %5837 = vmatpush3.msra.mxu0 %v4281_v2  ;;  %v4369_v62 = vld [vmem:[%s6581_s24 + $0x5c8] sm:$0xff]  ;;  %v4336_v7 = vld [vmem:[%s6581_s24 + $0x4c0] sm:$0xff] }
0x1845   : > { %5800 = vmatprep.subr.mxu1 %v4264_v3  ;;  %5838 = vmatprep.subr.mxu0 %v4296_v55  ;;  %v4368_v2 = vld [vmem:[%s6581_s24 + $0x5c0] sm:$0xff] }
0x1846   : > { %5801 = vmatpush3.msra.mxu1 %v4248_v34  ;;  %5839 = vmatpush3.msra.mxu0 %v4280_v6  ;;  %v4320_v3 = vld [vmem:[%s6581_s24 + $0x440] sm:$0xff]  ;;  %v4319_v34 = vld [vmem:[%s6581_s24 + $0x438] sm:$0xff] }
0x1847   : > { %4662 = vmatmul.mubr.f32.vlgmr.msra.gmra.mxu1 %v4156_v44  ;;  %4737 = vmatmul.mubr.f32.vlgmr.msra.gmra.mxu0 %v4158_v8  ;;  %v4352_v55 = vld [vmem:[%s6581_s24 + $0x540] sm:$0xff]  ;;  %v4351_v6 = vld [vmem:[%s6581_s24 + $0x538] sm:$0xff]  ;;  %v4334_v44 = vld [vmem:[%s6581_s24 + $0x4b0] sm:$0xff] }
0x1848   : > { %5846 = vmatprep.subr.mxu1 %v4343_v29  ;;  %5884 = vmatprep.subr.mxu0 %v4375_v30  ;;  %v4366_v8 = vld [vmem:[%s6581_s24 + $0x5b0] sm:$0xff] }
0x1849   : > { %4666 = vmatprep.mubr.f32.mxu1 %v4173_v15  ;;  %4741 = vmatprep.mubr.f32.mxu0 %v4175_v43  ;;  %v4318_v29 = vld [vmem:[%s6581_s24 + $0x430] sm:$0xff]  ;;  %v4349_v15 = vld [vmem:[%s6581_s24 + $0x528] sm:$0xff]  ;;  %v7352_v43 = vpop.f32.mrf.mxu1 }
0x184a   : > { %5847 = vmatpush3.msra.mxu1 %v4327_v19  ;;  %5885 = vmatpush3.msra.mxu0 %v4359_v20  ;;  %v4350_v30 = vld [vmem:[%s6581_s24 + $0x530] sm:$0xff]  ;;  %v4364_v19 = vld [vmem:[%s6581_s24 + $0x5a0] sm:$0xff]  ;;  %v3993_v20 = vpop.f32.mrf.mxu0 }
0x184b   : > { %5848 = vmatprep.subr.mxu1 %v4342_v59  ;;  %5886 = vmatprep.subr.mxu0 %v4374_v32  ;;  %v4316_v59 = vld [vmem:[%s6581_s24 + $0x420] sm:$0xff] }
0x184c   : > { %5849 = vmatpush3.msra.mxu1 %v4326_v21  ;;  %5887 = vmatpush3.msra.mxu0 %v4358_v22  ;;  %v4348_v32 = vld [vmem:[%s6581_s24 + $0x520] sm:$0xff]  ;;  %v4363_v21 = vld [vmem:[%s6581_s24 + $0x598] sm:$0xff]  ;;  %v3485_v22 = vrot.slane %v7168_v38, %v3452_v52  ;;  %v4314_v52 = vld [vmem:[%s6581_s24 + $0x410] sm:$0xff] }
0x184d   : > { %4667 = vmatmul.mubr.f32.gmra.mxu1 %v4172_v25  ;;  %4742 = vmatmul.mubr.f32.gmra.mxu0 %v4174_v26  ;;  %v4315_v25 = vld [vmem:[%s6581_s24 + $0x418] sm:$0xff] }
0x184e   : > { %5850 = vmatprep.subr.mxu1 %v4341_v28  ;;  %5888 = vmatprep.subr.mxu0 %v4373_v27  ;;  %v4347_v26 = vld [vmem:[%s6581_s24 + $0x518] sm:$0xff]  ;;  %v3918_v28 = vpop.f32.mrf.mxu1  ;;  %v4330_v27 = vld [vmem:[%s6581_s24 + $0x490] sm:$0xff] }
0x184f   : > { %5851 = vmatpush3.msra.mxu1 %v4325_v31  ;;  %4811 = vmatprep.mubr.f32.mxu1 %v4161_v24  ;;  %v4362_v31 = vld [vmem:[%s6581_s24 + $0x590] sm:$0xff]  ;;  %v3995_v24 = vpop.f32.mrf.mxu0 }
0x1850   : > { %5889 = vmatpush3.msra.mxu0 %v4357_v35  ;;  %4886 = vmatprep.mubr.f32.mxu0 %v4163_v37  ;;  %v4329_v35 = vld [vmem:[%s6581_s24 + $0x488] sm:$0xff] }
0x1851   : > { %5852 = vmatprep.subr.mxu1 %v4340_v36  ;;  %5890 = vmatprep.subr.mxu0 %v4372_v40  ;;  %v4361_v37 = vld [vmem:[%s6581_s24 + $0x588] sm:$0xff]  ;;  %v3911_v36 = vadd.f32 %v7285_v4, %v3485_v22  ;;  %v3988_v40 = vadd.f32 %v7291_v49, %v3493_v23  ;;  %v3996_v4 = vadd.f32 %v3995_v24, %v7305_v13  ;;  %v4312_v49 = vld [vmem:[%s6581_s24 + $0x400] sm:$0xff]  ;;  %v4439_v13 = vld [vmem:[%s6581_s24 + $0x7f8] sm:$0xff] }
0x1852   : > { %5853 = vmatpush3.msra.mxu1 %v4324_v41  ;;  %5891 = vmatpush3.msra.mxu0 %v4356_v42  ;;  %v4313_v41 = vld [vmem:[%s6581_s24 + $0x408] sm:$0xff] }
0x1853   : > { %5854 = vmatprep.subr.mxu1 %v4339_v45  ;;  %5892 = vmatprep.subr.mxu0 %v4371_v46  ;;  %v4345_v42 = vld [vmem:[%s6581_s24 + $0x508] sm:$0xff]  ;;  %v7378_v45 = vpop.f32.mrf.mxu1  ;;  %v4328_v46 = vld [vmem:[%s6581_s24 + $0x480] sm:$0xff] }
0x1854   : > { %5855 = vmatpush3.msra.mxu1 %v4323_v47  ;;  %5893 = vmatpush3.msra.mxu0 %v4355_v48  ;;  %v4360_v47 = vld [vmem:[%s6581_s24 + $0x580] sm:$0xff]  ;;  %v3919_v48 = vadd.f32 %v3918_v28, %v7298_v9  ;;  %v4407_v9 = vld [vmem:[%s6581_s24 + $0x6f8] sm:$0xff]  ;;  %v4401_v28 = vld [vmem:[%s6581_s24 + $0x6c8] sm:$0xff] }
0x1855   : > { %5856 = vmatprep.subr.mxu1 %v4338_v60  ;;  %5894 = vmatprep.subr.mxu0 %v4370_v61  ;;  %v7384_v60 = vpop.f32.mrf.mxu0  ;;  %v4344_v61 = vld [vmem:[%s6581_s24 + $0x500] sm:$0xff]  ;;  %v4417_v24 = vld [vmem:[%s6581_s24 + $0x748] sm:$0xff] }
0x1856   : > { %5857 = vmatpush3.msra.mxu1 %v4322_v50  ;;  %5895 = vmatpush3.msra.mxu0 %v4354_v54  ;;  %v4160_v50 = vmax.f32 %v3911_v36, 0.0  ;;  %v4162_v54 = vmax.f32 %v3988_v40, 0.0  ;;  %v4399_v36 = vld [vmem:[%s6581_s24 + $0x6b8] sm:$0xff] }
0x1857   : > { %5858 = vmatprep.subr.mxu1 %v4337_v56  ;;  %5896 = vmatprep.subr.mxu0 %v4369_v62  ;;  %v7391_v56 = vrot.slane %v7168_v38, %v3472_v17  ;;  %v4066_v62 = vpop.f32.mrf.mxu1  ;;  %v3994_v17 = vadd.f32 %v3993_v20, %v3493_v23  ;;  %v4420_v20 = vld [vmem:[%s6581_s24 + $0x760] sm:$0xff]  ;;  %v4434_v23 = vld [vmem:[%s6581_s24 + $0x7d0] sm:$0xff]  ;;  %v4431_v40 = vld [vmem:[%s6581_s24 + $0x7b8] sm:$0xff] }
0x1858   : > { %5859 = vmatpush3.msra.mxu1 %v4321_v63  ;;  %5897 = vmatpush3.msra.mxu0 %v4353_v0  ;;  %v7398_v63 = vrot.slane %v7168_v38, %v3480_v18  ;;  %v3917_v0 = vadd.f32 %v7352_v43, %v3485_v22  ;;  %v4438_v38 = vld [vmem:[%s6581_s24 + $0x7f0] sm:$0xff]  ;;  %v4404_v43 = vld [vmem:[%s6581_s24 + $0x6e0] sm:$0xff] }
0x1859   : > { %5860 = vmatprep.subr.mxu1 %v4336_v7  ;;  %5898 = vmatprep.subr.mxu0 %v4368_v2  ;;  %v4177_v7 = vmax.f32 %v3919_v48, 0.0  ;;  %v4179_v2 = vmax.f32 %v3996_v4, 0.0  ;;  %v4067_v18 = vadd.f32 %v4066_v62, %v7391_v56  ;;  %v4402_v22 = vld [vmem:[%s6581_s24 + $0x6d0] sm:$0xff]  ;;  %v4070_v62 = vpop.f32.mrf.mxu1 }
0x185a   : > { %5861 = vmatpush3.msra.mxu1 %v4320_v3  ;;  %5899 = vmatpush3.msra.mxu0 %v4352_v55  ;;  %v4143_v3 = vpop.f32.mrf.mxu0  ;;  %v4391_v55 = vld [vmem:[%s6581_s24 + $0x678] sm:$0xff]  ;;  %v4382_v48 = vld [vmem:[%s6581_s24 + $0x630] sm:$0xff] }
0x185b   : > { %5862 = vmatprep.subr.mxu1 %v4335_v5  ;;  %5900 = vmatprep.subr.mxu0 %v4367_v12  ;;  %v4423_v5 = vld [vmem:[%s6581_s24 + $0x778] sm:$0xff]  ;;  %v4390_v12 = vld [vmem:[%s6581_s24 + $0x670] sm:$0xff] }
0x185c   : > { %5863 = vmatpush3.msra.mxu1 %v4319_v34  ;;  %5901 = vmatpush3.msra.mxu0 %v4351_v6  ;;  %v4422_v34 = vld [vmem:[%s6581_s24 + $0x770] sm:$0xff]  ;;  %v4144_v6 = vadd.f32 %v4143_v3, %v7398_v63  ;;  %v4427_v3 = vld [vmem:[%s6581_s24 + $0x798] sm:$0xff] }
0x185d   : > { %5864 = vmatprep.subr.mxu1 %v4334_v44  ;;  %5902 = vmatprep.subr.mxu0 %v4366_v8  ;;  %v4176_v44 = vmax.f32 %v3917_v0, 0.0  ;;  %v4178_v8 = vmax.f32 %v3994_v17, 0.0  ;;  %v4414_v4 = vld [vmem:[%s6581_s24 + $0x730] sm:$0xff]  ;;  %v4147_v0 = vpop.f32.mrf.mxu0  ;;  %v4380_v17 = vld [vmem:[%s6581_s24 + $0x620] sm:$0xff] }
0x185e   : > { %5865 = vmatpush3.msra.mxu1 %v4318_v29  ;;  %5903 = vmatpush3.msra.mxu0 %v4350_v30  ;;  %v4405_v29 = vld [vmem:[%s6581_s24 + $0x6e8] sm:$0xff] }
0x185f   : > { %5866 = vmatprep.subr.mxu1 %v4333_v11  ;;  %5904 = vmatprep.subr.mxu0 %v4365_v14  ;;  %v4437_v30 = vld [vmem:[%s6581_s24 + $0x7e8] sm:$0xff]  ;;  %v4165_v14 = vmax.f32 %v4067_v18, 0.0  ;;  %v4072_v18 = vpop.f32.mrf.mxu1 }
0x1860   : > { %5867 = vmatpush3.msra.mxu1 %v4317_v58  ;;  %5905 = vmatpush3.msra.mxu0 %v4349_v15  ;;  %v4389_v11 = vld [vmem:[%s6581_s24 + $0x668] sm:$0xff]  ;;  %v4167_v15 = vmax.f32 %v4144_v6, 0.0  ;;  %v4410_v6 = vld [vmem:[%s6581_s24 + $0x710] sm:$0xff] }
0x1861   : > { %5868 = vmatprep.subr.mxu1 %v4332_v33  ;;  %5906 = vmatprep.subr.mxu0 %v4364_v19  ;;  %v4421_v58 = vld [vmem:[%s6581_s24 + $0x768] sm:$0xff]  ;;  %v4436_v33 = vld [vmem:[%s6581_s24 + $0x7e0] sm:$0xff] }
0x1862   : > { %5869 = vmatpush3.msra.mxu1 %v4316_v59  ;;  %5907 = vmatpush3.msra.mxu0 %v4348_v32  ;;  %v4388_v19 = vld [vmem:[%s6581_s24 + $0x660] sm:$0xff]  ;;  %v4403_v59 = vld [vmem:[%s6581_s24 + $0x6d8] sm:$0xff] }
0x1863   : > { %5870 = vmatprep.subr.mxu1 %v4331_v10  ;;  %5908 = vmatprep.subr.mxu0 %v4363_v21  ;;  %v4435_v32 = vld [vmem:[%s6581_s24 + $0x7d8] sm:$0xff] }
0x1864   : > { %5871 = vmatpush3.msra.mxu1 %v4315_v25  ;;  %5909 = vmatpush3.msra.mxu0 %v4347_v26  ;;  %v4387_v10 = vld [vmem:[%s6581_s24 + $0x658] sm:$0xff]  ;;  %v4386_v25 = vld [vmem:[%s6581_s24 + $0x650] sm:$0xff] }
0x1865   : > { %5872 = vmatprep.subr.mxu1 %v4330_v27  ;;  %5910 = vmatprep.subr.mxu0 %v4362_v31  ;;  %v4419_v21 = vld [vmem:[%s6581_s24 + $0x758] sm:$0xff]  ;;  %v4418_v26 = vld [vmem:[%s6581_s24 + $0x750] sm:$0xff]  ;;  %v4433_v27 = vld [vmem:[%s6581_s24 + $0x7c8] sm:$0xff] }
0x1866   : > { %5873 = vmatpush3.msra.mxu1 %v4314_v52  ;;  %5911 = vmatpush3.msra.mxu0 %v4346_v53  ;;  %v4385_v31 = vld [vmem:[%s6581_s24 + $0x648] sm:$0xff]  ;;  %v4400_v52 = vld [vmem:[%s6581_s24 + $0x6c0] sm:$0xff] }
0x1867   : > { %5874 = vmatprep.subr.mxu1 %v4329_v35  ;;  %5912 = vmatprep.subr.mxu0 %v4361_v37  ;;  %v4432_v53 = vld [vmem:[%s6581_s24 + $0x7c0] sm:$0xff] }
0x1868   : > { %5875 = vmatpush3.msra.mxu1 %v4313_v41  ;;  %5913 = vmatpush3.msra.mxu0 %v4345_v42  ;;  %v4384_v35 = vld [vmem:[%s6581_s24 + $0x640] sm:$0xff]  ;;  %v4383_v41 = vld [vmem:[%s6581_s24 + $0x638] sm:$0xff] }
0x1869   : > { %5876 = vmatprep.subr.mxu1 %v4328_v46  ;;  %5914 = vmatprep.subr.mxu0 %v4360_v47  ;;  %v4416_v37 = vld [vmem:[%s6581_s24 + $0x740] sm:$0xff]  ;;  %v4415_v42 = vld [vmem:[%s6581_s24 + $0x738] sm:$0xff]  ;;  %v4398_v46 = vld [vmem:[%s6581_s24 + $0x6b0] sm:$0xff] }
0x186a   : > { %5877 = vmatpush3.msra.mxu1 %v4312_v49  ;;  %5915 = vmatpush3.msra.mxu0 %v4344_v61  ;;  %v4430_v47 = vld [vmem:[%s6581_s24 + $0x7b0] sm:$0xff]  ;;  %v4397_v49 = vld [vmem:[%s6581_s24 + $0x6a8] sm:$0xff] }
0x186b   : > { %4812 = vmatmul.mubr.f32.vlgmr.msra.gmra.mxu1 %v4160_v50  ;;  %4887 = vmatmul.mubr.f32.vlgmr.msra.gmra.mxu0 %v4162_v54  ;;  %v4429_v61 = vld [vmem:[%s6581_s24 + $0x7a8] sm:$0xff] }
0x186c   : > { %5922 = vmatprep.subr.mxu1 %v4407_v9  ;;  %5960 = vmatprep.subr.mxu0 %v4439_v13  ;;  %v4381_v50 = vld [vmem:[%s6581_s24 + $0x628] sm:$0xff]  ;;  %v4396_v9 = vld [vmem:[%s6581_s24 + $0x6a0] sm:$0xff] }
0x186d   : > { %4816 = vmatprep.mubr.f32.mxu1 %v4177_v7  ;;  %4891 = vmatprep.mubr.f32.mxu0 %v4179_v2  ;;  %v4413_v54 = vld [vmem:[%s6581_s24 + $0x728] sm:$0xff]  ;;  %v4428_v13 = vld [vmem:[%s6581_s24 + $0x7a0] sm:$0xff]  ;;  %v4395_v2 = vld [vmem:[%s6581_s24 + $0x698] sm:$0xff] }
0x186e   : > { %5923 = vmatpush3.msra.mxu1 %v4391_v55  ;;  %5961 = vmatpush3.msra.mxu0 %v4423_v5  ;;  %v4412_v7 = vld [vmem:[%s6581_s24 + $0x720] sm:$0xff]  ;;  %v4379_v55 = vld [vmem:[%s6581_s24 + $0x618] sm:$0xff] }
0x186f   : > { %5924 = vmatprep.subr.mxu1 %v4406_v16  ;;  %5962 = vmatprep.subr.mxu0 %v4438_v38  ;;  %v4411_v5 = vld [vmem:[%s6581_s24 + $0x718] sm:$0xff]  ;;  %v4394_v16 = vld [vmem:[%s6581_s24 + $0x690] sm:$0xff] }
0x1870   : > { %5925 = vmatpush3.msra.mxu1 %v4390_v12  ;;  %5963 = vmatpush3.msra.mxu0 %v4422_v34  ;;  %v4426_v38 = vld [vmem:[%s6581_s24 + $0x790] sm:$0xff]  ;;  %v4149_v12 = vpop.f32.mrf.mxu0 }
0x1871   : > { %4817 = vmatmul.mubr.f32.gmra.mxu1 %v4176_v44  ;;  %4892 = vmatmul.mubr.f32.gmra.mxu0 %v4178_v8  ;;  %v4378_v34 = vld [vmem:[%s6581_s24 + $0x610] sm:$0xff]  ;;  %v4393_v44 = vld [vmem:[%s6581_s24 + $0x688] sm:$0xff] }
0x1872   : > { %5926 = vmatprep.subr.mxu1 %v4405_v29  ;;  %5964 = vmatprep.subr.mxu0 %v4437_v30  ;;  %v4425_v8 = vld [vmem:[%s6581_s24 + $0x788] sm:$0xff]  ;;  %v4065_v29 = vadd.f32 %v7378_v45, %v7173_v39  ;;  %v4142_v30 = vadd.f32 %v7384_v60, %v7178_v51 }
0x1873   : > { %5927 = vmatpush3.msra.mxu1 %v4389_v11  ;;  %4961 = vmatprep.mubr.f32.mxu1 %v4165_v14  ;;  %v4377_v11 = vld [vmem:[%s6581_s24 + $0x608] sm:$0xff] }
0x1874   : > { %5965 = vmatpush3.msra.mxu0 %v4421_v58  ;;  %5036 = vmatprep.mubr.f32.mxu0 %v4167_v15  ;;  %v4409_v14 = vld [vmem:[%s6581_s24 + $0x708] sm:$0xff]  ;;  %v4073_v58 = vadd.f32 %v4072_v18, %v7391_v56  ;;  %v4150_v15 = vadd.f32 %v4149_v12, %v7398_v63  ;;  %v4164_v45 = vmax.f32 %v4065_v29, 0.0  ;;  %v4166_v60 = vmax.f32 %v4142_v30, 0.0 }
0x1875   : > { %5928 = vmatprep.subr.mxu1 %v4404_v43  ;;  %5966 = vmatprep.subr.mxu0 %v4436_v33  ;;  %v4392_v43 = vld [vmem:[%s6581_s24 + $0x680] sm:$0xff] }
0x1876   : > { %5929 = vmatpush3.msra.mxu1 %v4388_v19  ;;  %5967 = vmatpush3.msra.mxu0 %v4420_v20  ;;  %v4424_v33 = vld [vmem:[%s6581_s24 + $0x780] sm:$0xff]  ;;  %v4181_v56 = vmax.f32 %v4073_v58, 0.0  ;;  %v4183_v63 = vmax.f32 %v4150_v15, 0.0 }
0x1877   : > { %5930 = vmatprep.subr.mxu1 %v4403_v59  ;;  %5968 = vmatprep.subr.mxu0 %v4435_v32  ;;  %v4376_v19 = vld [vmem:[%s6581_s24 + $0x600] sm:$0xff]  ;;  %v4071_v59 = vadd.f32 %v4070_v62, %v7173_v39  ;;  %v4148_v32 = vadd.f32 %v4147_v0, %v7178_v51 }
0x1878   : > { %5931 = vmatpush3.msra.mxu1 %v4387_v10  ;;  %5969 = vmatpush3.msra.mxu0 %v4419_v21  ;;  %v4408_v20 = vld [vmem:[%s6581_s24 + $0x700] sm:$0xff]  ;;  %s7642_s24 = scalar_lea.vmem %s7563_s21, %s6493_s7 }
0x1879   : > { %5932 = vmatprep.subr.mxu1 %v4402_v22  ;;  %5970 = vmatprep.subr.mxu0 %v4434_v23  ;;  %v4180_v10 = vmax.f32 %v4071_v59, 0.0  ;;  %v4182_v21 = vmax.f32 %v4148_v32, 0.0 }
0x187a   : > { %5933 = vmatpush3.msra.mxu1 %v4386_v25  ;;  %5971 = vmatpush3.msra.mxu0 %v4418_v26 }
0x187b   : > { %5934 = vmatprep.subr.mxu1 %v4401_v28  ;;  %5972 = vmatprep.subr.mxu0 %v4433_v27 }
0x187c   : > { %5935 = vmatpush3.msra.mxu1 %v4385_v31  ;;  %5973 = vmatpush3.msra.mxu0 %v4417_v24 }
0x187d   : > { %5936 = vmatprep.subr.mxu1 %v4400_v52  ;;  %5974 = vmatprep.subr.mxu0 %v4432_v53 }
0x187e   : > { %5937 = vmatpush3.msra.mxu1 %v4384_v35  ;;  %5975 = vmatpush3.msra.mxu0 %v4416_v37 }
0x187f   : > { %5938 = vmatprep.subr.mxu1 %v4399_v36  ;;  %5976 = vmatprep.subr.mxu0 %v4431_v40 }
0x1880   : > { %5939 = vmatpush3.msra.mxu1 %v4383_v41  ;;  %5977 = vmatpush3.msra.mxu0 %v4415_v42  ;;  %v5580_v41 = vld [vmem:[%s7642_s24] ss:$0 sm:$0xff] }
0x1881   : > { %5940 = vmatprep.subr.mxu1 %v4398_v46  ;;  %5978 = vmatprep.subr.mxu0 %v4430_v47 }
0x1882   : > { %5941 = vmatpush3.msra.mxu1 %v4382_v48  ;;  %5979 = vmatpush3.msra.mxu0 %v4414_v4 }
0x1883   : > { %5942 = vmatprep.subr.mxu1 %v4397_v49  ;;  %5980 = vmatprep.subr.mxu0 %v4429_v61 }
0x1884   : > { %5943 = vmatpush3.msra.mxu1 %v4381_v50  ;;  %5981 = vmatpush3.msra.mxu0 %v4413_v54 }
0x1885   : > { %5944 = vmatprep.subr.mxu1 %v4396_v9  ;;  %5982 = vmatprep.subr.mxu0 %v4428_v13 }
0x1886   : > { %5945 = vmatpush3.msra.mxu1 %v4380_v17  ;;  %5983 = vmatpush3.msra.mxu0 %v4412_v7 }
0x1887   : > { %5946 = vmatprep.subr.mxu1 %v4395_v2  ;;  %5984 = vmatprep.subr.mxu0 %v4427_v3 }
0x1888   : > { %5947 = vmatpush3.msra.mxu1 %v4379_v55  ;;  %5985 = vmatpush3.msra.mxu0 %v4411_v5 }
0x1889   : > { %5948 = vmatprep.subr.mxu1 %v4394_v16  ;;  %5986 = vmatprep.subr.mxu0 %v4426_v38 }
0x188a   : > { %5949 = vmatpush3.msra.mxu1 %v4378_v34  ;;  %5987 = vmatpush3.msra.mxu0 %v4410_v6 }
0x188b   : > { %5950 = vmatprep.subr.mxu1 %v4393_v44  ;;  %5988 = vmatprep.subr.mxu0 %v4425_v8 }
0x188c   : > { %5951 = vmatpush3.msra.mxu1 %v4377_v11  ;;  %5989 = vmatpush3.msra.mxu0 %v4409_v14 }
0x188d   : > { %5952 = vmatprep.subr.mxu1 %v4392_v43  ;;  %5990 = vmatprep.subr.mxu0 %v4424_v33 }
0x188e   : > { %5953 = vmatpush3.msra.mxu1 %v4376_v19  ;;  %5991 = vmatpush3.msra.mxu0 %v4408_v20 }
0x188f   : > { %4962 = vmatmul.mubr.f32.vlgmr.msra.gmra.mxu1 %v4164_v45  ;;  %5037 = vmatmul.mubr.f32.vlgmr.msra.gmra.mxu0 %v4166_v60 }
0x1890   : > { %4966 = vmatprep.mubr.f32.mxu1 %v4181_v56  ;;  %5041 = vmatprep.mubr.f32.mxu0 %v4183_v63 }
0x1893   : > { %4967 = vmatmul.mubr.f32.gmra.mxu1 %v4180_v10  ;;  %5042 = vmatmul.mubr.f32.gmra.mxu0 %v4182_v21 }
0x18e4   : > { %v5726_v22 = vpop.f32.mrf.mxu1  ;;  %v5764_v23 = vpop.f32.mrf.mxu0 }
0x18e6   : > { %v5727_v39 = vpop.f32.mrf.mxu1  ;;  %v5765_v25 = vpop.f32.mrf.mxu0 }
0x18e7   : > { %v5728_v40 = vadd.f32 %v5727_v39, %v5726_v22  ;;  %v5766_v61 = vadd.f32 %v5765_v25, %v5764_v23 }
0x18e9   : > { %v4514_v48 = vadd.f32 %v5728_v40, %v5580_v41 }
0x18ea   : > { %v5729_v51 = vpop.f32.mrf.mxu1  ;;  %v5767_v26 = vpop.f32.mrf.mxu0 }
0x18eb   : > { %v4589_v9 = vadd.f32 %v5766_v61, %v4514_v48 }
0x18ec   : > { %v5730_v28 = vpop.f32.mrf.mxu1  ;;  %v5768_v27 = vpop.f32.mrf.mxu0 }
0x18ed   : > { %v5731_v4 = vadd.f32 %v5730_v28, %v5729_v51  ;;  %v5769_v0 = vadd.f32 %v5768_v27, %v5767_v26 }
0x18ef   : > { %v4519_v13 = vadd.f32 %v5731_v4, %v5580_v41 }
0x18f1   : > { %v4594_v3 = vadd.f32 %v5769_v0, %v4519_v13 }
0x1907   : > { %v5802_v31 = vpop.f32.mrf.mxu1  ;;  %v5840_v24 = vpop.f32.mrf.mxu0 }
0x1909   : > { %v5803_v52 = vpop.f32.mrf.mxu1  ;;  %v5841_v53 = vpop.f32.mrf.mxu0 }
0x190a   : > { %v5804_v50 = vadd.f32 %v5803_v52, %v5802_v31  ;;  %v5842_v55 = vadd.f32 %v5841_v53, %v5840_v24 }
0x190c   : > { %v4664_v17 = vadd.f32 %v5804_v50, %v4589_v9  ;;  %v5582_v50 = vld [vmem:[%s7644_s8] ss:$0 sm:$0xff] }
0x190d   : > { %v5805_v35 = vpop.f32.mrf.mxu1  ;;  %v5843_v37 = vpop.f32.mrf.mxu0 }
0x190e   : > { %v4739_v38 = vadd.f32 %v5842_v55, %v4664_v17 }
0x190f   : > { %v5806_v36 = vpop.f32.mrf.mxu1  ;;  %v5844_v42 = vpop.f32.mrf.mxu0 }
0x1910   : > { %v5807_v7 = vadd.f32 %v5806_v36, %v5805_v35  ;;  %v5845_v34 = vadd.f32 %v5844_v42, %v5843_v37 }
0x1912   : > { %v4669_v18 = vadd.f32 %v5807_v7, %v4594_v3 }
0x1914   : > { %v4744_v30 = vadd.f32 %v5845_v34, %v4669_v18 }
0x192b   : > { %v5878_v46 = vpop.f32.mrf.mxu1  ;;  %v5916_v47 = vpop.f32.mrf.mxu0 }
0x192d   : > { %v5879_v49 = vpop.f32.mrf.mxu1  ;;  %v5917_v54 = vpop.f32.mrf.mxu0 }
0x192e   : > { %v5880_v5 = vadd.f32 %v5879_v49, %v5878_v46  ;;  %v5918_v11 = vadd.f32 %v5917_v54, %v5916_v47  ;;  %v5581_v49 = vld [vmem:[%s7643_s3] ss:$0 sm:$0xff] }
0x1930   : > { %v4814_v6 = vadd.f32 %v5880_v5, %v4739_v38 }
0x1931   : > { %v5881_v62 = vpop.f32.mrf.mxu1  ;;  %v5919_v2 = vpop.f32.mrf.mxu0 }
0x1932   : > { %v4889_v15 = vadd.f32 %v5918_v11, %v4814_v6 }
0x1933   : > { %v5882_v16 = vpop.f32.mrf.mxu1  ;;  %v5920_v12 = vpop.f32.mrf.mxu0 }
0x1934   : > { %v5883_v44 = vadd.f32 %v5882_v16, %v5881_v62  ;;  %v5921_v45 = vadd.f32 %v5920_v12, %v5919_v2 }
0x1936   : > { %v4819_v43 = vadd.f32 %v5883_v44, %v4744_v30 }
0x1938   : > { %v4894_v63 = vadd.f32 %v5921_v45, %v4819_v43 }
0x194f   : > { %v5954_v8 = vpop.f32.mrf.mxu1  ;;  %v5992_v29 = vpop.f32.mrf.mxu0 }
0x1951   : > { %v5955_v14 = vpop.f32.mrf.mxu1  ;;  %v5993_v58 = vpop.f32.mrf.mxu0 }
0x1952   : > { %v5956_v33 = vadd.f32 %v5955_v14, %v5954_v8  ;;  %v5994_v59 = vadd.f32 %v5993_v58, %v5992_v29 }
0x1953   : > { %v5957_v19 = vpop.f32.mrf.mxu1  ;;  %v5995_v20 = vpop.f32.mrf.mxu0 }
0x1954   : > { %v4964_v60 = vadd.f32 %v5956_v33, %v4889_v15 }
0x1955   : > { %v5958_v32 = vpop.f32.mrf.mxu1  ;;  %v5996_v56 = vpop.f32.mrf.mxu0 }
0x1956   : > { %v5039_v10 = vadd.f32 %v5994_v59, %v4964_v60  ;;  %v5959_v21 = vadd.f32 %v5958_v32, %v5957_v19  ;;  %v5997_v23 = vadd.f32 %v5996_v56, %v5995_v20 }
0x1958   : > { %v4969_v22 = vadd.f32 %v5959_v21, %v4894_v63  ;;  %v5047_v39 = vadd.f32 %v5039_v10, %v7003_v57 }
0x195a   : > { %v5044_v25 = vadd.f32 %v5997_v23, %v4969_v22  ;;  %v5051_v51 = vsel %vm1107_vm1, %v5047_v39, 0.0 }
0x195b   : > { %5052 = vadd.xlane.f32.xlu1 %v5051_v51 }
0x195c   : > { %v5048_v26 = vadd.f32 %v5044_v25, %v7015_v1 }
0x195e   : > { %v5054_v28 = vsel %vm1107_vm1, %v5048_v26, 0.0 }
0x195f   : > { %5055 = vadd.xlane.f32.xlu0 %v5054_v28 }
0x19e4   : > { %v5053_v27 = vpop.xlane.xlu1 %5052 }
0x19e5   : > { %v5057_v31 = vmul.f32 0.03125, %v5053_v27 }
0x19e7   : > { %v5059_v24 = vsub.f32 %v5047_v39, %v5057_v31 }
0x19e8   : > { %v5056_v52 = vpop.xlane.xlu0 %5055 }
0x19e9   : > { %v5058_v53 = vmul.f32 0.03125, %v5056_v52  ;;  %v5061_v35 = vmul.f32 %v5059_v24, %v5059_v24 }
0x19eb   : > { %v5060_v37 = vsub.f32 %v5048_v26, %v5058_v53  ;;  %v5063_v36 = vsel %vm1107_vm1, %v5061_v35, 0.0 }
0x19ec   : > { %5064 = vadd.xlane.f32.xlu1 %v5063_v36 }
0x19ed   : > { %v5062_v57 = vmul.f32 %v5060_v37, %v5060_v37 }
0x19ef   : > { %v5066_v40 = vsel %vm1107_vm1, %v5062_v57, 0.0 }
0x19f0   : > { %5067 = vadd.xlane.f32.xlu0 %v5066_v40 }
0x1a75   : > { %v5065_v1 = vpop.xlane.xlu1 %5064 }
0x1a76   : > { %v5069_v41 = vmul.f32 0.03125, %v5065_v1 }
0x1a78   : > { %v5071_v42 = vadd.f32 1e-05, %v5069_v41 }
0x1a79   : > { %v5068_v46 = vpop.xlane.xlu0 %5067 }
0x1a7a   : > { %6285 = vrsqrt.f32 %v5071_v42  ;;  %v5070_v47 = vmul.f32 0.03125, %v5068_v46 }
0x1a7c   : > { %v5072_v48 = vadd.f32 1e-05, %v5070_v47 }
0x1a7e   : > { %6287 = vrsqrt.f32 %v5072_v48 }
0x1a87   : > { %v6286_v4 = vpop.eup %6285 }
0x1a88   : > { %v5075_v61 = vmul.f32 %v6286_v4, %v5059_v24 }
0x1a8a   : > { %v5083_v54 = vmul.f32 %v5581_v49, %v5075_v61 }
0x1a8b   : > { %v6288_v9 = vpop.eup %6287 }
0x1a8c   : > { %v5091_v13 = vadd.f32 %v5582_v50, %v5083_v54  ;;  %v5076_v62 = vmul.f32 %v6288_v9, %v5060_v37 }
0x1a8e   : > { %5093 = vst.msk [vmem:[#allocation2] sm:$0xff] %vm1107_vm1, %v5091_v13  ;;  %v5084_v0 = vmul.f32 %v5581_v49, %v5076_v62  ;;  %5098 = sbr.rel (%p5583_p5) target bundleno = 7313 (0x1c91), region = 132 }
0x1a90   : > { %v5092_v17 = vadd.f32 %v5582_v50, %v5084_v0 }
0x1a92   : > { %5094 = vst.msk [vmem:[#allocation2 + $0x8] sm:$0xff] %vm1107_vm1, %v5092_v17 }
0x1a93   : > { %v5101_v7 = vsel %vm1107_vm1, %v5091_v13, 0.0  ;;  %v5104_v2 = vsel %vm1107_vm1, %v5092_v17, 0.0  ;;  %v5146_v8 = vld [vmem:[%s7646_s6 + $0x18] sm:$0xff]  ;;  %v5145_v29 = vld [vmem:[%s7646_s6 + $0x10] sm:$0xff]  ;;  %v5144_v30 = vld [vmem:[%s7646_s6 + $0x8] sm:$0xff] }
0x1a94   : > { %5102 = vadd.xlane.f32.xlu0 %v5101_v7  ;;  %6171 = vmatprep.subr.mxu0 %v5146_v8  ;;  %v5143_v11 = vld [vmem:[%s7646_s6] sm:$0xff] }
0x1a95   : > { %6172 = vmatpush3.msra.mxu0 %v5146_v8  ;;  %v5584_v45 = vld [vmem:[%s7647_s29] ss:$0 sm:$0xff] }
0x1a96   : > { %6173 = vmatprep.subr.mxu0 %v5145_v29  ;;  %v5585_v59 = vld [vmem:[%s7648_s30] ss:$0 sm:$0xff] }
0x1a97   : > { %6174 = vmatpush3.msra.mxu0 %v5145_v29  ;;  %v5586_v23 = vld [vmem:[%s7649_s28] ss:$0 sm:$0xff] }
0x1a98   : > { %5105 = vadd.xlane.f32.xlu0 %v5104_v2  ;;  %6175 = vmatprep.subr.mxu0 %v5144_v30 }
0x1a99   : > { %6176 = vmatpush3.msra.mxu0 %v5144_v30 }
0x1a9a   : > { %6177 = vmatprep.subr.mxu0 %v5143_v11 }
0x1a9b   : > { %6178 = vmatpush3.msra.mxu0 %v5143_v11 }
0x1b1d   : > { %v5103_v3 = vpop.xlane.xlu0 %5102 }
0x1b1e   : > { %v5107_v55 = vmul.f32 0.03125, %v5103_v3 }
0x1b20   : > { %v5109_v5 = vsub.f32 %v5091_v13, %v5107_v55 }
0x1b21   : > { %v5106_v16 = vpop.xlane.xlu0 %5105 }
0x1b22   : > { %v5108_v38 = vmul.f32 0.03125, %v5106_v16  ;;  %v5111_v18 = vmul.f32 %v5109_v5, %v5109_v5 }
0x1b24   : > { %v5110_v12 = vsub.f32 %v5092_v17, %v5108_v38  ;;  %v5113_v34 = vsel %vm1107_vm1, %v5111_v18, 0.0 }
0x1b25   : > { %5114 = vadd.xlane.f32.xlu1 %v5113_v34 }
0x1b26   : > { %v5112_v6 = vmul.f32 %v5110_v12, %v5110_v12 }
0x1b28   : > { %v5116_v44 = vsel %vm1107_vm1, %v5112_v6, 0.0 }
0x1b29   : > { %5117 = vadd.xlane.f32.xlu1 %v5116_v44 }
0x1bae   : > { %v5115_v14 = vpop.xlane.xlu1 %5114 }
0x1baf   : > { %v5119_v58 = vmul.f32 0.03125, %v5115_v14 }
0x1bb1   : > { %v5121_v15 = vadd.f32 1e-05, %v5119_v58 }
0x1bb2   : > { %v5118_v43 = vpop.xlane.xlu1 %5117 }
0x1bb3   : > { %6289 = vrsqrt.f32 %v5121_v15  ;;  %v5120_v33 = vmul.f32 0.03125, %v5118_v43 }
0x1bb5   : > { %v5122_v19 = vadd.f32 1e-05, %v5120_v33 }
0x1bb7   : > { %6291 = vrsqrt.f32 %v5122_v19 }
0x1bc0   : > { %v6290_v20 = vpop.eup %6289 }
0x1bc1   : > { %v5125_v60 = vmul.f32 %v6290_v20, %v5109_v5 }
0x1bc3   : > { %v5133_v32 = vmul.f32 %v5584_v45, %v5125_v60 }
0x1bc4   : > { %v6292_v56 = vpop.eup %6291 }
0x1bc5   : > { %v5126_v63 = vmul.f32 %v6292_v56, %v5110_v12  ;;  %v5141_v10 = vadd.f32 %v5585_v59, %v5133_v32 }
0x1bc7   : > { %v5134_v21 = vmul.f32 %v5584_v45, %v5126_v63  ;;  %6179 = vmatprep.mubr.msk.f32.mxu0 %vm1107_vm1, %v5141_v10 }
0x1bc9   : > { %v5142_v22 = vadd.f32 %v5585_v59, %v5134_v21 }
0x1bcb   : > { %6180 = vmatmul.mubr.msk.f32.vlgmr.msra.gmra.mxu0 %vm1107_vm1, %v5142_v22 }
0x1c8b   : > { %v6181_v39 = vpop.f32.mrf.mxu0 }
0x1c8c   : > { %v5232_v25 = vadd.f32 %v6181_v39, %v5586_v23 }
0x1c8d   : > { %v5226_v51 = vpop.f32.mrf.mxu0 }
0x1c8e   : > { %5236 = vst.msk [vmem:[#allocation3 + $0x8] sm:$0xff] %vm1238_vm2, %v5232_v25  ;;  %v5227_v26 = vadd.f32 %v5586_v23, %v5226_v51 }
0x1c90   : > { %5235 = vst.msk [vmem:[#allocation3] sm:$0xff] %vm1238_vm2, %v5227_v26 }
0x1c91 PF: > { %s7650_s7 = sld [smem:[#allocation7_spill]]  ;;  %s6344_s22 = smov [#allocation3]  }
0x1c92   : > { %s5243_s1 = sshll.u32 %s6344_s22, 4  ;;  %s5244_s1 = int_to_ptr.vmem [resolvable:$true] %s5243_s1 }
0x1c93   : > { %s6293_s9 = scalar_lea.vmem %s5244_s1, 256  ;;  %p6300_p10 = scmp.lt.s32.totalorder %s5244_s1, %s5244_s1 }
0x1c94   : > { %p6294_p7 = scmp.ne.s32.totalorder %s5244_s1, %s6293_s9  ;;  %p6301_p11 = scmp.lt.s32.totalorder %s6293_s9, %s6293_s9 }
0x1c96   : > { %p6302_p12 = por %p6301_p11, %p6300_p10 }
0x1c97   : > { %p6186_p6 = scmp.eq.s32.totalorder %s7650_s7, 5 }
0x1c99   : > { %p6295_p8 = pnand %p6294_p7, %p6186_p6 }
0x1c9b   : > { %p6296_p9 = pneg %p6295_p8 }
0x1c9d   : > { %p6303_p13 = pnand %p6302_p12, %p6296_p9 }
0x1c9f   : > { %6306 = shalt.err (!%p6303_p13)
}
0x1ca0   : > { %s6345_s2 = smov 128   ;;  %s7651_s25 = smov 8  }
0x1ca1   : > { %s7652_s23 = sld [smem:[#allocation26_spill]] }
0x1ca7   : > { %6183 = dma.vmem_to_hbm [thread:$0]  (%p6186_p6), %s5244_s1, 256, %s7652_s23, [#allocation4], %s6345_s2, %s6345_s2, %s7651_s25  }
0x1ca8   : > { %6322 = dma.done.wait (%p6186_p6), [#allocation4], 256  }
0x1ca9   : > { %6324 = vsyncadd (%p6186_p6), [#allocation4], 4294967040 }
0x1caa PF: > { %s7653_s24 = sld [smem:[#allocation6_spill]] }
0x1cb0   : > { %s37_s27 = sadd.s32 1, %s7653_s24  }
0x1cb1   : > { %p34_p0 = scmp.ge.s32.totalorder %s37_s27, 8  }
0x1cb3   :  { %36 = sbr.rel (!%p34_p0) target bundleno = 18 (0x12), region = 216 }
0x1cb8   :  { %5259 = vsyncpa [#allocation4], 1 }
0x1cb9   :  { %5261 = vsyncpa [#allocation4 + $0x1], 1 }

</bundles_post_ra>
